<compile_context>
chip_gen: v7x
topology: tpu7x:2x2x1
jax: 0.10.0
libtpu: 0.0.40
codegen_flags: <defaults>
</compile_context>

<pallas_src>
import numpy as np

import jax
import jax.numpy as jnp
from jax.experimental import pallas as pl
from jax.experimental.pallas import tpu as pltpu

BN_EPS = 1e-5        # nn.BatchNorm2d default
LRELU_SLOPE = 0.01   # nn.LeakyReLU default negative_slope


# ---------------------------------------------------------------------------
# Parameter construction (mirrors the PyTorch module's parameters)
# ---------------------------------------------------------------------------
def init_params(key, in_channels=3, latent_dim=128, hidden_dim=(32, 64, 128, 256)):
    """Deterministic synthetic parameters matching the module's shapes."""
    params = {"convs": []}
    cin = in_channels
    for cout in hidden_dim:
        key, kw, kb, kg, kbt = jax.random.split(key, 5)
        fan_in = cin * 9
        w = jax.random.normal(kw, (cout, cin, 3, 3), jnp.float32) / jnp.sqrt(fan_in)
        # Conv bias exists in the PyTorch module but is mathematically cancelled
        # by training-mode BatchNorm mean subtraction -> not used in the kernel.
        b = 0.01 * jax.random.normal(kb, (cout,), jnp.float32)
        # PyTorch default init is gamma=1, beta=0; perturb slightly so the BN
        # affine path is actually exercised (trained values are arbitrary).
        gamma = 1.0 + 0.1 * jax.random.normal(kg, (cout,), jnp.float32)
        beta = 0.1 * jax.random.normal(kbt, (cout,), jnp.float32)
        params["convs"].append((w, b, gamma, beta))
        cin = cout
    feat = hidden_dim[-1] * 4
    key, k1, k2, k3, k4 = jax.random.split(key, 5)
    params["fc_mu_w"] = jax.random.normal(k1, (latent_dim, feat), jnp.float32) / jnp.sqrt(feat)
    params["fc_mu_b"] = 0.01 * jax.random.normal(k2, (latent_dim,), jnp.float32)
    params["fc_var_w"] = jax.random.normal(k3, (latent_dim, feat), jnp.float32) / jnp.sqrt(feat)
    params["fc_var_b"] = 0.01 * jax.random.normal(k4, (latent_dim,), jnp.float32)
    return params


# ---------------------------------------------------------------------------
# One-time packing: fold conv weights / padding / stride / BN constants /
# flatten / fc into matmul-ready matrices.  Hoisted out of the traced forward.
# (S / G selection matrices fold the batch size, so `packed` is per-batch-size.)
# ---------------------------------------------------------------------------
def pack_params(params, batch, image_hw=(32, 32)):
    n = batch
    h_in, w_in = int(image_hw[0]), int(image_hw[1])
    layers = []
    for (w_conv, _b_conv, gamma, beta) in params["convs"]:
        cout, cin, _, _ = w_conv.shape
        h_out, w_out = h_in // 2, w_in // 2

        # R_kh[(w*cin + ci), (ow*cout + co)] = W[co, ci, kh, kw] where w = 2*ow + kw - 1
        mask = np.zeros((3, w_in, w_out), np.float32)
        for kw in range(3):
            for ow in range(w_out):
                wc = 2 * ow + kw - 1
                if 0 <= wc < w_in:
                    mask[kw, wc, ow] = 1.0
        r6 = jnp.einsum("bwv,oiab->awivo", jnp.asarray(mask), w_conv)
        r = r6.reshape(3, w_in * cin, w_out * cout).astype(jnp.bfloat16)

        # S_kh[(nn*h_out + oh), (nn*h_in + hh)] = 1 iff hh == 2*oh + kh - 1 (in range)
        s = np.zeros((3, n * h_out, n * h_in), np.float32)
        for kh in range(3):
            for nn in range(n):
                for oh in range(h_out):
                    hh = 2 * oh + kh - 1
                    if 0 <= hh < h_in:
                        s[kh, nn * h_out + oh, nn * h_in + hh] = 1.0

        # BN-statistics helper matrices (constants folded in at pack time):
        #   bsum  : per-channel reduce over lanes, scaled by 1/count
        #   bbc   : per-channel broadcast back to lanes
        #   bbcg  : broadcast with gamma folded in
        #   brow  : beta pre-broadcast to a lane-dense row
        count = float(n * h_out * w_out)
        eye = np.eye(cout, dtype=np.float32)
        bsum = np.tile(eye, (w_out, 1)) / count                 # (w_out*cout, cout)
        bbc = np.tile(eye, (w_out, 1)).T                        # (cout, w_out*cout)
        gamma_np = np.asarray(gamma, np.float32)
        beta_np = np.asarray(beta, np.float32)
        bbcg = gamma_np[:, None] * bbc                          # gamma folded in
        brow = np.tile(beta_np, w_out)[None, :]                 # (1, w_out*cout)

        layers.append(dict(
            s=jnp.asarray(s, jnp.bfloat16),
            r=r,
            bsum=jnp.asarray(bsum, jnp.float32),
            bbc=jnp.asarray(bbc, jnp.float32),
            bbcg=jnp.asarray(bbcg, jnp.float32),
            brow=jnp.asarray(brow, jnp.float32),
        ))
        h_in, w_in = h_out, w_out

    # Fold PyTorch NCHW flatten (c, h, w order) + fc_mu/fc_var into V / G / bias.
    clast = params["convs"][-1][0].shape[0]
    latent = params["fc_mu_w"].shape[0]
    wcat = jnp.concatenate([params["fc_mu_w"], params["fc_var_w"]], axis=0).T  # (F, 2*latent)
    wcat = wcat.reshape(clast, h_in, w_in, 2 * latent)                         # (c, h, w, j)
    v = jnp.transpose(wcat, (1, 2, 0, 3)).reshape(h_in, w_in * clast, 2 * latent)
    v = v.astype(jnp.bfloat16)

    g = np.zeros((h_in, n, n * h_in), np.float32)
    for hh in range(h_in):
        for nn in range(n):
            g[hh, nn, nn * h_in + hh] = 1.0

    fcb = jnp.concatenate([params["fc_mu_b"], params["fc_var_b"]])
    fcb = fcb.reshape(1, 2 * latent).astype(jnp.float32)

    return dict(layers=layers, g=jnp.asarray(g, jnp.bfloat16), v=v, fcb=fcb)


# ---------------------------------------------------------------------------
# Fused forward: one pallas_call for the whole encoder
# ---------------------------------------------------------------------------
def encoder_forward(packed, x_nchw):
    """Equivalent of Encoder.forward; returns [mu, log_var]."""
    layers = packed["layers"]
    n_layers = len(layers)
    n, c, h, w = x_nchw.shape
    latent = packed["fcb"].shape[1] // 2

    # Only wrapper-side layout op: NCHW -> 2-D (n*h, w*c) bf16 slab (tiny input).
    x2d = jnp.transpose(x_nchw, (0, 2, 3, 1)).reshape(n * h, w * c).astype(jnp.bfloat16)

    operands = [x2d]
    for lyr in layers:
        operands += [lyr["s"], lyr["r"], lyr["bsum"], lyr["bbc"], lyr["bbcg"], lyr["brow"]]
    operands += [packed["g"], packed["v"], packed["fcb"]]

    def kernel(*refs):
        x = refs[0][...]                                     # bf16 (n*H, W*Cin)
        pos = 1
        for _ in range(n_layers):
            s_ref, r_ref, bsum_ref, bbc_ref, bbcg_ref, brow_ref = refs[pos:pos + 6]
            pos += 6
            rows_o = s_ref.shape[1]                          # n * H_out
            cols_o = r_ref.shape[2]                          # W_out * Cout

            # Conv (3x3, stride 2, pad 1) as 3 pairs of bf16 matmuls, f32 accum.
            acc = jnp.zeros((rows_o, cols_o), jnp.float32)
            for kh in range(3):
                t = jnp.dot(s_ref[kh], x, preferred_element_type=jnp.float32)
                # t holds rows of x (bf16-representable) -> lossless cast.
                acc = acc + jnp.dot(t.astype(jnp.bfloat16), r_ref[kh],
                                    preferred_element_type=jnp.float32)

            # BatchNorm2d (training-mode batch stats, biased variance) in f32.
            # 1/count is folded into bsum; gamma into bbcg; beta into brow.
            col_sum = jnp.sum(acc, axis=0, keepdims=True)                        # (1, L)
            mean_c = jnp.dot(col_sum, bsum_ref[...],
                             preferred_element_type=jnp.float32)                 # (1, Cout)
            mean_row = jnp.dot(mean_c, bbc_ref[...],
                               preferred_element_type=jnp.float32)               # (1, L)
            cen = acc - mean_row
            sq_sum = jnp.sum(cen * cen, axis=0, keepdims=True)
            var_c = jnp.dot(sq_sum, bsum_ref[...],
                            preferred_element_type=jnp.float32)                  # (1, Cout)
            scale_row = jnp.dot(jax.lax.rsqrt(var_c + BN_EPS), bbcg_ref[...],
                                preferred_element_type=jnp.float32)              # (1, L)
            y = cen * scale_row + brow_ref[...]
            y = jnp.where(y > 0, y, LRELU_SLOPE * y)         # LeakyReLU(0.01)
            x = y.astype(jnp.bfloat16)                       # next layer's input

        # Flatten (NCHW order) + fc_mu / fc_var, folded into G / V / bias.
        g_ref, v_ref, fcb_ref, mu_ref, lv_ref = refs[pos:pos + 5]
        out = jnp.zeros((mu_ref.shape[0], fcb_ref.shape[1]), jnp.float32)
        for hh in range(g_ref.shape[0]):
            t = jnp.dot(g_ref[hh], x, preferred_element_type=jnp.float32)
            out = out + jnp.dot(t.astype(jnp.bfloat16), v_ref[hh],
                                preferred_element_type=jnp.float32)
        out = out + fcb_ref[...]
        lat = mu_ref.shape[1]
        mu_ref[...] = out[:, :lat]
        lv_ref[...] = out[:, lat:]

    vmem = pl.BlockSpec(memory_space=pltpu.MemorySpace.VMEM)
    mu, log_var = pl.pallas_call(
        kernel,
        out_shape=(jax.ShapeDtypeStruct((n, latent), jnp.float32),
                   jax.ShapeDtypeStruct((n, latent), jnp.float32)),
        in_specs=[vmem] * len(operands),
        out_specs=(vmem, vmem),
        compiler_params=pltpu.CompilerParams(vmem_limit_bytes=32 * 1024 * 1024),
    )(*operands)
    return [mu, log_var]


# ---------------------------------------------------------------------------
# Pure-JAX f32 reference of the PyTorch module (training-mode BatchNorm)
# ---------------------------------------------------------------------------
def encoder_reference(params, x):
    hi = jax.lax.Precision.HIGHEST
    h = x
    for (w, b, gamma, beta) in params["convs"]:
        h = jax.lax.conv_general_dilated(
            h, w, window_strides=(2, 2), padding=((1, 1), (1, 1)),
            dimension_numbers=("NCHW", "OIHW", "NCHW"), precision=hi)
        h = h + b.reshape(1, -1, 1, 1)
        mean = jnp.mean(h, axis=(0, 2, 3), keepdims=True)
        var = jnp.mean(jnp.square(h - mean), axis=(0, 2, 3), keepdims=True)
        h = (h - mean) * jax.lax.rsqrt(var + BN_EPS)
        h = h * gamma.reshape(1, -1, 1, 1) + beta.reshape(1, -1, 1, 1)
        h = jnp.where(h > 0, h, LRELU_SLOPE * h)
    feat = h.reshape(h.shape[0], -1)                        # NCHW flatten
    mu = jnp.dot(feat, params["fc_mu_w"].T, precision=hi) + params["fc_mu_b"]
    lv = jnp.dot(feat, params["fc_var_w"].T, precision=hi) + params["fc_var_b"]
    return mu, lv


if __name__ == "__main__":
    key = jax.random.PRNGKey(0)
    kp, kx = jax.random.split(key)
    params = init_params(kp)
    # fc_mu expects hidden_dim[-1]*4 features => spatial must be 32x32
    # (32 -> 16 -> 8 -> 4 -> 2 after four stride-2 convs; 256*2*2 = 1024).
    x = jax.random.normal(kx, (2, 3, 32, 32), jnp.float32)
    packed = pack_params(params, batch=x.shape[0], image_hw=(x.shape[2], x.shape[3]))

    fwd = jax.jit(encoder_forward)
    mu, log_var = fwd(packed, x)
    jax.block_until_ready((mu, log_var))

    assert mu.shape == (2, 128) and log_var.shape == (2, 128)
    assert mu.dtype == jnp.float32 and log_var.dtype == jnp.float32
    assert bool(jnp.all(jnp.isfinite(mu))) and bool(jnp.all(jnp.isfinite(log_var)))

    # Correctness vs. float32 reference (kernel uses bf16 MXU operands).
    mu_ref, lv_ref = encoder_reference(params, x)
    assert bool(jnp.allclose(mu, mu_ref, atol=1e-1, rtol=1e-1)), \
        f"mu mismatch: max abs diff {float(jnp.max(jnp.abs(mu - mu_ref)))}"
    assert bool(jnp.allclose(log_var, lv_ref, atol=1e-1, rtol=1e-1)), \
        f"log_var mismatch: max abs diff {float(jnp.max(jnp.abs(log_var - lv_ref)))}"

    print("KERNEL_OK")
</pallas_src>

<mosaic_0001>
module attributes {stable_mosaic.version = 11 : i64} {
  func.func @kernel(%arg0: memref<64x96xbf16, #tpu.memory_space<vmem>>, %arg1: memref<3x32x64xbf16, #tpu.memory_space<vmem>>, %arg2: memref<3x96x512xbf16, #tpu.memory_space<vmem>>, %arg3: memref<512x32xf32, #tpu.memory_space<vmem>>, %arg4: memref<32x512xf32, #tpu.memory_space<vmem>>, %arg5: memref<32x512xf32, #tpu.memory_space<vmem>>, %arg6: memref<1x512xf32, #tpu.memory_space<vmem>>, %arg7: memref<3x16x32xbf16, #tpu.memory_space<vmem>>, %arg8: memref<3x512x512xbf16, #tpu.memory_space<vmem>>, %arg9: memref<512x64xf32, #tpu.memory_space<vmem>>, %arg10: memref<64x512xf32, #tpu.memory_space<vmem>>, %arg11: memref<64x512xf32, #tpu.memory_space<vmem>>, %arg12: memref<1x512xf32, #tpu.memory_space<vmem>>, %arg13: memref<3x8x16xbf16, #tpu.memory_space<vmem>>, %arg14: memref<3x512x512xbf16, #tpu.memory_space<vmem>>, %arg15: memref<512x128xf32, #tpu.memory_space<vmem>>, %arg16: memref<128x512xf32, #tpu.memory_space<vmem>>, %arg17: memref<128x512xf32, #tpu.memory_space<vmem>>, %arg18: memref<1x512xf32, #tpu.memory_space<vmem>>, %arg19: memref<3x4x8xbf16, #tpu.memory_space<vmem>>, %arg20: memref<3x512x512xbf16, #tpu.memory_space<vmem>>, %arg21: memref<512x256xf32, #tpu.memory_space<vmem>>, %arg22: memref<256x512xf32, #tpu.memory_space<vmem>>, %arg23: memref<256x512xf32, #tpu.memory_space<vmem>>, %arg24: memref<1x512xf32, #tpu.memory_space<vmem>>, %arg25: memref<2x2x4xbf16, #tpu.memory_space<vmem>>, %arg26: memref<2x512x256xbf16, #tpu.memory_space<vmem>>, %arg27: memref<1x256xf32, #tpu.memory_space<vmem>>, %arg28: memref<2x128xf32, #tpu.memory_space<vmem>>, %arg29: memref<2x128xf32, #tpu.memory_space<vmem>>) attributes {dimension_semantics = [], scalar_prefetch = 0 : i64, scratch_operands = 0 : i64, tpu.core_type = #tpu.core_type<tc>} {
    %c0 = arith.constant 0 : index
    %c0_0 = arith.constant 0 : index
    %0 = vector.load %arg0[%c0, %c0_0] : memref<64x96xbf16, #tpu.memory_space<vmem>>, vector<64x96xbf16>
    %cst = arith.constant 0.000000e+00 : f32
    %1 = vector.broadcast %cst : f32 to vector<32x512xf32>
    %c0_1 = arith.constant 0 : index
    %c0_2 = arith.constant 0 : index
    %c0_3 = arith.constant 0 : index
    %2 = vector.load %arg1[%c0_1, %c0_2, %c0_3] : memref<3x32x64xbf16, #tpu.memory_space<vmem>>, vector<1x32x64xbf16>
    %3 = vector.shape_cast %2 : vector<1x32x64xbf16> to vector<32x64xbf16>
    %cst_4 = arith.constant dense<0.000000e+00> : vector<32x96xf32>
    %4 = tpu.matmul %3, %0, %cst_4 {dimension_numbers = #tpu.dot_dimension_numbers<[1], [0], [0], [1], [0, 0, 1, 1], [], []>} : vector<32x64xbf16>, vector<64x96xbf16>, vector<32x96xf32> -> vector<32x96xf32>
    %5 = arith.truncf %4 : vector<32x96xf32> to vector<32x96xbf16>
    %c0_5 = arith.constant 0 : index
    %c0_6 = arith.constant 0 : index
    %c0_7 = arith.constant 0 : index
    %6 = vector.load %arg2[%c0_5, %c0_6, %c0_7] : memref<3x96x512xbf16, #tpu.memory_space<vmem>>, vector<1x96x512xbf16>
    %7 = vector.shape_cast %6 : vector<1x96x512xbf16> to vector<96x512xbf16>
    %cst_8 = arith.constant dense<0.000000e+00> : vector<32x512xf32>
    %8 = tpu.matmul %5, %7, %cst_8 {dimension_numbers = #tpu.dot_dimension_numbers<[1], [0], [0], [1], [0, 0, 1, 1], [], []>} : vector<32x96xbf16>, vector<96x512xbf16>, vector<32x512xf32> -> vector<32x512xf32>
    %9 = arith.addf %1, %8 : vector<32x512xf32>
    %c1 = arith.constant 1 : index
    %c0_9 = arith.constant 0 : index
    %c0_10 = arith.constant 0 : index
    %10 = vector.load %arg1[%c1, %c0_9, %c0_10] : memref<3x32x64xbf16, #tpu.memory_space<vmem>>, vector<1x32x64xbf16>
    %11 = vector.shape_cast %10 : vector<1x32x64xbf16> to vector<32x64xbf16>
    %cst_11 = arith.constant dense<0.000000e+00> : vector<32x96xf32>
    %12 = tpu.matmul %11, %0, %cst_11 {dimension_numbers = #tpu.dot_dimension_numbers<[1], [0], [0], [1], [0, 0, 1, 1], [], []>} : vector<32x64xbf16>, vector<64x96xbf16>, vector<32x96xf32> -> vector<32x96xf32>
    %13 = arith.truncf %12 : vector<32x96xf32> to vector<32x96xbf16>
    %c1_12 = arith.constant 1 : index
    %c0_13 = arith.constant 0 : index
    %c0_14 = arith.constant 0 : index
    %14 = vector.load %arg2[%c1_12, %c0_13, %c0_14] : memref<3x96x512xbf16, #tpu.memory_space<vmem>>, vector<1x96x512xbf16>
    %15 = vector.shape_cast %14 : vector<1x96x512xbf16> to vector<96x512xbf16>
    %cst_15 = arith.constant dense<0.000000e+00> : vector<32x512xf32>
    %16 = tpu.matmul %13, %15, %cst_15 {dimension_numbers = #tpu.dot_dimension_numbers<[1], [0], [0], [1], [0, 0, 1, 1], [], []>} : vector<32x96xbf16>, vector<96x512xbf16>, vector<32x512xf32> -> vector<32x512xf32>
    %17 = arith.addf %9, %16 : vector<32x512xf32>
    %c2 = arith.constant 2 : index
    %c0_16 = arith.constant 0 : index
    %c0_17 = arith.constant 0 : index
    %18 = vector.load %arg1[%c2, %c0_16, %c0_17] : memref<3x32x64xbf16, #tpu.memory_space<vmem>>, vector<1x32x64xbf16>
    %19 = vector.shape_cast %18 : vector<1x32x64xbf16> to vector<32x64xbf16>
    %cst_18 = arith.constant dense<0.000000e+00> : vector<32x96xf32>
    %20 = tpu.matmul %19, %0, %cst_18 {dimension_numbers = #tpu.dot_dimension_numbers<[1], [0], [0], [1], [0, 0, 1, 1], [], []>} : vector<32x64xbf16>, vector<64x96xbf16>, vector<32x96xf32> -> vector<32x96xf32>
    %21 = arith.truncf %20 : vector<32x96xf32> to vector<32x96xbf16>
    %c2_19 = arith.constant 2 : index
    %c0_20 = arith.constant 0 : index
    %c0_21 = arith.constant 0 : index
    %22 = vector.load %arg2[%c2_19, %c0_20, %c0_21] : memref<3x96x512xbf16, #tpu.memory_space<vmem>>, vector<1x96x512xbf16>
    %23 = vector.shape_cast %22 : vector<1x96x512xbf16> to vector<96x512xbf16>
    %cst_22 = arith.constant dense<0.000000e+00> : vector<32x512xf32>
    %24 = tpu.matmul %21, %23, %cst_22 {dimension_numbers = #tpu.dot_dimension_numbers<[1], [0], [0], [1], [0, 0, 1, 1], [], []>} : vector<32x96xbf16>, vector<96x512xbf16>, vector<32x512xf32> -> vector<32x512xf32>
    %25 = arith.addf %17, %24 : vector<32x512xf32>
    %cst_23 = arith.constant dense<0.000000e+00> : vector<512xf32>
    %26 = vector.multi_reduction <add>, %25, %cst_23 [0] : vector<32x512xf32> to vector<512xf32>
    %27 = vector.shape_cast %26 : vector<512xf32> to vector<1x512xf32>
    %c0_24 = arith.constant 0 : index
    %c0_25 = arith.constant 0 : index
    %28 = vector.load %arg3[%c0_24, %c0_25] : memref<512x32xf32, #tpu.memory_space<vmem>>, vector<512x32xf32>
    %cst_26 = arith.constant dense<0.000000e+00> : vector<1x32xf32>
    %29 = tpu.matmul %27, %28, %cst_26 {dimension_numbers = #tpu.dot_dimension_numbers<[1], [0], [0], [1], [0, 0, 1, 1], [], []>} : vector<1x512xf32>, vector<512x32xf32>, vector<1x32xf32> -> vector<1x32xf32>
    %c0_27 = arith.constant 0 : index
    %c0_28 = arith.constant 0 : index
    %30 = vector.load %arg4[%c0_27, %c0_28] : memref<32x512xf32, #tpu.memory_space<vmem>>, vector<32x512xf32>
    %cst_29 = arith.constant dense<0.000000e+00> : vector<1x512xf32>
    %31 = tpu.matmul %29, %30, %cst_29 {dimension_numbers = #tpu.dot_dimension_numbers<[1], [0], [0], [1], [0, 0, 1, 1], [], []>} : vector<1x32xf32>, vector<32x512xf32>, vector<1x512xf32> -> vector<1x512xf32>
    %32 = vector.broadcast %31 : vector<1x512xf32> to vector<32x512xf32>
    %33 = arith.subf %25, %32 : vector<32x512xf32>
    %34 = arith.mulf %33, %33 : vector<32x512xf32>
    %cst_30 = arith.constant dense<0.000000e+00> : vector<512xf32>
    %35 = vector.multi_reduction <add>, %34, %cst_30 [0] : vector<32x512xf32> to vector<512xf32>
    %36 = vector.shape_cast %35 : vector<512xf32> to vector<1x512xf32>
    %c0_31 = arith.constant 0 : index
    %c0_32 = arith.constant 0 : index
    %37 = vector.load %arg3[%c0_31, %c0_32] : memref<512x32xf32, #tpu.memory_space<vmem>>, vector<512x32xf32>
    %cst_33 = arith.constant dense<0.000000e+00> : vector<1x32xf32>
    %38 = tpu.matmul %36, %37, %cst_33 {dimension_numbers = #tpu.dot_dimension_numbers<[1], [0], [0], [1], [0, 0, 1, 1], [], []>} : vector<1x512xf32>, vector<512x32xf32>, vector<1x32xf32> -> vector<1x32xf32>
    %cst_34 = arith.constant 9.99999974E-6 : f32
    %39 = vector.broadcast %cst_34 : f32 to vector<1x32xf32>
    %40 = arith.addf %38, %39 : vector<1x32xf32>
    %41 = math.rsqrt %40 : vector<1x32xf32>
    %c0_35 = arith.constant 0 : index
    %c0_36 = arith.constant 0 : index
    %42 = vector.load %arg5[%c0_35, %c0_36] : memref<32x512xf32, #tpu.memory_space<vmem>>, vector<32x512xf32>
    %cst_37 = arith.constant dense<0.000000e+00> : vector<1x512xf32>
    %43 = tpu.matmul %41, %42, %cst_37 {dimension_numbers = #tpu.dot_dimension_numbers<[1], [0], [0], [1], [0, 0, 1, 1], [], []>} : vector<1x32xf32>, vector<32x512xf32>, vector<1x512xf32> -> vector<1x512xf32>
    %44 = vector.broadcast %43 : vector<1x512xf32> to vector<32x512xf32>
    %45 = arith.mulf %33, %44 : vector<32x512xf32>
    %c0_38 = arith.constant 0 : index
    %c0_39 = arith.constant 0 : index
    %46 = vector.load %arg6[%c0_38, %c0_39] : memref<1x512xf32, #tpu.memory_space<vmem>>, vector<1x512xf32>
    %47 = vector.broadcast %46 : vector<1x512xf32> to vector<32x512xf32>
    %48 = arith.addf %45, %47 : vector<32x512xf32>
    %cst_40 = arith.constant 0.000000e+00 : f32
    %49 = vector.broadcast %cst_40 : f32 to vector<32x512xf32>
    %50 = arith.cmpf ogt, %48, %49 : vector<32x512xf32>
    %cst_41 = arith.constant 0.00999999977 : f32
    %51 = vector.broadcast %cst_41 : f32 to vector<32x512xf32>
    %52 = arith.mulf %51, %48 : vector<32x512xf32>
    %53 = arith.select %50, %48, %52 : vector<32x512xi1>, vector<32x512xf32>
    %54 = arith.truncf %53 : vector<32x512xf32> to vector<32x512xbf16>
    %cst_42 = arith.constant 0.000000e+00 : f32
    %55 = vector.broadcast %cst_42 : f32 to vector<16x512xf32>
    %c0_43 = arith.constant 0 : index
    %c0_44 = arith.constant 0 : index
    %c0_45 = arith.constant 0 : index
    %56 = vector.load %arg7[%c0_43, %c0_44, %c0_45] : memref<3x16x32xbf16, #tpu.memory_space<vmem>>, vector<1x16x32xbf16>
    %57 = vector.shape_cast %56 : vector<1x16x32xbf16> to vector<16x32xbf16>
    %cst_46 = arith.constant dense<0.000000e+00> : vector<16x512xf32>
    %58 = tpu.matmul %57, %54, %cst_46 {dimension_numbers = #tpu.dot_dimension_numbers<[1], [0], [0], [1], [0, 0, 1, 1], [], []>} : vector<16x32xbf16>, vector<32x512xbf16>, vector<16x512xf32> -> vector<16x512xf32>
    %59 = arith.truncf %58 : vector<16x512xf32> to vector<16x512xbf16>
    %c0_47 = arith.constant 0 : index
    %c0_48 = arith.constant 0 : index
    %c0_49 = arith.constant 0 : index
    %60 = vector.load %arg8[%c0_47, %c0_48, %c0_49] : memref<3x512x512xbf16, #tpu.memory_space<vmem>>, vector<1x512x512xbf16>
    %61 = vector.shape_cast %60 : vector<1x512x512xbf16> to vector<512x512xbf16>
    %cst_50 = arith.constant dense<0.000000e+00> : vector<16x512xf32>
    %62 = tpu.matmul %59, %61, %cst_50 {dimension_numbers = #tpu.dot_dimension_numbers<[1], [0], [0], [1], [0, 0, 1, 1], [], []>} : vector<16x512xbf16>, vector<512x512xbf16>, vector<16x512xf32> -> vector<16x512xf32>
    %63 = arith.addf %55, %62 : vector<16x512xf32>
    %c1_51 = arith.constant 1 : index
    %c0_52 = arith.constant 0 : index
    %c0_53 = arith.constant 0 : index
    %64 = vector.load %arg7[%c1_51, %c0_52, %c0_53] : memref<3x16x32xbf16, #tpu.memory_space<vmem>>, vector<1x16x32xbf16>
    %65 = vector.shape_cast %64 : vector<1x16x32xbf16> to vector<16x32xbf16>
    %cst_54 = arith.constant dense<0.000000e+00> : vector<16x512xf32>
    %66 = tpu.matmul %65, %54, %cst_54 {dimension_numbers = #tpu.dot_dimension_numbers<[1], [0], [0], [1], [0, 0, 1, 1], [], []>} : vector<16x32xbf16>, vector<32x512xbf16>, vector<16x512xf32> -> vector<16x512xf32>
    %67 = arith.truncf %66 : vector<16x512xf32> to vector<16x512xbf16>
    %c1_55 = arith.constant 1 : index
    %c0_56 = arith.constant 0 : index
    %c0_57 = arith.constant 0 : index
    %68 = vector.load %arg8[%c1_55, %c0_56, %c0_57] : memref<3x512x512xbf16, #tpu.memory_space<vmem>>, vector<1x512x512xbf16>
    %69 = vector.shape_cast %68 : vector<1x512x512xbf16> to vector<512x512xbf16>
    %cst_58 = arith.constant dense<0.000000e+00> : vector<16x512xf32>
    %70 = tpu.matmul %67, %69, %cst_58 {dimension_numbers = #tpu.dot_dimension_numbers<[1], [0], [0], [1], [0, 0, 1, 1], [], []>} : vector<16x512xbf16>, vector<512x512xbf16>, vector<16x512xf32> -> vector<16x512xf32>
    %71 = arith.addf %63, %70 : vector<16x512xf32>
    %c2_59 = arith.constant 2 : index
    %c0_60 = arith.constant 0 : index
    %c0_61 = arith.constant 0 : index
    %72 = vector.load %arg7[%c2_59, %c0_60, %c0_61] : memref<3x16x32xbf16, #tpu.memory_space<vmem>>, vector<1x16x32xbf16>
    %73 = vector.shape_cast %72 : vector<1x16x32xbf16> to vector<16x32xbf16>
    %cst_62 = arith.constant dense<0.000000e+00> : vector<16x512xf32>
    %74 = tpu.matmul %73, %54, %cst_62 {dimension_numbers = #tpu.dot_dimension_numbers<[1], [0], [0], [1], [0, 0, 1, 1], [], []>} : vector<16x32xbf16>, vector<32x512xbf16>, vector<16x512xf32> -> vector<16x512xf32>
    %75 = arith.truncf %74 : vector<16x512xf32> to vector<16x512xbf16>
    %c2_63 = arith.constant 2 : index
    %c0_64 = arith.constant 0 : index
    %c0_65 = arith.constant 0 : index
    %76 = vector.load %arg8[%c2_63, %c0_64, %c0_65] : memref<3x512x512xbf16, #tpu.memory_space<vmem>>, vector<1x512x512xbf16>
    %77 = vector.shape_cast %76 : vector<1x512x512xbf16> to vector<512x512xbf16>
    %cst_66 = arith.constant dense<0.000000e+00> : vector<16x512xf32>
    %78 = tpu.matmul %75, %77, %cst_66 {dimension_numbers = #tpu.dot_dimension_numbers<[1], [0], [0], [1], [0, 0, 1, 1], [], []>} : vector<16x512xbf16>, vector<512x512xbf16>, vector<16x512xf32> -> vector<16x512xf32>
    %79 = arith.addf %71, %78 : vector<16x512xf32>
    %cst_67 = arith.constant dense<0.000000e+00> : vector<512xf32>
    %80 = vector.multi_reduction <add>, %79, %cst_67 [0] : vector<16x512xf32> to vector<512xf32>
    %81 = vector.shape_cast %80 : vector<512xf32> to vector<1x512xf32>
    %c0_68 = arith.constant 0 : index
    %c0_69 = arith.constant 0 : index
    %82 = vector.load %arg9[%c0_68, %c0_69] : memref<512x64xf32, #tpu.memory_space<vmem>>, vector<512x64xf32>
    %cst_70 = arith.constant dense<0.000000e+00> : vector<1x64xf32>
    %83 = tpu.matmul %81, %82, %cst_70 {dimension_numbers = #tpu.dot_dimension_numbers<[1], [0], [0], [1], [0, 0, 1, 1], [], []>} : vector<1x512xf32>, vector<512x64xf32>, vector<1x64xf32> -> vector<1x64xf32>
    %c0_71 = arith.constant 0 : index
    %c0_72 = arith.constant 0 : index
    %84 = vector.load %arg10[%c0_71, %c0_72] : memref<64x512xf32, #tpu.memory_space<vmem>>, vector<64x512xf32>
    %cst_73 = arith.constant dense<0.000000e+00> : vector<1x512xf32>
    %85 = tpu.matmul %83, %84, %cst_73 {dimension_numbers = #tpu.dot_dimension_numbers<[1], [0], [0], [1], [0, 0, 1, 1], [], []>} : vector<1x64xf32>, vector<64x512xf32>, vector<1x512xf32> -> vector<1x512xf32>
    %86 = vector.broadcast %85 : vector<1x512xf32> to vector<16x512xf32>
    %87 = arith.subf %79, %86 : vector<16x512xf32>
    %88 = arith.mulf %87, %87 : vector<16x512xf32>
    %cst_74 = arith.constant dense<0.000000e+00> : vector<512xf32>
    %89 = vector.multi_reduction <add>, %88, %cst_74 [0] : vector<16x512xf32> to vector<512xf32>
    %90 = vector.shape_cast %89 : vector<512xf32> to vector<1x512xf32>
    %c0_75 = arith.constant 0 : index
    %c0_76 = arith.constant 0 : index
    %91 = vector.load %arg9[%c0_75, %c0_76] : memref<512x64xf32, #tpu.memory_space<vmem>>, vector<512x64xf32>
    %cst_77 = arith.constant dense<0.000000e+00> : vector<1x64xf32>
    %92 = tpu.matmul %90, %91, %cst_77 {dimension_numbers = #tpu.dot_dimension_numbers<[1], [0], [0], [1], [0, 0, 1, 1], [], []>} : vector<1x512xf32>, vector<512x64xf32>, vector<1x64xf32> -> vector<1x64xf32>
    %cst_78 = arith.constant 9.99999974E-6 : f32
    %93 = vector.broadcast %cst_78 : f32 to vector<1x64xf32>
    %94 = arith.addf %92, %93 : vector<1x64xf32>
    %95 = math.rsqrt %94 : vector<1x64xf32>
    %c0_79 = arith.constant 0 : index
    %c0_80 = arith.constant 0 : index
    %96 = vector.load %arg11[%c0_79, %c0_80] : memref<64x512xf32, #tpu.memory_space<vmem>>, vector<64x512xf32>
    %cst_81 = arith.constant dense<0.000000e+00> : vector<1x512xf32>
    %97 = tpu.matmul %95, %96, %cst_81 {dimension_numbers = #tpu.dot_dimension_numbers<[1], [0], [0], [1], [0, 0, 1, 1], [], []>} : vector<1x64xf32>, vector<64x512xf32>, vector<1x512xf32> -> vector<1x512xf32>
    %98 = vector.broadcast %97 : vector<1x512xf32> to vector<16x512xf32>
    %99 = arith.mulf %87, %98 : vector<16x512xf32>
    %c0_82 = arith.constant 0 : index
    %c0_83 = arith.constant 0 : index
    %100 = vector.load %arg12[%c0_82, %c0_83] : memref<1x512xf32, #tpu.memory_space<vmem>>, vector<1x512xf32>
    %101 = vector.broadcast %100 : vector<1x512xf32> to vector<16x512xf32>
    %102 = arith.addf %99, %101 : vector<16x512xf32>
    %cst_84 = arith.constant 0.000000e+00 : f32
    %103 = vector.broadcast %cst_84 : f32 to vector<16x512xf32>
    %104 = arith.cmpf ogt, %102, %103 : vector<16x512xf32>
    %cst_85 = arith.constant 0.00999999977 : f32
    %105 = vector.broadcast %cst_85 : f32 to vector<16x512xf32>
    %106 = arith.mulf %105, %102 : vector<16x512xf32>
    %107 = arith.select %104, %102, %106 : vector<16x512xi1>, vector<16x512xf32>
    %108 = arith.truncf %107 : vector<16x512xf32> to vector<16x512xbf16>
    %cst_86 = arith.constant 0.000000e+00 : f32
    %109 = vector.broadcast %cst_86 : f32 to vector<8x512xf32>
    %c0_87 = arith.constant 0 : index
    %c0_88 = arith.constant 0 : index
    %c0_89 = arith.constant 0 : index
    %110 = vector.load %arg13[%c0_87, %c0_88, %c0_89] : memref<3x8x16xbf16, #tpu.memory_space<vmem>>, vector<1x8x16xbf16>
    %111 = vector.shape_cast %110 : vector<1x8x16xbf16> to vector<8x16xbf16>
    %cst_90 = arith.constant dense<0.000000e+00> : vector<8x512xf32>
    %112 = tpu.matmul %111, %108, %cst_90 {dimension_numbers = #tpu.dot_dimension_numbers<[1], [0], [0], [1], [0, 0, 1, 1], [], []>} : vector<8x16xbf16>, vector<16x512xbf16>, vector<8x512xf32> -> vector<8x512xf32>
    %113 = arith.truncf %112 : vector<8x512xf32> to vector<8x512xbf16>
    %c0_91 = arith.constant 0 : index
    %c0_92 = arith.constant 0 : index
    %c0_93 = arith.constant 0 : index
    %114 = vector.load %arg14[%c0_91, %c0_92, %c0_93] : memref<3x512x512xbf16, #tpu.memory_space<vmem>>, vector<1x512x512xbf16>
    %115 = vector.shape_cast %114 : vector<1x512x512xbf16> to vector<512x512xbf16>
    %cst_94 = arith.constant dense<0.000000e+00> : vector<8x512xf32>
    %116 = tpu.matmul %113, %115, %cst_94 {dimension_numbers = #tpu.dot_dimension_numbers<[1], [0], [0], [1], [0, 0, 1, 1], [], []>} : vector<8x512xbf16>, vector<512x512xbf16>, vector<8x512xf32> -> vector<8x512xf32>
    %117 = arith.addf %109, %116 : vector<8x512xf32>
    %c1_95 = arith.constant 1 : index
    %c0_96 = arith.constant 0 : index
    %c0_97 = arith.constant 0 : index
    %118 = vector.load %arg13[%c1_95, %c0_96, %c0_97] : memref<3x8x16xbf16, #tpu.memory_space<vmem>>, vector<1x8x16xbf16>
    %119 = vector.shape_cast %118 : vector<1x8x16xbf16> to vector<8x16xbf16>
    %cst_98 = arith.constant dense<0.000000e+00> : vector<8x512xf32>
    %120 = tpu.matmul %119, %108, %cst_98 {dimension_numbers = #tpu.dot_dimension_numbers<[1], [0], [0], [1], [0, 0, 1, 1], [], []>} : vector<8x16xbf16>, vector<16x512xbf16>, vector<8x512xf32> -> vector<8x512xf32>
    %121 = arith.truncf %120 : vector<8x512xf32> to vector<8x512xbf16>
    %c1_99 = arith.constant 1 : index
    %c0_100 = arith.constant 0 : index
    %c0_101 = arith.constant 0 : index
    %122 = vector.load %arg14[%c1_99, %c0_100, %c0_101] : memref<3x512x512xbf16, #tpu.memory_space<vmem>>, vector<1x512x512xbf16>
    %123 = vector.shape_cast %122 : vector<1x512x512xbf16> to vector<512x512xbf16>
    %cst_102 = arith.constant dense<0.000000e+00> : vector<8x512xf32>
    %124 = tpu.matmul %121, %123, %cst_102 {dimension_numbers = #tpu.dot_dimension_numbers<[1], [0], [0], [1], [0, 0, 1, 1], [], []>} : vector<8x512xbf16>, vector<512x512xbf16>, vector<8x512xf32> -> vector<8x512xf32>
    %125 = arith.addf %117, %124 : vector<8x512xf32>
    %c2_103 = arith.constant 2 : index
    %c0_104 = arith.constant 0 : index
    %c0_105 = arith.constant 0 : index
    %126 = vector.load %arg13[%c2_103, %c0_104, %c0_105] : memref<3x8x16xbf16, #tpu.memory_space<vmem>>, vector<1x8x16xbf16>
    %127 = vector.shape_cast %126 : vector<1x8x16xbf16> to vector<8x16xbf16>
    %cst_106 = arith.constant dense<0.000000e+00> : vector<8x512xf32>
    %128 = tpu.matmul %127, %108, %cst_106 {dimension_numbers = #tpu.dot_dimension_numbers<[1], [0], [0], [1], [0, 0, 1, 1], [], []>} : vector<8x16xbf16>, vector<16x512xbf16>, vector<8x512xf32> -> vector<8x512xf32>
    %129 = arith.truncf %128 : vector<8x512xf32> to vector<8x512xbf16>
    %c2_107 = arith.constant 2 : index
    %c0_108 = arith.constant 0 : index
    %c0_109 = arith.constant 0 : index
    %130 = vector.load %arg14[%c2_107, %c0_108, %c0_109] : memref<3x512x512xbf16, #tpu.memory_space<vmem>>, vector<1x512x512xbf16>
    %131 = vector.shape_cast %130 : vector<1x512x512xbf16> to vector<512x512xbf16>
    %cst_110 = arith.constant dense<0.000000e+00> : vector<8x512xf32>
    %132 = tpu.matmul %129, %131, %cst_110 {dimension_numbers = #tpu.dot_dimension_numbers<[1], [0], [0], [1], [0, 0, 1, 1], [], []>} : vector<8x512xbf16>, vector<512x512xbf16>, vector<8x512xf32> -> vector<8x512xf32>
    %133 = arith.addf %125, %132 : vector<8x512xf32>
    %cst_111 = arith.constant dense<0.000000e+00> : vector<512xf32>
    %134 = vector.multi_reduction <add>, %133, %cst_111 [0] : vector<8x512xf32> to vector<512xf32>
    %135 = vector.shape_cast %134 : vector<512xf32> to vector<1x512xf32>
    %c0_112 = arith.constant 0 : index
    %c0_113 = arith.constant 0 : index
    %136 = vector.load %arg15[%c0_112, %c0_113] : memref<512x128xf32, #tpu.memory_space<vmem>>, vector<512x128xf32>
    %cst_114 = arith.constant dense<0.000000e+00> : vector<1x128xf32>
    %137 = tpu.matmul %135, %136, %cst_114 {dimension_numbers = #tpu.dot_dimension_numbers<[1], [0], [0], [1], [0, 0, 1, 1], [], []>} : vector<1x512xf32>, vector<512x128xf32>, vector<1x128xf32> -> vector<1x128xf32>
    %c0_115 = arith.constant 0 : index
    %c0_116 = arith.constant 0 : index
    %138 = vector.load %arg16[%c0_115, %c0_116] : memref<128x512xf32, #tpu.memory_space<vmem>>, vector<128x512xf32>
    %cst_117 = arith.constant dense<0.000000e+00> : vector<1x512xf32>
    %139 = tpu.matmul %137, %138, %cst_117 {dimension_numbers = #tpu.dot_dimension_numbers<[1], [0], [0], [1], [0, 0, 1, 1], [], []>} : vector<1x128xf32>, vector<128x512xf32>, vector<1x512xf32> -> vector<1x512xf32>
    %140 = vector.broadcast %139 : vector<1x512xf32> to vector<8x512xf32>
    %141 = arith.subf %133, %140 : vector<8x512xf32>
    %142 = arith.mulf %141, %141 : vector<8x512xf32>
    %cst_118 = arith.constant dense<0.000000e+00> : vector<512xf32>
    %143 = vector.multi_reduction <add>, %142, %cst_118 [0] : vector<8x512xf32> to vector<512xf32>
    %144 = vector.shape_cast %143 : vector<512xf32> to vector<1x512xf32>
    %c0_119 = arith.constant 0 : index
    %c0_120 = arith.constant 0 : index
    %145 = vector.load %arg15[%c0_119, %c0_120] : memref<512x128xf32, #tpu.memory_space<vmem>>, vector<512x128xf32>
    %cst_121 = arith.constant dense<0.000000e+00> : vector<1x128xf32>
    %146 = tpu.matmul %144, %145, %cst_121 {dimension_numbers = #tpu.dot_dimension_numbers<[1], [0], [0], [1], [0, 0, 1, 1], [], []>} : vector<1x512xf32>, vector<512x128xf32>, vector<1x128xf32> -> vector<1x128xf32>
    %cst_122 = arith.constant 9.99999974E-6 : f32
    %147 = vector.broadcast %cst_122 : f32 to vector<1x128xf32>
    %148 = arith.addf %146, %147 : vector<1x128xf32>
    %149 = math.rsqrt %148 : vector<1x128xf32>
    %c0_123 = arith.constant 0 : index
    %c0_124 = arith.constant 0 : index
    %150 = vector.load %arg17[%c0_123, %c0_124] : memref<128x512xf32, #tpu.memory_space<vmem>>, vector<128x512xf32>
    %cst_125 = arith.constant dense<0.000000e+00> : vector<1x512xf32>
    %151 = tpu.matmul %149, %150, %cst_125 {dimension_numbers = #tpu.dot_dimension_numbers<[1], [0], [0], [1], [0, 0, 1, 1], [], []>} : vector<1x128xf32>, vector<128x512xf32>, vector<1x512xf32> -> vector<1x512xf32>
    %152 = vector.broadcast %151 : vector<1x512xf32> to vector<8x512xf32>
    %153 = arith.mulf %141, %152 : vector<8x512xf32>
    %c0_126 = arith.constant 0 : index
    %c0_127 = arith.constant 0 : index
    %154 = vector.load %arg18[%c0_126, %c0_127] : memref<1x512xf32, #tpu.memory_space<vmem>>, vector<1x512xf32>
    %155 = vector.broadcast %154 : vector<1x512xf32> to vector<8x512xf32>
    %156 = arith.addf %153, %155 : vector<8x512xf32>
    %cst_128 = arith.constant 0.000000e+00 : f32
    %157 = vector.broadcast %cst_128 : f32 to vector<8x512xf32>
    %158 = arith.cmpf ogt, %156, %157 : vector<8x512xf32>
    %cst_129 = arith.constant 0.00999999977 : f32
    %159 = vector.broadcast %cst_129 : f32 to vector<8x512xf32>
    %160 = arith.mulf %159, %156 : vector<8x512xf32>
    %161 = arith.select %158, %156, %160 : vector<8x512xi1>, vector<8x512xf32>
    %162 = arith.truncf %161 : vector<8x512xf32> to vector<8x512xbf16>
    %cst_130 = arith.constant 0.000000e+00 : f32
    %163 = vector.broadcast %cst_130 : f32 to vector<4x512xf32>
    %c0_131 = arith.constant 0 : index
    %c0_132 = arith.constant 0 : index
    %c0_133 = arith.constant 0 : index
    %164 = vector.load %arg19[%c0_131, %c0_132, %c0_133] : memref<3x4x8xbf16, #tpu.memory_space<vmem>>, vector<1x4x8xbf16>
    %165 = vector.shape_cast %164 : vector<1x4x8xbf16> to vector<4x8xbf16>
    %cst_134 = arith.constant dense<0.000000e+00> : vector<4x512xf32>
    %166 = tpu.matmul %165, %162, %cst_134 {dimension_numbers = #tpu.dot_dimension_numbers<[1], [0], [0], [1], [0, 0, 1, 1], [], []>} : vector<4x8xbf16>, vector<8x512xbf16>, vector<4x512xf32> -> vector<4x512xf32>
    %167 = arith.truncf %166 : vector<4x512xf32> to vector<4x512xbf16>
    %c0_135 = arith.constant 0 : index
    %c0_136 = arith.constant 0 : index
    %c0_137 = arith.constant 0 : index
    %168 = vector.load %arg20[%c0_135, %c0_136, %c0_137] : memref<3x512x512xbf16, #tpu.memory_space<vmem>>, vector<1x512x512xbf16>
    %169 = vector.shape_cast %168 : vector<1x512x512xbf16> to vector<512x512xbf16>
    %cst_138 = arith.constant dense<0.000000e+00> : vector<4x512xf32>
    %170 = tpu.matmul %167, %169, %cst_138 {dimension_numbers = #tpu.dot_dimension_numbers<[1], [0], [0], [1], [0, 0, 1, 1], [], []>} : vector<4x512xbf16>, vector<512x512xbf16>, vector<4x512xf32> -> vector<4x512xf32>
    %171 = arith.addf %163, %170 : vector<4x512xf32>
    %c1_139 = arith.constant 1 : index
    %c0_140 = arith.constant 0 : index
    %c0_141 = arith.constant 0 : index
    %172 = vector.load %arg19[%c1_139, %c0_140, %c0_141] : memref<3x4x8xbf16, #tpu.memory_space<vmem>>, vector<1x4x8xbf16>
    %173 = vector.shape_cast %172 : vector<1x4x8xbf16> to vector<4x8xbf16>
    %cst_142 = arith.constant dense<0.000000e+00> : vector<4x512xf32>
    %174 = tpu.matmul %173, %162, %cst_142 {dimension_numbers = #tpu.dot_dimension_numbers<[1], [0], [0], [1], [0, 0, 1, 1], [], []>} : vector<4x8xbf16>, vector<8x512xbf16>, vector<4x512xf32> -> vector<4x512xf32>
    %175 = arith.truncf %174 : vector<4x512xf32> to vector<4x512xbf16>
    %c1_143 = arith.constant 1 : index
    %c0_144 = arith.constant 0 : index
    %c0_145 = arith.constant 0 : index
    %176 = vector.load %arg20[%c1_143, %c0_144, %c0_145] : memref<3x512x512xbf16, #tpu.memory_space<vmem>>, vector<1x512x512xbf16>
    %177 = vector.shape_cast %176 : vector<1x512x512xbf16> to vector<512x512xbf16>
    %cst_146 = arith.constant dense<0.000000e+00> : vector<4x512xf32>
    %178 = tpu.matmul %175, %177, %cst_146 {dimension_numbers = #tpu.dot_dimension_numbers<[1], [0], [0], [1], [0, 0, 1, 1], [], []>} : vector<4x512xbf16>, vector<512x512xbf16>, vector<4x512xf32> -> vector<4x512xf32>
    %179 = arith.addf %171, %178 : vector<4x512xf32>
    %c2_147 = arith.constant 2 : index
    %c0_148 = arith.constant 0 : index
    %c0_149 = arith.constant 0 : index
    %180 = vector.load %arg19[%c2_147, %c0_148, %c0_149] : memref<3x4x8xbf16, #tpu.memory_space<vmem>>, vector<1x4x8xbf16>
    %181 = vector.shape_cast %180 : vector<1x4x8xbf16> to vector<4x8xbf16>
    %cst_150 = arith.constant dense<0.000000e+00> : vector<4x512xf32>
    %182 = tpu.matmul %181, %162, %cst_150 {dimension_numbers = #tpu.dot_dimension_numbers<[1], [0], [0], [1], [0, 0, 1, 1], [], []>} : vector<4x8xbf16>, vector<8x512xbf16>, vector<4x512xf32> -> vector<4x512xf32>
    %183 = arith.truncf %182 : vector<4x512xf32> to vector<4x512xbf16>
    %c2_151 = arith.constant 2 : index
    %c0_152 = arith.constant 0 : index
    %c0_153 = arith.constant 0 : index
    %184 = vector.load %arg20[%c2_151, %c0_152, %c0_153] : memref<3x512x512xbf16, #tpu.memory_space<vmem>>, vector<1x512x512xbf16>
    %185 = vector.shape_cast %184 : vector<1x512x512xbf16> to vector<512x512xbf16>
    %cst_154 = arith.constant dense<0.000000e+00> : vector<4x512xf32>
    %186 = tpu.matmul %183, %185, %cst_154 {dimension_numbers = #tpu.dot_dimension_numbers<[1], [0], [0], [1], [0, 0, 1, 1], [], []>} : vector<4x512xbf16>, vector<512x512xbf16>, vector<4x512xf32> -> vector<4x512xf32>
    %187 = arith.addf %179, %186 : vector<4x512xf32>
    %cst_155 = arith.constant dense<0.000000e+00> : vector<512xf32>
    %188 = vector.multi_reduction <add>, %187, %cst_155 [0] : vector<4x512xf32> to vector<512xf32>
    %189 = vector.shape_cast %188 : vector<512xf32> to vector<1x512xf32>
    %c0_156 = arith.constant 0 : index
    %c0_157 = arith.constant 0 : index
    %190 = vector.load %arg21[%c0_156, %c0_157] : memref<512x256xf32, #tpu.memory_space<vmem>>, vector<512x256xf32>
    %cst_158 = arith.constant dense<0.000000e+00> : vector<1x256xf32>
    %191 = tpu.matmul %189, %190, %cst_158 {dimension_numbers = #tpu.dot_dimension_numbers<[1], [0], [0], [1], [0, 0, 1, 1], [], []>} : vector<1x512xf32>, vector<512x256xf32>, vector<1x256xf32> -> vector<1x256xf32>
    %c0_159 = arith.constant 0 : index
    %c0_160 = arith.constant 0 : index
    %192 = vector.load %arg22[%c0_159, %c0_160] : memref<256x512xf32, #tpu.memory_space<vmem>>, vector<256x512xf32>
    %cst_161 = arith.constant dense<0.000000e+00> : vector<1x512xf32>
    %193 = tpu.matmul %191, %192, %cst_161 {dimension_numbers = #tpu.dot_dimension_numbers<[1], [0], [0], [1], [0, 0, 1, 1], [], []>} : vector<1x256xf32>, vector<256x512xf32>, vector<1x512xf32> -> vector<1x512xf32>
    %194 = vector.broadcast %193 : vector<1x512xf32> to vector<4x512xf32>
    %195 = arith.subf %187, %194 : vector<4x512xf32>
    %196 = arith.mulf %195, %195 : vector<4x512xf32>
    %cst_162 = arith.constant dense<0.000000e+00> : vector<512xf32>
    %197 = vector.multi_reduction <add>, %196, %cst_162 [0] : vector<4x512xf32> to vector<512xf32>
    %198 = vector.shape_cast %197 : vector<512xf32> to vector<1x512xf32>
    %c0_163 = arith.constant 0 : index
    %c0_164 = arith.constant 0 : index
    %199 = vector.load %arg21[%c0_163, %c0_164] : memref<512x256xf32, #tpu.memory_space<vmem>>, vector<512x256xf32>
    %cst_165 = arith.constant dense<0.000000e+00> : vector<1x256xf32>
    %200 = tpu.matmul %198, %199, %cst_165 {dimension_numbers = #tpu.dot_dimension_numbers<[1], [0], [0], [1], [0, 0, 1, 1], [], []>} : vector<1x512xf32>, vector<512x256xf32>, vector<1x256xf32> -> vector<1x256xf32>
    %cst_166 = arith.constant 9.99999974E-6 : f32
    %201 = vector.broadcast %cst_166 : f32 to vector<1x256xf32>
    %202 = arith.addf %200, %201 : vector<1x256xf32>
    %203 = math.rsqrt %202 : vector<1x256xf32>
    %c0_167 = arith.constant 0 : index
    %c0_168 = arith.constant 0 : index
    %204 = vector.load %arg23[%c0_167, %c0_168] : memref<256x512xf32, #tpu.memory_space<vmem>>, vector<256x512xf32>
    %cst_169 = arith.constant dense<0.000000e+00> : vector<1x512xf32>
    %205 = tpu.matmul %203, %204, %cst_169 {dimension_numbers = #tpu.dot_dimension_numbers<[1], [0], [0], [1], [0, 0, 1, 1], [], []>} : vector<1x256xf32>, vector<256x512xf32>, vector<1x512xf32> -> vector<1x512xf32>
    %206 = vector.broadcast %205 : vector<1x512xf32> to vector<4x512xf32>
    %207 = arith.mulf %195, %206 : vector<4x512xf32>
    %c0_170 = arith.constant 0 : index
    %c0_171 = arith.constant 0 : index
    %208 = vector.load %arg24[%c0_170, %c0_171] : memref<1x512xf32, #tpu.memory_space<vmem>>, vector<1x512xf32>
    %209 = vector.broadcast %208 : vector<1x512xf32> to vector<4x512xf32>
    %210 = arith.addf %207, %209 : vector<4x512xf32>
    %cst_172 = arith.constant 0.000000e+00 : f32
    %211 = vector.broadcast %cst_172 : f32 to vector<4x512xf32>
    %212 = arith.cmpf ogt, %210, %211 : vector<4x512xf32>
    %cst_173 = arith.constant 0.00999999977 : f32
    %213 = vector.broadcast %cst_173 : f32 to vector<4x512xf32>
    %214 = arith.mulf %213, %210 : vector<4x512xf32>
    %215 = arith.select %212, %210, %214 : vector<4x512xi1>, vector<4x512xf32>
    %216 = arith.truncf %215 : vector<4x512xf32> to vector<4x512xbf16>
    %cst_174 = arith.constant 0.000000e+00 : f32
    %217 = vector.broadcast %cst_174 : f32 to vector<2x256xf32>
    %c0_175 = arith.constant 0 : index
    %c0_176 = arith.constant 0 : index
    %c0_177 = arith.constant 0 : index
    %218 = vector.load %arg25[%c0_175, %c0_176, %c0_177] : memref<2x2x4xbf16, #tpu.memory_space<vmem>>, vector<1x2x4xbf16>
    %219 = vector.shape_cast %218 : vector<1x2x4xbf16> to vector<2x4xbf16>
    %cst_178 = arith.constant dense<0.000000e+00> : vector<2x512xf32>
    %220 = tpu.matmul %219, %216, %cst_178 {dimension_numbers = #tpu.dot_dimension_numbers<[1], [0], [0], [1], [0, 0, 1, 1], [], []>} : vector<2x4xbf16>, vector<4x512xbf16>, vector<2x512xf32> -> vector<2x512xf32>
    %221 = arith.truncf %220 : vector<2x512xf32> to vector<2x512xbf16>
    %c0_179 = arith.constant 0 : index
    %c0_180 = arith.constant 0 : index
    %c0_181 = arith.constant 0 : index
    %222 = vector.load %arg26[%c0_179, %c0_180, %c0_181] : memref<2x512x256xbf16, #tpu.memory_space<vmem>>, vector<1x512x256xbf16>
    %223 = vector.shape_cast %222 : vector<1x512x256xbf16> to vector<512x256xbf16>
    %cst_182 = arith.constant dense<0.000000e+00> : vector<2x256xf32>
    %224 = tpu.matmul %221, %223, %cst_182 {dimension_numbers = #tpu.dot_dimension_numbers<[1], [0], [0], [1], [0, 0, 1, 1], [], []>} : vector<2x512xbf16>, vector<512x256xbf16>, vector<2x256xf32> -> vector<2x256xf32>
    %225 = arith.addf %217, %224 : vector<2x256xf32>
    %c1_183 = arith.constant 1 : index
    %c0_184 = arith.constant 0 : index
    %c0_185 = arith.constant 0 : index
    %226 = vector.load %arg25[%c1_183, %c0_184, %c0_185] : memref<2x2x4xbf16, #tpu.memory_space<vmem>>, vector<1x2x4xbf16>
    %227 = vector.shape_cast %226 : vector<1x2x4xbf16> to vector<2x4xbf16>
    %cst_186 = arith.constant dense<0.000000e+00> : vector<2x512xf32>
    %228 = tpu.matmul %227, %216, %cst_186 {dimension_numbers = #tpu.dot_dimension_numbers<[1], [0], [0], [1], [0, 0, 1, 1], [], []>} : vector<2x4xbf16>, vector<4x512xbf16>, vector<2x512xf32> -> vector<2x512xf32>
    %229 = arith.truncf %228 : vector<2x512xf32> to vector<2x512xbf16>
    %c1_187 = arith.constant 1 : index
    %c0_188 = arith.constant 0 : index
    %c0_189 = arith.constant 0 : index
    %230 = vector.load %arg26[%c1_187, %c0_188, %c0_189] : memref<2x512x256xbf16, #tpu.memory_space<vmem>>, vector<1x512x256xbf16>
    %231 = vector.shape_cast %230 : vector<1x512x256xbf16> to vector<512x256xbf16>
    %cst_190 = arith.constant dense<0.000000e+00> : vector<2x256xf32>
    %232 = tpu.matmul %229, %231, %cst_190 {dimension_numbers = #tpu.dot_dimension_numbers<[1], [0], [0], [1], [0, 0, 1, 1], [], []>} : vector<2x512xbf16>, vector<512x256xbf16>, vector<2x256xf32> -> vector<2x256xf32>
    %233 = arith.addf %225, %232 : vector<2x256xf32>
    %c0_191 = arith.constant 0 : index
    %c0_192 = arith.constant 0 : index
    %234 = vector.load %arg27[%c0_191, %c0_192] : memref<1x256xf32, #tpu.memory_space<vmem>>, vector<1x256xf32>
    %235 = vector.broadcast %234 : vector<1x256xf32> to vector<2x256xf32>
    %236 = arith.addf %233, %235 : vector<2x256xf32>
    %237 = vector.extract_strided_slice %236 {offsets = [0, 0], sizes = [2, 128], strides = [1, 1]} : vector<2x256xf32> to vector<2x128xf32>
    %c0_193 = arith.constant 0 : index
    %c0_194 = arith.constant 0 : index
    %238 = vector.load %arg28[%c0_193, %c0_194] : memref<2x128xf32, #tpu.memory_space<vmem>>, vector<2x128xf32>
    tpu.vector_store %arg28[%c0_193, %c0_194], %237 {strides = array<i32>} : memref<2x128xf32, #tpu.memory_space<vmem>>, vector<2x128xf32>,
    %239 = vector.extract_strided_slice %236 {offsets = [0, 128], sizes = [2, 128], strides = [1, 1]} : vector<2x256xf32> to vector<2x128xf32>
    %c0_195 = arith.constant 0 : index
    %c0_196 = arith.constant 0 : index
    %240 = vector.load %arg29[%c0_195, %c0_196] : memref<2x128xf32, #tpu.memory_space<vmem>>, vector<2x128xf32>
    tpu.vector_store %arg29[%c0_195, %c0_196], %239 {strides = array<i32>} : memref<2x128xf32, #tpu.memory_space<vmem>>, vector<2x128xf32>,
    return
  }
}

</mosaic_0001>

<bundles_post_ra>
// kernel: encoder_forward.1
= control target key start
LH: loop header
LB: loop body
LE: loop exit
PB: predicated region body
PF: predicated region fallthrough
CT: control target
= control target key end

     0   :  { %s21688_s6 = smov 1   ;;  %s21689_s10 = smov 2   ;;  %s23568_s0 = inlined_call_operand.smem [shape: u32[30], index: -1, kind: input, shape index: {}] }
   0x1   :  { %s21764_s5 = sld [smem:[%s23568_s0]]   ;;  %s21690_s14 = smov 3  }
   0x2   :  { %s21769_s9 = sld [smem:[%s23568_s0 + %s21688_s6]]   ;;  %s21691_s18 = smov 4  }
   0x3   :  { %s21774_s13 = sld [smem:[%s23568_s0 + %s21689_s10]]   ;;  %s21692_s22 = smov 5  }
   0x4   :  { %s21779_s17 = sld [smem:[%s23568_s0 + %s21690_s14]]   ;;  %s21693_s26 = smov 6  }
   0x5   :  { %s21784_s21 = sld [smem:[%s23568_s0 + %s21691_s18]]   ;;  %s21694_s30 = smov 7  }
   0x6   :  { %s21789_s25 = sld [smem:[%s23568_s0 + %s21692_s22]]   ;;  %s21695_s4 = smov 8  }
   0x7   :  { %23637 = sst [smem:[#allocation59_spill]] %s21764_s5  ;;  %s21696_s10 = smov 9  }
   0x8   :  { %s21794_s29 = sld [smem:[%s23568_s0 + %s21693_s26]]   ;;  %s21697_s15 = smov 10  }
   0x9   :  { %s21799_s3 = sld [smem:[%s23568_s0 + %s21694_s30]]   ;;  %s21698_s20 = smov 11  }
   0xa   :  { %23638 = sst [smem:[#allocation60_spill]] %s21779_s17  ;;  %s21699_s26 = smov 12  }
   0xb   :  { %s21804_s8 = sld [smem:[%s23568_s0 + %s21695_s4]]   ;;  %s21700_s1 = smov 13  }
   0xc   :  { %s21809_s14 = sld [smem:[%s23568_s0 + %s21696_s10]]   ;;  %s21701_s7 = smov 14  }
   0xd   :  { %s21814_s19 = sld [smem:[%s23568_s0 + %s21697_s15]]   ;;  %s21702_s15 = smov 15  }
   0xe   :  { %s21819_s24 = sld [smem:[%s23568_s0 + %s21698_s20]]   ;;  %s21703_s22 = smov 16  }
   0xf   :  { %s21824_s30 = sld [smem:[%s23568_s0 + %s21699_s26]]   ;;  %s21704_s28 = smov 17  }
  0x10   :  { %s21829_s6 = sld [smem:[%s23568_s0 + %s21700_s1]]  }
  0x11   :  { %23639 = sst [smem:[#allocation61_spill]] %s21804_s8 }
  0x12   :  { %23640 = sst [smem:[#allocation62_spill]] %s21809_s14 }
  0x13   :  { %s21834_s12 = sld [smem:[%s23568_s0 + %s21701_s7]]   ;;  %s21705_s7 = smov 18  }
  0x14   :  { %23641 = sst [smem:[#allocation63_spill]] %s21819_s24 }
  0x15   :  { %s21839_s20 = sld [smem:[%s23568_s0 + %s21702_s15]]   ;;  %s21706_s15 = smov 19  }
  0x16   :  { %23642 = sst [smem:[#allocation64_spill]] %s21829_s6 }
  0x17   :  { %s21844_s27 = sld [smem:[%s23568_s0 + %s21703_s22]]   ;;  %s21707_s22 = smov 20  }
  0x18   :  { %s21849_s4 = sld [smem:[%s23568_s0 + %s21704_s28]]   ;;  %s21708_s28 = smov 21  }
  0x19   :  { %s21854_s14 = sld [smem:[%s23568_s0 + %s21705_s7]]   ;;  %s21709_s7 = smov 22  }
  0x1a   :  { %s21859_s17 = sld [smem:[%s23568_s0 + %s21706_s15]]   ;;  %s21710_s15 = smov 23  }
  0x1b   :  { %23643 = sst [smem:[#allocation65_spill]] %s21839_s20 }
  0x1c   :  { %s21864_s5 = sld [smem:[%s23568_s0 + %s21707_s22]]   ;;  %s21711_s22 = smov 24  }
  0x1d   :  { %s21874_s20 = sld [smem:[%s23568_s0 + %s21709_s7]]   ;;  %s21713_s7 = smov 26  }
  0x1e   :  { %23644 = sst [smem:[#allocation66_spill]] %s21849_s4 }
  0x1f   :  { %s21869_s4 = sld [smem:[%s23568_s0 + %s21708_s28]]   ;;  %s21712_s28 = smov 25  }
  0x20   :  { %23645 = sst [smem:[#allocation67_spill]] %s21859_s17 }
  0x21   :  { %s21879_s17 = sld [smem:[%s23568_s0 + %s21710_s15]]   ;;  %s21714_s15 = smov 27  }
  0x22   :  { %s21884_s6 = sld [smem:[%s23568_s0 + %s21711_s22]]   ;;  %s21715_s22 = smov 28  }
  0x23   :  { %s21894_s24 = sld [smem:[%s23568_s0 + %s21713_s7]]  }
  0x24   :  { %s21904_s8 = sld [smem:[%s23568_s0 + %s21715_s22]]  }
  0x25   :  { %23646 = sst [smem:[#allocation68_spill]] %s21869_s4 }
  0x26   :  { %s21889_s4 = sld [smem:[%s23568_s0 + %s21712_s28]]   ;;  %s21716_s28 = smov 29  }
  0x27   :  { %23647 = sst [smem:[#allocation69_spill]] %s21879_s17 }
  0x28   :  { %s21899_s17 = sld [smem:[%s23568_s0 + %s21714_s15]]  }
  0x2c   :  { %23648 = sst [smem:[#allocation70_spill]] %s21889_s4 }
  0x2d   :  { %s21909_s4 = sld [smem:[%s23568_s0 + %s21716_s28]]  }
  0x2e   :  { %65 = vsyncpa [#allocation3], 0 }
  0x2f   :  { %66 = vsyncpa [#allocation6], 0 }
  0x30   :  { %67 = vsyncpa [#allocation9], 0 }
  0x31   :  { %68 = vsyncpa [#allocation12], 0 }
  0x32   :  { %69 = vsyncpa [#allocation15], 0 }
  0x33   :  { %70 = vsyncpa [#allocation18], 0 }
  0x34   :  { %71 = vsyncpa [#allocation21], 0 }
  0x35   :  { %72 = vsyncpa [#allocation24], 0 }
  0x36   :  { %73 = vsyncpa [#allocation27], 0 }
  0x37   :  { %74 = vsyncpa [#allocation30], 0 }
  0x38   :  { %75 = vsyncpa [#allocation33], 0 }
  0x39   :  { %76 = vsyncpa [#allocation36], 0 }
  0x3a   :  { %77 = vsyncpa [#allocation39], 0 }
  0x3b   :  { %78 = vsyncpa [#allocation4], 0 }
  0x3c   :  { %79 = vsyncpa [#allocation43], 0  ;;  %s21717_s0 = smov [#allocation5]   ;;  %s21064_s10 = scalar_lea.hbm %s21774_s13, 9216 }
  0x3d   :  { %s99_s7 = sshll.u32 %s21717_s0, 4  ;;  %p21065_p0 = scmp.ne.s32.totalorder %s21774_s13, %s21064_s10  ;;  %s100_s7 = int_to_ptr.vmem [resolvable:$true] %s99_s7 }
  0x3e   :  { %p21068_p1 = scmp.lt.u32.totalorder %s21064_s10, %s21774_s13 }
  0x40   :  { %p21070_p2 = pnand %p21068_p1, %p21065_p0 }
  0x42   :  { %21073 = shalt.err (!%p21070_p2)
}
  0x43   :  { %s21074_s11 = scalar_lea.vmem %s100_s7, 9216  ;;  %p21079_p4 = scmp.lt.s32.totalorder %s100_s7, %s100_s7 }
  0x44   :  { %p21075_p3 = scmp.ne.s32.totalorder %s100_s7, %s21074_s11  ;;  %p21080_p5 = scmp.lt.s32.totalorder %s21074_s11, %s21074_s11 }
  0x46   :  { %p21081_p6 = por %p21080_p5, %p21079_p4 }
  0x48   :  { %p21082_p7 = pnand %p21081_p6, %p21075_p3 }
  0x4a   :  { %21085 = shalt.err (!%p21082_p7)
}
  0x4b   :  { %s21718_s15 = smov 256   ;;  %s21719_s16 = smov 16  }
  0x4c   :  { %105 = dma.hbm_to_vmem [thread:$0]  %s21774_s13, 9216, %s100_s7, [#allocation6], %s21718_s15, %s21718_s15, %s21719_s16  }
  0x4d   :  { %s21720_s18 = smov [#allocation8]   ;;  %s21086_s23 = scalar_lea.hbm %s21789_s25, 2048 }
  0x4e   :  { %s125_s22 = sshll.u32 %s21720_s18, 4  ;;  %p21087_p8 = scmp.ne.s32.totalorder %s21789_s25, %s21086_s23  ;;  %s126_s22 = int_to_ptr.vmem [resolvable:$true] %s125_s22 }
  0x4f   :  { %p21090_p9 = scmp.lt.u32.totalorder %s21086_s23, %s21789_s25 }
  0x51   :  { %p21092_p10 = pnand %p21090_p9, %p21087_p8 }
  0x53   :  { %21095 = shalt.err (!%p21092_p10)
}
  0x54   :  { %s21096_s26 = scalar_lea.vmem %s126_s22, 2048  ;;  %p21101_p12 = scmp.lt.s32.totalorder %s126_s22, %s126_s22 }
  0x55   :  { %p21097_p11 = scmp.ne.s32.totalorder %s126_s22, %s21096_s26  ;;  %p21102_p13 = scmp.lt.s32.totalorder %s21096_s26, %s21096_s26 }
  0x57   :  { %p21103_p0 = por %p21102_p13, %p21101_p12 }
  0x59   :  { %p21104_p1 = pnand %p21103_p0, %p21097_p11 }
  0x5b   :  { %21107 = shalt.err (!%p21104_p1)
}
  0x5c   :  { %s21721_s28 = smov 512   ;;  %s21722_s13 = smov 32  }
  0x5d   :  { %131 = dma.hbm_to_vmem [thread:$0]  %s21789_s25, 2048, %s126_s22, [#allocation9], %s21721_s28, %s21721_s28, %s21722_s13  }
  0x5e   :  { %s21723_s1 = smov [#allocation11]   ;;  %s21724_s0 = smov [#allocation14]  }
  0x5f   :  { %s147_s2 = sshll.u32 %s21723_s1, 4  ;;  %s173_s7 = sshll.u32 %s21724_s0, 4  ;;  %s148_s2 = int_to_ptr.vmem [resolvable:$true] %s147_s2  ;;  %s21925_s7 = int_to_ptr.vmem [resolvable:$true] %s173_s7 }
  0x60   :  { %s21108_s10 = scalar_lea.hbm %s21799_s3, 384 }
  0x61   :  { %p21109_p2 = scmp.ne.s32.totalorder %s21799_s3, %s21108_s10  ;;  %p21112_p3 = scmp.lt.u32.totalorder %s21108_s10, %s21799_s3 }
  0x63   :  { %p21114_p4 = pnand %p21112_p3, %p21109_p2 }
  0x65   :  { %21117 = shalt.err (!%p21114_p4)
}
  0x66   :  { %s21118_s11 = scalar_lea.vmem %s148_s2, 384  ;;  %p21123_p6 = scmp.lt.s32.totalorder %s148_s2, %s148_s2 }
  0x67   :  { %p21119_p5 = scmp.ne.s32.totalorder %s148_s2, %s21118_s11  ;;  %p21124_p7 = scmp.lt.s32.totalorder %s21118_s11, %s21118_s11 }
  0x69   :  { %p21125_p8 = por %p21124_p7, %p21123_p6 }
  0x6b   :  { %p21126_p9 = pnand %p21125_p8, %p21119_p5 }
  0x6d   :  { %21129 = shalt.err (!%p21126_p9)
}
  0x6e   :  { %s21725_s25 = smov 64   ;;  %s21726_s18 = smov 4  }
  0x6f   :  { %153 = dma.hbm_to_vmem [thread:$0]  %s21799_s3, 384, %s148_s2, [#allocation12], %s21725_s25, %s21725_s25, %s21726_s18  }
  0x70   :  { %s21130_s22 = scalar_lea.hbm %s21814_s19, 4096 }
  0x71   :  { %p21131_p10 = scmp.ne.s32.totalorder %s21814_s19, %s21130_s22  ;;  %p21134_p11 = scmp.lt.u32.totalorder %s21130_s22, %s21814_s19 }
  0x73   :  { %p21136_p12 = pnand %p21134_p11, %p21131_p10 }
  0x75   :  { %21139 = shalt.err (!%p21136_p12)
}
  0x76   :  { %s21140_s23 = scalar_lea.vmem %s21925_s7, 4096  ;;  %p21145_p0 = scmp.lt.s32.totalorder %s21925_s7, %s21925_s7 }
  0x77   :  { %p21141_p13 = scmp.ne.s32.totalorder %s21925_s7, %s21140_s23  ;;  %p21146_p1 = scmp.lt.s32.totalorder %s21140_s23, %s21140_s23 }
  0x79   :  { %p21147_p2 = por %p21146_p1, %p21145_p0 }
  0x7b   :  { %p21148_p3 = pnand %p21147_p2, %p21141_p13 }
  0x7d   :  { %21151 = shalt.err (!%p21148_p3)
}
  0x7e   :  { %179 = dma.hbm_to_vmem [thread:$0]  %s21814_s19, 4096, %s21925_s7, [#allocation15], %s21721_s28, %s21721_s28, %s21722_s13  }
  0x7f   :  { %s21727_s3 = smov [#allocation17]   ;;  %s21728_s1 = smov [#allocation20]  }
  0x80   :  { %s198_s26 = sshll.u32 %s21727_s3, 4  ;;  %s219_s2 = sshll.u32 %s21728_s1, 4  ;;  %s199_s26 = int_to_ptr.vmem [resolvable:$true] %s198_s26  ;;  %s21946_s2 = int_to_ptr.vmem [resolvable:$true] %s219_s2 }
  0x81   :  { %s21152_s0 = scalar_lea.hbm %s21824_s30, 64 }
  0x82   :  { %p21153_p4 = scmp.ne.s32.totalorder %s21824_s30, %s21152_s0  ;;  %p21156_p5 = scmp.lt.u32.totalorder %s21152_s0, %s21824_s30 }
  0x84   :  { %p21158_p6 = pnand %p21156_p5, %p21153_p4 }
  0x86   :  { %21161 = shalt.err (!%p21158_p6)
}
  0x87   :  { %s21162_s10 = scalar_lea.vmem %s199_s26, 64  ;;  %p21167_p8 = scmp.lt.s32.totalorder %s199_s26, %s199_s26 }
  0x88   :  { %p21163_p7 = scmp.ne.s32.totalorder %s199_s26, %s21162_s10  ;;  %p21168_p9 = scmp.lt.s32.totalorder %s21162_s10, %s21162_s10 }
  0x8a   :  { %p21169_p10 = por %p21168_p9, %p21167_p8 }
  0x8c   :  { %p21170_p11 = pnand %p21169_p10, %p21163_p7 }
  0x8e   :  { %21173 = shalt.err (!%p21170_p11)
}
  0x8f   :  { %201 = dma.hbm_to_vmem [thread:$0]  %s21824_s30, 64, %s199_s26, [#allocation18]  }
  0x90   :  { %s21174_s19 = scalar_lea.hbm %s21834_s12, 49152 }
  0x91   :  { %p21175_p12 = scmp.ne.s32.totalorder %s21834_s12, %s21174_s19  ;;  %p21178_p13 = scmp.lt.u32.totalorder %s21174_s19, %s21834_s12 }
  0x93   :  { %p21180_p0 = pnand %p21178_p13, %p21175_p12 }
  0x95   :  { %21183 = shalt.err (!%p21180_p0)
}
  0x96   :  { %s21184_s7 = scalar_lea.vmem %s21946_s2, 49152  ;;  %p21189_p2 = scmp.lt.s32.totalorder %s21946_s2, %s21946_s2 }
  0x97   :  { %p21185_p1 = scmp.ne.s32.totalorder %s21946_s2, %s21184_s7  ;;  %p21190_p3 = scmp.lt.s32.totalorder %s21184_s7, %s21184_s7 }
  0x99   :  { %p21191_p4 = por %p21190_p3, %p21189_p2 }
  0x9b   :  { %p21192_p5 = pnand %p21191_p4, %p21185_p1 }
  0x9d   :  { %21195 = shalt.err (!%p21192_p5)
}
  0x9e   :  { %225 = dma.hbm_to_vmem [thread:$0]  %s21834_s12, 49152, %s21946_s2, [#allocation21], %s21718_s15, %s21718_s15, %s21719_s16  }
  0x9f   :  { %s21729_s30 = smov [#allocation23]   ;;  %s21730_s22 = smov [#allocation26]  }
  0xa0   :  { %s243_s11 = sshll.u32 %s21729_s30, 4  ;;  %s268_s23 = sshll.u32 %s21730_s22, 4  ;;  %s244_s11 = int_to_ptr.vmem [resolvable:$true] %s243_s11  ;;  %s269_s23 = int_to_ptr.vmem [resolvable:$true] %s268_s23 }
  0xa1   :  { %s21196_s3 = scalar_lea.hbm %s21844_s27, 8192 }
  0xa2   :  { %p21197_p6 = scmp.ne.s32.totalorder %s21844_s27, %s21196_s3  ;;  %p21200_p7 = scmp.lt.u32.totalorder %s21196_s3, %s21844_s27 }
  0xa4   :  { %p21202_p8 = pnand %p21200_p7, %p21197_p6 }
  0xa6   :  { %21205 = shalt.err (!%p21202_p8)
}
  0xa7   :  { %s21206_s26 = scalar_lea.vmem %s244_s11, 8192  ;;  %p21211_p10 = scmp.lt.s32.totalorder %s244_s11, %s244_s11 }
  0xa8   :  { %p21207_p9 = scmp.ne.s32.totalorder %s244_s11, %s21206_s26  ;;  %p21212_p11 = scmp.lt.s32.totalorder %s21206_s26, %s21206_s26 }
  0xaa   :  { %p21213_p12 = por %p21212_p11, %p21211_p10 }
  0xac   :  { %p21214_p13 = pnand %p21213_p12, %p21207_p9 }
  0xae   :  { %21217 = shalt.err (!%p21214_p13)
}
  0xaf   :  { %249 = dma.hbm_to_vmem [thread:$0]  %s21844_s27, 8192, %s244_s11, [#allocation24], %s21721_s28, %s21721_s28, %s21722_s13  }
  0xb0   :  { %s21218_s12 = scalar_lea.hbm %s21854_s14, 64 }
  0xb1   :  { %p21219_p0 = scmp.ne.s32.totalorder %s21854_s14, %s21218_s12  ;;  %p21222_p1 = scmp.lt.u32.totalorder %s21218_s12, %s21854_s14 }
  0xb3   :  { %p21224_p2 = pnand %p21222_p1, %p21219_p0 }
  0xb5   :  { %21227 = shalt.err (!%p21224_p2)
}
  0xb6   :  { %s21228_s1 = scalar_lea.vmem %s269_s23, 64  ;;  %p21233_p4 = scmp.lt.s32.totalorder %s269_s23, %s269_s23 }
  0xb7   :  { %p21229_p3 = scmp.ne.s32.totalorder %s269_s23, %s21228_s1  ;;  %p21234_p5 = scmp.lt.s32.totalorder %s21228_s1, %s21228_s1 }
  0xb9   :  { %p21235_p6 = por %p21234_p5, %p21233_p4 }
  0xbb   :  { %p21236_p7 = pnand %p21235_p6, %p21229_p3 }
  0xbd   :  { %21239 = shalt.err (!%p21236_p7)
}
  0xbe   :  { %271 = dma.hbm_to_vmem [thread:$0]  %s21854_s14, 64, %s269_s23, [#allocation27]  }
  0xbf   :  { %s21731_s2 = smov [#allocation29]   ;;  %s21732_s27 = smov [#allocation32]  }
  0xc0   :  { %s289_s0 = sshll.u32 %s21731_s2, 4  ;;  %s313_s10 = sshll.u32 %s21732_s27, 4  ;;  %s290_s0 = int_to_ptr.vmem [resolvable:$true] %s289_s0  ;;  %s21975_s10 = int_to_ptr.vmem [resolvable:$true] %s313_s10 }
  0xc1   :  { %s21240_s19 = scalar_lea.hbm %s21864_s5, 49152 }
  0xc2   :  { %p21241_p8 = scmp.ne.s32.totalorder %s21864_s5, %s21240_s19  ;;  %p21244_p9 = scmp.lt.u32.totalorder %s21240_s19, %s21864_s5 }
  0xc4   :  { %p21246_p10 = pnand %p21244_p9, %p21241_p8 }
  0xc6   :  { %21249 = shalt.err (!%p21246_p10)
}
  0xc7   :  { %s21250_s7 = scalar_lea.vmem %s290_s0, 49152  ;;  %p21255_p12 = scmp.lt.s32.totalorder %s290_s0, %s290_s0 }
  0xc8   :  { %p21251_p11 = scmp.ne.s32.totalorder %s290_s0, %s21250_s7  ;;  %p21256_p13 = scmp.lt.s32.totalorder %s21250_s7, %s21250_s7 }
  0xca   :  { %p21257_p0 = por %p21256_p13, %p21255_p12 }
  0xcc   :  { %p21258_p1 = pnand %p21257_p0, %p21251_p11 }
  0xce   :  { %21261 = shalt.err (!%p21258_p1)
}
  0xcf   :  { %295 = dma.hbm_to_vmem [thread:$0]  %s21864_s5, 49152, %s290_s0, [#allocation30], %s21718_s15, %s21718_s15, %s21719_s16  }
  0xd0   :  { %s21262_s14 = scalar_lea.hbm %s21874_s20, 16384 }
  0xd1   :  { %p21263_p2 = scmp.ne.s32.totalorder %s21874_s20, %s21262_s14  ;;  %p21266_p3 = scmp.lt.u32.totalorder %s21262_s14, %s21874_s20 }
  0xd3   :  { %p21268_p4 = pnand %p21266_p3, %p21263_p2 }
  0xd5   :  { %21271 = shalt.err (!%p21268_p4)
}
  0xd6   :  { %s21272_s30 = scalar_lea.vmem %s21975_s10, 16384  ;;  %p21277_p6 = scmp.lt.s32.totalorder %s21975_s10, %s21975_s10 }
  0xd7   :  { %p21273_p5 = scmp.ne.s32.totalorder %s21975_s10, %s21272_s30  ;;  %p21278_p7 = scmp.lt.s32.totalorder %s21272_s30, %s21272_s30 }
  0xd9   :  { %p21279_p8 = por %p21278_p7, %p21277_p6 }
  0xdb   :  { %p21280_p9 = pnand %p21279_p8, %p21273_p5 }
  0xdd   :  { %21283 = shalt.err (!%p21280_p9)
}
  0xde   :  { %319 = dma.hbm_to_vmem [thread:$0]  %s21874_s20, 16384, %s21975_s10, [#allocation33], %s21721_s28, %s21721_s28, %s21722_s13  }
  0xdf   :  { %s21733_s5 = smov [#allocation35]   ;;  %s21284_s22 = scalar_lea.hbm %s21884_s6, 64 }
  0xe0   :  { %s338_s11 = sshll.u32 %s21733_s5, 4  ;;  %p21285_p10 = scmp.ne.s32.totalorder %s21884_s6, %s21284_s22  ;;  %s339_s11 = int_to_ptr.vmem [resolvable:$true] %s338_s11 }
  0xe1   :  { %p21288_p11 = scmp.lt.u32.totalorder %s21284_s22, %s21884_s6 }
  0xe3   :  { %p21290_p12 = pnand %p21288_p11, %p21285_p10 }
  0xe5   :  { %21293 = shalt.err (!%p21290_p12)
}
  0xe6   :  { %s21294_s23 = scalar_lea.vmem %s339_s11, 64  ;;  %p21299_p0 = scmp.lt.s32.totalorder %s339_s11, %s339_s11 }
  0xe7   :  { %p21295_p13 = scmp.ne.s32.totalorder %s339_s11, %s21294_s23  ;;  %p21300_p1 = scmp.lt.s32.totalorder %s21294_s23, %s21294_s23 }
  0xe9   :  { %p21301_p2 = por %p21300_p1, %p21299_p0 }
  0xeb   :  { %p21302_p3 = pnand %p21301_p2, %p21295_p13 }
  0xed   :  { %21305 = shalt.err (!%p21302_p3)
}
  0xee   :  { %341 = dma.hbm_to_vmem [thread:$0]  %s21884_s6, 64, %s339_s11, [#allocation36]  }
  0xef   :  { %s21734_s20 = smov [#allocation38]   ;;  %s21735_s26 = smov [#allocation2]  }
  0xf0   :  { %s359_s3 = sshll.u32 %s21734_s20, 4  ;;  %s87_s12 = sshll.u32 %s21735_s26, 4  ;;  %s360_s3 = int_to_ptr.vmem [resolvable:$true] %s359_s3  ;;  %s88_s12 = int_to_ptr.vmem [resolvable:$true] %s87_s12 }
  0xf1   :  { %s21306_s1 = scalar_lea.hbm %s21894_s24, 16384 }
  0xf2   :  { %p21307_p4 = scmp.ne.s32.totalorder %s21894_s24, %s21306_s1  ;;  %p21310_p5 = scmp.lt.u32.totalorder %s21306_s1, %s21894_s24 }
  0xf4   :  { %p21312_p6 = pnand %p21310_p5, %p21307_p4 }
  0xf6   :  { %21315 = shalt.err (!%p21312_p6)
}
  0xf7   :  { %s21316_s2 = scalar_lea.vmem %s360_s3, 16384  ;;  %p21321_p8 = scmp.lt.s32.totalorder %s360_s3, %s360_s3 }
  0xf8   :  { %p21317_p7 = scmp.ne.s32.totalorder %s360_s3, %s21316_s2  ;;  %p21322_p9 = scmp.lt.s32.totalorder %s21316_s2, %s21316_s2 }
  0xfa   :  { %p21323_p10 = por %p21322_p9, %p21321_p8 }
  0xfc   :  { %p21324_p11 = pnand %p21323_p10, %p21317_p7 }
  0xfe   :  { %21327 = shalt.err (!%p21324_p11)
}
  0xff   :  { %s21736_s0 = smov 128   ;;  %s21737_s6 = smov 8  }
 0x100   :  { %365 = dma.hbm_to_vmem [thread:$0]  %s21894_s24, 16384, %s360_s3, [#allocation39], %s21736_s0, %s21736_s0, %s21737_s6  }
 0x101   :  { %s21328_s27 = scalar_lea.hbm %s21769_s9, 768 }
 0x102   :  { %p21329_p12 = scmp.ne.s32.totalorder %s21769_s9, %s21328_s27  ;;  %p21332_p13 = scmp.lt.u32.totalorder %s21328_s27, %s21769_s9 }
 0x104   :  { %p21334_p0 = pnand %p21332_p13, %p21329_p12 }
 0x106   :  { %21337 = shalt.err (!%p21334_p0)
}
 0x107   :  { %s21338_s10 = scalar_lea.vmem %s88_s12, 768  ;;  %p21343_p2 = scmp.lt.s32.totalorder %s88_s12, %s88_s12 }
 0x108   :  { %p21339_p1 = scmp.ne.s32.totalorder %s88_s12, %s21338_s10  ;;  %p21344_p3 = scmp.lt.s32.totalorder %s21338_s10, %s21338_s10 }
 0x10a   :  { %p21345_p4 = por %p21344_p3, %p21343_p2 }
 0x10c   :  { %p21346_p5 = pnand %p21345_p4, %p21339_p1 }
 0x10e   :  { %21349 = shalt.err (!%p21346_p5)
}
 0x10f   :  { %93 = dma.hbm_to_vmem [thread:$0]  %s21769_s9, 768, %s88_s12, [#allocation3], %s21725_s25, %s21725_s25, %s21726_s18  }
 0x110   :  { %s21738_s24 = smov [#allocation7]   ;;  %s21739_s7 = smov [#allocation10]  }
 0x111   :  { %s113_s19 = sshll.u32 %s21738_s24, 4  ;;  %s138_s14 = sshll.u32 %s21739_s7, 4  ;;  %s114_s19 = int_to_ptr.vmem [resolvable:$true] %s113_s19  ;;  %s139_s14 = int_to_ptr.vmem [resolvable:$true] %s138_s14 }
 0x112   :  { %s21350_s30 = scalar_lea.hbm %s21784_s21, 2048 }
 0x113   :  { %p21351_p6 = scmp.ne.s32.totalorder %s21784_s21, %s21350_s30  ;;  %p21354_p7 = scmp.lt.u32.totalorder %s21350_s30, %s21784_s21 }
 0x115   :  { %p21356_p8 = pnand %p21354_p7, %p21351_p6 }
 0x117   :  { %21359 = shalt.err (!%p21356_p8)
}
 0x118   :  { %s21360_s5 = scalar_lea.vmem %s114_s19, 2048  ;;  %p21365_p10 = scmp.lt.s32.totalorder %s114_s19, %s114_s19 }
 0x119   :  { %p21361_p9 = scmp.ne.s32.totalorder %s114_s19, %s21360_s5  ;;  %p21366_p11 = scmp.lt.s32.totalorder %s21360_s5, %s21360_s5 }
 0x11b   :  { %p21367_p12 = por %p21366_p11, %p21365_p10 }
 0x11d   :  { %p21368_p13 = pnand %p21367_p12, %p21361_p9 }
 0x11f   :  { %21371 = shalt.err (!%p21368_p13)
}
 0x120   :  { %119 = dma.hbm_to_vmem [thread:$0]  %s21784_s21, 2048, %s114_s19, [#allocation6], %s21721_s28, %s21721_s28, %s21722_s13  }
 0x121   :  { %s21372_s9 = scalar_lea.hbm %s21794_s29, 64 }
 0x122   :  { %p21373_p0 = scmp.ne.s32.totalorder %s21794_s29, %s21372_s9  ;;  %p21376_p1 = scmp.lt.u32.totalorder %s21372_s9, %s21794_s29 }
 0x124   :  { %p21378_p2 = pnand %p21376_p1, %p21373_p0 }
 0x126   :  { %21381 = shalt.err (!%p21378_p2)
}
 0x127   :  { %s21382_s11 = scalar_lea.vmem %s139_s14, 64  ;;  %p21387_p4 = scmp.lt.s32.totalorder %s139_s14, %s139_s14 }
 0x128   :  { %p21383_p3 = scmp.ne.s32.totalorder %s139_s14, %s21382_s11  ;;  %p21388_p5 = scmp.lt.s32.totalorder %s21382_s11, %s21382_s11 }
 0x12a   :  { %p21389_p6 = por %p21388_p5, %p21387_p4 }
 0x12c   :  { %p21390_p7 = pnand %p21389_p6, %p21383_p3 }
 0x12e   :  { %21393 = shalt.err (!%p21390_p7)
}
 0x12f   :  { %s23649_s22 = sld [smem:[#allocation61_spill]]  ;;  %s21740_s23 = smov [#allocation13]  }
 0x130   :  { %141 = dma.hbm_to_vmem [thread:$0]  %s21794_s29, 64, %s139_s14, [#allocation9]  }
 0x131   :  { %s159_s21 = sshll.u32 %s21740_s23, 4  ;;  %s21741_s20 = smov [#allocation16]   ;;  %s160_s21 = int_to_ptr.vmem [resolvable:$true] %s159_s21 }
 0x132   :  { %s185_s3 = sshll.u32 %s21741_s20, 4  ;;  %s186_s3 = int_to_ptr.vmem [resolvable:$true] %s185_s3 }
 0x135   :  { %s21394_s26 = scalar_lea.hbm %s23649_s22, 49152 }
 0x136   :  { %p21395_p8 = scmp.ne.s32.totalorder %s23649_s22, %s21394_s26  ;;  %p21398_p9 = scmp.lt.u32.totalorder %s21394_s26, %s23649_s22 }
 0x138   :  { %p21400_p10 = pnand %p21398_p9, %p21395_p8 }
 0x13a   :  { %21403 = shalt.err (!%p21400_p10)
}
 0x13b   :  { %s21404_s12 = scalar_lea.vmem %s160_s21, 49152  ;;  %p21409_p12 = scmp.lt.s32.totalorder %s160_s21, %s160_s21 }
 0x13c   :  { %p21405_p11 = scmp.ne.s32.totalorder %s160_s21, %s21404_s12  ;;  %p21410_p13 = scmp.lt.s32.totalorder %s21404_s12, %s21404_s12 }
 0x13e   :  { %p21411_p0 = por %p21410_p13, %p21409_p12 }
 0x140   :  { %p21412_p1 = pnand %p21411_p0, %p21405_p11 }
 0x142   :  { %21415 = shalt.err (!%p21412_p1)
}
 0x143   :  { %s23650_s29 = sld [smem:[#allocation63_spill]] }
 0x144   :  { %165 = dma.hbm_to_vmem [thread:$0]  %s23649_s22, 49152, %s160_s21, [#allocation12], %s21718_s15, %s21718_s15, %s21719_s16  }
 0x149   :  { %s21416_s1 = scalar_lea.hbm %s23650_s29, 4096 }
 0x14a   :  { %p21417_p2 = scmp.ne.s32.totalorder %s23650_s29, %s21416_s1  ;;  %p21420_p3 = scmp.lt.u32.totalorder %s21416_s1, %s23650_s29 }
 0x14c   :  { %p21422_p4 = pnand %p21420_p3, %p21417_p2 }
 0x14e   :  { %21425 = shalt.err (!%p21422_p4)
}
 0x14f   :  { %s21426_s2 = scalar_lea.vmem %s186_s3, 4096  ;;  %p21431_p6 = scmp.lt.s32.totalorder %s186_s3, %s186_s3 }
 0x150   :  { %p21427_p5 = scmp.ne.s32.totalorder %s186_s3, %s21426_s2  ;;  %p21432_p7 = scmp.lt.s32.totalorder %s21426_s2, %s21426_s2 }
 0x152   :  { %p21433_p8 = por %p21432_p7, %p21431_p6 }
 0x154   :  { %p21434_p9 = pnand %p21433_p8, %p21427_p5 }
 0x156   :  { %21437 = shalt.err (!%p21434_p9)
}
 0x157   :  { %s23651_s27 = sld [smem:[#allocation64_spill]]  ;;  %s21742_s10 = smov [#allocation19]  }
 0x158   :  { %191 = dma.hbm_to_vmem [thread:$0]  %s23650_s29, 4096, %s186_s3, [#allocation15], %s21721_s28, %s21721_s28, %s21722_s13  }
 0x159   :  { %s207_s24 = sshll.u32 %s21742_s10, 4  ;;  %s21743_s19 = smov [#allocation22]   ;;  %s208_s24 = int_to_ptr.vmem [resolvable:$true] %s207_s24 }
 0x15a   :  { %s231_s7 = sshll.u32 %s21743_s19, 4  ;;  %s232_s7 = int_to_ptr.vmem [resolvable:$true] %s231_s7 }
 0x15d   :  { %s21438_s14 = scalar_lea.hbm %s23651_s27, 192 }
 0x15e   :  { %p21439_p10 = scmp.ne.s32.totalorder %s23651_s27, %s21438_s14  ;;  %p21442_p11 = scmp.lt.u32.totalorder %s21438_s14, %s23651_s27 }
 0x160   :  { %p21444_p12 = pnand %p21442_p11, %p21439_p10 }
 0x162   :  { %21447 = shalt.err (!%p21444_p12)
}
 0x163   :  { %s21448_s30 = scalar_lea.vmem %s208_s24, 192  ;;  %p21453_p0 = scmp.lt.s32.totalorder %s208_s24, %s208_s24 }
 0x164   :  { %p21449_p13 = scmp.ne.s32.totalorder %s208_s24, %s21448_s30  ;;  %p21454_p1 = scmp.lt.s32.totalorder %s21448_s30, %s21448_s30 }
 0x166   :  { %p21455_p2 = por %p21454_p1, %p21453_p0 }
 0x168   :  { %p21456_p3 = pnand %p21455_p2, %p21449_p13 }
 0x16a   :  { %21459 = shalt.err (!%p21456_p3)
}
 0x16b   :  { %s23652_s5 = sld [smem:[#allocation65_spill]] }
 0x16c   :  { %213 = dma.hbm_to_vmem [thread:$0]  %s23651_s27, 192, %s208_s24, [#allocation18], %s21725_s25, %s21725_s25, %s21726_s18  }
 0x171   :  { %s21460_s9 = scalar_lea.hbm %s23652_s5, 8192 }
 0x172   :  { %p21461_p4 = scmp.ne.s32.totalorder %s23652_s5, %s21460_s9  ;;  %p21464_p5 = scmp.lt.u32.totalorder %s21460_s9, %s23652_s5 }
 0x174   :  { %p21466_p6 = pnand %p21464_p5, %p21461_p4 }
 0x176   :  { %21469 = shalt.err (!%p21466_p6)
}
 0x177   :  { %s21470_s11 = scalar_lea.vmem %s232_s7, 8192  ;;  %p21475_p8 = scmp.lt.s32.totalorder %s232_s7, %s232_s7 }
 0x178   :  { %p21471_p7 = scmp.ne.s32.totalorder %s232_s7, %s21470_s11  ;;  %p21476_p9 = scmp.lt.s32.totalorder %s21470_s11, %s21470_s11 }
 0x17a   :  { %p21477_p10 = por %p21476_p9, %p21475_p8 }
 0x17c   :  { %p21478_p11 = pnand %p21477_p10, %p21471_p7 }
 0x17e   :  { %21481 = shalt.err (!%p21478_p11)
}
 0x17f   :  { %s23653_s22 = sld [smem:[#allocation66_spill]]  ;;  %s21744_s25 = smov [#allocation25]  }
 0x180   :  { %237 = dma.hbm_to_vmem [thread:$0]  %s23652_s5, 8192, %s232_s7, [#allocation21], %s21736_s0, %s21736_s0, %s21737_s6  }
 0x181   :  { %s255_s18 = sshll.u32 %s21744_s25, 4  ;;  %s21745_s23 = smov [#allocation28]   ;;  %s256_s18 = int_to_ptr.vmem [resolvable:$true] %s255_s18 }
 0x182   :  { %s277_s21 = sshll.u32 %s21745_s23, 4  ;;  %s278_s21 = int_to_ptr.vmem [resolvable:$true] %s277_s21 }
 0x185   :  { %s21482_s20 = scalar_lea.hbm %s23653_s22, 8192 }
 0x186   :  { %p21483_p12 = scmp.ne.s32.totalorder %s23653_s22, %s21482_s20  ;;  %p21486_p13 = scmp.lt.u32.totalorder %s21482_s20, %s23653_s22 }
 0x188   :  { %p21488_p0 = pnand %p21486_p13, %p21483_p12 }
 0x18a   :  { %21491 = shalt.err (!%p21488_p0)
}
 0x18b   :  { %s21492_s3 = scalar_lea.vmem %s256_s18, 8192  ;;  %p21497_p2 = scmp.lt.s32.totalorder %s256_s18, %s256_s18 }
 0x18c   :  { %p21493_p1 = scmp.ne.s32.totalorder %s256_s18, %s21492_s3  ;;  %p21498_p3 = scmp.lt.s32.totalorder %s21492_s3, %s21492_s3 }
 0x18e   :  { %p21499_p4 = por %p21498_p3, %p21497_p2 }
 0x190   :  { %p21500_p5 = pnand %p21499_p4, %p21493_p1 }
 0x192   :  { %21503 = shalt.err (!%p21500_p5)
}
 0x193   :  { %s23654_s0 = sld [smem:[#allocation67_spill]] }
 0x194   :  { %261 = dma.hbm_to_vmem [thread:$0]  %s23653_s22, 8192, %s256_s18, [#allocation24], %s21721_s28, %s21721_s28, %s21722_s13  }
 0x199   :  { %s21504_s6 = scalar_lea.hbm %s23654_s0, 96 }
 0x19a   :  { %p21505_p6 = scmp.ne.s32.totalorder %s23654_s0, %s21504_s6  ;;  %p21508_p7 = scmp.lt.u32.totalorder %s21504_s6, %s23654_s0 }
 0x19c   :  { %p21510_p8 = pnand %p21508_p7, %p21505_p6 }
 0x19e   :  { %21513 = shalt.err (!%p21510_p8)
}
 0x19f   :  { %s21514_s26 = scalar_lea.vmem %s278_s21, 96  ;;  %p21519_p10 = scmp.lt.s32.totalorder %s278_s21, %s278_s21 }
 0x1a0   :  { %p21515_p9 = scmp.ne.s32.totalorder %s278_s21, %s21514_s26  ;;  %p21520_p11 = scmp.lt.s32.totalorder %s21514_s26, %s21514_s26 }
 0x1a2   :  { %p21521_p12 = por %p21520_p11, %p21519_p10 }
 0x1a4   :  { %p21522_p13 = pnand %p21521_p12, %p21515_p9 }
 0x1a6   :  { %21525 = shalt.err (!%p21522_p13)
}
 0x1a7   :  { %s21746_s12 = smov 2   ;;  %s23655_s29 = sld [smem:[#allocation68_spill]] }
 0x1a8   :  { %283 = dma.hbm_to_vmem [thread:$0]  %s23654_s0, 96, %s278_s21, [#allocation27], %s21722_s13, %s21722_s13, %s21746_s12  }
 0x1a9   :  { %s21747_s1 = smov [#allocation31]   ;;  %s21748_s27 = smov [#allocation34]  }
 0x1aa   :  { %s301_s2 = sshll.u32 %s21747_s1, 4  ;;  %s325_s10 = sshll.u32 %s21748_s27, 4  ;;  %s302_s2 = int_to_ptr.vmem [resolvable:$true] %s301_s2  ;;  %s22066_s10 = int_to_ptr.vmem [resolvable:$true] %s325_s10 }
 0x1ad   :  { %s21526_s24 = scalar_lea.hbm %s23655_s29, 16384 }
 0x1ae   :  { %p21527_p0 = scmp.ne.s32.totalorder %s23655_s29, %s21526_s24  ;;  %p21530_p1 = scmp.lt.u32.totalorder %s21526_s24, %s23655_s29 }
 0x1b0   :  { %p21532_p2 = pnand %p21530_p1, %p21527_p0 }
 0x1b2   :  { %21535 = shalt.err (!%p21532_p2)
}
 0x1b3   :  { %s21536_s19 = scalar_lea.vmem %s302_s2, 16384  ;;  %p21541_p4 = scmp.lt.s32.totalorder %s302_s2, %s302_s2 }
 0x1b4   :  { %p21537_p3 = scmp.ne.s32.totalorder %s302_s2, %s21536_s19  ;;  %p21542_p5 = scmp.lt.s32.totalorder %s21536_s19, %s21536_s19 }
 0x1b6   :  { %p21543_p6 = por %p21542_p5, %p21541_p4 }
 0x1b8   :  { %p21544_p7 = pnand %p21543_p6, %p21537_p3 }
 0x1ba   :  { %21547 = shalt.err (!%p21544_p7)
}
 0x1bb   :  { %s23656_s7 = sld [smem:[#allocation69_spill]] }
 0x1bc   :  { %307 = dma.hbm_to_vmem [thread:$0]  %s23655_s29, 16384, %s302_s2, [#allocation30], %s21718_s15, %s21718_s15, %s21719_s16  }
 0x1c1   :  { %s21548_s14 = scalar_lea.hbm %s23656_s7, 16384 }
 0x1c2   :  { %p21549_p8 = scmp.ne.s32.totalorder %s23656_s7, %s21548_s14  ;;  %p21552_p9 = scmp.lt.u32.totalorder %s21548_s14, %s23656_s7 }
 0x1c4   :  { %p21554_p10 = pnand %p21552_p9, %p21549_p8 }
 0x1c6   :  { %21557 = shalt.err (!%p21554_p10)
}
 0x1c7   :  { %s21558_s30 = scalar_lea.vmem %s22066_s10, 16384  ;;  %p21563_p12 = scmp.lt.s32.totalorder %s22066_s10, %s22066_s10 }
 0x1c8   :  { %p21559_p11 = scmp.ne.s32.totalorder %s22066_s10, %s21558_s30  ;;  %p21564_p13 = scmp.lt.s32.totalorder %s21558_s30, %s21558_s30 }
 0x1ca   :  { %p21565_p0 = por %p21564_p13, %p21563_p12 }
 0x1cc   :  { %p21566_p1 = pnand %p21565_p0, %p21559_p11 }
 0x1ce   :  { %21569 = shalt.err (!%p21566_p1)
}
 0x1cf   :  { %s23657_s15 = sld [smem:[#allocation70_spill]]  ;;  %s21749_s5 = smov [#allocation37]  }
 0x1d0   :  { %331 = dma.hbm_to_vmem [thread:$0]  %s23656_s7, 16384, %s22066_s10, [#allocation33], %s21721_s28, %s21721_s28, %s21722_s13  }
 0x1d1   :  { %s347_s9 = sshll.u32 %s21749_s5, 4  ;;  %s21750_s11 = smov [#allocation40]   ;;  %s348_s9 = int_to_ptr.vmem [resolvable:$true] %s347_s9 }
 0x1d2   :  { %s372_s22 = sshll.u32 %s21750_s11, 4  ;;  %s373_s22 = int_to_ptr.vmem [resolvable:$true] %s372_s22 }
 0x1d5   :  { %s21570_s25 = scalar_lea.hbm %s23657_s15, 32 }
 0x1d6   :  { %p21571_p2 = scmp.ne.s32.totalorder %s23657_s15, %s21570_s25  ;;  %p21574_p3 = scmp.lt.u32.totalorder %s21570_s25, %s23657_s15 }
 0x1d8   :  { %p21576_p4 = pnand %p21574_p3, %p21571_p2 }
 0x1da   :  { %21579 = shalt.err (!%p21576_p4)
}
 0x1db   :  { %s21580_s18 = scalar_lea.vmem %s348_s9, 32  ;;  %p21585_p6 = scmp.lt.s32.totalorder %s348_s9, %s348_s9 }
 0x1dc   :  { %p21581_p5 = scmp.ne.s32.totalorder %s348_s9, %s21580_s18  ;;  %p21586_p7 = scmp.lt.s32.totalorder %s21580_s18, %s21580_s18 }
 0x1de   :  { %p21587_p8 = por %p21586_p7, %p21585_p6 }
 0x1e0   :  { %p21588_p9 = pnand %p21587_p8, %p21581_p5 }
 0x1e2   :  { %21591 = shalt.err (!%p21588_p9)
}
 0x1e3   :  { %s21751_s23 = smov 1   ;;  %s21592_s28 = scalar_lea.hbm %s21899_s17, 32 }
 0x1e4   :  { %353 = dma.hbm_to_vmem [thread:$0]  %s23657_s15, 32, %s348_s9, [#allocation36], %s21719_s16, %s21719_s16, %s21751_s23  }
 0x1e5   :  { %p21593_p10 = scmp.ne.s32.totalorder %s21899_s17, %s21592_s28  ;;  %p21596_p11 = scmp.lt.u32.totalorder %s21592_s28, %s21899_s17 }
 0x1e7   :  { %p21598_p12 = pnand %p21596_p11, %p21593_p10 }
 0x1e9   :  { %21601 = shalt.err (!%p21598_p12)
}
 0x1ea   :  { %s21602_s13 = scalar_lea.vmem %s373_s22, 32  ;;  %p21607_p0 = scmp.lt.s32.totalorder %s373_s22, %s373_s22 }
 0x1eb   :  { %p21603_p13 = scmp.ne.s32.totalorder %s373_s22, %s21602_s13  ;;  %p21608_p1 = scmp.lt.s32.totalorder %s21602_s13, %s21602_s13 }
 0x1ed   :  { %p21609_p2 = por %p21608_p1, %p21607_p0 }
 0x1ef   :  { %p21610_p3 = pnand %p21609_p2, %p21603_p13 }
 0x1f1   :  { %21613 = shalt.err (!%p21610_p3)
}
 0x1f2   :  { %375 = dma.hbm_to_vmem [thread:$0]  %s21899_s17, 32, %s373_s22, [#allocation39]  }
 0x1f3   :  { %21658 = dma.done.wait [#allocation3], 768  }
 0x1f4   :  { %21659 = vsyncadd [#allocation3], 4294966528 }
 0x1f5   :  { %21660 = dma.done.wait [#allocation6], 11264  }
 0x1f6   :  { %21661 = vsyncadd [#allocation6], 4294956032 }
 0x1f7   :  { %21662 = dma.done.wait [#allocation9], 2112  }
 0x1f8   :  { %21663 = vsyncadd [#allocation9], 4294965184 }
 0x1f9   :  { %21664 = dma.done.wait [#allocation12], 49536  }
 0x1fa   :  { %21665 = vsyncadd [#allocation12], 4294917760 }
 0x1fb   :  { %21666 = dma.done.wait [#allocation15], 8192  }
 0x1fc   :  { %21667 = vsyncadd [#allocation15], 4294959104 }
 0x1fd   :  { %21668 = dma.done.wait [#allocation18], 256  }
 0x1fe   :  { %21669 = vsyncadd [#allocation18], 4294967040 }
 0x1ff   :  { %21670 = dma.done.wait [#allocation21], 57344  }
 0x200   :  { %21671 = vsyncadd [#allocation21], 4294909952 }
 0x201   :  { %21672 = dma.done.wait [#allocation24], 16384  }
 0x202   :  { %21673 = vsyncadd [#allocation24], 4294950912 }
 0x203   :  { %21674 = dma.done.wait [#allocation27], 160  }
 0x204   :  { %21675 = vsyncadd [#allocation27], 4294967136 }
 0x205   :  { %21676 = dma.done.wait [#allocation30], 65536  }
 0x206   :  { %21677 = vsyncadd [#allocation30], 4294901760 }
 0x207   :  { %21678 = dma.done.wait [#allocation33], 32768  }
 0x208   :  { %21679 = vsyncadd [#allocation33], 4294934528 }
 0x209   :  { %21680 = dma.done.wait [#allocation36], 96  }
 0x20a   :  { %21681 = vsyncadd [#allocation36], 4294967200 }
 0x20b   :  { %21682 = dma.done.wait [#allocation39], 16416  }
 0x20c   :  { %21683 = vsyncadd [#allocation39], 4294950880  ;;  %s23658_s17 = sld [smem:[#allocation59_spill]]  ;;  %vm498_vm0 = vcmask 523264   ;;  %v19013_v3 = vld [vmem:[#allocation2 + $0x10] sm:$0xff]   ;;  %v19015_v4 = vld [vmem:[#allocation2] sm:$0xff]  }
 0x20d   :  { %17647 = vmatprep.mubr.msk.bf16.mxu1 %vm498_vm0, %v19013_v3  ;;  %17635 = vmatprep.mubr.msk.bf16.mxu0 %vm498_vm0, %v19015_v4  ;;  %v19019_v6 = vld [vmem:[#allocation5 + $0xc4] ss:$16 sps:$4 sm:$0xff]   ;;  %v19022_v7 = vld [vmem:[#allocation5 + $0xcc] ss:$16 sps:$4 sm:$0xff]   ;;  %v19017_v10 = vld [vmem:[#allocation5 + $0xc0] ss:$16 sps:$4 sm:$0xff]  }
 0x20e   :  { %v19014_v8 = vld [vmem:[#allocation2 + $0x18] sm:$0xff]   ;;  %v19016_v9 = vld [vmem:[#allocation2 + $0x8] sm:$0xff]   ;;  %v19025_v12 = vld [vmem:[#allocation5 + $0xe4] ss:$16 sps:$4 sm:$0xff]   ;;  %v23581_v34 = vmov 0   ;;  %vm797_vm1 = vcmask 785408  }
 0x20f   :  { %v19020_v11 = vld [vmem:[#allocation5 + $0xc8] ss:$16 sps:$4 sm:$0xff]   ;;  %v19028_v13 = vld [vmem:[#allocation5 + $0xec] ss:$16 sps:$4 sm:$0xff]   ;;  %v19023_v14 = vld [vmem:[#allocation5 + $0xe0] ss:$16 sps:$4 sm:$0xff]  }
 0x210   :  { %v19026_v15 = vld [vmem:[#allocation5 + $0xe8] ss:$16 sps:$4 sm:$0xff]   ;;  %v19031_v16 = vld [vmem:[#allocation5 + $0x104] ss:$16 sps:$4 sm:$0xff]   ;;  %v19034_v17 = vld [vmem:[#allocation5 + $0x10c] ss:$16 sps:$4 sm:$0xff]  }
 0x211   :  { %v19029_v18 = vld [vmem:[#allocation5 + $0x100] ss:$16 sps:$4 sm:$0xff]   ;;  %v19032_v19 = vld [vmem:[#allocation5 + $0x108] ss:$16 sps:$4 sm:$0xff]   ;;  %v19037_v20 = vld [vmem:[#allocation5 + $0x124] ss:$16 sps:$4 sm:$0xff]  }
 0x212   :  { %v19009_v0 = vld [vmem:[%s23658_s17] sm:$0xff]   ;;  %v19010_v1 = vld [vmem:[%s23658_s17 + $0x8] sm:$0xff]   ;;  %v19011_v2 = vld [vmem:[%s23658_s17 + $0x10] sm:$0xff]   ;;  %s23659_s16 = sld [smem:[#allocation60_spill]]  ;;  %vm1743_vm2 = vcmask 261120   ;;  %s23687_s21 = sld [smem:[#allocation62_spill]] }
 0x213   :  { %17639 = vmatprep.subr.bf16.mxu1 %v19009_v0  ;;  %17627 = vmatprep.subr.bf16.mxu0 %v19009_v0  ;;  %v19012_v5 = vld [vmem:[%s23658_s17 + $0x18] sm:$0xff]   ;;  %v19035_v22 = vld [vmem:[#allocation5 + $0x120] ss:$16 sps:$4 sm:$0xff]   ;;  %v19043_v24 = vld [vmem:[#allocation5 + $0x144] ss:$16 sps:$4 sm:$0xff]   ;;  %s21754_s20 = smov [#allocation41]  }
 0x214   :  { %17640 = vmatpush3.bf16.msra.mxu1 %v19009_v0  ;;  %17628 = vmatpush3.bf16.msra.mxu0 %v19009_v0  ;;  %v19040_v21 = vld [vmem:[#allocation5 + $0x12c] ss:$16 sps:$4 sm:$0xff]   ;;  %v19038_v23 = vld [vmem:[#allocation5 + $0x128] ss:$16 sps:$4 sm:$0xff]   ;;  %v19041_v26 = vld [vmem:[#allocation5 + $0x140] ss:$16 sps:$4 sm:$0xff]  }
 0x215   :  { %17641 = vmatprep.subr.bf16.mxu1 %v19010_v1  ;;  %17629 = vmatprep.subr.bf16.mxu0 %v19010_v1  ;;  %v19046_v25 = vld [vmem:[#allocation5 + $0x14c] ss:$16 sps:$4 sm:$0xff]   ;;  %v19044_v27 = vld [vmem:[#allocation5 + $0x148] ss:$16 sps:$4 sm:$0xff]   ;;  %v19049_v28 = vld [vmem:[#allocation5 + $0x164] ss:$16 sps:$4 sm:$0xff]  }
 0x216   :  { %v19052_v29 = vld [vmem:[#allocation5 + $0x16c] ss:$16 sps:$4 sm:$0xff]   ;;  %v19047_v30 = vld [vmem:[#allocation5 + $0x160] ss:$16 sps:$4 sm:$0xff]   ;;  %v19050_v31 = vld [vmem:[#allocation5 + $0x168] ss:$16 sps:$4 sm:$0xff]  }
 0x217   :  { %v19055_v32 = vld [vmem:[#allocation5 + $0x4] ss:$16 sps:$4 sm:$0xff]   ;;  %v19058_v33 = vld [vmem:[#allocation5 + $0xc] ss:$16 sps:$4 sm:$0xff]   ;;  %v19053_v38 = vld [vmem:[#allocation5] ss:$16 sps:$4 sm:$0xff]  }
 0x218   :  { %17642 = vmatpush3.bf16.msra.mxu1 %v19010_v1  ;;  %17630 = vmatpush3.bf16.msra.mxu0 %v19010_v1  ;;  %v19056_v39 = vld [vmem:[#allocation5 + $0x8] ss:$16 sps:$4 sm:$0xff]   ;;  %v19061_v42 = vld [vmem:[#allocation5 + $0x24] ss:$16 sps:$4 sm:$0xff]   ;;  %v19064_v43 = vld [vmem:[#allocation5 + $0x2c] ss:$16 sps:$4 sm:$0xff]  }
 0x219   :  { %17643 = vmatprep.subr.bf16.mxu1 %v19011_v2  ;;  %17631 = vmatprep.subr.bf16.mxu0 %v19011_v2  ;;  %v19059_v51 = vld [vmem:[#allocation5 + $0x20] ss:$16 sps:$4 sm:$0xff]   ;;  %v19062_v52 = vld [vmem:[#allocation5 + $0x28] ss:$16 sps:$4 sm:$0xff]   ;;  %v19067_v53 = vld [vmem:[#allocation5 + $0x44] ss:$16 sps:$4 sm:$0xff]  }
 0x21a   :  { %v19070_v54 = vld [vmem:[#allocation5 + $0x4c] ss:$16 sps:$4 sm:$0xff]   ;;  %v19065_v55 = vld [vmem:[#allocation5 + $0x40] ss:$16 sps:$4 sm:$0xff]   ;;  %v19068_v56 = vld [vmem:[#allocation5 + $0x48] ss:$16 sps:$4 sm:$0xff]  }
 0x21b   :  { %v19073_v57 = vld [vmem:[#allocation5 + $0x64] ss:$16 sps:$4 sm:$0xff]   ;;  %v19076_v58 = vld [vmem:[#allocation5 + $0x6c] ss:$16 sps:$4 sm:$0xff]   ;;  %v19071_v59 = vld [vmem:[#allocation5 + $0x60] ss:$16 sps:$4 sm:$0xff]  }
 0x21c   :  { %17644 = vmatpush3.bf16.msra.mxu1 %v19011_v2  ;;  %17632 = vmatpush3.bf16.msra.mxu0 %v19011_v2  ;;  %v19074_v60 = vld [vmem:[#allocation5 + $0x68] ss:$16 sps:$4 sm:$0xff]   ;;  %v19079_v61 = vld [vmem:[#allocation5 + $0x84] ss:$16 sps:$4 sm:$0xff]   ;;  %v19082_v62 = vld [vmem:[#allocation5 + $0x8c] ss:$16 sps:$4 sm:$0xff]  }
 0x21d   :  { %17645 = vmatprep.subr.bf16.mxu1 %v19012_v5  ;;  %17633 = vmatprep.subr.bf16.mxu0 %v19012_v5  ;;  %v19077_v63 = vld [vmem:[#allocation5 + $0x80] ss:$16 sps:$4 sm:$0xff]   ;;  %v19080_v0 = vld [vmem:[#allocation5 + $0x88] ss:$16 sps:$4 sm:$0xff]   ;;  %v19085_v1 = vld [vmem:[#allocation5 + $0xa4] ss:$16 sps:$4 sm:$0xff]  }
 0x21e   :  { %v19088_v2 = vld [vmem:[#allocation5 + $0xac] ss:$16 sps:$4 sm:$0xff]   ;;  %v19083_v3 = vld [vmem:[#allocation5 + $0xa0] ss:$16 sps:$4 sm:$0xff]   ;;  %v19086_v4 = vld [vmem:[#allocation5 + $0xa8] ss:$16 sps:$4 sm:$0xff]  }
 0x21f   :  { %s15702_s3 = sshll.u32 %s21754_s20, 4  ;;  %s21755_s0 = smov [#allocation42]   ;;  %s15703_s3 = int_to_ptr.vmem [resolvable:$true] %s15702_s3 }
 0x220   :  { %17646 = vmatpush3.bf16.msra.mxu1 %v19012_v5  ;;  %17634 = vmatpush3.bf16.msra.mxu0 %v19012_v5  ;;  %v19096_v5 = vld [vmem:[#allocation5 + $0x18c] ss:$16 sps:$4 sm:$0xff]   ;;  %s15712_s6 = sshll.u32 %s21755_s0, 4  ;;  %s21614_s26 = scalar_lea.vmem %s15703_s3, 32  ;;  %s15713_s6 = int_to_ptr.vmem [resolvable:$true] %s15712_s6 }
 0x221   :  { %804 = vmatprep.subr.bf16.mxu0 %v19019_v6  ;;  %857 = vmatprep.subr.bf16.mxu1 %v19022_v7  ;;  %v19094_v6 = vld [vmem:[#allocation5 + $0x188] ss:$16 sps:$4 sm:$0xff]   ;;  %v21060_v7 = vld [vmem:[%s23658_s17] sm:$0xff]   ;;  %p21615_p4 = scmp.ne.s32.totalorder %s15703_s3, %s21614_s26  ;;  %p21619_p5 = scmp.lt.s32.totalorder %s15703_s3, %s15703_s3 }
 0x222   :  { %p21620_p6 = scmp.lt.s32.totalorder %s21614_s26, %s21614_s26 }
 0x223   :  { %17648 = vmatmul.mubr.msk.bf16.vlgmr.msra.gmra.mrb[0].mxu1 %vm498_vm0, %v19014_v8  ;;  %17636 = vmatmul.mubr.msk.bf16.vlgmr.msra.gmra.mrb[0].mxu0 %vm498_vm0, %v19016_v9  ;;  %v19102_v8 = vld [vmem:[#allocation5 + $0x1ac] ss:$16 sps:$4 sm:$0xff]   ;;  %v19100_v9 = vld [vmem:[#allocation5 + $0x1a8] ss:$16 sps:$4 sm:$0xff]  }
 0x224   :  { %805 = vmatpush1.bf16.msra.mxu0 %v19017_v10  ;;  %858 = vmatpush1.bf16.msra.mxu1 %v19020_v11  ;;  %v21061_v10 = vld [vmem:[%s23658_s17 + $0x8] sm:$0xff]   ;;  %v19089_v11 = vld [vmem:[#allocation2 + $0x20] sm:$0xff]   ;;  %p21621_p7 = por %p21620_p6, %p21619_p5 }
 0x225   :  { %806 = vmatprep.subr.bf16.mxu0 %v19025_v12  ;;  %859 = vmatprep.subr.bf16.mxu1 %v19028_v13  ;;  %v19108_v12 = vld [vmem:[#allocation5 + $0x1cc] ss:$16 sps:$4 sm:$0xff]   ;;  %v19106_v13 = vld [vmem:[#allocation5 + $0x1c8] ss:$16 sps:$4 sm:$0xff]  }
 0x226   :  { %836 = vmatprep.mubr.bf16.mxu0 %v23581_v34  ;;  %889 = vmatprep.mubr.bf16.mxu1 %v23581_v34  ;;  %p21622_p8 = pnand %p21621_p7, %p21615_p4 }
 0x228   :  { %807 = vmatpush1.bf16.msra.mxu0 %v19023_v14  ;;  %860 = vmatpush1.bf16.msra.mxu1 %v19026_v15  ;;  %v21062_v14 = vld [vmem:[%s23658_s17 + $0x10] sm:$0xff]   ;;  %v19114_v15 = vld [vmem:[#allocation5 + $0x1ec] ss:$16 sps:$4 sm:$0xff]  }
 0x229   :  { %808 = vmatprep.subr.bf16.mxu0 %v19031_v16  ;;  %861 = vmatprep.subr.bf16.mxu1 %v19034_v17  ;;  %v19093_v16 = vld [vmem:[#allocation5 + $0x184] ss:$16 sps:$4 sm:$0xff]   ;;  %v19112_v17 = vld [vmem:[#allocation5 + $0x1e8] ss:$16 sps:$4 sm:$0xff]  }
 0x22c   :  { %809 = vmatpush1.bf16.msra.mxu0 %v19029_v18  ;;  %862 = vmatpush1.bf16.msra.mxu1 %v19032_v19  ;;  %v21063_v18 = vld [vmem:[%s23658_s17 + $0x18] sm:$0xff]   ;;  %v19090_v19 = vld [vmem:[#allocation2 + $0x28] sm:$0xff]  }
 0x22d   :  { %810 = vmatprep.subr.bf16.mxu0 %v19037_v20  ;;  %863 = vmatprep.subr.bf16.mxu1 %v19040_v21  ;;  %v19120_v20 = vld [vmem:[#allocation5 + $0x20c] ss:$16 sps:$4 sm:$0xff]   ;;  %v19091_v21 = vld [vmem:[#allocation5 + $0x180] ss:$16 sps:$4 sm:$0xff]  }
 0x230   :  { %811 = vmatpush1.bf16.msra.mxu0 %v19035_v22  ;;  %864 = vmatpush1.bf16.msra.mxu1 %v19038_v23  ;;  %v19099_v22 = vld [vmem:[#allocation5 + $0x1a4] ss:$16 sps:$4 sm:$0xff]   ;;  %v19118_v23 = vld [vmem:[#allocation5 + $0x208] ss:$16 sps:$4 sm:$0xff]  }
 0x231   :  { %812 = vmatprep.subr.bf16.mxu0 %v19043_v24  ;;  %865 = vmatprep.subr.bf16.mxu1 %v19046_v25  ;;  %v19097_v24 = vld [vmem:[#allocation5 + $0x1a0] ss:$16 sps:$4 sm:$0xff]   ;;  %v19105_v25 = vld [vmem:[#allocation5 + $0x1c4] ss:$16 sps:$4 sm:$0xff]  }
 0x234   :  { %813 = vmatpush1.bf16.msra.mxu0 %v19041_v26  ;;  %866 = vmatpush1.bf16.msra.mxu1 %v19044_v27  ;;  %v19103_v26 = vld [vmem:[#allocation5 + $0x1c0] ss:$16 sps:$4 sm:$0xff]   ;;  %v19111_v27 = vld [vmem:[#allocation5 + $0x1e4] ss:$16 sps:$4 sm:$0xff]  }
 0x235   :  { %814 = vmatprep.subr.bf16.mxu0 %v19049_v28  ;;  %867 = vmatprep.subr.bf16.mxu1 %v19052_v29  ;;  %v19109_v28 = vld [vmem:[#allocation5 + $0x1e0] ss:$16 sps:$4 sm:$0xff]   ;;  %v19117_v29 = vld [vmem:[#allocation5 + $0x204] ss:$16 sps:$4 sm:$0xff]  }
 0x238   :  { %815 = vmatpush1.bf16.msra.mxu0 %v19047_v30  ;;  %868 = vmatpush1.bf16.msra.mxu1 %v19050_v31  ;;  %v19115_v30 = vld [vmem:[#allocation5 + $0x200] ss:$16 sps:$4 sm:$0xff]   ;;  %v19123_v31 = vld [vmem:[#allocation5 + $0x224] ss:$16 sps:$4 sm:$0xff]  }
 0x239   :  { %1036 = vmatprep.subr.bf16.mxu0 %v19055_v32  ;;  %1089 = vmatprep.subr.bf16.mxu1 %v19058_v33  ;;  %v19126_v32 = vld [vmem:[#allocation5 + $0x22c] ss:$16 sps:$4 sm:$0xff]   ;;  %v19121_v33 = vld [vmem:[#allocation5 + $0x220] ss:$16 sps:$4 sm:$0xff]  }
 0x2f6   :  { %v17649_v35 = vpop.f32.mrb[0].mxu1  ;;  %v17637_v36 = vpop.f32.mrb[0].mxu0 }
 0x2f7   :  { %v635_v37 = vpop.f32.mrb[1].mxu1  ;;  %v539_v40 = vpop.f32.mrb[1].mxu0 }
 0x2f8   :  { %v17650_v41 = vpop.f32.mrb[2].mxu1  ;;  %v17638_v44 = vpop.f32.mrb[2].mxu0 }
 0x2f9   :  { %v651_v45 = vpack.c.bf16 %v17650_v41, %v17649_v35  ;;  %v638_v46 = vpop.f32.mrb[3].mxu1  ;;  %v22107_v47 = vpack.c.bf16 %v17638_v44, %v17637_v36  ;;  %v542_v48 = vpop.f32.mrb[3].mxu0  ;;  %v19124_v35 = vld [vmem:[#allocation5 + $0x228] ss:$16 sps:$4 sm:$0xff]   ;;  %v1539_v36 = vld [vmem:[%s23659_s16 + $0x80] sm:$0xff] }
 0x2fa   :  { %v650_v49 = vpack.c.bf16 %v638_v46, %v635_v37  ;;  %v554_v50 = vpack.c.bf16 %v542_v48, %v539_v40  ;;  %v1540_v37 = vld [vmem:[%s23659_s16 + $0x88] sm:$0xff]  ;;  %v1555_v44 = vld [vmem:[%s23659_s16 + $0x100] sm:$0xff]  ;;  %v1542_v48 = vld [vmem:[%s23659_s16 + $0x98] sm:$0xff] }
 0x2fb   :  { %v1572_v40 = vld [vmem:[%s23659_s16 + $0x188] sm:$0xff] }
 0x2fc   :  { %15802 = vmatmul.mubr.msk.bf16.vlgmr.msra.gmra.mrb[4].mxu0 %vm797_vm1, %v650_v49  ;;  %15804 = vmatmul.mubr.msk.bf16.vlgmr.msra.gmra.mrb[4].mxu1 %vm797_vm1, %v650_v49  ;;  %v1573_v49 = vld [vmem:[%s23659_s16 + $0x190] sm:$0xff] }
 0x2fd   :  { %1037 = vmatpush1.bf16.msra.mxu0 %v19053_v38  ;;  %1090 = vmatpush1.bf16.msra.mxu1 %v19056_v39  ;;  %v1571_v38 = vld [vmem:[%s23659_s16 + $0x180] sm:$0xff]  ;;  %v22136_v39 = vpack.c.bf16 %v1540_v37, %v1539_v36  ;;  %v1564_v37 = vld [vmem:[%s23659_s16 + $0x148] sm:$0xff] }
 0x2fe   :  { %1038 = vmatprep.subr.bf16.mxu0 %v19061_v42  ;;  %1091 = vmatprep.subr.bf16.mxu1 %v19064_v43  ;;  %v22139_v41 = vpack.c.bf16 %v1572_v40, %v1571_v38  ;;  %v1523_v42 = vld [vmem:[%s23659_s16] sm:$0xff]  ;;  %v1524_v43 = vld [vmem:[%s23659_s16 + $0x8] sm:$0xff]  ;;  %v1549_v40 = vld [vmem:[%s23659_s16 + $0xd0] sm:$0xff] }
 0x2ff   :  { %846 = vmatprep.mubr.bf16.mxu0 %v23581_v34  ;;  %899 = vmatprep.mubr.bf16.mxu1 %v23581_v34  ;;  %v1563_v36 = vld [vmem:[%s23659_s16 + $0x140] sm:$0xff] }
 0x300   :  { %v22234_v38 = vpack.c.bf16 %v1564_v37, %v1563_v36 }
 0x301   :  { %1039 = vmatpush1.bf16.msra.mxu0 %v19059_v51  ;;  %1092 = vmatpush1.bf16.msra.mxu1 %v19062_v52 }
 0x302   :  { %1040 = vmatprep.subr.bf16.mxu0 %v19067_v53  ;;  %1093 = vmatprep.subr.bf16.mxu1 %v19070_v54 }
 0x304   :  { %15803 = vmatmul.mubr.msk.bf16.gmra.mrb[8].mxu0 %vm797_vm1, %v651_v45  ;;  %15805 = vmatmul.mubr.msk.bf16.gmra.mrb[8].mxu1 %vm797_vm1, %v651_v45  ;;  %v1556_v45 = vld [vmem:[%s23659_s16 + $0x108] sm:$0xff] }
 0x305   :  { %1041 = vmatpush1.bf16.msra.mxu0 %v19065_v55  ;;  %1094 = vmatpush1.bf16.msra.mxu1 %v19068_v56  ;;  %v22151_v56 = vpack.c.bf16 %v1524_v43, %v1523_v42  ;;  %v1550_v42 = vld [vmem:[%s23659_s16 + $0xd8] sm:$0xff]  ;;  %v1581_v43 = vld [vmem:[%s23659_s16 + $0x1d0] sm:$0xff] }
 0x306   :  { %1042 = vmatprep.subr.bf16.mxu0 %v19073_v57  ;;  %1095 = vmatprep.subr.bf16.mxu1 %v19076_v58  ;;  %v22153_v57 = vpack.c.bf16 %v1556_v45, %v1555_v44  ;;  %v22242_v44 = vpack.c.bf16 %v1550_v42, %v1549_v40  ;;  %v1582_v45 = vld [vmem:[%s23659_s16 + $0x1d8] sm:$0xff] }
 0x307   :  { %1068 = vmatprep.mubr.bf16.mxu0 %v23581_v34  ;;  %1121 = vmatprep.mubr.bf16.mxu1 %v23581_v34 }
 0x309   :  { %1043 = vmatpush1.bf16.msra.mxu0 %v19071_v59  ;;  %1096 = vmatpush1.bf16.msra.mxu1 %v19074_v60  ;;  %v1525_v60 = vld [vmem:[%s23659_s16 + $0x10] sm:$0xff] }
 0x30a   :  { %1044 = vmatprep.subr.bf16.mxu0 %v19079_v61  ;;  %1097 = vmatprep.subr.bf16.mxu1 %v19082_v62  ;;  %v1526_v61 = vld [vmem:[%s23659_s16 + $0x18] sm:$0xff]  ;;  %v1557_v62 = vld [vmem:[%s23659_s16 + $0x110] sm:$0xff] }
 0x30d   :  { %1045 = vmatpush1.bf16.msra.mxu0 %v19077_v63  ;;  %1098 = vmatpush1.bf16.msra.mxu1 %v19080_v0  ;;  %v22172_v63 = vpack.c.bf16 %v1526_v61, %v1525_v60  ;;  %v1558_v0 = vld [vmem:[%s23659_s16 + $0x118] sm:$0xff]  ;;  %v1584_v61 = vld [vmem:[%s23659_s16 + $0x1e8] sm:$0xff] }
 0x30e   :  { %1046 = vmatprep.subr.bf16.mxu0 %v19085_v1  ;;  %1099 = vmatprep.subr.bf16.mxu1 %v19088_v2  ;;  %v22175_v1 = vpack.c.bf16 %v1558_v0, %v1557_v62  ;;  %v1543_v2 = vld [vmem:[%s23659_s16 + $0xa0] sm:$0xff]  ;;  %v1536_v0 = vld [vmem:[%s23659_s16 + $0x68] sm:$0xff] }
 0x30f   :  { %v1535_v62 = vld [vmem:[%s23659_s16 + $0x60] sm:$0xff] }
 0x311   :  { %1047 = vmatpush1.bf16.msra.mxu0 %v19083_v3  ;;  %1100 = vmatpush1.bf16.msra.mxu1 %v19086_v4  ;;  %v1544_v3 = vld [vmem:[%s23659_s16 + $0xa8] sm:$0xff]  ;;  %v1575_v4 = vld [vmem:[%s23659_s16 + $0x1a0] sm:$0xff] }
 0x312   :  { %17651 = vmatprep.subr.bf16.mxu0 %v21060_v7  ;;  %1418 = vmatprep.subr.bf16.mxu1 %v19096_v5  ;;  %v22182_v5 = vpack.c.bf16 %v1544_v3, %v1543_v2  ;;  %v22269_v3 = vpack.c.bf16 %v1536_v0, %v1535_v62 }
 0x314   :  { %15830 = vmatmul.mubr.msk.bf16.vlgmr.msra.gmra.mrb[4].mxu0 %vm797_vm1, %v554_v50  ;;  %15832 = vmatmul.mubr.msk.bf16.vlgmr.msra.gmra.mrb[4].mxu1 %vm797_vm1, %v554_v50  ;;  %v1574_v50 = vld [vmem:[%s23659_s16 + $0x198] sm:$0xff] }
 0x315   :  { %17652 = vmatpush3.bf16.msra.mxu0 %v21060_v7  ;;  %1078 = vmatprep.mubr.bf16.mxu0 %v23581_v34  ;;  %v22157_v59 = vpack.c.bf16 %v1574_v50, %v1573_v49  ;;  %v1527_v7 = vld [vmem:[%s23659_s16 + $0x20] sm:$0xff]  ;;  %v1565_v50 = vld [vmem:[%s23659_s16 + $0x150] sm:$0xff] }
 0x316   :  { %17653 = vmatprep.subr.bf16.mxu0 %v21061_v10  ;;  %1131 = vmatprep.mubr.bf16.mxu1 %v23581_v34 }
 0x317   :  { %1419 = vmatpush1.bf16.msra.mxu1 %v19094_v6  ;;  %v1576_v6 = vld [vmem:[%s23659_s16 + $0x1a8] sm:$0xff] }
 0x318   :  { %1420 = vmatprep.subr.bf16.mxu1 %v19102_v8  ;;  %v1528_v8 = vld [vmem:[%s23659_s16 + $0x28] sm:$0xff] }
 0x319   :  { %17654 = vmatpush3.bf16.msra.mxu0 %v21061_v10  ;;  %v22189_v10 = vpack.c.bf16 %v1528_v8, %v1527_v7  ;;  %v1553_v8 = vld [vmem:[%s23659_s16 + $0xf0] sm:$0xff] }
 0x31a   :  { %17655 = vmatprep.subr.bf16.mxu0 %v21062_v14 }
 0x31b   :  { %1421 = vmatpush1.bf16.msra.mxu1 %v19100_v9  ;;  %v22187_v9 = vpack.c.bf16 %v1576_v6, %v1575_v4  ;;  %v1567_v4 = vld [vmem:[%s23659_s16 + $0x160] sm:$0xff]  ;;  %v1568_v6 = vld [vmem:[%s23659_s16 + $0x168] sm:$0xff] }
 0x31c   :  { %15831 = vmatmul.mubr.msk.bf16.gmra.mrb[8].mxu0 %vm797_vm1, %v22107_v47  ;;  %15833 = vmatmul.mubr.msk.bf16.gmra.mrb[8].mxu1 %vm797_vm1, %v22107_v47  ;;  %v1541_v47 = vld [vmem:[%s23659_s16 + $0x90] sm:$0xff]  ;;  %v22274_v7 = vpack.c.bf16 %v1568_v6, %v1567_v4 }
 0x31d   :  { %17656 = vmatpush3.bf16.msra.mxu0 %v21062_v14  ;;  %17659 = vmatprep.mubr.msk.bf16.mxu0 %vm498_vm0, %v19089_v11  ;;  %v22155_v58 = vpack.c.bf16 %v1542_v48, %v1541_v47  ;;  %v1559_v11 = vld [vmem:[%s23659_s16 + $0x120] sm:$0xff]  ;;  %v1545_v14 = vld [vmem:[%s23659_s16 + $0xb0] sm:$0xff]  ;;  %v1534_v47 = vld [vmem:[%s23659_s16 + $0x58] sm:$0xff]  ;;  %v22247_v48 = vpack.c.bf16 %v1582_v45, %v1581_v43 }
 0x31e   :  { %17657 = vmatprep.subr.bf16.mxu0 %v21063_v18  ;;  %1422 = vmatprep.subr.bf16.mxu1 %v19108_v12  ;;  %v1560_v12 = vld [vmem:[%s23659_s16 + $0x128] sm:$0xff] }
 0x31f   :  { %1423 = vmatpush1.bf16.msra.mxu1 %v19106_v13  ;;  %1450 = vmatprep.mubr.bf16.mxu1 %v23581_v34  ;;  %v22194_v13 = vpack.c.bf16 %v1560_v12, %v1559_v11  ;;  %v1554_v11 = vld [vmem:[%s23659_s16 + $0xf8] sm:$0xff]  ;;  %v1585_v12 = vld [vmem:[%s23659_s16 + $0x1f0] sm:$0xff] }
 0x320   :  { %1424 = vmatprep.subr.bf16.mxu1 %v19114_v15  ;;  %v1546_v15 = vld [vmem:[%s23659_s16 + $0xb8] sm:$0xff] }
 0x321   :  { %17658 = vmatpush3.bf16.msra.mxu0 %v21063_v18  ;;  %v1578_v18 = vld [vmem:[%s23659_s16 + $0x1b8] sm:$0xff] }
 0x322   :  { %1365 = vmatprep.subr.bf16.mxu0 %v19093_v16  ;;  %v1577_v16 = vld [vmem:[%s23659_s16 + $0x1b0] sm:$0xff] }
 0x323   :  { %1425 = vmatpush1.bf16.msra.mxu1 %v19112_v17  ;;  %v22202_v17 = vpack.c.bf16 %v1546_v15, %v1545_v14  ;;  %v22282_v14 = vpack.c.bf16 %v1554_v11, %v1553_v8  ;;  %v1586_v15 = vld [vmem:[%s23659_s16 + $0x1f8] sm:$0xff] }
 0x324   :  { %17660 = vmatmul.mubr.msk.bf16.vlgmr.msra.gmra.mrb[12].mxu0 %vm498_vm0, %v19090_v19  ;;  %1426 = vmatprep.subr.bf16.mxu1 %v19120_v20  ;;  %v1529_v19 = vld [vmem:[%s23659_s16 + $0x30] sm:$0xff]  ;;  %v1530_v20 = vld [vmem:[%s23659_s16 + $0x38] sm:$0xff] }
 0x325   :  { %1366 = vmatpush1.bf16.msra.mxu0 %v19091_v21  ;;  %1397 = vmatprep.mubr.bf16.mxu0 %v23581_v34  ;;  %v22207_v21 = vpack.c.bf16 %v1578_v18, %v1577_v16  ;;  %v1537_v16 = vld [vmem:[%s23659_s16 + $0x70] sm:$0xff]  ;;  %v1538_v18 = vld [vmem:[%s23659_s16 + $0x78] sm:$0xff] }
 0x326   :  { %1367 = vmatprep.subr.bf16.mxu0 %v19099_v22  ;;  %v22209_v22 = vpack.c.bf16 %v1530_v20, %v1529_v19  ;;  %v22287_v19 = vpack.c.bf16 %v1586_v15, %v1585_v12  ;;  %v22289_v20 = vpack.c.bf16 %v1538_v18, %v1537_v16 }
 0x327   :  { %1427 = vmatpush1.bf16.msra.mxu1 %v19118_v23  ;;  %v1561_v23 = vld [vmem:[%s23659_s16 + $0x130] sm:$0xff] }
 0x328   :  { %1428 = vmatprep.subr.bf16.mxu1 %v19126_v32  ;;  %v1532_v32 = vld [vmem:[%s23659_s16 + $0x48] sm:$0xff] }
 0x329   :  { %1368 = vmatpush1.bf16.msra.mxu0 %v19097_v24  ;;  %v1562_v24 = vld [vmem:[%s23659_s16 + $0x138] sm:$0xff] }
 0x32a   :  { %1369 = vmatprep.subr.bf16.mxu0 %v19105_v25  ;;  %v22214_v25 = vpack.c.bf16 %v1562_v24, %v1561_v23  ;;  %v1569_v23 = vld [vmem:[%s23659_s16 + $0x170] sm:$0xff]  ;;  %v1570_v24 = vld [vmem:[%s23659_s16 + $0x178] sm:$0xff] }
 0x32b   :  { %1429 = vmatpush1.bf16.msra.mxu1 %v19124_v35 }
 0x32c   :  { %17664 = vmatprep.subr.bf16.mxu1 %v22136_v39 }
 0x32d   :  { %1370 = vmatpush1.bf16.msra.mxu0 %v19103_v26  ;;  %v1547_v26 = vld [vmem:[%s23659_s16 + $0xc0] sm:$0xff] }
 0x32e   :  { %1371 = vmatprep.subr.bf16.mxu0 %v19111_v27  ;;  %v1548_v27 = vld [vmem:[%s23659_s16 + $0xc8] sm:$0xff] }
 0x331   :  { %1372 = vmatpush1.bf16.msra.mxu0 %v19109_v28  ;;  %v1579_v28 = vld [vmem:[%s23659_s16 + $0x1c0] sm:$0xff] }
 0x332   :  { %1373 = vmatprep.subr.bf16.mxu0 %v19117_v29  ;;  %v22222_v29 = vpack.c.bf16 %v1548_v27, %v1547_v26  ;;  %v22294_v26 = vpack.c.bf16 %v1570_v24, %v1569_v23  ;;  %v1728_v27 = vld [vmem:[#allocation7 + $0x8] sm:$0xff] }
 0x335   :  { %1374 = vmatpush1.bf16.msra.mxu0 %v19115_v30  ;;  %v1580_v30 = vld [vmem:[%s23659_s16 + $0x1c8] sm:$0xff] }
 0x336   :  { %1375 = vmatprep.subr.bf16.mxu0 %v19123_v31  ;;  %v1531_v31 = vld [vmem:[%s23659_s16 + $0x40] sm:$0xff] }
 0x337   :  { %v22229_v35 = vpack.c.bf16 %v1532_v32, %v1531_v31 }
 0x339   :  { %1376 = vmatpush1.bf16.msra.mxu0 %v19121_v33  ;;  %v22227_v33 = vpack.c.bf16 %v1580_v30, %v1579_v28  ;;  %v1732_v28 = vld [vmem:[#allocation7 + $0x28] sm:$0xff] }
 0x33a   :  { %17696 = vmatprep.subr.bf16.mxu0 %v22139_v41  ;;  %v17727_v30 = vpack.c.bf16 %v1732_v28, %v1728_v27 }
 0x3f7   :  { %v17661_v46 = vpop.f32.mrb[12].mxu0 }
 0x3f8   :  { %v1197_v51 = vpop.f32.mrb[13].mxu0 }
 0x3f9   :  { %v17662_v52 = vpop.f32.mrb[14].mxu0 }
 0x3fa   :  { %v1213_v53 = vpack.c.bf16 %v17662_v52, %v17661_v46  ;;  %v1200_v54 = vpop.f32.mrb[15].mxu0  ;;  %v1533_v46 = vld [vmem:[%s23659_s16 + $0x50] sm:$0xff] }
 0x3fb   :  { %v1212_v55 = vpack.c.bf16 %v1200_v54, %v1197_v51  ;;  %v22249_v49 = vpack.c.bf16 %v1534_v47, %v1533_v46  ;;  %v1566_v51 = vld [vmem:[%s23659_s16 + $0x158] sm:$0xff]  ;;  %v1552_v54 = vld [vmem:[%s23659_s16 + $0xe8] sm:$0xff] }
 0x3fc   :  { %v22254_v52 = vpack.c.bf16 %v1566_v51, %v1565_v50 }
 0x3fd   :  { %15862 = vmatmul.mubr.msk.bf16.vlgmr.msra.gmra.mrb[4].mxu0 %vm797_vm1, %v1212_v55  ;;  %15864 = vmatmul.mubr.msk.bf16.vlgmr.msra.gmra.mrb[4].mxu1 %vm797_vm1, %v1212_v55  ;;  %v1583_v55 = vld [vmem:[%s23659_s16 + $0x1e0] sm:$0xff] }
 0x3fe   :  { %1407 = vmatprep.mubr.bf16.mxu0 %v23581_v34  ;;  %1460 = vmatprep.mubr.bf16.mxu1 %v23581_v34  ;;  %v22267_v2 = vpack.c.bf16 %v1584_v61, %v1583_v55 }
 0x3ff   :  { %17666 = vmatpush3.bf16.msra.mxu1 %v22151_v56  ;;  %17698 = vmatpush3.bf16.msra.mxu0 %v22153_v57 }
 0x400   :  { %17668 = vmatprep.subr.bf16.mxu1 %v22155_v58  ;;  %17700 = vmatprep.subr.bf16.mxu0 %v22157_v59 }
 0x403   :  { %17670 = vmatpush3.bf16.msra.mxu1 %v22172_v63  ;;  %17702 = vmatpush3.bf16.msra.mxu0 %v22175_v1 }
 0x404   :  { %17672 = vmatprep.subr.bf16.mxu1 %v22182_v5  ;;  %17704 = vmatprep.subr.bf16.mxu0 %v22187_v9 }
 0x405   :  { %15863 = vmatmul.mubr.msk.bf16.gmra.mrb[8].mxu0 %vm797_vm1, %v1213_v53  ;;  %15865 = vmatmul.mubr.msk.bf16.gmra.mrb[8].mxu1 %vm797_vm1, %v1213_v53  ;;  %v1551_v53 = vld [vmem:[%s23659_s16 + $0xe0] sm:$0xff] }
 0x406   :  { %v22262_v60 = vpack.c.bf16 %v1552_v54, %v1551_v53 }
 0x407   :  { %17674 = vmatpush3.bf16.msra.mxu1 %v22189_v10  ;;  %17706 = vmatpush3.bf16.msra.mxu0 %v22194_v13 }
 0x408   :  { %17676 = vmatprep.subr.bf16.mxu1 %v22202_v17  ;;  %17708 = vmatprep.subr.bf16.mxu0 %v22207_v21 }
 0x40b   :  { %17678 = vmatpush3.bf16.msra.mxu1 %v22209_v22  ;;  %17710 = vmatpush3.bf16.msra.mxu0 %v22214_v25 }
 0x40c   :  { %17680 = vmatprep.subr.bf16.mxu1 %v22222_v29  ;;  %17712 = vmatprep.subr.bf16.mxu0 %v22227_v33 }
 0x40f   :  { %17682 = vmatpush3.bf16.msra.mxu1 %v22229_v35  ;;  %17714 = vmatpush3.bf16.msra.mxu0 %v22234_v38 }
 0x410   :  { %17684 = vmatprep.subr.bf16.mxu1 %v22242_v44  ;;  %17716 = vmatprep.subr.bf16.mxu0 %v22247_v48 }
 0x413   :  { %17686 = vmatpush3.bf16.msra.mxu1 %v22249_v49  ;;  %17718 = vmatpush3.bf16.msra.mxu0 %v22254_v52 }
 0x414   :  { %17688 = vmatprep.subr.bf16.mxu1 %v22262_v60  ;;  %17720 = vmatprep.subr.bf16.mxu0 %v22267_v2 }
 0x417   :  { %17690 = vmatpush3.bf16.msra.mxu1 %v22269_v3  ;;  %17722 = vmatpush3.bf16.msra.mxu0 %v22274_v7 }
 0x418   :  { %17692 = vmatprep.subr.bf16.mxu1 %v22282_v14  ;;  %17724 = vmatprep.subr.bf16.mxu0 %v22287_v19 }
 0x41b   :  { %17694 = vmatpush3.bf16.msra.mxu1 %v22289_v20  ;;  %17726 = vmatpush3.bf16.msra.mxu0 %v22294_v26 }
 0x41c   :  { %17744 = vmatprep.subr.bf16.mxu0 %v22136_v39  ;;  %17728 = vmatprep.subr.bf16.mxu1 %v17727_v30 }
 0x4d0   :  { %v22300_v31 = vpop.f32.mrb[4].mxu0  ;;  %v22302_v32 = vpop.f32.mrb[4].mxu1 }
 0x4d1   :  { %23660 = vst [vmem:[#allocation71_spill] sm:$0xff] %v22302_v32  ;;  %v22304_v36 = vpop.f32.mrb[5].mxu0  ;;  %v22306_v37 = vpop.f32.mrb[5].mxu1 }
 0x4d2   :  { %23661 = vst [vmem:[#allocation72_spill] sm:$0xff] %v22306_v37  ;;  %v22308_v40 = vpop.f32.mrb[6].mxu0  ;;  %v22310_v42 = vpop.f32.mrb[6].mxu1 }
 0x4d3   :  { %23662 = vst [vmem:[#allocation73_spill] sm:$0xff] %v22310_v42  ;;  %v1487_v43 = vadd.f32 %v22308_v40, %v22300_v31  ;;  %v1505_v39 = vadd.f32 %v22310_v42, %v22302_v32  ;;  %v22316_v45 = vpop.f32.mrb[7].mxu0  ;;  %v22318_v46 = vpop.f32.mrb[7].mxu1  ;;  %v1727_v32 = vld [vmem:[#allocation7] sm:$0xff] }
 0x4d4   :  { %23663 = vst [vmem:[#allocation74_spill] sm:$0xff] %v22316_v45  ;;  %23664 = vst [vmem:[#allocation75_spill] sm:$0xff] %v22318_v46  ;;  %v1496_v47 = vadd.f32 %v22316_v45, %v22304_v36  ;;  %v1514_v50 = vadd.f32 %v22318_v46, %v22306_v37 }
 0x4d8   :  { %v22324_v51 = vpop.f32.mrb[8].mxu0  ;;  %v22326_v53 = vpop.f32.mrb[8].mxu1 }
 0x4d9   :  { %23665 = vst [vmem:[#allocation76_spill] sm:$0xff] %v22326_v53  ;;  %v1488_v54 = vadd.f32 %v1487_v43, %v22324_v51  ;;  %v1506_v55 = vadd.f32 %v1505_v39, %v22326_v53  ;;  %v22330_v61 = vpop.f32.mrb[9].mxu0  ;;  %v22332_v62 = vpop.f32.mrb[9].mxu1 }
 0x4da   :  { %23666 = vst [vmem:[#allocation77_spill] sm:$0xff] %v22330_v61  ;;  %23667 = vst [vmem:[#allocation78_spill] sm:$0xff] %v22332_v62  ;;  %v1497_v0 = vadd.f32 %v1496_v47, %v22330_v61  ;;  %v1515_v4 = vadd.f32 %v1514_v50, %v22332_v62  ;;  %v22336_v6 = vpop.f32.mrb[10].mxu0  ;;  %v22338_v8 = vpop.f32.mrb[10].mxu1 }
 0x4db   :  { %23668 = vst [vmem:[#allocation79_spill] sm:$0xff] %v22338_v8  ;;  %v1489_v11 = vadd.f32 %v1488_v54, %v22336_v6  ;;  %v1507_v12 = vadd.f32 %v1506_v55, %v22338_v8  ;;  %v22342_v15 = vpop.f32.mrb[11].mxu0  ;;  %v22344_v16 = vpop.f32.mrb[11].mxu1 }
 0x4dc   :  { %23669 = vst [vmem:[#allocation80_spill] sm:$0xff] %v22342_v15  ;;  %23670 = vst [vmem:[#allocation81_spill] sm:$0xff] %v22344_v16  ;;  %v1498_v18 = vadd.f32 %v1497_v0, %v22342_v15  ;;  %v1516_v23 = vadd.f32 %v1515_v4, %v22344_v16  ;;  %v1731_v4 = vld [vmem:[#allocation7 + $0x20] sm:$0xff] }
 0x4dd   :  { %v1490_v24 = vrot.slane %v1489_v11, 4  ;;  %v1508_v27 = vrot.slane %v1507_v12, 4 }
 0x4de   :  { %v1499_v28 = vrot.slane %v1498_v18, 4  ;;  %v1517_v30 = vrot.slane %v1516_v23, 4 }
 0x4df   :  { %v1491_v43 = vadd.f32 %v1490_v24, %v1489_v11  ;;  %v1509_v39 = vadd.f32 %v1508_v27, %v1507_v12  ;;  %v17729_v11 = vpack.c.bf16 %v1731_v4, %v1727_v32  ;;  %v1738_v32 = vld [vmem:[#allocation7 + $0x58] sm:$0xff]  ;;  %v23675_v4 = vld [vmem:[#allocation71_spill] sm:$0xff] }
 0x4e0   :  { %v1500_v47 = vadd.f32 %v1499_v28, %v1498_v18  ;;  %v1518_v50 = vadd.f32 %v1517_v30, %v1516_v23 }
 0x4e1   :  { %v1492_v34 = vrot.slane %v1491_v43, 2  ;;  %v1510_v54 = vrot.slane %v1509_v39, 2 }
 0x4e2   :  { %v1501_v62 = vrot.slane %v1500_v47, 2  ;;  %v1519_v55 = vrot.slane %v1518_v50, 2 }
 0x4e3   :  { %v1493_v46 = vadd.f32 %v1492_v34, %v1491_v43  ;;  %v1511_v37 = vadd.f32 %v1510_v54, %v1509_v39  ;;  %v1736_v34 = vld [vmem:[#allocation7 + $0x48] sm:$0xff] }
 0x4e4   :  { %v1502_v8 = vadd.f32 %v1501_v62, %v1500_v47  ;;  %v1520_v53 = vadd.f32 %v1519_v55, %v1518_v50  ;;  %v1737_v62 = vld [vmem:[#allocation7 + $0x50] sm:$0xff] }
 0x4e5   :  { %v1494_v42 = vrot.slane %v1493_v46, 1  ;;  %v1512_v0 = vrot.slane %v1511_v37, 1 }
 0x4e6   :  { %v1503_v16 = vrot.slane %v1502_v8, 1  ;;  %v1521_v15 = vrot.slane %v1520_v53, 1 }
 0x4e7   :  { %v1495_v12 = vadd.f32 %v1494_v42, %v1493_v46  ;;  %v1513_v18 = vadd.f32 %v1512_v0, %v1511_v37  ;;  %v1742_v37 = vld [vmem:[#allocation7 + $0x78] sm:$0xff] }
 0x4e8   :  { %v1504_v61 = vadd.f32 %v1503_v16, %v1502_v8  ;;  %v1522_v45 = vadd.f32 %v1521_v15, %v1520_v53  ;;  %v1741_v8 = vld [vmem:[#allocation7 + $0x70] sm:$0xff] }
 0x4e9   :  { %v17741_v15 = vpack.c.bf16 %v1741_v8, %v1737_v62 }
 0x4ea   :  { %1651 = vmatprep.mubr.f32.mxu1 %v1504_v61  ;;  %1721 = vmatprep.mubr.f32.mxu0 %v1522_v45  ;;  %v17739_v61 = vpack.c.bf16 %v1742_v37, %v1738_v32 }
 0x4eb   :  { %1652 = vmatmul.mubr.f32.vlgmr.msra.gmra.mrb[12].mxu1 %v1495_v12  ;;  %1722 = vmatmul.mubr.f32.vlgmr.msra.gmra.mrb[16].mxu0 %v1513_v18  ;;  %v23676_v12 = vld [vmem:[#allocation73_spill] sm:$0xff] }
 0x4ec   :  { %17730 = vmatpush1.bf16.msra.mxu1 %v17729_v11  ;;  %17746 = vmatpush3.bf16.msra.mxu0 %v22151_v56  ;;  %v1740_v56 = vld [vmem:[#allocation7 + $0x68] sm:$0xff] }
 0x4ed   :  { %17748 = vmatprep.subr.bf16.mxu0 %v22155_v58  ;;  %v17731_v58 = vpack.c.bf16 %v1740_v56, %v1736_v34  ;;  %v23677_v34 = vld [vmem:[#allocation76_spill] sm:$0xff] }
 0x4ef   :  { %17732 = vmatprep.subr.bf16.mxu1 %v17731_v58  ;;  %v23678_v58 = vld [vmem:[#allocation79_spill] sm:$0xff] }
 0x4f0   :  { %17750 = vmatpush3.bf16.msra.mxu0 %v22172_v63  ;;  %v1735_v63 = vld [vmem:[#allocation7 + $0x40] sm:$0xff] }
 0x4f1   :  { %17752 = vmatprep.subr.bf16.mxu0 %v22182_v5  ;;  %v1739_v5 = vld [vmem:[#allocation7 + $0x60] sm:$0xff] }
 0x4f4   :  { %17754 = vmatpush3.bf16.msra.mxu0 %v22189_v10  ;;  %v17733_v10 = vpack.c.bf16 %v1739_v5, %v1735_v63  ;;  %v23679_v5 = vld [vmem:[#allocation72_spill] sm:$0xff] }
 0x4f5   :  { %17756 = vmatprep.subr.bf16.mxu0 %v22202_v17  ;;  %v1730_v17 = vld [vmem:[#allocation7 + $0x18] sm:$0xff] }
 0x4f6   :  { %17734 = vmatpush1.bf16.msra.mxu1 %v17733_v10 }
 0x4f8   :  { %17758 = vmatpush3.bf16.msra.mxu0 %v22209_v22  ;;  %v1734_v22 = vld [vmem:[#allocation7 + $0x38] sm:$0xff] }
 0x4f9   :  { %17760 = vmatprep.subr.bf16.mxu0 %v22222_v29  ;;  %v17735_v29 = vpack.c.bf16 %v1734_v22, %v1730_v17  ;;  %v23680_v17 = vld [vmem:[#allocation75_spill] sm:$0xff] }
 0x4fb   :  { %17736 = vmatprep.subr.bf16.mxu1 %v17735_v29  ;;  %v23681_v29 = vld [vmem:[#allocation78_spill] sm:$0xff] }
 0x4fc   :  { %17762 = vmatpush3.bf16.msra.mxu0 %v22229_v35  ;;  %v23594_v35 = vmov 0.0  }
 0x4fd   :  { %17764 = vmatprep.subr.bf16.mxu0 %v22242_v44  ;;  %1811 = vmatprep.mubr.f32.mxu1 %v23594_v35 }
 0x500   :  { %17766 = vmatpush3.bf16.msra.mxu0 %v22249_v49 }
 0x501   :  { %17768 = vmatprep.subr.bf16.mxu0 %v22262_v60  ;;  %v1729_v60 = vld [vmem:[#allocation7 + $0x10] sm:$0xff] }
 0x504   :  { %17770 = vmatpush3.bf16.msra.mxu0 %v22269_v3  ;;  %v1733_v3 = vld [vmem:[#allocation7 + $0x30] sm:$0xff] }
 0x505   :  { %17772 = vmatprep.subr.bf16.mxu0 %v22282_v14  ;;  %v17737_v46 = vpack.c.bf16 %v1733_v3, %v1729_v60 }
 0x508   :  { %17774 = vmatpush3.bf16.msra.mxu0 %v22289_v20 }
 0x5be   :  { %v17239_v44 = vpop.f32.mrb[12].mxu1  ;;  %v17274_v49 = vpop.f32.mrb[16].mxu0 }
 0x5bf   :  { %v17240_v14 = vpop.f32.mrb[13].mxu1  ;;  %v17275_v20 = vpop.f32.mrb[17].mxu0 }
 0x5c0   :  { %v17241_v42 = vadd.f32 %v17240_v14, %v17239_v44  ;;  %v17276_v45 = vadd.f32 %v17275_v20, %v17274_v49  ;;  %v23682_v14 = vld [vmem:[#allocation81_spill] sm:$0xff] }
 0x5c2   :  { %v1724_v53 = vadd.f32 %v17276_v45, %v17241_v42 }
 0x5c4   :  { %15866 = vmatmul.mubr.msk.f32.vlgmr.msra.gmra.mrb[14].mxu1 %vm1743_vm2, %v1724_v53 }
 0x5c5   :  { %17738 = vmatpush1.bf16.msra.mxu1 %v17737_v46  ;;  %1882 = vmatprep.mubr.f32.mxu1 %v23594_v35 }
 0x5c6   :  { %17740 = vmatprep.subr.bf16.mxu1 %v17739_v61 }
 0x5c9   :  { %17742 = vmatpush1.bf16.msra.mxu1 %v17741_v15 }
 0x5ca   :  { %17776 = vmatprep.subr.bf16.mxu1 %v22139_v41  ;;  %v1889_v41 = vlaneseq }
 0x5cc   :  { %15867 = vmatmul.mubr.msk.f32.vlgmr.msra.gmra.mrb[16].mxu1 %vm1743_vm2, %v1724_v53 }
 0x5cd   :  { %17778 = vmatpush3.bf16.msra.mxu1 %v22153_v57  ;;  %v22383_v57 = vshrl.u32 %v1889_v41, 7 }
 0x5ce   :  { %17780 = vmatprep.subr.bf16.mxu1 %v22157_v59 }
 0x5cf   :  { %v22386_v59 = vsub.s32 0, %v22383_v57 }
 0x5d1   :  { %17782 = vmatpush3.bf16.msra.mxu1 %v22175_v1  ;;  %23671 = vst [vmem:[#allocation82_spill] sm:$0xff] %v22386_v59 }
 0x5d2   :  { %17784 = vmatprep.subr.bf16.mxu1 %v22187_v9 }
 0x5d5   :  { %17786 = vmatpush3.bf16.msra.mxu1 %v22194_v13 }
 0x5d6   :  { %17788 = vmatprep.subr.bf16.mxu1 %v22207_v21 }
 0x5d9   :  { %17790 = vmatpush3.bf16.msra.mxu1 %v22214_v25 }
 0x5da   :  { %17792 = vmatprep.subr.bf16.mxu1 %v22227_v33 }
 0x5dd   :  { %17794 = vmatpush3.bf16.msra.mxu1 %v22234_v38 }
 0x5de   :  { %17796 = vmatprep.subr.bf16.mxu1 %v22247_v48 }
 0x5e1   :  { %17798 = vmatpush3.bf16.msra.mxu1 %v22254_v52 }
 0x5e2   :  { %17800 = vmatprep.subr.bf16.mxu1 %v22267_v2  ;;  %v23672_v2 = vld [vmem:[#allocation74_spill] sm:$0xff] }
 0x5e5   :  { %17802 = vmatpush3.bf16.msra.mxu1 %v22274_v7 }
 0x5e6   :  { %17804 = vmatprep.subr.bf16.mxu1 %v22287_v19  ;;  %v23673_v19 = vld [vmem:[#allocation77_spill] sm:$0xff] }
 0x5e9   :  { %17806 = vmatpush3.bf16.msra.mxu1 %v22294_v26 }
 0x697   :  { %v1813_v1 = vpop.f32.mrb[14].mxu1 }
 0x698   :  { %v1892_v9 = vrot.slane %v1813_v1, %v22386_v59  ;;  %v1815_v13 = vpop.f32.mrb[15].mxu1 }
 0x699   :  { %v1896_v21 = vrot.slane %v1815_v13, %v22386_v59 }
 0x69a   :  { %v22391_v25 = vsub.f32 %v22300_v31, %v1892_v9  ;;  %v22394_v33 = vsub.f32 %v22308_v40, %v1892_v9  ;;  %v22397_v38 = vsub.f32 %v22324_v51, %v1892_v9  ;;  %v22400_v48 = vsub.f32 %v22336_v6, %v1892_v9  ;;  %v23674_v31 = vld [vmem:[#allocation80_spill] sm:$0xff] }
 0x69b   :  { %v22403_v52 = vsub.f32 %v22304_v36, %v1896_v21  ;;  %v22406_v7 = vsub.f32 %v23672_v2, %v1896_v21  ;;  %v22409_v26 = vsub.f32 %v23673_v19, %v1896_v21  ;;  %v22412_v16 = vsub.f32 %v23674_v31, %v1896_v21 }
 0x69c   :  { %v1921_v40 = vmul.f32 %v22391_v25, %v22391_v25  ;;  %v1925_v51 = vmul.f32 %v22394_v33, %v22394_v33  ;;  %v1929_v23 = vmul.f32 %v22397_v38, %v22397_v38  ;;  %v1933_v43 = vmul.f32 %v22400_v48, %v22400_v48 }
 0x69d   :  { %v1922_v6 = vmul.f32 %v22403_v52, %v22403_v52  ;;  %v1926_v36 = vmul.f32 %v22406_v7, %v22406_v7  ;;  %v1930_v27 = vmul.f32 %v22409_v26, %v22409_v26  ;;  %v1934_v49 = vmul.f32 %v22412_v16, %v22412_v16 }
 0x69e   :  { %v1937_v24 = vadd.f32 %v1925_v51, %v1921_v40 }
 0x69f   :  { %v1946_v28 = vadd.f32 %v1926_v36, %v1922_v6  ;;  %v1884_v30 = vpop.f32.mrb[16].mxu1 }
 0x6a0   :  { %v1938_v39 = vadd.f32 %v1937_v24, %v1929_v23  ;;  %v1900_v47 = vrot.slane %v1884_v30, %v22386_v59  ;;  %v1886_v50 = vpop.f32.mrb[17].mxu1 }
 0x6a1   :  { %v1904_v54 = vrot.slane %v1886_v50, %v22386_v59  ;;  %v1947_v55 = vadd.f32 %v1946_v28, %v1930_v27 }
 0x6a2   :  { %v1939_v0 = vadd.f32 %v1938_v39, %v1933_v43  ;;  %v22431_v11 = vsub.f32 %v23675_v4, %v1900_v47  ;;  %v22434_v18 = vsub.f32 %v23676_v12, %v1900_v47  ;;  %v22437_v56 = vsub.f32 %v23677_v34, %v1900_v47 }
 0x6a3   :  { %v22440_v63 = vsub.f32 %v23678_v58, %v1900_v47  ;;  %v22443_v10 = vsub.f32 %v23679_v5, %v1904_v54  ;;  %v22446_v22 = vsub.f32 %v23680_v17, %v1904_v54  ;;  %v22449_v44 = vsub.f32 %v23681_v29, %v1904_v54  ;;  %v2115_v58 = vld [vmem:[#allocation8 + $0x8] sm:$0xff]  ;;  %v2117_v17 = vld [vmem:[#allocation8 + $0x18] sm:$0xff] }
 0x6a4   :  { %v1923_v60 = vmul.f32 %v22431_v11, %v22431_v11  ;;  %v1927_v3 = vmul.f32 %v22434_v18, %v22434_v18  ;;  %v22458_v20 = vsub.f32 %v23682_v14, %v1904_v54  ;;  %v1931_v42 = vmul.f32 %v22437_v56, %v22437_v56  ;;  %v2119_v5 = vld [vmem:[#allocation8 + $0x28] sm:$0xff] }
 0x6a5   :  { %v1924_v32 = vmul.f32 %v22443_v10, %v22443_v10  ;;  %v1928_v37 = vmul.f32 %v22446_v22, %v22446_v22  ;;  %v1948_v46 = vadd.f32 %v1947_v55, %v1934_v49  ;;  %v1940_v53 = vrot.slane %v1939_v0, 4  ;;  %v2121_v49 = vld [vmem:[#allocation8 + $0x38] sm:$0xff] }
 0x6a6   :  { %v1955_v45 = vadd.f32 %v1927_v3, %v1923_v60  ;;  %v1932_v61 = vmul.f32 %v22449_v44, %v22449_v44  ;;  %v1935_v8 = vmul.f32 %v22440_v63, %v22440_v63  ;;  %v1936_v9 = vmul.f32 %v22458_v20, %v22458_v20  ;;  %v2114_v60 = vld [vmem:[#allocation8] sm:$0xff] }
 0x6a7   :  { %v1964_v62 = vadd.f32 %v1928_v37, %v1924_v32  ;;  %v1949_v41 = vrot.slane %v1948_v46, 4  ;;  %v1941_v1 = vadd.f32 %v1940_v53, %v1939_v0  ;;  %v17807_v29 = vpack.c.bf16 %v2119_v5, %v2115_v58  ;;  %v2118_v3 = vld [vmem:[#allocation8 + $0x20] sm:$0xff]  ;;  %v2116_v37 = vld [vmem:[#allocation8 + $0x10] sm:$0xff]  ;;  %v2127_v53 = vld [vmem:[#allocation8 + $0x68] sm:$0xff] }
 0x6a8   :  { %v1956_v15 = vadd.f32 %v1955_v45, %v1931_v42  ;;  %v17815_v14 = vpack.c.bf16 %v2121_v49, %v2117_v17  ;;  %v17809_v32 = vpack.c.bf16 %v2118_v3, %v2114_v60  ;;  %v2120_v42 = vld [vmem:[#allocation8 + $0x30] sm:$0xff]  ;;  %v2123_v45 = vld [vmem:[#allocation8 + $0x48] sm:$0xff] }
 0x6a9   :  { %v1965_v13 = vadd.f32 %v1964_v62, %v1932_v61  ;;  %v1950_v2 = vadd.f32 %v1949_v41, %v1948_v46  ;;  %v1942_v19 = vrot.slane %v1941_v1, 2  ;;  %17808 = vmatprep.subr.bf16.mxu0 %v17807_v29  ;;  %v17817_v46 = vpack.c.bf16 %v2120_v42, %v2116_v37  ;;  %v2125_v61 = vld [vmem:[#allocation8 + $0x58] sm:$0xff]  ;;  %v2122_v41 = vld [vmem:[#allocation8 + $0x40] sm:$0xff] }
 0x6aa   :  { %v1957_v21 = vadd.f32 %v1956_v15, %v1935_v8  ;;  %v2129_v62 = vld [vmem:[#allocation8 + $0x78] sm:$0xff]  ;;  %17816 = vmatprep.subr.bf16.mxu1 %v17815_v14  ;;  %v17811_v8 = vpack.c.bf16 %v2127_v53, %v2123_v45 }
 0x6ab   :  { %v1966_v31 = vadd.f32 %v1965_v13, %v1936_v9  ;;  %v1951_v40 = vrot.slane %v1950_v2, 2  ;;  %v1943_v51 = vadd.f32 %v1942_v19, %v1941_v1  ;;  %v17819_v15 = vpack.c.bf16 %v2129_v62, %v2125_v61  ;;  %v2126_v1 = vld [vmem:[#allocation8 + $0x60] sm:$0xff]  ;;  %v2124_v9 = vld [vmem:[#allocation8 + $0x50] sm:$0xff] }
 0x6ac   :  { %v1958_v6 = vrot.slane %v1957_v21, 4  ;;  %v17813_v13 = vpack.c.bf16 %v2126_v1, %v2122_v41 }
 0x6ad   :  { %v1967_v36 = vrot.slane %v1966_v31, 4  ;;  %v1952_v23 = vadd.f32 %v1951_v40, %v1950_v2  ;;  %v1944_v27 = vrot.slane %v1943_v51, 1 }
 0x6ae   :  { %v1959_v24 = vadd.f32 %v1958_v6, %v1957_v21  ;;  %v2128_v21 = vld [vmem:[#allocation8 + $0x70] sm:$0xff] }
 0x6af   :  { %v1968_v28 = vadd.f32 %v1967_v36, %v1966_v31  ;;  %v1953_v30 = vrot.slane %v1952_v23, 1  ;;  %v1945_v54 = vadd.f32 %v1944_v27, %v1943_v51  ;;  %v17821_v2 = vpack.c.bf16 %v2128_v21, %v2124_v9 }
 0x6b0   :  { %v1960_v43 = vrot.slane %v1959_v24, 2 }
 0x6b1   :  { %v1969_v39 = vrot.slane %v1968_v28, 2  ;;  %v1954_v47 = vadd.f32 %v1953_v30, %v1952_v23  ;;  %v22479_v30 = vsub.s32 2, %v22383_v57 }
 0x6b2   :  { %v1961_v50 = vadd.f32 %v1960_v43, %v1959_v24  ;;  %v2307_v43 = vld [vmem:[#allocation10] sm:$0xf] }
 0x6b3   :  { %v1970_v55 = vadd.f32 %v1969_v39, %v1968_v28  ;;  %2037 = vmatprep.mubr.f32.mxu0 %v1954_v47  ;;  %v23683_v28 = vmov 0   ;;  %23684 = vst [vmem:[#allocation74_spill] sm:$0xff] %v22479_v30  ;;  %v22482_v39 = vsub.s32 1, %v22383_v57  ;;  %v22485_v47 = vsub.s32 3, %v22383_v57 }
 0x6b4   :  { %v1962_v0 = vrot.slane %v1961_v50, 1  ;;  %2038 = vmatmul.mubr.f32.vlgmr.msra.gmra.mrb[18].mxu0 %v1945_v54 }
 0x6b5   :  { %v1971_v4 = vrot.slane %v1970_v55, 1  ;;  %2197 = vmatprep.mubr.f32.mxu0 %v23594_v35  ;;  %17810 = vmatpush1.bf16.msra.mxu0 %v17809_v32  ;;  %23685 = vst [vmem:[#allocation77_spill] sm:$0xff] %v22482_v39  ;;  %23686 = vst [vmem:[#allocation80_spill] sm:$0xff] %v22485_v47  ;;  %v2316_v29 = vrot.slane %v2307_v43, %v22482_v39  ;;  %v2324_v57 = vrot.slane %v2307_v43, %v22485_v47  ;;  %v5765_v39 = vld [vmem:[#allocation14] sm:$0xff] }
 0x6b6   :  { %v1963_v34 = vadd.f32 %v1962_v0, %v1961_v50  ;;  %17812 = vmatprep.subr.bf16.mxu0 %v17811_v8  ;;  %v2312_v0 = vrot.slane %v2307_v43, %v22386_v59 }
 0x6b7   :  { %v1972_v12 = vadd.f32 %v1971_v4, %v1970_v55 }
 0x6b9   :  { %2107 = vmatprep.mubr.f32.mxu1 %v1972_v12  ;;  %17814 = vmatpush1.bf16.msra.mxu0 %v17813_v13  ;;  %v2320_v12 = vrot.slane %v2307_v43, %v22479_v30  ;;  %v5769_v30 = vld [vmem:[#allocation14 + $0x20] sm:$0xff] }
 0x6ba   :  { %2108 = vmatmul.mubr.f32.vlgmr.msra.gmra.mrb[18].mxu1 %v1963_v34 }
 0x6bb   :  { %2268 = vmatprep.mubr.f32.mxu1 %v23594_v35  ;;  %17818 = vmatpush1.bf16.msra.mxu1 %v17817_v46 }
 0x6bc   :  { %17820 = vmatprep.subr.bf16.mxu1 %v17819_v15 }
 0x6bf   :  { %17822 = vmatpush1.bf16.msra.mxu1 %v17821_v2 }
 0x787   :  { %v17309_v19 = vpop.f32.mrb[18].mxu0 }
 0x788   :  { %v17310_v31 = vpop.f32.mrb[19].mxu0 }
 0x789   :  { %v17311_v40 = vadd.f32 %v17310_v31, %v17309_v19 }
 0x78b   :  { %v2040_v36 = vadd.f32 1e-05, %v17311_v40 }
 0x78d   :  { %v17344_v51 = vpop.f32.mrb[18].mxu1 }
 0x78e   :  { %v17345_v6 = vpop.f32.mrb[19].mxu1 }
 0x78f   :  { %v17346_v23 = vadd.f32 %v17345_v6, %v17344_v51 }
 0x791   :  { %v2110_v24 = vadd.f32 %v17346_v23, %v2040_v36 }
 0x793   :  { %21050 = vrsqrt.f32 %v2110_v24 }
 0x79d   :  { %v21051_v27 = vpop.eup %21050 }
 0x79e   :  { %15868 = vmatmul.mubr.msk.f32.vlgmr.msra.gmra.mrb[20].mxu0 %vm1743_vm2, %v21051_v27  ;;  %15869 = vmatmul.mubr.msk.f32.vlgmr.msra.gmra.mrb[20].mxu1 %vm1743_vm2, %v21051_v27 }
 0x79f   :  { %2443 = vmatprep.mubr.bf16.mxu0 %v23683_v28  ;;  %2486 = vmatprep.mubr.bf16.mxu1 %v23683_v28 }
 0x871   :  { %v2199_v50 = vpop.f32.mrb[20].mxu0  ;;  %v2270_v54 = vpop.f32.mrb[20].mxu1 }
 0x872   :  { %v2278_v55 = vrot.slane %v2199_v50, %v22386_v59  ;;  %v2286_v4 = vrot.slane %v2270_v54, %v22386_v59  ;;  %v2201_v34 = vpop.f32.mrb[21].mxu0  ;;  %v2272_v58 = vpop.f32.mrb[21].mxu1 }
 0x873   :  { %v2282_v5 = vrot.slane %v2201_v34, %v22386_v59  ;;  %v2290_v17 = vrot.slane %v2272_v58, %v22386_v59  ;;  %v5788_v59 = vld [vmem:[#allocation14 + $0xb8] sm:$0xff] }
 0x874   :  { %v2291_v49 = vmul.f32 %v2278_v55, %v22391_v25  ;;  %v2295_v60 = vmul.f32 %v2278_v55, %v22394_v33  ;;  %v2299_v3 = vmul.f32 %v2278_v55, %v22397_v38  ;;  %v2303_v14 = vmul.f32 %v2278_v55, %v22400_v48 }
 0x875   :  { %v2293_v32 = vmul.f32 %v2286_v4, %v22431_v11  ;;  %v2297_v37 = vmul.f32 %v2286_v4, %v22434_v18  ;;  %v2301_v42 = vmul.f32 %v2286_v4, %v22437_v56  ;;  %v2305_v45 = vmul.f32 %v2286_v4, %v22440_v63 }
 0x876   :  { %v2329_v46 = vadd.f32 %v2312_v0, %v2291_v49  ;;  %v2333_v53 = vadd.f32 %v2312_v0, %v2295_v60  ;;  %v22503_v61 = vadd.f32 %v2312_v0, %v2299_v3  ;;  %v22505_v62 = vadd.f32 %v2312_v0, %v2303_v14 }
 0x877   :  { %v2331_v25 = vadd.f32 %v2320_v12, %v2293_v32  ;;  %v2335_v33 = vadd.f32 %v2320_v12, %v2297_v37  ;;  %v22507_v8 = vadd.f32 %v2320_v12, %v2301_v42  ;;  %v22509_v38 = vadd.f32 %v2320_v12, %v2305_v45 }
 0x878   :  { %v2292_v48 = vmul.f32 %v2282_v5, %v22403_v52  ;;  %v2296_v11 = vmul.f32 %v2282_v5, %v22406_v7  ;;  %v2300_v18 = vmul.f32 %v2282_v5, %v22409_v26  ;;  %v2304_v56 = vmul.f32 %v2282_v5, %v22412_v16 }
 0x879   :  { %v2294_v63 = vmul.f32 %v2290_v17, %v22443_v10  ;;  %v2298_v15 = vmul.f32 %v2290_v17, %v22446_v22  ;;  %v2302_v41 = vmul.f32 %v2290_v17, %v22449_v44  ;;  %v2306_v1 = vmul.f32 %v2290_v17, %v22458_v20 }
 0x87a   :  { %v2330_v9 = vadd.f32 %v2316_v29, %v2292_v48  ;;  %v2334_v13 = vadd.f32 %v2316_v29, %v2296_v11  ;;  %vm2345_vm3 = vcmp.gt.f32.partialorder %v2329_v46, 0.0  ;;  %vm2349_vm4 = vcmp.gt.f32.partialorder %v2333_v53, 0.0  ;;  %v19127_v48 = vld [vmem:[#allocation11] sm:$0xff]  }
 0x87b   :  { %v2332_v21 = vadd.f32 %v2324_v57, %v2294_v63  ;;  %v2336_v52 = vadd.f32 %v2324_v57, %v2298_v15  ;;  %v2361_v2 = vmul.f32 0.01, %v2329_v46  ;;  %v2365_v7 = vmul.f32 0.01, %v2333_v53  ;;  %v19132_v63 = vld [vmem:[#allocation13 + $0x408] ss:$16 sps:$4 sm:$0xff]  }
 0x87c   :  { %vm2346_vm5 = vcmp.gt.f32.partialorder %v2330_v9, 0.0  ;;  %vm2350_vm6 = vcmp.gt.f32.partialorder %v2334_v13, 0.0  ;;  %v2362_v26 = vmul.f32 0.01, %v2330_v9  ;;  %v2366_v16 = vmul.f32 0.01, %v2334_v13 }
 0x87d   :  { %vm2348_vm7 = vcmp.gt.f32.partialorder %v2332_v21, 0.0  ;;  %vm2352_vm8 = vcmp.gt.f32.partialorder %v2336_v52, 0.0  ;;  %v2364_v10 = vmul.f32 0.01, %v2332_v21  ;;  %v2368_v22 = vmul.f32 0.01, %v2336_v52 }
 0x87e   :  { %v2378_v19 = vsel %vm2346_vm5, %v2330_v9, %v2362_v26  ;;  %v2382_v44 = vsel %vm2350_vm6, %v2334_v13, %v2366_v16  ;;  %v2377_v20 = vsel %vm2345_vm3, %v2329_v46, %v2361_v2  ;;  %v2381_v31 = vsel %vm2349_vm4, %v2333_v53, %v2365_v7  ;;  %v19140_v15 = vld [vmem:[#allocation13 + $0x42c] ss:$16 sps:$4 sm:$0xff]   ;;  %v19138_v9 = vld [vmem:[#allocation13 + $0x428] ss:$16 sps:$4 sm:$0xff]   ;;  %v19147_v26 = vld [vmem:[#allocation13 + $0x460] ss:$16 sps:$4 sm:$0xff]  }
 0x87f   :  { %v22521_v40 = vpack.c.bf16 %v2382_v44, %v2378_v19  ;;  %v2380_v51 = vsel %vm2348_vm7, %v2332_v21, %v2364_v10  ;;  %v2384_v6 = vsel %vm2352_vm8, %v2336_v52, %v2368_v22  ;;  %v22523_v36 = vpack.c.bf16 %v2381_v31, %v2377_v20  ;;  %v19146_v13 = vld [vmem:[#allocation13 + $0x44c] ss:$16 sps:$4 sm:$0xff]   ;;  %v19141_v21 = vld [vmem:[#allocation13 + $0x440] ss:$16 sps:$4 sm:$0xff]   ;;  %v19149_v52 = vld [vmem:[#allocation13 + $0x464] ss:$16 sps:$4 sm:$0xff]  }
 0x880   :  { %v22525_v23 = vpack.c.bf16 %v2384_v6, %v2380_v51  ;;  %vm2347_vm9 = vcmp.gt.f32.partialorder %v2331_v25, 0.0  ;;  %vm2351_vm10 = vcmp.gt.f32.partialorder %v2335_v33, 0.0  ;;  %v2363_v24 = vmul.f32 0.01, %v2331_v25  ;;  %v19144_v2 = vld [vmem:[#allocation13 + $0x448] ss:$16 sps:$4 sm:$0xff]  }
 0x881   :  { %2411 = vmatprep.subr.bf16.mxu0 %v22521_v40  ;;  %v2367_v27 = vmul.f32 0.01, %v2335_v33  ;;  %v2338_v43 = vadd.f32 %v2316_v29, %v2300_v18  ;;  %v2342_v50 = vadd.f32 %v2316_v29, %v2304_v56  ;;  %v2340_v54 = vadd.f32 %v2324_v57, %v2302_v41  ;;  %v19129_v18 = vld [vmem:[#allocation13 + $0x400] ss:$16 sps:$4 sm:$0xff]   ;;  %v19137_v56 = vld [vmem:[#allocation13 + $0x424] ss:$16 sps:$4 sm:$0xff]  }
 0x882   :  { %2454 = vmatprep.subr.bf16.mxu1 %v22525_v23  ;;  %2412 = vmatpush1.bf16.msra.mxu0 %v22523_v36  ;;  %v2379_v55 = vsel %vm2347_vm9, %v2331_v25, %v2363_v24  ;;  %v2344_v0 = vadd.f32 %v2324_v57, %v2306_v1  ;;  %vm2353_vm11 = vcmp.gt.f32.partialorder %v22503_v61, 0.0  ;;  %vm2357_vm12 = vcmp.gt.f32.partialorder %v22505_v62, 0.0  ;;  %v19135_v41 = vld [vmem:[#allocation13 + $0x420] ss:$16 sps:$4 sm:$0xff]   ;;  %v19143_v1 = vld [vmem:[#allocation13 + $0x444] ss:$16 sps:$4 sm:$0xff]  }
 0x883   :  { %v2383_v4 = vsel %vm2351_vm10, %v2335_v33, %v2367_v27  ;;  %vm2354_vm13 = vcmp.gt.f32.partialorder %v2338_v43, 0.0  ;;  %vm2358_vm14 = vcmp.gt.f32.partialorder %v2342_v50, 0.0  ;;  %v2370_v12 = vmul.f32 0.01, %v2338_v43  ;;  %v19152_v7 = vld [vmem:[#allocation13 + $0x46c] ss:$16 sps:$4 sm:$0xff]  }
 0x884   :  { %v22532_v34 = vpack.c.bf16 %v2383_v4, %v2379_v55  ;;  %v2374_v58 = vmul.f32 0.01, %v2342_v50  ;;  %vm2356_vm15 = vcmp.gt.f32.partialorder %v2340_v54, 0.0  ;;  %vm2360_vm1 = vcmp.gt.f32.partialorder %v2344_v0, 0.0  ;;  %v19155_v16 = vld [vmem:[#allocation13 + $0x484] ss:$16 sps:$4 sm:$0xff]  }
 0x885   :  { %v2386_v5 = vsel %vm2354_vm13, %v2338_v43, %v2370_v12  ;;  %v2372_v17 = vmul.f32 0.01, %v2340_v54  ;;  %v2376_v29 = vmul.f32 0.01, %v2344_v0  ;;  %v2369_v49 = vmul.f32 0.01, %v22503_v61 }
 0x886   :  { %2455 = vmatpush1.bf16.msra.mxu1 %v22532_v34  ;;  %v2390_v57 = vsel %vm2358_vm14, %v2342_v50, %v2374_v58  ;;  %v2373_v60 = vmul.f32 0.01, %v22505_v62  ;;  %vm2355_vm3 = vcmp.gt.f32.partialorder %v22507_v8, 0.0  ;;  %vm2359_vm4 = vcmp.gt.f32.partialorder %v22509_v38, 0.0  ;;  %v19150_v10 = vld [vmem:[#allocation13 + $0x468] ss:$16 sps:$4 sm:$0xff]  }
 0x887   :  { %v22539_v3 = vpack.c.bf16 %v2390_v57, %v2386_v5  ;;  %v2388_v14 = vsel %vm2356_vm15, %v2340_v54, %v2372_v17  ;;  %v2392_v32 = vsel %vm2360_vm1, %v2344_v0, %v2376_v29  ;;  %v2385_v37 = vsel %vm2353_vm11, %v22503_v61, %v2369_v49  ;;  %v19158_v22 = vld [vmem:[#allocation13 + $0x48c] ss:$16 sps:$4 sm:$0xff]   ;;  %v19153_v19 = vld [vmem:[#allocation13 + $0x480] ss:$16 sps:$4 sm:$0xff]   ;;  %v19161_v44 = vld [vmem:[#allocation13 + $0x4a4] ss:$16 sps:$4 sm:$0xff]  }
 0x888   :  { %v22544_v42 = vpack.c.bf16 %v2392_v32, %v2388_v14  ;;  %v2389_v45 = vsel %vm2357_vm12, %v22505_v62, %v2373_v60  ;;  %v2371_v46 = vmul.f32 0.01, %v22507_v8  ;;  %v2375_v53 = vmul.f32 0.01, %v22509_v38  ;;  %v19131_v62 = vld [vmem:[#allocation13 + $0x404] ss:$16 sps:$4 sm:$0xff]  }
 0x889   :  { %2413 = vmatprep.subr.bf16.mxu0 %v22539_v3  ;;  %v22552_v25 = vpack.c.bf16 %v2389_v45, %v2385_v37  ;;  %v19156_v20 = vld [vmem:[#allocation13 + $0x488] ss:$16 sps:$4 sm:$0xff]   ;;  %v19164_v31 = vld [vmem:[#allocation13 + $0x4ac] ss:$16 sps:$4 sm:$0xff]   ;;  %v19159_v51 = vld [vmem:[#allocation13 + $0x4a0] ss:$16 sps:$4 sm:$0xff]  }
 0x88a   :  { %2456 = vmatprep.subr.bf16.mxu1 %v22544_v42  ;;  %v2387_v33 = vsel %vm2355_vm3, %v22507_v8, %v2371_v46  ;;  %v2391_v61 = vsel %vm2359_vm4, %v22509_v38, %v2375_v53  ;;  %v19128_v8 = vld [vmem:[#allocation11 + $0x8] sm:$0xff]   ;;  %v19134_v38 = vld [vmem:[#allocation13 + $0x40c] ss:$16 sps:$4 sm:$0xff]   ;;  %v19162_v24 = vld [vmem:[#allocation13 + $0x4a8] ss:$16 sps:$4 sm:$0xff]   ;;  %vm6403_vm11 = vcmask 130048  }
 0x88b   :  { %2414 = vmatpush1.bf16.msra.mxu0 %v22552_v25  ;;  %v22558_v11 = vpack.c.bf16 %v2391_v61, %v2387_v33  ;;  %v19167_v6 = vld [vmem:[#allocation13 + $0x4c4] ss:$16 sps:$4 sm:$0xff]   ;;  %v19170_v27 = vld [vmem:[#allocation13 + $0x4cc] ss:$16 sps:$4 sm:$0xff]   ;;  %v19165_v43 = vld [vmem:[#allocation13 + $0x4c0] ss:$16 sps:$4 sm:$0xff]  }
 0x88c   :  { %2640 = vmatprep.subr.bf16.mxu0 %v22521_v40  ;;  %v19173_v50 = vld [vmem:[#allocation13 + $0x4e4] ss:$16 sps:$4 sm:$0xff]   ;;  %v19168_v54 = vld [vmem:[#allocation13 + $0x4c8] ss:$16 sps:$4 sm:$0xff]   ;;  %v19176_v55 = vld [vmem:[#allocation13 + $0x4ec] ss:$16 sps:$4 sm:$0xff]  }
 0x88d   :  { %2457 = vmatpush1.bf16.msra.mxu1 %v22558_v11  ;;  %v19171_v0 = vld [vmem:[#allocation13 + $0x4e0] ss:$16 sps:$4 sm:$0xff]   ;;  %v19179_v4 = vld [vmem:[#allocation13 + $0x504] ss:$16 sps:$4 sm:$0xff]   ;;  %v19174_v12 = vld [vmem:[#allocation13 + $0x4e8] ss:$16 sps:$4 sm:$0xff]  }
 0x88e   :  { %2683 = vmatprep.subr.bf16.mxu1 %v22525_v23  ;;  %15871 = vmatmul.mubr.msk.bf16.vlgmr.msra.gmra.mrb[24].mxu0 %vm1743_vm2, %v19127_v48  ;;  %v19182_v58 = vld [vmem:[#allocation13 + $0x50c] ss:$16 sps:$4 sm:$0xff]   ;;  %v19177_v5 = vld [vmem:[#allocation13 + $0x500] ss:$16 sps:$4 sm:$0xff]   ;;  %v19185_v17 = vld [vmem:[#allocation13 + $0x524] ss:$16 sps:$4 sm:$0xff]  }
 0x88f   :  { %2641 = vmatpush1.bf16.msra.mxu0 %v22523_v36  ;;  %2672 = vmatprep.mubr.bf16.mxu0 %v23683_v28  ;;  %v19180_v29 = vld [vmem:[#allocation13 + $0x508] ss:$16 sps:$4 sm:$0xff]   ;;  %v19188_v49 = vld [vmem:[#allocation13 + $0x52c] ss:$16 sps:$4 sm:$0xff]   ;;  %v19183_v57 = vld [vmem:[#allocation13 + $0x520] ss:$16 sps:$4 sm:$0xff]  }
 0x890   :  { %15872 = vmatmul.mubr.msk.bf16.vlgmr.msra.gmra.mrb[24].mxu1 %vm1743_vm2, %v19127_v48  ;;  %2642 = vmatprep.subr.bf16.mxu0 %v22539_v3  ;;  %v19191_v60 = vld [vmem:[#allocation13 + $0x544] ss:$16 sps:$4 sm:$0xff]   ;;  %v19186_v14 = vld [vmem:[#allocation13 + $0x528] ss:$16 sps:$4 sm:$0xff]   ;;  %v19194_v32 = vld [vmem:[#allocation13 + $0x54c] ss:$16 sps:$4 sm:$0xff]  }
 0x891   :  { %2684 = vmatpush1.bf16.msra.mxu1 %v22532_v34  ;;  %2715 = vmatprep.mubr.bf16.mxu1 %v23683_v28  ;;  %v19189_v37 = vld [vmem:[#allocation13 + $0x540] ss:$16 sps:$4 sm:$0xff]   ;;  %v19197_v45 = vld [vmem:[#allocation13 + $0x564] ss:$16 sps:$4 sm:$0xff]   ;;  %v19192_v46 = vld [vmem:[#allocation13 + $0x548] ss:$16 sps:$4 sm:$0xff]  }
 0x892   :  { %2685 = vmatprep.subr.bf16.mxu1 %v22544_v42  ;;  %v19200_v53 = vld [vmem:[#allocation13 + $0x56c] ss:$16 sps:$4 sm:$0xff]   ;;  %v19195_v33 = vld [vmem:[#allocation13 + $0x560] ss:$16 sps:$4 sm:$0xff]   ;;  %v19203_v61 = vld [vmem:[#allocation13 + $0x584] ss:$16 sps:$4 sm:$0xff]  }
 0x893   :  { %2643 = vmatpush1.bf16.msra.mxu0 %v22552_v25  ;;  %v19198_v48 = vld [vmem:[#allocation13 + $0x568] ss:$16 sps:$4 sm:$0xff]   ;;  %vm10373_vm1 = vcmask 1043456   ;;  %vm10369_vm3 = vcmask 64512  }
 0x894   :  { %3499 = vmatprep.subr.bf16.mxu0 %v19131_v62  ;;  %v19206_v62 = vld [vmem:[#allocation13 + $0x58c] ss:$16 sps:$4 sm:$0xff]  }
 0x895   :  { %2686 = vmatpush1.bf16.msra.mxu1 %v22558_v11 }
 0x896   :  { %15874 = vmatmul.mubr.msk.bf16.vlgmr.msra.gmra.mrb[28].mxu0 %vm1743_vm2, %v19128_v8  ;;  %3585 = vmatprep.subr.bf16.mxu1 %v19134_v38  ;;  %v19204_v38 = vld [vmem:[#allocation13 + $0x588] ss:$16 sps:$4 sm:$0xff]  }
 0x897   :  { %3500 = vmatpush1.bf16.msra.mxu0 %v19129_v18  ;;  %v19207_v18 = vld [vmem:[#allocation13 + $0x5a0] ss:$16 sps:$4 sm:$0xff]  }
 0x898   :  { %15875 = vmatmul.mubr.msk.bf16.vlgmr.msra.gmra.mrb[28].mxu1 %vm1743_vm2, %v19128_v8  ;;  %3501 = vmatprep.subr.bf16.mxu0 %v19137_v56  ;;  %v19201_v8 = vld [vmem:[#allocation13 + $0x580] ss:$16 sps:$4 sm:$0xff]   ;;  %v19209_v56 = vld [vmem:[#allocation13 + $0x5a4] ss:$16 sps:$4 sm:$0xff]  }
 0x899   :  { %3586 = vmatpush1.bf16.msra.mxu1 %v19132_v63  ;;  %v19210_v63 = vld [vmem:[#allocation13 + $0x5a8] ss:$16 sps:$4 sm:$0xff]  }
 0x89a   :  { %3587 = vmatprep.subr.bf16.mxu1 %v19140_v15  ;;  %v19212_v15 = vld [vmem:[#allocation13 + $0x5ac] ss:$16 sps:$4 sm:$0xff]  }
 0x89b   :  { %3502 = vmatpush1.bf16.msra.mxu0 %v19135_v41  ;;  %v19215_v41 = vld [vmem:[#allocation13 + $0x5c4] ss:$16 sps:$4 sm:$0xff]  }
 0x89c   :  { %3503 = vmatprep.subr.bf16.mxu0 %v19143_v1  ;;  %v19218_v1 = vld [vmem:[#allocation13 + $0x5cc] ss:$16 sps:$4 sm:$0xff]  }
 0x89d   :  { %3588 = vmatpush1.bf16.msra.mxu1 %v19138_v9  ;;  %v19213_v9 = vld [vmem:[#allocation13 + $0x5c0] ss:$16 sps:$4 sm:$0xff]  }
 0x89e   :  { %3589 = vmatprep.subr.bf16.mxu1 %v19146_v13  ;;  %v19216_v13 = vld [vmem:[#allocation13 + $0x5c8] ss:$16 sps:$4 sm:$0xff]  }
 0x89f   :  { %3504 = vmatpush1.bf16.msra.mxu0 %v19141_v21  ;;  %v19219_v21 = vld [vmem:[#allocation13 + $0x5e0] ss:$16 sps:$4 sm:$0xff]  }
 0x8a0   :  { %3505 = vmatprep.subr.bf16.mxu0 %v19149_v52  ;;  %v19221_v52 = vld [vmem:[#allocation13 + $0x5e4] ss:$16 sps:$4 sm:$0xff]  }
 0x8a1   :  { %3590 = vmatpush1.bf16.msra.mxu1 %v19144_v2  ;;  %v19222_v2 = vld [vmem:[#allocation13 + $0x5e8] ss:$16 sps:$4 sm:$0xff]  }
 0x8a2   :  { %3591 = vmatprep.subr.bf16.mxu1 %v19152_v7  ;;  %v19224_v7 = vld [vmem:[#allocation13 + $0x5ec] ss:$16 sps:$4 sm:$0xff]  }
 0x8a3   :  { %3506 = vmatpush1.bf16.msra.mxu0 %v19147_v26  ;;  %v19227_v26 = vld [vmem:[#allocation13 + $0x604] ss:$16 sps:$4 sm:$0xff]  }
 0x8a4   :  { %3507 = vmatprep.subr.bf16.mxu0 %v19155_v16  ;;  %v19230_v16 = vld [vmem:[#allocation13 + $0x60c] ss:$16 sps:$4 sm:$0xff]  }
 0x8a5   :  { %3592 = vmatpush1.bf16.msra.mxu1 %v19150_v10 }
 0x8a6   :  { %3593 = vmatprep.subr.bf16.mxu1 %v19158_v22 }
 0x8a7   :  { %3508 = vmatpush1.bf16.msra.mxu0 %v19153_v19 }
 0x8a8   :  { %3509 = vmatprep.subr.bf16.mxu0 %v19161_v44 }
 0x8a9   :  { %3594 = vmatpush1.bf16.msra.mxu1 %v19156_v20 }
 0x8aa   :  { %3595 = vmatprep.subr.bf16.mxu1 %v19164_v31 }
 0x8ab   :  { %3510 = vmatpush1.bf16.msra.mxu0 %v19159_v51 }
 0x8ac   :  { %3511 = vmatprep.subr.bf16.mxu0 %v19167_v6 }
 0x8ad   :  { %3596 = vmatpush1.bf16.msra.mxu1 %v19162_v24 }
 0x8ae   :  { %3597 = vmatprep.subr.bf16.mxu1 %v19170_v27 }
 0x8af   :  { %3512 = vmatpush1.bf16.msra.mxu0 %v19165_v43 }
 0x8b0   :  { %3513 = vmatprep.subr.bf16.mxu0 %v19173_v50 }
 0x8b1   :  { %3598 = vmatpush1.bf16.msra.mxu1 %v19168_v54 }
 0x8b2   :  { %3599 = vmatprep.subr.bf16.mxu1 %v19176_v55 }
 0x8b3   :  { %3514 = vmatpush1.bf16.msra.mxu0 %v19171_v0 }
 0x8b4   :  { %3515 = vmatprep.subr.bf16.mxu0 %v19179_v4 }
 0x8b5   :  { %3600 = vmatpush1.bf16.msra.mxu1 %v19174_v12 }
 0x8b6   :  { %3601 = vmatprep.subr.bf16.mxu1 %v19182_v58 }
 0x8b7   :  { %3516 = vmatpush1.bf16.msra.mxu0 %v19177_v5 }
 0x8b8   :  { %3517 = vmatprep.subr.bf16.mxu0 %v19185_v17 }
 0x8b9   :  { %3602 = vmatpush1.bf16.msra.mxu1 %v19180_v29  ;;  %v19225_v29 = vld [vmem:[#allocation13 + $0x600] ss:$16 sps:$4 sm:$0xff]  }
 0x8ba   :  { %3603 = vmatprep.subr.bf16.mxu1 %v19188_v49  ;;  %v19228_v49 = vld [vmem:[#allocation13 + $0x608] ss:$16 sps:$4 sm:$0xff]  }
 0x8bb   :  { %3518 = vmatpush1.bf16.msra.mxu0 %v19183_v57 }
 0x8bc   :  { %3519 = vmatprep.subr.bf16.mxu0 %v19191_v60  ;;  %v19233_v60 = vld [vmem:[#allocation13 + $0x624] ss:$16 sps:$4 sm:$0xff]  }
 0x8bd   :  { %3604 = vmatpush1.bf16.msra.mxu1 %v19186_v14  ;;  %v19236_v14 = vld [vmem:[#allocation13 + $0x62c] ss:$16 sps:$4 sm:$0xff]  }
 0x8be   :  { %3605 = vmatprep.subr.bf16.mxu1 %v19194_v32 }
 0x8bf   :  { %3520 = vmatpush1.bf16.msra.mxu0 %v19189_v37 }
 0x8c0   :  { %3521 = vmatprep.subr.bf16.mxu0 %v19197_v45 }
 0x8c1   :  { %3606 = vmatpush1.bf16.msra.mxu1 %v19192_v46  ;;  %v19231_v46 = vld [vmem:[#allocation13 + $0x620] ss:$16 sps:$4 sm:$0xff]  }
 0x8c2   :  { %3607 = vmatprep.subr.bf16.mxu1 %v19200_v53  ;;  %v19234_v53 = vld [vmem:[#allocation13 + $0x628] ss:$16 sps:$4 sm:$0xff]  }
 0x8c3   :  { %3522 = vmatpush1.bf16.msra.mxu0 %v19195_v33  ;;  %v19239_v33 = vld [vmem:[#allocation13 + $0x644] ss:$16 sps:$4 sm:$0xff]  }
 0x8c4   :  { %3523 = vmatprep.subr.bf16.mxu0 %v19203_v61  ;;  %v19242_v61 = vld [vmem:[#allocation13 + $0x64c] ss:$16 sps:$4 sm:$0xff]  }
 0x8c5   :  { %3608 = vmatpush1.bf16.msra.mxu1 %v19198_v48  ;;  %v19237_v48 = vld [vmem:[#allocation13 + $0x640] ss:$16 sps:$4 sm:$0xff]  }
 0x8c6   :  { %3609 = vmatprep.subr.bf16.mxu1 %v19206_v62  ;;  %v19240_v62 = vld [vmem:[#allocation13 + $0x648] ss:$16 sps:$4 sm:$0xff]  }
 0x8c7   :  { %3524 = vmatpush1.bf16.msra.mxu0 %v19201_v8  ;;  %v19245_v8 = vld [vmem:[#allocation13 + $0x664] ss:$16 sps:$4 sm:$0xff]  }
 0x8c8   :  { %3525 = vmatprep.subr.bf16.mxu0 %v19209_v56  ;;  %v19246_v56 = vld [vmem:[#allocation13 + $0x668] ss:$16 sps:$4 sm:$0xff]  }
 0x8c9   :  { %3610 = vmatpush1.bf16.msra.mxu1 %v19204_v38  ;;  %v19248_v38 = vld [vmem:[#allocation13 + $0x66c] ss:$16 sps:$4 sm:$0xff]  }
 0x8ca   :  { %3611 = vmatprep.subr.bf16.mxu1 %v19212_v15  ;;  %v19254_v15 = vld [vmem:[#allocation13 + $0x68c] ss:$16 sps:$4 sm:$0xff]  }
 0x8cb   :  { %3526 = vmatpush1.bf16.msra.mxu0 %v19207_v18  ;;  %v19243_v18 = vld [vmem:[#allocation13 + $0x660] ss:$16 sps:$4 sm:$0xff]  }
 0x8cc   :  { %3527 = vmatprep.subr.bf16.mxu0 %v19215_v41  ;;  %v19249_v41 = vld [vmem:[#allocation13 + $0x680] ss:$16 sps:$4 sm:$0xff]  }
 0x8cd   :  { %3612 = vmatpush1.bf16.msra.mxu1 %v19210_v63  ;;  %v19251_v63 = vld [vmem:[#allocation13 + $0x684] ss:$16 sps:$4 sm:$0xff]  }
 0x8ce   :  { %3613 = vmatprep.subr.bf16.mxu1 %v19218_v1  ;;  %v19252_v1 = vld [vmem:[#allocation13 + $0x688] ss:$16 sps:$4 sm:$0xff]  }
 0x8cf   :  { %3528 = vmatpush1.bf16.msra.mxu0 %v19213_v9  ;;  %v19257_v9 = vld [vmem:[#allocation13 + $0x6a4] ss:$16 sps:$4 sm:$0xff]  }
 0x8d0   :  { %3529 = vmatprep.subr.bf16.mxu0 %v19221_v52  ;;  %v19258_v52 = vld [vmem:[#allocation13 + $0x6a8] ss:$16 sps:$4 sm:$0xff]  }
 0x8d1   :  { %3614 = vmatpush1.bf16.msra.mxu1 %v19216_v13  ;;  %v19260_v13 = vld [vmem:[#allocation13 + $0x6ac] ss:$16 sps:$4 sm:$0xff]  }
 0x8d2   :  { %3615 = vmatprep.subr.bf16.mxu1 %v19224_v7  ;;  %v19266_v7 = vld [vmem:[#allocation13 + $0x6cc] ss:$16 sps:$4 sm:$0xff]  }
 0x8d3   :  { %3530 = vmatpush1.bf16.msra.mxu0 %v19219_v21  ;;  %v19255_v21 = vld [vmem:[#allocation13 + $0x6a0] ss:$16 sps:$4 sm:$0xff]  }
 0x8d4   :  { %3542 = vmatprep.subr.bf16.mxu0 %v19227_v26  ;;  %v19261_v26 = vld [vmem:[#allocation13 + $0x6c0] ss:$16 sps:$4 sm:$0xff]  }
 0x8d5   :  { %3616 = vmatpush1.bf16.msra.mxu1 %v19222_v2  ;;  %v19263_v2 = vld [vmem:[#allocation13 + $0x6c4] ss:$16 sps:$4 sm:$0xff]  }
 0x8d6   :  { %3628 = vmatprep.subr.bf16.mxu1 %v19230_v16  ;;  %v19264_v16 = vld [vmem:[#allocation13 + $0x6c8] ss:$16 sps:$4 sm:$0xff]  }
 0x961   :  { %v2445_v10 = vpop.f32.mrb[24].mxu0 }
 0x962   :  { %v2447_v22 = vpop.f32.mrb[25].mxu0 }
 0x963   :  { %v2449_v19 = vpop.f32.mrb[26].mxu0  ;;  %v2488_v44 = vpop.f32.mrb[24].mxu1 }
 0x964   :  { %v22575_v20 = vpack.c.bf16 %v2449_v19, %v2445_v10  ;;  %v2451_v31 = vpop.f32.mrb[27].mxu0  ;;  %v2490_v51 = vpop.f32.mrb[25].mxu1  ;;  %v19269_v10 = vld [vmem:[#allocation13 + $0x6e4] ss:$16 sps:$4 sm:$0xff]   ;;  %v19267_v19 = vld [vmem:[#allocation13 + $0x6e0] ss:$16 sps:$4 sm:$0xff]  }
 0x965   :  { %v22577_v6 = vpack.c.bf16 %v2451_v31, %v2447_v22  ;;  %v2492_v24 = vpop.f32.mrb[26].mxu1  ;;  %v19272_v22 = vld [vmem:[#allocation13 + $0x6ec] ss:$16 sps:$4 sm:$0xff]   ;;  %v19275_v31 = vld [vmem:[#allocation13 + $0x704] ss:$16 sps:$4 sm:$0xff]  }
 0x966   :  { %v22579_v27 = vpack.c.bf16 %v2492_v24, %v2488_v44  ;;  %v2494_v43 = vpop.f32.mrb[27].mxu1  ;;  %v19270_v44 = vld [vmem:[#allocation13 + $0x6e8] ss:$16 sps:$4 sm:$0xff]   ;;  %v19273_v24 = vld [vmem:[#allocation13 + $0x700] ss:$16 sps:$4 sm:$0xff]  }
 0x967   :  { %v22581_v50 = vpack.c.bf16 %v2494_v43, %v2490_v51  ;;  %v19278_v51 = vld [vmem:[#allocation13 + $0x70c] ss:$16 sps:$4 sm:$0xff]   ;;  %v19276_v43 = vld [vmem:[#allocation13 + $0x708] ss:$16 sps:$4 sm:$0xff]  }
 0x969   :  { %v2674_v54 = vpop.f32.mrb[28].mxu0 }
 0x96a   :  { %v2676_v55 = vpop.f32.mrb[29].mxu0 }
 0x96b   :  { %v2678_v0 = vpop.f32.mrb[30].mxu0  ;;  %v2717_v4 = vpop.f32.mrb[28].mxu1 }
 0x96c   :  { %v2726_v12 = vpack.c.bf16 %v2678_v0, %v2674_v54  ;;  %v2680_v58 = vpop.f32.mrb[31].mxu0  ;;  %v2719_v5 = vpop.f32.mrb[29].mxu1  ;;  %v19281_v54 = vld [vmem:[#allocation13 + $0x724] ss:$16 sps:$4 sm:$0xff]   ;;  %v19279_v0 = vld [vmem:[#allocation13 + $0x720] ss:$16 sps:$4 sm:$0xff]  }
 0x96d   :  { %v2727_v17 = vpack.c.bf16 %v2680_v58, %v2676_v55  ;;  %v2721_v57 = vpop.f32.mrb[30].mxu1  ;;  %v19284_v55 = vld [vmem:[#allocation13 + $0x72c] ss:$16 sps:$4 sm:$0xff]  }
 0x96e   :  { %v22583_v32 = vpack.c.bf16 %v2721_v57, %v2717_v4  ;;  %v2723_v37 = vpop.f32.mrb[31].mxu1  ;;  %v19282_v4 = vld [vmem:[#allocation13 + $0x728] ss:$16 sps:$4 sm:$0xff]   ;;  %v19290_v58 = vld [vmem:[#allocation13 + $0x74c] ss:$16 sps:$4 sm:$0xff]  }
 0x96f   :  { %3531 = vmatprep.mubr.bf16.mxu0 %v2727_v17  ;;  %3617 = vmatprep.mubr.bf16.mxu1 %v2727_v17  ;;  %v2729_v45 = vpack.c.bf16 %v2723_v37, %v2719_v5  ;;  %v19285_v5 = vld [vmem:[#allocation13 + $0x740] ss:$16 sps:$4 sm:$0xff]   ;;  %v19288_v17 = vld [vmem:[#allocation13 + $0x748] ss:$16 sps:$4 sm:$0xff]   ;;  %v19302_v37 = vld [vmem:[#allocation13 + $0x78c] ss:$16 sps:$4 sm:$0xff]  }
 0x970   :  { %3532 = vmatmul.mubr.bf16.vlgmr.msra.gmra.mrb[32].mxu0 %v2726_v12  ;;  %3618 = vmatmul.mubr.bf16.vlgmr.msra.gmra.mrb[32].mxu1 %v2726_v12  ;;  %v19287_v12 = vld [vmem:[#allocation13 + $0x744] ss:$16 sps:$4 sm:$0xff]   ;;  %v19291_v57 = vld [vmem:[#allocation13 + $0x760] ss:$16 sps:$4 sm:$0xff]  }
 0x971   :  { %3543 = vmatpush1.bf16.msra.mxu0 %v19225_v29  ;;  %3629 = vmatpush1.bf16.msra.mxu1 %v19228_v49  ;;  %v19293_v29 = vld [vmem:[#allocation13 + $0x764] ss:$16 sps:$4 sm:$0xff]   ;;  %v19296_v49 = vld [vmem:[#allocation13 + $0x76c] ss:$16 sps:$4 sm:$0xff]  }
 0x972   :  { %3544 = vmatprep.subr.bf16.mxu0 %v19233_v60  ;;  %3630 = vmatprep.subr.bf16.mxu1 %v19236_v14  ;;  %v19294_v60 = vld [vmem:[#allocation13 + $0x768] ss:$16 sps:$4 sm:$0xff]   ;;  %v19299_v14 = vld [vmem:[#allocation13 + $0x784] ss:$16 sps:$4 sm:$0xff]  }
 0x973   :  { %3574 = vmatprep.mubr.bf16.mxu0 %v2729_v45  ;;  %3660 = vmatprep.mubr.bf16.mxu1 %v2729_v45  ;;  %v19297_v45 = vld [vmem:[#allocation13 + $0x780] ss:$16 sps:$4 sm:$0xff]  }
 0x975   :  { %3545 = vmatpush1.bf16.msra.mxu0 %v19231_v46  ;;  %3631 = vmatpush1.bf16.msra.mxu1 %v19234_v53  ;;  %v19300_v46 = vld [vmem:[#allocation13 + $0x788] ss:$16 sps:$4 sm:$0xff]   ;;  %v19305_v53 = vld [vmem:[#allocation13 + $0x7a4] ss:$16 sps:$4 sm:$0xff]  }
 0x976   :  { %3546 = vmatprep.subr.bf16.mxu0 %v19239_v33  ;;  %3632 = vmatprep.subr.bf16.mxu1 %v19242_v61  ;;  %v19308_v33 = vld [vmem:[#allocation13 + $0x7ac] ss:$16 sps:$4 sm:$0xff]   ;;  %v19303_v61 = vld [vmem:[#allocation13 + $0x7a0] ss:$16 sps:$4 sm:$0xff]  }
 0x979   :  { %3547 = vmatpush1.bf16.msra.mxu0 %v19237_v48  ;;  %3633 = vmatpush1.bf16.msra.mxu1 %v19240_v62  ;;  %v19306_v48 = vld [vmem:[#allocation13 + $0x7a8] ss:$16 sps:$4 sm:$0xff]   ;;  %v19311_v62 = vld [vmem:[#allocation13 + $0x7c4] ss:$16 sps:$4 sm:$0xff]  }
 0x97a   :  { %3548 = vmatprep.subr.bf16.mxu0 %v19245_v8  ;;  %3634 = vmatprep.subr.bf16.mxu1 %v19248_v38  ;;  %v19314_v8 = vld [vmem:[#allocation13 + $0x7cc] ss:$16 sps:$4 sm:$0xff]   ;;  %v19309_v38 = vld [vmem:[#allocation13 + $0x7c0] ss:$16 sps:$4 sm:$0xff]  }
 0x97d   :  { %3549 = vmatpush1.bf16.msra.mxu0 %v19243_v18  ;;  %3635 = vmatpush1.bf16.msra.mxu1 %v19246_v56  ;;  %v19312_v18 = vld [vmem:[#allocation13 + $0x7c8] ss:$16 sps:$4 sm:$0xff]   ;;  %v19317_v56 = vld [vmem:[#allocation13 + $0x7e4] ss:$16 sps:$4 sm:$0xff]  }
 0x97e   :  { %3550 = vmatprep.subr.bf16.mxu0 %v19251_v63  ;;  %3636 = vmatprep.subr.bf16.mxu1 %v19254_v15  ;;  %v19320_v63 = vld [vmem:[#allocation13 + $0x7ec] ss:$16 sps:$4 sm:$0xff]   ;;  %v19315_v15 = vld [vmem:[#allocation13 + $0x7e0] ss:$16 sps:$4 sm:$0xff]  }
 0x981   :  { %3551 = vmatpush1.bf16.msra.mxu0 %v19249_v41  ;;  %3637 = vmatpush1.bf16.msra.mxu1 %v19252_v1  ;;  %v19318_v41 = vld [vmem:[#allocation13 + $0x7e8] ss:$16 sps:$4 sm:$0xff]   ;;  %v19323_v1 = vld [vmem:[#allocation13 + $0x4] ss:$16 sps:$4 sm:$0xff]  }
 0x982   :  { %3552 = vmatprep.subr.bf16.mxu0 %v19257_v9  ;;  %3638 = vmatprep.subr.bf16.mxu1 %v19260_v13  ;;  %v19326_v9 = vld [vmem:[#allocation13 + $0xc] ss:$16 sps:$4 sm:$0xff]   ;;  %v19321_v13 = vld [vmem:[#allocation13] ss:$16 sps:$4 sm:$0xff]  }
 0x985   :  { %3553 = vmatpush1.bf16.msra.mxu0 %v19255_v21  ;;  %3639 = vmatpush1.bf16.msra.mxu1 %v19258_v52  ;;  %v19324_v21 = vld [vmem:[#allocation13 + $0x8] ss:$16 sps:$4 sm:$0xff]   ;;  %v19329_v52 = vld [vmem:[#allocation13 + $0x24] ss:$16 sps:$4 sm:$0xff]  }
 0x986   :  { %3554 = vmatprep.subr.bf16.mxu0 %v19263_v2  ;;  %3640 = vmatprep.subr.bf16.mxu1 %v19266_v7  ;;  %v19332_v2 = vld [vmem:[#allocation13 + $0x2c] ss:$16 sps:$4 sm:$0xff]   ;;  %v19327_v7 = vld [vmem:[#allocation13 + $0x20] ss:$16 sps:$4 sm:$0xff]  }
 0x989   :  { %3555 = vmatpush1.bf16.msra.mxu0 %v19261_v26  ;;  %3641 = vmatpush1.bf16.msra.mxu1 %v19264_v16  ;;  %v19330_v26 = vld [vmem:[#allocation13 + $0x28] ss:$16 sps:$4 sm:$0xff]   ;;  %v19335_v16 = vld [vmem:[#allocation13 + $0x44] ss:$16 sps:$4 sm:$0xff]  }
 0x98a   :  { %3556 = vmatprep.subr.bf16.mxu0 %v19269_v10  ;;  %3642 = vmatprep.subr.bf16.mxu1 %v19272_v22  ;;  %v19338_v10 = vld [vmem:[#allocation13 + $0x4c] ss:$16 sps:$4 sm:$0xff]   ;;  %v19333_v22 = vld [vmem:[#allocation13 + $0x40] ss:$16 sps:$4 sm:$0xff]  }
 0x98d   :  { %3557 = vmatpush1.bf16.msra.mxu0 %v19267_v19  ;;  %3643 = vmatpush1.bf16.msra.mxu1 %v19270_v44  ;;  %v19336_v19 = vld [vmem:[#allocation13 + $0x48] ss:$16 sps:$4 sm:$0xff]   ;;  %v19341_v44 = vld [vmem:[#allocation13 + $0x64] ss:$16 sps:$4 sm:$0xff]  }
 0x98e   :  { %3558 = vmatprep.subr.bf16.mxu0 %v19275_v31  ;;  %3644 = vmatprep.subr.bf16.mxu1 %v19278_v51  ;;  %v19339_v31 = vld [vmem:[#allocation13 + $0x60] ss:$16 sps:$4 sm:$0xff]   ;;  %v19342_v51 = vld [vmem:[#allocation13 + $0x68] ss:$16 sps:$4 sm:$0xff]  }
 0x991   :  { %3559 = vmatpush1.bf16.msra.mxu0 %v19273_v24  ;;  %3645 = vmatpush1.bf16.msra.mxu1 %v19276_v43  ;;  %v19347_v24 = vld [vmem:[#allocation13 + $0x84] ss:$16 sps:$4 sm:$0xff]   ;;  %v19345_v43 = vld [vmem:[#allocation13 + $0x80] ss:$16 sps:$4 sm:$0xff]  }
 0x992   :  { %3560 = vmatprep.subr.bf16.mxu0 %v19281_v54  ;;  %3646 = vmatprep.subr.bf16.mxu1 %v19284_v55  ;;  %v19348_v54 = vld [vmem:[#allocation13 + $0x88] ss:$16 sps:$4 sm:$0xff]   ;;  %v19353_v55 = vld [vmem:[#allocation13 + $0xa4] ss:$16 sps:$4 sm:$0xff]  }
 0x995   :  { %3561 = vmatpush1.bf16.msra.mxu0 %v19279_v0  ;;  %3647 = vmatpush1.bf16.msra.mxu1 %v19282_v4  ;;  %v19356_v0 = vld [vmem:[#allocation13 + $0xac] ss:$16 sps:$4 sm:$0xff]   ;;  %v19351_v4 = vld [vmem:[#allocation13 + $0xa0] ss:$16 sps:$4 sm:$0xff]  }
 0x996   :  { %3562 = vmatprep.subr.bf16.mxu0 %v19287_v12  ;;  %3648 = vmatprep.subr.bf16.mxu1 %v19290_v58  ;;  %v19354_v12 = vld [vmem:[#allocation13 + $0xa8] ss:$16 sps:$4 sm:$0xff]   ;;  %v19359_v58 = vld [vmem:[#allocation13 + $0xc4] ss:$16 sps:$4 sm:$0xff]  }
 0x999   :  { %3563 = vmatpush1.bf16.msra.mxu0 %v19285_v5  ;;  %3649 = vmatpush1.bf16.msra.mxu1 %v19288_v17  ;;  %v19362_v5 = vld [vmem:[#allocation13 + $0xcc] ss:$16 sps:$4 sm:$0xff]   ;;  %v19357_v17 = vld [vmem:[#allocation13 + $0xc0] ss:$16 sps:$4 sm:$0xff]  }
 0x99a   :  { %3564 = vmatprep.subr.bf16.mxu0 %v19293_v29  ;;  %3650 = vmatprep.subr.bf16.mxu1 %v19296_v49  ;;  %v19360_v29 = vld [vmem:[#allocation13 + $0xc8] ss:$16 sps:$4 sm:$0xff]   ;;  %v19365_v49 = vld [vmem:[#allocation13 + $0xe4] ss:$16 sps:$4 sm:$0xff]  }
 0x99d   :  { %3565 = vmatpush1.bf16.msra.mxu0 %v19291_v57  ;;  %3651 = vmatpush1.bf16.msra.mxu1 %v19294_v60  ;;  %v19368_v57 = vld [vmem:[#allocation13 + $0xec] ss:$16 sps:$4 sm:$0xff]   ;;  %v19363_v60 = vld [vmem:[#allocation13 + $0xe0] ss:$16 sps:$4 sm:$0xff]  }
 0x99e   :  { %3566 = vmatprep.subr.bf16.mxu0 %v19299_v14  ;;  %3652 = vmatprep.subr.bf16.mxu1 %v19302_v37  ;;  %v19366_v14 = vld [vmem:[#allocation13 + $0xe8] ss:$16 sps:$4 sm:$0xff]   ;;  %v19371_v37 = vld [vmem:[#allocation13 + $0x104] ss:$16 sps:$4 sm:$0xff]  }
 0x9a1   :  { %3567 = vmatpush1.bf16.msra.mxu0 %v19297_v45  ;;  %3653 = vmatpush1.bf16.msra.mxu1 %v19300_v46  ;;  %v19374_v45 = vld [vmem:[#allocation13 + $0x10c] ss:$16 sps:$4 sm:$0xff]   ;;  %v19369_v46 = vld [vmem:[#allocation13 + $0x100] ss:$16 sps:$4 sm:$0xff]  }
 0x9a2   :  { %3568 = vmatprep.subr.bf16.mxu0 %v19305_v53  ;;  %3654 = vmatprep.subr.bf16.mxu1 %v19308_v33  ;;  %v19372_v53 = vld [vmem:[#allocation13 + $0x108] ss:$16 sps:$4 sm:$0xff]   ;;  %v19377_v33 = vld [vmem:[#allocation13 + $0x124] ss:$16 sps:$4 sm:$0xff]  }
 0x9a5   :  { %3569 = vmatpush1.bf16.msra.mxu0 %v19303_v61  ;;  %3655 = vmatpush1.bf16.msra.mxu1 %v19306_v48  ;;  %v19380_v61 = vld [vmem:[#allocation13 + $0x12c] ss:$16 sps:$4 sm:$0xff]   ;;  %v19375_v48 = vld [vmem:[#allocation13 + $0x120] ss:$16 sps:$4 sm:$0xff]  }
 0x9a6   :  { %3570 = vmatprep.subr.bf16.mxu0 %v19311_v62  ;;  %3656 = vmatprep.subr.bf16.mxu1 %v19314_v8  ;;  %v19378_v62 = vld [vmem:[#allocation13 + $0x128] ss:$16 sps:$4 sm:$0xff]   ;;  %v19383_v8 = vld [vmem:[#allocation13 + $0x144] ss:$16 sps:$4 sm:$0xff]  }
 0x9a9   :  { %3571 = vmatpush1.bf16.msra.mxu0 %v19309_v38  ;;  %3657 = vmatpush1.bf16.msra.mxu1 %v19312_v18  ;;  %v19386_v38 = vld [vmem:[#allocation13 + $0x14c] ss:$16 sps:$4 sm:$0xff]   ;;  %v19381_v18 = vld [vmem:[#allocation13 + $0x140] ss:$16 sps:$4 sm:$0xff]  }
 0x9aa   :  { %3572 = vmatprep.subr.bf16.mxu0 %v19317_v56  ;;  %3658 = vmatprep.subr.bf16.mxu1 %v19320_v63  ;;  %v19384_v56 = vld [vmem:[#allocation13 + $0x148] ss:$16 sps:$4 sm:$0xff]   ;;  %v19389_v63 = vld [vmem:[#allocation13 + $0x164] ss:$16 sps:$4 sm:$0xff]  }
 0x9ad   :  { %3573 = vmatpush1.bf16.msra.mxu0 %v19315_v15  ;;  %3659 = vmatpush1.bf16.msra.mxu1 %v19318_v41  ;;  %v19392_v15 = vld [vmem:[#allocation13 + $0x16c] ss:$16 sps:$4 sm:$0xff]   ;;  %v19387_v41 = vld [vmem:[#allocation13 + $0x160] ss:$16 sps:$4 sm:$0xff]  }
 0x9ae   :  { %4311 = vmatprep.subr.bf16.mxu0 %v19323_v1  ;;  %4397 = vmatprep.subr.bf16.mxu1 %v19326_v9  ;;  %v19390_v1 = vld [vmem:[#allocation13 + $0x168] ss:$16 sps:$4 sm:$0xff]   ;;  %v19395_v9 = vld [vmem:[#allocation13 + $0x184] ss:$16 sps:$4 sm:$0xff]  }
 0x9b0   :  { %3575 = vmatmul.mubr.bf16.vlgmr.msra.gmra.mrb[32].mxu0 %v22583_v32  ;;  %3661 = vmatmul.mubr.bf16.vlgmr.msra.gmra.mrb[32].mxu1 %v22583_v32  ;;  %v19344_v32 = vld [vmem:[#allocation13 + $0x6c] ss:$16 sps:$4 sm:$0xff]  }
 0x9b1   :  { %4312 = vmatpush1.bf16.msra.mxu0 %v19321_v13  ;;  %4343 = vmatprep.mubr.bf16.mxu0 %v22577_v6  ;;  %v19398_v13 = vld [vmem:[#allocation13 + $0x18c] ss:$16 sps:$4 sm:$0xff]  }
 0x9b2   :  { %4398 = vmatpush1.bf16.msra.mxu1 %v19324_v21  ;;  %4429 = vmatprep.mubr.bf16.mxu1 %v22577_v6  ;;  %v19350_v6 = vld [vmem:[#allocation13 + $0x8c] ss:$16 sps:$4 sm:$0xff]   ;;  %v19393_v21 = vld [vmem:[#allocation13 + $0x180] ss:$16 sps:$4 sm:$0xff]  }
 0x9b3   :  { %4313 = vmatprep.subr.bf16.mxu0 %v19329_v52  ;;  %4399 = vmatprep.subr.bf16.mxu1 %v19332_v2  ;;  %v19396_v52 = vld [vmem:[#allocation13 + $0x188] ss:$16 sps:$4 sm:$0xff]   ;;  %v19401_v2 = vld [vmem:[#allocation13 + $0x1a4] ss:$16 sps:$4 sm:$0xff]  }
 0x9b5   :  { %4314 = vmatpush1.bf16.msra.mxu0 %v19327_v7  ;;  %v19404_v7 = vld [vmem:[#allocation13 + $0x1ac] ss:$16 sps:$4 sm:$0xff]  }
 0x9b6   :  { %4400 = vmatpush1.bf16.msra.mxu1 %v19330_v26  ;;  %4315 = vmatprep.subr.bf16.mxu0 %v19335_v16  ;;  %v19399_v26 = vld [vmem:[#allocation13 + $0x1a0] ss:$16 sps:$4 sm:$0xff]   ;;  %v19402_v16 = vld [vmem:[#allocation13 + $0x1a8] ss:$16 sps:$4 sm:$0xff]  }
 0x9b7   :  { %4401 = vmatprep.subr.bf16.mxu1 %v19338_v10  ;;  %v19407_v10 = vld [vmem:[#allocation13 + $0x1c4] ss:$16 sps:$4 sm:$0xff]  }
 0x9b9   :  { %4316 = vmatpush1.bf16.msra.mxu0 %v19333_v22  ;;  %v19410_v22 = vld [vmem:[#allocation13 + $0x1cc] ss:$16 sps:$4 sm:$0xff]  }
 0x9ba   :  { %4402 = vmatpush1.bf16.msra.mxu1 %v19336_v19  ;;  %4317 = vmatprep.subr.bf16.mxu0 %v19341_v44  ;;  %v19405_v19 = vld [vmem:[#allocation13 + $0x1c0] ss:$16 sps:$4 sm:$0xff]   ;;  %v19408_v44 = vld [vmem:[#allocation13 + $0x1c8] ss:$16 sps:$4 sm:$0xff]  }
 0x9bb   :  { %4403 = vmatprep.subr.bf16.mxu1 %v19344_v32  ;;  %v19413_v32 = vld [vmem:[#allocation13 + $0x1e4] ss:$16 sps:$4 sm:$0xff]  }
 0x9bd   :  { %4318 = vmatpush1.bf16.msra.mxu0 %v19339_v31  ;;  %v19416_v31 = vld [vmem:[#allocation13 + $0x1ec] ss:$16 sps:$4 sm:$0xff]  }
 0x9be   :  { %4404 = vmatpush1.bf16.msra.mxu1 %v19342_v51  ;;  %4319 = vmatprep.subr.bf16.mxu0 %v19347_v24  ;;  %v19411_v51 = vld [vmem:[#allocation13 + $0x1e0] ss:$16 sps:$4 sm:$0xff]   ;;  %v19414_v24 = vld [vmem:[#allocation13 + $0x1e8] ss:$16 sps:$4 sm:$0xff]  }
 0x9bf   :  { %4405 = vmatprep.subr.bf16.mxu1 %v19350_v6  ;;  %v19419_v6 = vld [vmem:[#allocation13 + $0x204] ss:$16 sps:$4 sm:$0xff]  }
 0x9c1   :  { %4320 = vmatpush1.bf16.msra.mxu0 %v19345_v43  ;;  %v19422_v43 = vld [vmem:[#allocation13 + $0x20c] ss:$16 sps:$4 sm:$0xff]  }
 0x9c2   :  { %4406 = vmatpush1.bf16.msra.mxu1 %v19348_v54  ;;  %4321 = vmatprep.subr.bf16.mxu0 %v19353_v55  ;;  %v19417_v54 = vld [vmem:[#allocation13 + $0x200] ss:$16 sps:$4 sm:$0xff]   ;;  %v19420_v55 = vld [vmem:[#allocation13 + $0x208] ss:$16 sps:$4 sm:$0xff]  }
 0x9c3   :  { %4407 = vmatprep.subr.bf16.mxu1 %v19356_v0  ;;  %v19425_v0 = vld [vmem:[#allocation13 + $0x224] ss:$16 sps:$4 sm:$0xff]  }
 0x9c5   :  { %4322 = vmatpush1.bf16.msra.mxu0 %v19351_v4  ;;  %v19428_v4 = vld [vmem:[#allocation13 + $0x22c] ss:$16 sps:$4 sm:$0xff]  }
 0x9c6   :  { %4408 = vmatpush1.bf16.msra.mxu1 %v19354_v12  ;;  %4323 = vmatprep.subr.bf16.mxu0 %v19359_v58  ;;  %v19423_v12 = vld [vmem:[#allocation13 + $0x220] ss:$16 sps:$4 sm:$0xff]   ;;  %v19426_v58 = vld [vmem:[#allocation13 + $0x228] ss:$16 sps:$4 sm:$0xff]  }
 0x9c7   :  { %4409 = vmatprep.subr.bf16.mxu1 %v19362_v5  ;;  %v19431_v5 = vld [vmem:[#allocation13 + $0x244] ss:$16 sps:$4 sm:$0xff]  }
 0x9c9   :  { %4324 = vmatpush1.bf16.msra.mxu0 %v19357_v17  ;;  %v19434_v17 = vld [vmem:[#allocation13 + $0x24c] ss:$16 sps:$4 sm:$0xff]  }
 0x9ca   :  { %4410 = vmatpush1.bf16.msra.mxu1 %v19360_v29  ;;  %4325 = vmatprep.subr.bf16.mxu0 %v19365_v49  ;;  %v19429_v29 = vld [vmem:[#allocation13 + $0x240] ss:$16 sps:$4 sm:$0xff]   ;;  %v19432_v49 = vld [vmem:[#allocation13 + $0x248] ss:$16 sps:$4 sm:$0xff]  }
 0x9cb   :  { %4411 = vmatprep.subr.bf16.mxu1 %v19368_v57  ;;  %v19437_v57 = vld [vmem:[#allocation13 + $0x264] ss:$16 sps:$4 sm:$0xff]  }
 0x9cd   :  { %4326 = vmatpush1.bf16.msra.mxu0 %v19363_v60  ;;  %v19435_v60 = vld [vmem:[#allocation13 + $0x260] ss:$16 sps:$4 sm:$0xff]  }
 0x9ce   :  { %4412 = vmatpush1.bf16.msra.mxu1 %v19366_v14  ;;  %4327 = vmatprep.subr.bf16.mxu0 %v19371_v37  ;;  %v19438_v14 = vld [vmem:[#allocation13 + $0x268] ss:$16 sps:$4 sm:$0xff]   ;;  %v19443_v37 = vld [vmem:[#allocation13 + $0x284] ss:$16 sps:$4 sm:$0xff]  }
 0x9cf   :  { %4413 = vmatprep.subr.bf16.mxu1 %v19374_v45  ;;  %v19446_v45 = vld [vmem:[#allocation13 + $0x28c] ss:$16 sps:$4 sm:$0xff]  }
 0x9d1   :  { %4328 = vmatpush1.bf16.msra.mxu0 %v19369_v46  ;;  %v19444_v46 = vld [vmem:[#allocation13 + $0x288] ss:$16 sps:$4 sm:$0xff]  }
 0x9d2   :  { %4414 = vmatpush1.bf16.msra.mxu1 %v19372_v53  ;;  %4329 = vmatprep.subr.bf16.mxu0 %v19377_v33  ;;  %v19449_v53 = vld [vmem:[#allocation13 + $0x2a4] ss:$16 sps:$4 sm:$0xff]   ;;  %v19452_v33 = vld [vmem:[#allocation13 + $0x2ac] ss:$16 sps:$4 sm:$0xff]  }
 0x9d3   :  { %4415 = vmatprep.subr.bf16.mxu1 %v19380_v61  ;;  %v19447_v61 = vld [vmem:[#allocation13 + $0x2a0] ss:$16 sps:$4 sm:$0xff]  }
 0x9d5   :  { %4330 = vmatpush1.bf16.msra.mxu0 %v19375_v48  ;;  %v19450_v48 = vld [vmem:[#allocation13 + $0x2a8] ss:$16 sps:$4 sm:$0xff]  }
 0x9d6   :  { %4416 = vmatpush1.bf16.msra.mxu1 %v19378_v62  ;;  %4331 = vmatprep.subr.bf16.mxu0 %v19383_v8  ;;  %v19455_v62 = vld [vmem:[#allocation13 + $0x2c4] ss:$16 sps:$4 sm:$0xff]   ;;  %v19458_v8 = vld [vmem:[#allocation13 + $0x2cc] ss:$16 sps:$4 sm:$0xff]  }
 0x9d7   :  { %4417 = vmatprep.subr.bf16.mxu1 %v19386_v38  ;;  %v19453_v38 = vld [vmem:[#allocation13 + $0x2c0] ss:$16 sps:$4 sm:$0xff]  }
 0x9d9   :  { %4332 = vmatpush1.bf16.msra.mxu0 %v19381_v18  ;;  %v19456_v18 = vld [vmem:[#allocation13 + $0x2c8] ss:$16 sps:$4 sm:$0xff]  }
 0x9da   :  { %4418 = vmatpush1.bf16.msra.mxu1 %v19384_v56  ;;  %4333 = vmatprep.subr.bf16.mxu0 %v19389_v63  ;;  %v19461_v56 = vld [vmem:[#allocation13 + $0x2e4] ss:$16 sps:$4 sm:$0xff]   ;;  %v19464_v63 = vld [vmem:[#allocation13 + $0x2ec] ss:$16 sps:$4 sm:$0xff]  }
 0x9db   :  { %4419 = vmatprep.subr.bf16.mxu1 %v19392_v15  ;;  %v19459_v15 = vld [vmem:[#allocation13 + $0x2e0] ss:$16 sps:$4 sm:$0xff]  }
 0x9dd   :  { %4334 = vmatpush1.bf16.msra.mxu0 %v19387_v41  ;;  %v19462_v41 = vld [vmem:[#allocation13 + $0x2e8] ss:$16 sps:$4 sm:$0xff]  }
 0x9de   :  { %4420 = vmatpush1.bf16.msra.mxu1 %v19390_v1  ;;  %4335 = vmatprep.subr.bf16.mxu0 %v19395_v9  ;;  %v19467_v1 = vld [vmem:[#allocation13 + $0x304] ss:$16 sps:$4 sm:$0xff]   ;;  %v19470_v9 = vld [vmem:[#allocation13 + $0x30c] ss:$16 sps:$4 sm:$0xff]  }
 0x9df   :  { %4421 = vmatprep.subr.bf16.mxu1 %v19398_v13  ;;  %v19465_v13 = vld [vmem:[#allocation13 + $0x300] ss:$16 sps:$4 sm:$0xff]  }
 0x9e1   :  { %4336 = vmatpush1.bf16.msra.mxu0 %v19393_v21  ;;  %v19468_v21 = vld [vmem:[#allocation13 + $0x308] ss:$16 sps:$4 sm:$0xff]  }
 0x9e2   :  { %4422 = vmatpush1.bf16.msra.mxu1 %v19396_v52  ;;  %4337 = vmatprep.subr.bf16.mxu0 %v19401_v2  ;;  %v19473_v52 = vld [vmem:[#allocation13 + $0x324] ss:$16 sps:$4 sm:$0xff]   ;;  %v19476_v2 = vld [vmem:[#allocation13 + $0x32c] ss:$16 sps:$4 sm:$0xff]  }
 0x9e3   :  { %4423 = vmatprep.subr.bf16.mxu1 %v19404_v7  ;;  %v19471_v7 = vld [vmem:[#allocation13 + $0x320] ss:$16 sps:$4 sm:$0xff]  }
 0x9e5   :  { %4338 = vmatpush1.bf16.msra.mxu0 %v19399_v26  ;;  %v19474_v26 = vld [vmem:[#allocation13 + $0x328] ss:$16 sps:$4 sm:$0xff]  }
 0x9e6   :  { %4424 = vmatpush1.bf16.msra.mxu1 %v19402_v16  ;;  %4339 = vmatprep.subr.bf16.mxu0 %v19407_v10  ;;  %v19479_v16 = vld [vmem:[#allocation13 + $0x344] ss:$16 sps:$4 sm:$0xff]   ;;  %v19482_v10 = vld [vmem:[#allocation13 + $0x34c] ss:$16 sps:$4 sm:$0xff]  }
 0x9e7   :  { %4425 = vmatprep.subr.bf16.mxu1 %v19410_v22  ;;  %v19477_v22 = vld [vmem:[#allocation13 + $0x340] ss:$16 sps:$4 sm:$0xff]  }
 0x9e9   :  { %4340 = vmatpush1.bf16.msra.mxu0 %v19405_v19  ;;  %v19480_v19 = vld [vmem:[#allocation13 + $0x348] ss:$16 sps:$4 sm:$0xff]  }
 0x9ea   :  { %4426 = vmatpush1.bf16.msra.mxu1 %v19408_v44  ;;  %4341 = vmatprep.subr.bf16.mxu0 %v19413_v32  ;;  %v19485_v44 = vld [vmem:[#allocation13 + $0x364] ss:$16 sps:$4 sm:$0xff]   ;;  %v19488_v32 = vld [vmem:[#allocation13 + $0x36c] ss:$16 sps:$4 sm:$0xff]  }
 0x9eb   :  { %4427 = vmatprep.subr.bf16.mxu1 %v19416_v31  ;;  %v19483_v31 = vld [vmem:[#allocation13 + $0x360] ss:$16 sps:$4 sm:$0xff]  }
 0x9ed   :  { %4342 = vmatpush1.bf16.msra.mxu0 %v19411_v51  ;;  %v19486_v51 = vld [vmem:[#allocation13 + $0x368] ss:$16 sps:$4 sm:$0xff]  }
 0x9ee   :  { %4428 = vmatpush1.bf16.msra.mxu1 %v19414_v24  ;;  %4354 = vmatprep.subr.bf16.mxu0 %v19419_v6  ;;  %v19491_v24 = vld [vmem:[#allocation13 + $0x384] ss:$16 sps:$4 sm:$0xff]   ;;  %v19494_v6 = vld [vmem:[#allocation13 + $0x38c] ss:$16 sps:$4 sm:$0xff]  }
 0x9ef   :  { %4440 = vmatprep.subr.bf16.mxu1 %v19422_v43  ;;  %v19489_v43 = vld [vmem:[#allocation13 + $0x380] ss:$16 sps:$4 sm:$0xff]  }
 0x9f0   :  { %4344 = vmatmul.mubr.bf16.vlgmr.msra.gmra.mrb[32].mxu0 %v22575_v20 }
 0x9f1   :  { %4430 = vmatmul.mubr.bf16.vlgmr.msra.gmra.mrb[32].mxu1 %v22575_v20  ;;  %4355 = vmatpush1.bf16.msra.mxu0 %v19417_v54  ;;  %v19440_v20 = vld [vmem:[#allocation13 + $0x26c] ss:$16 sps:$4 sm:$0xff]   ;;  %v19492_v54 = vld [vmem:[#allocation13 + $0x388] ss:$16 sps:$4 sm:$0xff]  }
 0x9f2   :  { %4386 = vmatprep.mubr.bf16.mxu0 %v22581_v50  ;;  %4441 = vmatpush1.bf16.msra.mxu1 %v19420_v55  ;;  %v19497_v55 = vld [vmem:[#allocation13 + $0x3a4] ss:$16 sps:$4 sm:$0xff]  }
 0x9f3   :  { %4472 = vmatprep.mubr.bf16.mxu1 %v22581_v50  ;;  %4356 = vmatprep.subr.bf16.mxu0 %v19425_v0  ;;  %v19441_v50 = vld [vmem:[#allocation13 + $0x280] ss:$16 sps:$4 sm:$0xff]   ;;  %v19500_v0 = vld [vmem:[#allocation13 + $0x3ac] ss:$16 sps:$4 sm:$0xff]  }
 0x9f4   :  { %4442 = vmatprep.subr.bf16.mxu1 %v19428_v4  ;;  %v19495_v4 = vld [vmem:[#allocation13 + $0x3a0] ss:$16 sps:$4 sm:$0xff]  }
 0x9f5   :  { %4357 = vmatpush1.bf16.msra.mxu0 %v19423_v12  ;;  %v19498_v12 = vld [vmem:[#allocation13 + $0x3a8] ss:$16 sps:$4 sm:$0xff]  }
 0x9f6   :  { %4443 = vmatpush1.bf16.msra.mxu1 %v19426_v58  ;;  %4358 = vmatprep.subr.bf16.mxu0 %v19431_v5  ;;  %v19503_v58 = vld [vmem:[#allocation13 + $0x3c4] ss:$16 sps:$4 sm:$0xff]   ;;  %v19506_v5 = vld [vmem:[#allocation13 + $0x3cc] ss:$16 sps:$4 sm:$0xff]  }
 0x9f7   :  { %4444 = vmatprep.subr.bf16.mxu1 %v19434_v17  ;;  %v19501_v17 = vld [vmem:[#allocation13 + $0x3c0] ss:$16 sps:$4 sm:$0xff]  }
 0x9f9   :  { %4359 = vmatpush1.bf16.msra.mxu0 %v19429_v29  ;;  %v19504_v29 = vld [vmem:[#allocation13 + $0x3c8] ss:$16 sps:$4 sm:$0xff]  }
 0x9fa   :  { %4445 = vmatpush1.bf16.msra.mxu1 %v19432_v49  ;;  %4360 = vmatprep.subr.bf16.mxu0 %v19437_v57  ;;  %v19509_v49 = vld [vmem:[#allocation13 + $0x3e4] ss:$16 sps:$4 sm:$0xff]   ;;  %v19512_v57 = vld [vmem:[#allocation13 + $0x3ec] ss:$16 sps:$4 sm:$0xff]  }
 0x9fb   :  { %4446 = vmatprep.subr.bf16.mxu1 %v19440_v20  ;;  %v19507_v20 = vld [vmem:[#allocation13 + $0x3e0] ss:$16 sps:$4 sm:$0xff]  }
 0x9fd   :  { %4361 = vmatpush1.bf16.msra.mxu0 %v19435_v60  ;;  %v19510_v60 = vld [vmem:[#allocation13 + $0x3e8] ss:$16 sps:$4 sm:$0xff]  }
 0x9fe   :  { %4447 = vmatpush1.bf16.msra.mxu1 %v19438_v14  ;;  %4362 = vmatprep.subr.bf16.mxu0 %v19443_v37  ;;  %v19516_v14 = vld [vmem:[#allocation13 + $0x804] ss:$16 sps:$4 sm:$0xff]   ;;  %v19519_v37 = vld [vmem:[#allocation13 + $0x80c] ss:$16 sps:$4 sm:$0xff]  }
 0x9ff   :  { %4448 = vmatprep.subr.bf16.mxu1 %v19446_v45  ;;  %v19513_v45 = vld [vmem:[#allocation11 + $0x10] sm:$0xff]  }
 0xa01   :  { %4363 = vmatpush1.bf16.msra.mxu0 %v19441_v50  ;;  %v19526_v50 = vld [vmem:[#allocation13 + $0x840] ss:$16 sps:$4 sm:$0xff]  }
 0xa02   :  { %4449 = vmatpush1.bf16.msra.mxu1 %v19444_v46  ;;  %4364 = vmatprep.subr.bf16.mxu0 %v19449_v53  ;;  %v19534_v46 = vld [vmem:[#allocation13 + $0x864] ss:$16 sps:$4 sm:$0xff]   ;;  %v19537_v53 = vld [vmem:[#allocation13 + $0x86c] ss:$16 sps:$4 sm:$0xff]  }
 0xa03   :  { %4450 = vmatprep.subr.bf16.mxu1 %v19452_v33  ;;  %v19532_v33 = vld [vmem:[#allocation13 + $0x860] ss:$16 sps:$4 sm:$0xff]  }
 0xa05   :  { %4365 = vmatpush1.bf16.msra.mxu0 %v19447_v61  ;;  %v19535_v61 = vld [vmem:[#allocation13 + $0x868] ss:$16 sps:$4 sm:$0xff]  }
 0xa06   :  { %4451 = vmatpush1.bf16.msra.mxu1 %v19450_v48  ;;  %4366 = vmatprep.subr.bf16.mxu0 %v19455_v62  ;;  %v19540_v48 = vld [vmem:[#allocation13 + $0x884] ss:$16 sps:$4 sm:$0xff]   ;;  %v19543_v62 = vld [vmem:[#allocation13 + $0x88c] ss:$16 sps:$4 sm:$0xff]  }
 0xa07   :  { %4452 = vmatprep.subr.bf16.mxu1 %v19458_v8  ;;  %v19538_v8 = vld [vmem:[#allocation13 + $0x880] ss:$16 sps:$4 sm:$0xff]  }
 0xa09   :  { %4367 = vmatpush1.bf16.msra.mxu0 %v19453_v38  ;;  %v19541_v38 = vld [vmem:[#allocation13 + $0x888] ss:$16 sps:$4 sm:$0xff]  }
 0xa0a   :  { %4453 = vmatpush1.bf16.msra.mxu1 %v19456_v18  ;;  %4368 = vmatprep.subr.bf16.mxu0 %v19461_v56  ;;  %v19546_v18 = vld [vmem:[#allocation13 + $0x8a4] ss:$16 sps:$4 sm:$0xff]   ;;  %v19549_v56 = vld [vmem:[#allocation13 + $0x8ac] ss:$16 sps:$4 sm:$0xff]  }
 0xa0b   :  { %4454 = vmatprep.subr.bf16.mxu1 %v19464_v63  ;;  %v19544_v63 = vld [vmem:[#allocation13 + $0x8a0] ss:$16 sps:$4 sm:$0xff]  }
 0xa0d   :  { %4369 = vmatpush1.bf16.msra.mxu0 %v19459_v15  ;;  %v19547_v15 = vld [vmem:[#allocation13 + $0x8a8] ss:$16 sps:$4 sm:$0xff]  }
 0xa0e   :  { %4455 = vmatpush1.bf16.msra.mxu1 %v19462_v41  ;;  %4370 = vmatprep.subr.bf16.mxu0 %v19467_v1  ;;  %v19552_v41 = vld [vmem:[#allocation13 + $0x8c4] ss:$16 sps:$4 sm:$0xff]   ;;  %v19555_v1 = vld [vmem:[#allocation13 + $0x8cc] ss:$16 sps:$4 sm:$0xff]  }
 0xa0f   :  { %4456 = vmatprep.subr.bf16.mxu1 %v19470_v9  ;;  %v19550_v9 = vld [vmem:[#allocation13 + $0x8c0] ss:$16 sps:$4 sm:$0xff]  }
 0xa11   :  { %4371 = vmatpush1.bf16.msra.mxu0 %v19465_v13  ;;  %v19553_v13 = vld [vmem:[#allocation13 + $0x8c8] ss:$16 sps:$4 sm:$0xff]  }
 0xa12   :  { %4457 = vmatpush1.bf16.msra.mxu1 %v19468_v21  ;;  %4372 = vmatprep.subr.bf16.mxu0 %v19473_v52  ;;  %v19558_v21 = vld [vmem:[#allocation13 + $0x8e4] ss:$16 sps:$4 sm:$0xff]   ;;  %v19561_v52 = vld [vmem:[#allocation13 + $0x8ec] ss:$16 sps:$4 sm:$0xff]  }
 0xa13   :  { %4458 = vmatprep.subr.bf16.mxu1 %v19476_v2  ;;  %v19556_v2 = vld [vmem:[#allocation13 + $0x8e0] ss:$16 sps:$4 sm:$0xff]  }
 0xa15   :  { %4373 = vmatpush1.bf16.msra.mxu0 %v19471_v7  ;;  %v19559_v7 = vld [vmem:[#allocation13 + $0x8e8] ss:$16 sps:$4 sm:$0xff]  }
 0xa16   :  { %4459 = vmatpush1.bf16.msra.mxu1 %v19474_v26  ;;  %4374 = vmatprep.subr.bf16.mxu0 %v19479_v16  ;;  %v19564_v26 = vld [vmem:[#allocation13 + $0x904] ss:$16 sps:$4 sm:$0xff]   ;;  %v19567_v16 = vld [vmem:[#allocation13 + $0x90c] ss:$16 sps:$4 sm:$0xff]  }
 0xa17   :  { %4460 = vmatprep.subr.bf16.mxu1 %v19482_v10  ;;  %v19562_v10 = vld [vmem:[#allocation13 + $0x900] ss:$16 sps:$4 sm:$0xff]  }
 0xa19   :  { %4375 = vmatpush1.bf16.msra.mxu0 %v19477_v22  ;;  %v19565_v22 = vld [vmem:[#allocation13 + $0x908] ss:$16 sps:$4 sm:$0xff]  }
 0xa1a   :  { %4461 = vmatpush1.bf16.msra.mxu1 %v19480_v19  ;;  %4376 = vmatprep.subr.bf16.mxu0 %v19485_v44  ;;  %v19570_v19 = vld [vmem:[#allocation13 + $0x924] ss:$16 sps:$4 sm:$0xff]   ;;  %v19573_v44 = vld [vmem:[#allocation13 + $0x92c] ss:$16 sps:$4 sm:$0xff]  }
 0xa1b   :  { %4462 = vmatprep.subr.bf16.mxu1 %v19488_v32  ;;  %v19568_v32 = vld [vmem:[#allocation13 + $0x920] ss:$16 sps:$4 sm:$0xff]  }
 0xa1d   :  { %4377 = vmatpush1.bf16.msra.mxu0 %v19483_v31  ;;  %v19571_v31 = vld [vmem:[#allocation13 + $0x928] ss:$16 sps:$4 sm:$0xff]  }
 0xa1e   :  { %4463 = vmatpush1.bf16.msra.mxu1 %v19486_v51  ;;  %4378 = vmatprep.subr.bf16.mxu0 %v19491_v24  ;;  %v19576_v51 = vld [vmem:[#allocation13 + $0x944] ss:$16 sps:$4 sm:$0xff]   ;;  %v19579_v24 = vld [vmem:[#allocation13 + $0x94c] ss:$16 sps:$4 sm:$0xff]  }
 0xa1f   :  { %4464 = vmatprep.subr.bf16.mxu1 %v19494_v6  ;;  %v19574_v6 = vld [vmem:[#allocation13 + $0x940] ss:$16 sps:$4 sm:$0xff]  }
 0xa21   :  { %4379 = vmatpush1.bf16.msra.mxu0 %v19489_v43  ;;  %v19577_v43 = vld [vmem:[#allocation13 + $0x948] ss:$16 sps:$4 sm:$0xff]  }
 0xa22   :  { %4465 = vmatpush1.bf16.msra.mxu1 %v19492_v54  ;;  %4380 = vmatprep.subr.bf16.mxu0 %v19497_v55  ;;  %v19582_v54 = vld [vmem:[#allocation13 + $0x964] ss:$16 sps:$4 sm:$0xff]   ;;  %v19585_v55 = vld [vmem:[#allocation13 + $0x96c] ss:$16 sps:$4 sm:$0xff]  }
 0xa23   :  { %4466 = vmatprep.subr.bf16.mxu1 %v19500_v0  ;;  %v19580_v0 = vld [vmem:[#allocation13 + $0x960] ss:$16 sps:$4 sm:$0xff]  }
 0xa25   :  { %4381 = vmatpush1.bf16.msra.mxu0 %v19495_v4  ;;  %v19583_v4 = vld [vmem:[#allocation13 + $0x968] ss:$16 sps:$4 sm:$0xff]  }
 0xa26   :  { %4467 = vmatpush1.bf16.msra.mxu1 %v19498_v12  ;;  %4382 = vmatprep.subr.bf16.mxu0 %v19503_v58  ;;  %v19588_v12 = vld [vmem:[#allocation13 + $0x984] ss:$16 sps:$4 sm:$0xff]   ;;  %v19591_v58 = vld [vmem:[#allocation13 + $0x98c] ss:$16 sps:$4 sm:$0xff]  }
 0xa27   :  { %4468 = vmatprep.subr.bf16.mxu1 %v19506_v5  ;;  %v19586_v5 = vld [vmem:[#allocation13 + $0x980] ss:$16 sps:$4 sm:$0xff]  }
 0xa29   :  { %4383 = vmatpush1.bf16.msra.mxu0 %v19501_v17  ;;  %v19589_v17 = vld [vmem:[#allocation13 + $0x988] ss:$16 sps:$4 sm:$0xff]  }
 0xa2a   :  { %4469 = vmatpush1.bf16.msra.mxu1 %v19504_v29  ;;  %4384 = vmatprep.subr.bf16.mxu0 %v19509_v49  ;;  %v19594_v29 = vld [vmem:[#allocation13 + $0x9a4] ss:$16 sps:$4 sm:$0xff]   ;;  %v19597_v49 = vld [vmem:[#allocation13 + $0x9ac] ss:$16 sps:$4 sm:$0xff]  }
 0xa2b   :  { %4470 = vmatprep.subr.bf16.mxu1 %v19512_v57  ;;  %v19592_v57 = vld [vmem:[#allocation13 + $0x9a0] ss:$16 sps:$4 sm:$0xff]  }
 0xa2d   :  { %4385 = vmatpush1.bf16.msra.mxu0 %v19507_v20  ;;  %v19595_v20 = vld [vmem:[#allocation13 + $0x9a8] ss:$16 sps:$4 sm:$0xff]  }
 0xa2e   :  { %4471 = vmatpush1.bf16.msra.mxu1 %v19510_v60  ;;  %4494 = vmatprep.subr.bf16.mxu0 %v22521_v40  ;;  %v19514_v40 = vld [vmem:[#allocation13 + $0x800] ss:$16 sps:$4 sm:$0xff]   ;;  %v19600_v60 = vld [vmem:[#allocation13 + $0x9c4] ss:$16 sps:$4 sm:$0xff]  }
 0xa2f   :  { %4537 = vmatprep.subr.bf16.mxu1 %v22525_v23  ;;  %v19522_v23 = vld [vmem:[#allocation13 + $0x824] ss:$16 sps:$4 sm:$0xff]  }
 0xa30   :  { %4387 = vmatmul.mubr.bf16.vlgmr.msra.gmra.mrb[32].mxu0 %v22579_v27 }
 0xa31   :  { %4473 = vmatmul.mubr.bf16.vlgmr.msra.gmra.mrb[32].mxu1 %v22579_v27  ;;  %4495 = vmatpush1.bf16.msra.mxu0 %v22523_v36  ;;  %v19517_v36 = vld [vmem:[#allocation13 + $0x808] ss:$16 sps:$4 sm:$0xff]   ;;  %v19528_v27 = vld [vmem:[#allocation13 + $0x844] ss:$16 sps:$4 sm:$0xff]  }
 0xa32   :  { %4538 = vmatpush1.bf16.msra.mxu1 %v22532_v34  ;;  %4496 = vmatprep.subr.bf16.mxu0 %v22539_v3  ;;  %v19525_v34 = vld [vmem:[#allocation13 + $0x82c] ss:$16 sps:$4 sm:$0xff]   ;;  %v19520_v3 = vld [vmem:[#allocation13 + $0x820] ss:$16 sps:$4 sm:$0xff]  }
 0xa33   :  { %4539 = vmatprep.subr.bf16.mxu1 %v22544_v42  ;;  %4526 = vmatprep.mubr.bf16.mxu0 %v23683_v28  ;;  %v19523_v42 = vld [vmem:[#allocation13 + $0x828] ss:$16 sps:$4 sm:$0xff]  }
 0xa34   :  { %4569 = vmatprep.mubr.bf16.mxu1 %v23683_v28 }
 0xa35   :  { %4497 = vmatpush1.bf16.msra.mxu0 %v22552_v25  ;;  %v19531_v25 = vld [vmem:[#allocation13 + $0x84c] ss:$16 sps:$4 sm:$0xff]  }
 0xa36   :  { %4540 = vmatpush1.bf16.msra.mxu1 %v22558_v11  ;;  %5353 = vmatprep.subr.bf16.mxu0 %v19516_v14  ;;  %v19529_v11 = vld [vmem:[#allocation13 + $0x848] ss:$16 sps:$4 sm:$0xff]   ;;  %v19603_v14 = vld [vmem:[#allocation13 + $0x9cc] ss:$16 sps:$4 sm:$0xff]  }
 0xa37   :  { %5439 = vmatprep.subr.bf16.mxu1 %v19519_v37  ;;  %v19598_v37 = vld [vmem:[#allocation13 + $0x9c0] ss:$16 sps:$4 sm:$0xff]  }
 0xa38   :  { %16133 = vmatmul.mubr.msk.bf16.vlgmr.msra.gmra.mrb[36].mxu0 %vm1743_vm2, %v19513_v45 }
 0xa39   :  { %16134 = vmatmul.mubr.msk.bf16.vlgmr.msra.gmra.mrb[36].mxu1 %vm1743_vm2, %v19513_v45  ;;  %5354 = vmatpush1.bf16.msra.mxu0 %v19514_v40  ;;  %v19601_v45 = vld [vmem:[#allocation13 + $0x9c8] ss:$16 sps:$4 sm:$0xff]   ;;  %v19604_v40 = vld [vmem:[#allocation13 + $0x9e0] ss:$16 sps:$4 sm:$0xff]  }
 0xa3a   :  { %5440 = vmatpush1.bf16.msra.mxu1 %v19517_v36  ;;  %5355 = vmatprep.subr.bf16.mxu0 %v19522_v23  ;;  %v19606_v36 = vld [vmem:[#allocation13 + $0x9e4] ss:$16 sps:$4 sm:$0xff]   ;;  %v19607_v23 = vld [vmem:[#allocation13 + $0x9e8] ss:$16 sps:$4 sm:$0xff]  }
 0xa3b   :  { %5441 = vmatprep.subr.bf16.mxu1 %v19525_v34  ;;  %v19609_v34 = vld [vmem:[#allocation13 + $0x9ec] ss:$16 sps:$4 sm:$0xff]  }
 0xa3d   :  { %5356 = vmatpush1.bf16.msra.mxu0 %v19520_v3  ;;  %v19612_v3 = vld [vmem:[#allocation13 + $0xa04] ss:$16 sps:$4 sm:$0xff]  }
 0xa3e   :  { %5442 = vmatpush1.bf16.msra.mxu1 %v19523_v42  ;;  %5357 = vmatprep.subr.bf16.mxu0 %v19528_v27  ;;  %v19615_v42 = vld [vmem:[#allocation13 + $0xa0c] ss:$16 sps:$4 sm:$0xff]  }
 0xa3f   :  { %5443 = vmatprep.subr.bf16.mxu1 %v19531_v25 }
 0xa41   :  { %5358 = vmatpush1.bf16.msra.mxu0 %v19526_v50 }
 0xa42   :  { %5444 = vmatpush1.bf16.msra.mxu1 %v19529_v11  ;;  %5359 = vmatprep.subr.bf16.mxu0 %v19534_v46 }
 0xa43   :  { %5445 = vmatprep.subr.bf16.mxu1 %v19537_v53 }
 0xa45   :  { %5360 = vmatpush1.bf16.msra.mxu0 %v19532_v33 }
 0xa46   :  { %5446 = vmatpush1.bf16.msra.mxu1 %v19535_v61  ;;  %5361 = vmatprep.subr.bf16.mxu0 %v19540_v48 }
 0xa47   :  { %5447 = vmatprep.subr.bf16.mxu1 %v19543_v62  ;;  %v19610_v62 = vld [vmem:[#allocation13 + $0xa00] ss:$16 sps:$4 sm:$0xff]  }
 0xa49   :  { %5362 = vmatpush1.bf16.msra.mxu0 %v19538_v8  ;;  %v19613_v8 = vld [vmem:[#allocation13 + $0xa08] ss:$16 sps:$4 sm:$0xff]  }
 0xa4a   :  { %5448 = vmatpush1.bf16.msra.mxu1 %v19541_v38  ;;  %5363 = vmatprep.subr.bf16.mxu0 %v19546_v18 }
 0xa4b   :  { %5449 = vmatprep.subr.bf16.mxu1 %v19549_v56  ;;  %v19618_v56 = vld [vmem:[#allocation13 + $0xa24] ss:$16 sps:$4 sm:$0xff]  }
 0xa4d   :  { %5364 = vmatpush1.bf16.msra.mxu0 %v19544_v63  ;;  %v19621_v63 = vld [vmem:[#allocation13 + $0xa2c] ss:$16 sps:$4 sm:$0xff]  }
 0xa4e   :  { %5450 = vmatpush1.bf16.msra.mxu1 %v19547_v15  ;;  %5365 = vmatprep.subr.bf16.mxu0 %v19552_v41  ;;  %v19616_v41 = vld [vmem:[#allocation13 + $0xa20] ss:$16 sps:$4 sm:$0xff]  }
 0xa4f   :  { %5451 = vmatprep.subr.bf16.mxu1 %v19555_v1  ;;  %v19619_v1 = vld [vmem:[#allocation13 + $0xa28] ss:$16 sps:$4 sm:$0xff]  }
 0xa51   :  { %5366 = vmatpush1.bf16.msra.mxu0 %v19550_v9  ;;  %v19624_v9 = vld [vmem:[#allocation13 + $0xa44] ss:$16 sps:$4 sm:$0xff]  }
 0xa52   :  { %5452 = vmatpush1.bf16.msra.mxu1 %v19553_v13  ;;  %5367 = vmatprep.subr.bf16.mxu0 %v19558_v21  ;;  %v19627_v13 = vld [vmem:[#allocation13 + $0xa4c] ss:$16 sps:$4 sm:$0xff]   ;;  %v19622_v21 = vld [vmem:[#allocation13 + $0xa40] ss:$16 sps:$4 sm:$0xff]  }
 0xa53   :  { %5453 = vmatprep.subr.bf16.mxu1 %v19561_v52  ;;  %v19625_v52 = vld [vmem:[#allocation13 + $0xa48] ss:$16 sps:$4 sm:$0xff]  }
 0xa55   :  { %5368 = vmatpush1.bf16.msra.mxu0 %v19556_v2  ;;  %v19630_v2 = vld [vmem:[#allocation13 + $0xa64] ss:$16 sps:$4 sm:$0xff]  }
 0xa56   :  { %5454 = vmatpush1.bf16.msra.mxu1 %v19559_v7  ;;  %5369 = vmatprep.subr.bf16.mxu0 %v19564_v26  ;;  %v19633_v7 = vld [vmem:[#allocation13 + $0xa6c] ss:$16 sps:$4 sm:$0xff]   ;;  %v19628_v26 = vld [vmem:[#allocation13 + $0xa60] ss:$16 sps:$4 sm:$0xff]  }
 0xa57   :  { %5455 = vmatprep.subr.bf16.mxu1 %v19567_v16  ;;  %v19631_v16 = vld [vmem:[#allocation13 + $0xa68] ss:$16 sps:$4 sm:$0xff]  }
 0xa59   :  { %5370 = vmatpush1.bf16.msra.mxu0 %v19562_v10  ;;  %v19636_v10 = vld [vmem:[#allocation13 + $0xa84] ss:$16 sps:$4 sm:$0xff]  }
 0xa5a   :  { %5456 = vmatpush1.bf16.msra.mxu1 %v19565_v22  ;;  %5371 = vmatprep.subr.bf16.mxu0 %v19570_v19  ;;  %v19639_v22 = vld [vmem:[#allocation13 + $0xa8c] ss:$16 sps:$4 sm:$0xff]   ;;  %v19634_v19 = vld [vmem:[#allocation13 + $0xa80] ss:$16 sps:$4 sm:$0xff]  }
 0xa5b   :  { %5457 = vmatprep.subr.bf16.mxu1 %v19573_v44  ;;  %v19637_v44 = vld [vmem:[#allocation13 + $0xa88] ss:$16 sps:$4 sm:$0xff]  }
 0xa5d   :  { %5372 = vmatpush1.bf16.msra.mxu0 %v19568_v32  ;;  %v19642_v32 = vld [vmem:[#allocation13 + $0xaa4] ss:$16 sps:$4 sm:$0xff]  }
 0xa5e   :  { %5458 = vmatpush1.bf16.msra.mxu1 %v19571_v31  ;;  %5373 = vmatprep.subr.bf16.mxu0 %v19576_v51  ;;  %v19645_v31 = vld [vmem:[#allocation13 + $0xaac] ss:$16 sps:$4 sm:$0xff]   ;;  %v19640_v51 = vld [vmem:[#allocation13 + $0xaa0] ss:$16 sps:$4 sm:$0xff]  }
 0xa5f   :  { %5459 = vmatprep.subr.bf16.mxu1 %v19579_v24  ;;  %v19643_v24 = vld [vmem:[#allocation13 + $0xaa8] ss:$16 sps:$4 sm:$0xff]  }
 0xa61   :  { %5374 = vmatpush1.bf16.msra.mxu0 %v19574_v6  ;;  %v19648_v6 = vld [vmem:[#allocation13 + $0xac4] ss:$16 sps:$4 sm:$0xff]  }
 0xa62   :  { %5460 = vmatpush1.bf16.msra.mxu1 %v19577_v43  ;;  %5375 = vmatprep.subr.bf16.mxu0 %v19582_v54  ;;  %v19651_v43 = vld [vmem:[#allocation13 + $0xacc] ss:$16 sps:$4 sm:$0xff]   ;;  %v19646_v54 = vld [vmem:[#allocation13 + $0xac0] ss:$16 sps:$4 sm:$0xff]  }
 0xa63   :  { %5461 = vmatprep.subr.bf16.mxu1 %v19585_v55  ;;  %v19649_v55 = vld [vmem:[#allocation13 + $0xac8] ss:$16 sps:$4 sm:$0xff]  }
 0xa65   :  { %5376 = vmatpush1.bf16.msra.mxu0 %v19580_v0  ;;  %v19654_v0 = vld [vmem:[#allocation13 + $0xae4] ss:$16 sps:$4 sm:$0xff]  }
 0xa66   :  { %5462 = vmatpush1.bf16.msra.mxu1 %v19583_v4  ;;  %5377 = vmatprep.subr.bf16.mxu0 %v19588_v12  ;;  %v19657_v4 = vld [vmem:[#allocation13 + $0xaec] ss:$16 sps:$4 sm:$0xff]   ;;  %v19652_v12 = vld [vmem:[#allocation13 + $0xae0] ss:$16 sps:$4 sm:$0xff]  }
 0xa67   :  { %5463 = vmatprep.subr.bf16.mxu1 %v19591_v58  ;;  %v19655_v58 = vld [vmem:[#allocation13 + $0xae8] ss:$16 sps:$4 sm:$0xff]  }
 0xa69   :  { %5378 = vmatpush1.bf16.msra.mxu0 %v19586_v5  ;;  %v19660_v5 = vld [vmem:[#allocation13 + $0xb04] ss:$16 sps:$4 sm:$0xff]  }
 0xa6a   :  { %5464 = vmatpush1.bf16.msra.mxu1 %v19589_v17  ;;  %5379 = vmatprep.subr.bf16.mxu0 %v19594_v29  ;;  %v19663_v17 = vld [vmem:[#allocation13 + $0xb0c] ss:$16 sps:$4 sm:$0xff]   ;;  %v19658_v29 = vld [vmem:[#allocation13 + $0xb00] ss:$16 sps:$4 sm:$0xff]  }
 0xa6b   :  { %5465 = vmatprep.subr.bf16.mxu1 %v19597_v49  ;;  %v19661_v49 = vld [vmem:[#allocation13 + $0xb08] ss:$16 sps:$4 sm:$0xff]  }
 0xa6d   :  { %5380 = vmatpush1.bf16.msra.mxu0 %v19592_v57  ;;  %v19666_v57 = vld [vmem:[#allocation13 + $0xb24] ss:$16 sps:$4 sm:$0xff]  }
 0xa6e   :  { %5466 = vmatpush1.bf16.msra.mxu1 %v19595_v20  ;;  %5381 = vmatprep.subr.bf16.mxu0 %v19600_v60  ;;  %v19669_v20 = vld [vmem:[#allocation13 + $0xb2c] ss:$16 sps:$4 sm:$0xff]   ;;  %v19664_v60 = vld [vmem:[#allocation13 + $0xb20] ss:$16 sps:$4 sm:$0xff]  }
 0xa6f   :  { %5467 = vmatprep.subr.bf16.mxu1 %v19603_v14  ;;  %v19667_v14 = vld [vmem:[#allocation13 + $0xb28] ss:$16 sps:$4 sm:$0xff]  }
 0xa71   :  { %5382 = vmatpush1.bf16.msra.mxu0 %v19598_v37  ;;  %v19672_v37 = vld [vmem:[#allocation13 + $0xb44] ss:$16 sps:$4 sm:$0xff]  }
 0xa72   :  { %5468 = vmatpush1.bf16.msra.mxu1 %v19601_v45  ;;  %5383 = vmatprep.subr.bf16.mxu0 %v19606_v36  ;;  %v19675_v45 = vld [vmem:[#allocation13 + $0xb4c] ss:$16 sps:$4 sm:$0xff]   ;;  %v19673_v36 = vld [vmem:[#allocation13 + $0xb48] ss:$16 sps:$4 sm:$0xff]  }
 0xa73   :  { %5469 = vmatprep.subr.bf16.mxu1 %v19609_v34  ;;  %v19681_v34 = vld [vmem:[#allocation13 + $0xb6c] ss:$16 sps:$4 sm:$0xff]  }
 0xa75   :  { %5384 = vmatpush1.bf16.msra.mxu0 %v19604_v40  ;;  %v19670_v40 = vld [vmem:[#allocation13 + $0xb40] ss:$16 sps:$4 sm:$0xff]  }
 0xa76   :  { %5470 = vmatpush1.bf16.msra.mxu1 %v19607_v23  ;;  %5396 = vmatprep.subr.bf16.mxu0 %v19612_v3  ;;  %v19678_v23 = vld [vmem:[#allocation13 + $0xb64] ss:$16 sps:$4 sm:$0xff]   ;;  %v19676_v3 = vld [vmem:[#allocation13 + $0xb60] ss:$16 sps:$4 sm:$0xff]  }
 0xa77   :  { %5482 = vmatprep.subr.bf16.mxu1 %v19615_v42  ;;  %v19679_v42 = vld [vmem:[#allocation13 + $0xb68] ss:$16 sps:$4 sm:$0xff]  }
 0xb0b   :  { %v4528_v27 = vpop.f32.mrb[36].mxu0 }
 0xb0c   :  { %v4530_v25 = vpop.f32.mrb[37].mxu0  ;;  %v4571_v50 = vpop.f32.mrb[36].mxu1 }
 0xb0d   :  { %v4532_v11 = vpop.f32.mrb[38].mxu0  ;;  %v4573_v46 = vpop.f32.mrb[37].mxu1 }
 0xb0e   :  { %v4580_v53 = vpack.c.bf16 %v4532_v11, %v4528_v27  ;;  %v4534_v33 = vpop.f32.mrb[39].mxu0  ;;  %v4575_v61 = vpop.f32.mrb[38].mxu1  ;;  %v19684_v27 = vld [vmem:[#allocation13 + $0xb84] ss:$16 sps:$4 sm:$0xff]   ;;  %v19685_v11 = vld [vmem:[#allocation13 + $0xb88] ss:$16 sps:$4 sm:$0xff]  }
 0xb0f   :  { %v4581_v48 = vpack.c.bf16 %v4534_v33, %v4530_v25  ;;  %v22607_v38 = vpack.c.bf16 %v4575_v61, %v4571_v50  ;;  %v4577_v18 = vpop.f32.mrb[39].mxu1  ;;  %v19687_v25 = vld [vmem:[#allocation13 + $0xb8c] ss:$16 sps:$4 sm:$0xff]   ;;  %v19682_v50 = vld [vmem:[#allocation13 + $0xb80] ss:$16 sps:$4 sm:$0xff]  }
 0xb10   :  { %v4583_v15 = vpack.c.bf16 %v4577_v18, %v4573_v46  ;;  %v19690_v46 = vld [vmem:[#allocation13 + $0xba4] ss:$16 sps:$4 sm:$0xff]   ;;  %v19688_v33 = vld [vmem:[#allocation13 + $0xba0] ss:$16 sps:$4 sm:$0xff]   ;;  %v19691_v61 = vld [vmem:[#allocation13 + $0xba8] ss:$16 sps:$4 sm:$0xff]  }
 0xb11   :  { %5385 = vmatprep.mubr.bf16.mxu0 %v4581_v48  ;;  %5471 = vmatprep.mubr.bf16.mxu1 %v4581_v48  ;;  %v19696_v48 = vld [vmem:[#allocation13 + $0xbc4] ss:$16 sps:$4 sm:$0xff]   ;;  %v19697_v18 = vld [vmem:[#allocation13 + $0xbc8] ss:$16 sps:$4 sm:$0xff]  }
 0xb12   :  { %5386 = vmatmul.mubr.bf16.vlgmr.msra.gmra.mrb[32].mxu0 %v4580_v53  ;;  %5472 = vmatmul.mubr.bf16.vlgmr.msra.gmra.mrb[32].mxu1 %v4580_v53  ;;  %v19693_v53 = vld [vmem:[#allocation13 + $0xbac] ss:$16 sps:$4 sm:$0xff]  }
 0xb13   :  { %5397 = vmatpush1.bf16.msra.mxu0 %v19610_v62  ;;  %5483 = vmatpush1.bf16.msra.mxu1 %v19613_v8  ;;  %v19699_v62 = vld [vmem:[#allocation13 + $0xbcc] ss:$16 sps:$4 sm:$0xff]   ;;  %v19694_v8 = vld [vmem:[#allocation13 + $0xbc0] ss:$16 sps:$4 sm:$0xff]  }
 0xb14   :  { %5398 = vmatprep.subr.bf16.mxu0 %v19618_v56  ;;  %5484 = vmatprep.subr.bf16.mxu1 %v19621_v63  ;;  %v19702_v56 = vld [vmem:[#allocation13 + $0xbe4] ss:$16 sps:$4 sm:$0xff]   ;;  %v19705_v63 = vld [vmem:[#allocation13 + $0xbec] ss:$16 sps:$4 sm:$0xff]  }
 0xb15   :  { %5428 = vmatprep.mubr.bf16.mxu0 %v4583_v15  ;;  %5514 = vmatprep.mubr.bf16.mxu1 %v4583_v15  ;;  %v5577_v15 = vld [vmem:[%s23687_s21 + $0x80] sm:$0xff] }
 0xb17   :  { %5399 = vmatpush1.bf16.msra.mxu0 %v19616_v41  ;;  %5485 = vmatpush1.bf16.msra.mxu1 %v19619_v1  ;;  %v5578_v41 = vld [vmem:[%s23687_s21 + $0x88] sm:$0xff]  ;;  %v5609_v1 = vld [vmem:[%s23687_s21 + $0x180] sm:$0xff] }
 0xb18   :  { %5400 = vmatprep.subr.bf16.mxu0 %v19624_v9  ;;  %5486 = vmatprep.subr.bf16.mxu1 %v19627_v13  ;;  %v5610_v9 = vld [vmem:[%s23687_s21 + $0x188] sm:$0xff] }
 0xb19   :  { %v19700_v13 = vld [vmem:[#allocation13 + $0xbe0] ss:$16 sps:$4 sm:$0xff]  }
 0xb1b   :  { %5401 = vmatpush1.bf16.msra.mxu0 %v19622_v21  ;;  %5487 = vmatpush1.bf16.msra.mxu1 %v19625_v52  ;;  %v19703_v21 = vld [vmem:[#allocation13 + $0xbe8] ss:$16 sps:$4 sm:$0xff]  }
 0xb1c   :  { %5402 = vmatprep.subr.bf16.mxu0 %v19630_v2  ;;  %5488 = vmatprep.subr.bf16.mxu1 %v19633_v7  ;;  %v5561_v52 = vld [vmem:[%s23687_s21] sm:$0xff]  ;;  %v5562_v2 = vld [vmem:[%s23687_s21 + $0x8] sm:$0xff]  ;;  %v22615_v7 = vpack.c.bf16 %v5578_v41, %v5577_v15 }
 0xb1d   :  { %v5601_v41 = vld [vmem:[%s23687_s21 + $0x140] sm:$0xff] }
 0xb1f   :  { %5403 = vmatpush1.bf16.msra.mxu0 %v19628_v26  ;;  %5489 = vmatpush1.bf16.msra.mxu1 %v19631_v16  ;;  %v22617_v26 = vpack.c.bf16 %v5610_v9, %v5609_v1  ;;  %v5593_v16 = vld [vmem:[%s23687_s21 + $0x100] sm:$0xff]  ;;  %v5602_v1 = vld [vmem:[%s23687_s21 + $0x148] sm:$0xff] }
 0xb20   :  { %5404 = vmatprep.subr.bf16.mxu0 %v19636_v10  ;;  %5490 = vmatprep.subr.bf16.mxu1 %v19639_v22  ;;  %v5594_v10 = vld [vmem:[%s23687_s21 + $0x108] sm:$0xff]  ;;  %v5579_v22 = vld [vmem:[%s23687_s21 + $0x90] sm:$0xff]  ;;  %v22706_v9 = vpack.c.bf16 %v5602_v1, %v5601_v41 }
 0xb21   :  { %v5766_v41 = vld [vmem:[#allocation14 + $0x8] sm:$0xff] }
 0xb22   :  { %v5770_v1 = vld [vmem:[#allocation14 + $0x28] sm:$0xff] }
 0xb23   :  { %5405 = vmatpush1.bf16.msra.mxu0 %v19634_v19  ;;  %5491 = vmatpush1.bf16.msra.mxu1 %v19637_v44  ;;  %v5580_v19 = vld [vmem:[%s23687_s21 + $0x98] sm:$0xff]  ;;  %v5611_v44 = vld [vmem:[%s23687_s21 + $0x190] sm:$0xff] }
 0xb24   :  { %5406 = vmatprep.subr.bf16.mxu0 %v19642_v32  ;;  %5492 = vmatprep.subr.bf16.mxu1 %v19645_v31  ;;  %v5612_v32 = vld [vmem:[%s23687_s21 + $0x198] sm:$0xff]  ;;  %v22625_v31 = vpack.c.bf16 %v5562_v2, %v5561_v52  ;;  %v5619_v52 = vld [vmem:[%s23687_s21 + $0x1d0] sm:$0xff] }
 0xb27   :  { %5407 = vmatpush1.bf16.msra.mxu0 %v19640_v51  ;;  %5493 = vmatpush1.bf16.msra.mxu1 %v19643_v24  ;;  %v22627_v51 = vpack.c.bf16 %v5594_v10, %v5593_v16  ;;  %v5563_v24 = vld [vmem:[%s23687_s21 + $0x10] sm:$0xff]  ;;  %v5620_v16 = vld [vmem:[%s23687_s21 + $0x1d8] sm:$0xff] }
 0xb28   :  { %5408 = vmatprep.subr.bf16.mxu0 %v19648_v6  ;;  %5494 = vmatprep.subr.bf16.mxu1 %v19651_v43  ;;  %v5564_v6 = vld [vmem:[%s23687_s21 + $0x18] sm:$0xff]  ;;  %v22633_v43 = vpack.c.bf16 %v5580_v19, %v5579_v22  ;;  %v5571_v10 = vld [vmem:[%s23687_s21 + $0x50] sm:$0xff]  ;;  %v22719_v19 = vpack.c.bf16 %v5620_v16, %v5619_v52  ;;  %v5772_v52 = vld [vmem:[#allocation14 + $0x38] sm:$0xff] }
 0xb29   :  { %v5572_v22 = vld [vmem:[%s23687_s21 + $0x58] sm:$0xff] }
 0xb2b   :  { %5409 = vmatpush1.bf16.msra.mxu0 %v19646_v54  ;;  %5495 = vmatpush1.bf16.msra.mxu1 %v19649_v55  ;;  %v22635_v54 = vpack.c.bf16 %v5612_v32, %v5611_v44  ;;  %v5595_v55 = vld [vmem:[%s23687_s21 + $0x110] sm:$0xff]  ;;  %v22721_v44 = vpack.c.bf16 %v5572_v22, %v5571_v10 }
 0xb2c   :  { %5410 = vmatprep.subr.bf16.mxu0 %v19654_v0  ;;  %5496 = vmatprep.subr.bf16.mxu1 %v19657_v4  ;;  %v5596_v0 = vld [vmem:[%s23687_s21 + $0x118] sm:$0xff]  ;;  %v5581_v4 = vld [vmem:[%s23687_s21 + $0xa0] sm:$0xff]  ;;  %v5603_v32 = vld [vmem:[%s23687_s21 + $0x150] sm:$0xff] }
 0xb2f   :  { %5411 = vmatpush1.bf16.msra.mxu0 %v19652_v12  ;;  %5497 = vmatpush1.bf16.msra.mxu1 %v19655_v58  ;;  %v5582_v12 = vld [vmem:[%s23687_s21 + $0xa8] sm:$0xff]  ;;  %v5613_v58 = vld [vmem:[%s23687_s21 + $0x1a0] sm:$0xff] }
 0xb30   :  { %5412 = vmatprep.subr.bf16.mxu0 %v19660_v5  ;;  %5498 = vmatprep.subr.bf16.mxu1 %v19663_v17  ;;  %v5614_v5 = vld [vmem:[%s23687_s21 + $0x1a8] sm:$0xff]  ;;  %v22647_v17 = vpack.c.bf16 %v5564_v6, %v5563_v24  ;;  %v5604_v24 = vld [vmem:[%s23687_s21 + $0x158] sm:$0xff] }
 0xb31   :  { %v22726_v6 = vpack.c.bf16 %v5604_v24, %v5603_v32 }
 0xb33   :  { %5413 = vmatpush1.bf16.msra.mxu0 %v19658_v29  ;;  %5499 = vmatpush1.bf16.msra.mxu1 %v19661_v49  ;;  %v22649_v29 = vpack.c.bf16 %v5596_v0, %v5595_v55  ;;  %v5565_v49 = vld [vmem:[%s23687_s21 + $0x20] sm:$0xff]  ;;  %v5590_v0 = vld [vmem:[%s23687_s21 + $0xe8] sm:$0xff] }
 0xb34   :  { %5414 = vmatprep.subr.bf16.mxu0 %v19666_v57  ;;  %5500 = vmatprep.subr.bf16.mxu1 %v19669_v20  ;;  %v5566_v57 = vld [vmem:[%s23687_s21 + $0x28] sm:$0xff]  ;;  %v22655_v20 = vpack.c.bf16 %v5582_v12, %v5581_v4  ;;  %v5589_v55 = vld [vmem:[%s23687_s21 + $0xe0] sm:$0xff] }
 0xb35   :  { %v5621_v4 = vld [vmem:[%s23687_s21 + $0x1e0] sm:$0xff]  ;;  %v22733_v12 = vpack.c.bf16 %v5590_v0, %v5589_v55 }
 0xb37   :  { %5415 = vmatpush1.bf16.msra.mxu0 %v19664_v60  ;;  %5501 = vmatpush1.bf16.msra.mxu1 %v19667_v14  ;;  %v22657_v60 = vpack.c.bf16 %v5614_v5, %v5613_v58  ;;  %v5598_v14 = vld [vmem:[%s23687_s21 + $0x128] sm:$0xff]  ;;  %v5573_v5 = vld [vmem:[%s23687_s21 + $0x60] sm:$0xff] }
 0xb38   :  { %5416 = vmatprep.subr.bf16.mxu0 %v19672_v37  ;;  %5502 = vmatprep.subr.bf16.mxu1 %v19675_v45  ;;  %v5583_v37 = vld [vmem:[%s23687_s21 + $0xb0] sm:$0xff]  ;;  %v5584_v45 = vld [vmem:[%s23687_s21 + $0xb8] sm:$0xff]  ;;  %v5622_v58 = vld [vmem:[%s23687_s21 + $0x1e8] sm:$0xff] }
 0xb3b   :  { %5417 = vmatpush1.bf16.msra.mxu0 %v19670_v40  ;;  %5503 = vmatpush1.bf16.msra.mxu1 %v19673_v36  ;;  %v5615_v40 = vld [vmem:[%s23687_s21 + $0x1b0] sm:$0xff]  ;;  %v5616_v36 = vld [vmem:[%s23687_s21 + $0x1b8] sm:$0xff] }
 0xb3c   :  { %5418 = vmatprep.subr.bf16.mxu0 %v19678_v23  ;;  %5504 = vmatprep.subr.bf16.mxu1 %v19681_v34  ;;  %v22667_v23 = vpack.c.bf16 %v5566_v57, %v5565_v49  ;;  %v5574_v49 = vld [vmem:[%s23687_s21 + $0x68] sm:$0xff]  ;;  %v22739_v57 = vpack.c.bf16 %v5622_v58, %v5621_v4 }
 0xb3f   :  { %5419 = vmatpush1.bf16.msra.mxu0 %v19676_v3  ;;  %5505 = vmatpush1.bf16.msra.mxu1 %v19679_v42  ;;  %v22673_v3 = vpack.c.bf16 %v5584_v45, %v5583_v37  ;;  %v22675_v42 = vpack.c.bf16 %v5616_v36, %v5615_v40  ;;  %v5606_v37 = vld [vmem:[%s23687_s21 + $0x168] sm:$0xff]  ;;  %v5591_v45 = vld [vmem:[%s23687_s21 + $0xf0] sm:$0xff]  ;;  %v5592_v36 = vld [vmem:[%s23687_s21 + $0xf8] sm:$0xff] }
 0xb40   :  { %5420 = vmatprep.subr.bf16.mxu0 %v19684_v27  ;;  %5506 = vmatprep.subr.bf16.mxu1 %v19687_v25  ;;  %v5567_v27 = vld [vmem:[%s23687_s21 + $0x30] sm:$0xff]  ;;  %v5568_v25 = vld [vmem:[%s23687_s21 + $0x38] sm:$0xff] }
 0xb43   :  { %5421 = vmatpush1.bf16.msra.mxu0 %v19682_v50  ;;  %5507 = vmatpush1.bf16.msra.mxu1 %v19685_v11  ;;  %v5599_v50 = vld [vmem:[%s23687_s21 + $0x130] sm:$0xff]  ;;  %v22684_v11 = vpack.c.bf16 %v5568_v25, %v5567_v27  ;;  %v5624_v25 = vld [vmem:[%s23687_s21 + $0x1f8] sm:$0xff] }
 0xb44   :  { %5422 = vmatprep.subr.bf16.mxu0 %v19690_v46  ;;  %5508 = vmatprep.subr.bf16.mxu1 %v19693_v53  ;;  %v5600_v46 = vld [vmem:[%s23687_s21 + $0x138] sm:$0xff]  ;;  %v5623_v27 = vld [vmem:[%s23687_s21 + $0x1f0] sm:$0xff] }
 0xb45   :  { %v22687_v53 = vpack.c.bf16 %v5600_v46, %v5599_v50  ;;  %v22753_v50 = vpack.c.bf16 %v5592_v36, %v5591_v45  ;;  %v22755_v46 = vpack.c.bf16 %v5624_v25, %v5623_v27 }
 0xb47   :  { %5423 = vmatpush1.bf16.msra.mxu0 %v19688_v33  ;;  %5509 = vmatpush1.bf16.msra.mxu1 %v19691_v61  ;;  %v5585_v33 = vld [vmem:[%s23687_s21 + $0xc0] sm:$0xff]  ;;  %v5586_v61 = vld [vmem:[%s23687_s21 + $0xc8] sm:$0xff] }
 0xb48   :  { %5424 = vmatprep.subr.bf16.mxu0 %v19696_v48  ;;  %5510 = vmatprep.subr.bf16.mxu1 %v19699_v62  ;;  %v5617_v48 = vld [vmem:[%s23687_s21 + $0x1c0] sm:$0xff]  ;;  %v22694_v62 = vpack.c.bf16 %v5586_v61, %v5585_v33  ;;  %v5575_v33 = vld [vmem:[%s23687_s21 + $0x70] sm:$0xff]  ;;  %v5576_v61 = vld [vmem:[%s23687_s21 + $0x78] sm:$0xff] }
 0xb4b   :  { %5425 = vmatpush1.bf16.msra.mxu0 %v19694_v8  ;;  %5511 = vmatpush1.bf16.msra.mxu1 %v19697_v18  ;;  %v5618_v8 = vld [vmem:[%s23687_s21 + $0x1c8] sm:$0xff]  ;;  %v5569_v18 = vld [vmem:[%s23687_s21 + $0x40] sm:$0xff] }
 0xb4c   :  { %5426 = vmatprep.subr.bf16.mxu0 %v19702_v56  ;;  %5512 = vmatprep.subr.bf16.mxu1 %v19705_v63  ;;  %v5570_v56 = vld [vmem:[%s23687_s21 + $0x48] sm:$0xff]  ;;  %v22699_v63 = vpack.c.bf16 %v5618_v8, %v5617_v48  ;;  %v5607_v48 = vld [vmem:[%s23687_s21 + $0x170] sm:$0xff]  ;;  %v22761_v8 = vpack.c.bf16 %v5576_v61, %v5575_v33 }
 0xb4d   :  { %v22701_v15 = vpack.c.bf16 %v5570_v56, %v5569_v18  ;;  %v5608_v18 = vld [vmem:[%s23687_s21 + $0x178] sm:$0xff] }
 0xb4e   :  { %v22766_v56 = vpack.c.bf16 %v5608_v18, %v5607_v48 }
 0xb4f   :  { %5427 = vmatpush1.bf16.msra.mxu0 %v19700_v13  ;;  %5513 = vmatpush1.bf16.msra.mxu1 %v19703_v21  ;;  %v5587_v13 = vld [vmem:[%s23687_s21 + $0xd0] sm:$0xff]  ;;  %v5588_v21 = vld [vmem:[%s23687_s21 + $0xd8] sm:$0xff] }
 0xb50   :  { %17824 = vmatprep.subr.bf16.mxu0 %v22615_v7  ;;  %17856 = vmatprep.subr.bf16.mxu1 %v22617_v26  ;;  %v22714_v2 = vpack.c.bf16 %v5588_v21, %v5587_v13  ;;  %v5768_v13 = vld [vmem:[#allocation14 + $0x18] sm:$0xff]  ;;  %v17887_v21 = vpack.c.bf16 %v5770_v1, %v5766_v41 }
 0xb51   :  { %v17903_v16 = vpack.c.bf16 %v5772_v52, %v5768_v13 }
 0xb52   :  { %5429 = vmatmul.mubr.bf16.vlgmr.msra.gmra.mrb[32].mxu0 %v22607_v38  ;;  %5515 = vmatmul.mubr.bf16.vlgmr.msra.gmra.mrb[32].mxu1 %v22607_v38  ;;  %v5597_v38 = vld [vmem:[%s23687_s21 + $0x120] sm:$0xff] }
 0xb53   :  { %17826 = vmatpush3.bf16.msra.mxu0 %v22625_v31  ;;  %17858 = vmatpush3.bf16.msra.mxu1 %v22627_v51  ;;  %v22669_v34 = vpack.c.bf16 %v5598_v14, %v5597_v38  ;;  %v22741_v38 = vpack.c.bf16 %v5574_v49, %v5573_v5  ;;  %v5605_v14 = vld [vmem:[%s23687_s21 + $0x160] sm:$0xff] }
 0xb54   :  { %17828 = vmatprep.subr.bf16.mxu0 %v22633_v43  ;;  %17860 = vmatprep.subr.bf16.mxu1 %v22635_v54  ;;  %v22747_v40 = vpack.c.bf16 %v5606_v37, %v5605_v14 }
 0xb57   :  { %17830 = vmatpush3.bf16.msra.mxu0 %v22647_v17  ;;  %17862 = vmatpush3.bf16.msra.mxu1 %v22649_v29 }
 0xb58   :  { %17832 = vmatprep.subr.bf16.mxu0 %v22655_v20  ;;  %17864 = vmatprep.subr.bf16.mxu1 %v22657_v60 }
 0xb5b   :  { %17834 = vmatpush3.bf16.msra.mxu0 %v22667_v23  ;;  %17866 = vmatpush3.bf16.msra.mxu1 %v22669_v34 }
 0xb5c   :  { %17836 = vmatprep.subr.bf16.mxu0 %v22673_v3  ;;  %17868 = vmatprep.subr.bf16.mxu1 %v22675_v42 }
 0xb5f   :  { %17838 = vmatpush3.bf16.msra.mxu0 %v22684_v11  ;;  %17870 = vmatpush3.bf16.msra.mxu1 %v22687_v53 }
 0xb60   :  { %17840 = vmatprep.subr.bf16.mxu0 %v22694_v62  ;;  %17872 = vmatprep.subr.bf16.mxu1 %v22699_v63 }
 0xb63   :  { %17842 = vmatpush3.bf16.msra.mxu0 %v22701_v15  ;;  %17874 = vmatpush3.bf16.msra.mxu1 %v22706_v9 }
 0xb64   :  { %17844 = vmatprep.subr.bf16.mxu0 %v22714_v2  ;;  %17876 = vmatprep.subr.bf16.mxu1 %v22719_v19 }
 0xb67   :  { %17846 = vmatpush3.bf16.msra.mxu0 %v22721_v44  ;;  %17878 = vmatpush3.bf16.msra.mxu1 %v22726_v6 }
 0xb68   :  { %17848 = vmatprep.subr.bf16.mxu0 %v22733_v12  ;;  %17880 = vmatprep.subr.bf16.mxu1 %v22739_v57 }
 0xb6b   :  { %17850 = vmatpush3.bf16.msra.mxu0 %v22741_v38  ;;  %17882 = vmatpush3.bf16.msra.mxu1 %v22747_v40 }
 0xb6c   :  { %17852 = vmatprep.subr.bf16.mxu0 %v22753_v50  ;;  %17884 = vmatprep.subr.bf16.mxu1 %v22755_v46 }
 0xb6f   :  { %17854 = vmatpush3.bf16.msra.mxu0 %v22761_v8  ;;  %17886 = vmatpush3.bf16.msra.mxu1 %v22766_v56 }
 0xb70   :  { %17888 = vmatprep.subr.bf16.mxu0 %v17887_v21  ;;  %17904 = vmatprep.subr.bf16.mxu1 %v17903_v16 }
 0xc25   :  { %v22771_v10 = vpop.f32.mrb[32].mxu0  ;;  %v22773_v22 = vpop.f32.mrb[32].mxu1 }
 0xc26   :  { %23688 = vst [vmem:[#allocation71_spill] sm:$0xff] %v22771_v10  ;;  %23689 = vst [vmem:[#allocation73_spill] sm:$0xff] %v22773_v22  ;;  %v22775_v32 = vpop.f32.mrb[33].mxu0  ;;  %v22777_v24 = vpop.f32.mrb[33].mxu1 }
 0xc27   :  { %23690 = vst [vmem:[#allocation76_spill] sm:$0xff] %v22775_v32  ;;  %23691 = vst [vmem:[#allocation79_spill] sm:$0xff] %v22777_v24  ;;  %v22779_v55 = vpop.f32.mrb[34].mxu0  ;;  %v22781_v0 = vpop.f32.mrb[34].mxu1 }
 0xc28   :  { %23692 = vst [vmem:[#allocation72_spill] sm:$0xff] %v22779_v55  ;;  %23693 = vst [vmem:[#allocation75_spill] sm:$0xff] %v22781_v0  ;;  %v5533_v4 = vadd.f32 %v22779_v55, %v22771_v10  ;;  %v5547_v58 = vadd.f32 %v22781_v0, %v22773_v22  ;;  %v22787_v5 = vpop.f32.mrb[35].mxu0  ;;  %v22789_v49 = vpop.f32.mrb[35].mxu1  ;;  %v5782_v22 = vld [vmem:[#allocation14 + $0x88] sm:$0xff]  ;;  %v5784_v10 = vld [vmem:[#allocation14 + $0x98] sm:$0xff] }
 0xc29   :  { %23694 = vst [vmem:[#allocation78_spill] sm:$0xff] %v22787_v5  ;;  %23695 = vst [vmem:[#allocation81_spill] sm:$0xff] %v22789_v49  ;;  %v5540_v14 = vadd.f32 %v22787_v5, %v22775_v32  ;;  %v5554_v37 = vadd.f32 %v22789_v49, %v22777_v24  ;;  %v5767_v24 = vld [vmem:[#allocation14 + $0x10] sm:$0xff]  ;;  %v5774_v32 = vld [vmem:[#allocation14 + $0x48] sm:$0xff] }
 0xc2a   :  { %v5534_v45 = vrot.slane %v5533_v4, 4  ;;  %v5548_v36 = vrot.slane %v5547_v58, 4  ;;  %v5771_v5 = vld [vmem:[#allocation14 + $0x30] sm:$0xff]  ;;  %v5786_v55 = vld [vmem:[#allocation14 + $0xa8] sm:$0xff] }
 0xc2b   :  { %v5541_v27 = vrot.slane %v5540_v14, 4  ;;  %v5555_v25 = vrot.slane %v5554_v37, 4 }
 0xc2c   :  { %v5535_v33 = vadd.f32 %v5534_v45, %v5533_v4  ;;  %v5549_v61 = vadd.f32 %v5548_v36, %v5547_v58  ;;  %v5778_v58 = vld [vmem:[#allocation14 + $0x68] sm:$0xff] }
 0xc2d   :  { %v5542_v48 = vadd.f32 %v5541_v27, %v5540_v14  ;;  %v5556_v18 = vadd.f32 %v5555_v25, %v5554_v37  ;;  %v5776_v14 = vld [vmem:[#allocation14 + $0x58] sm:$0xff]  ;;  %v17889_v27 = vpack.c.bf16 %v5769_v30, %v5765_v39  ;;  %v17905_v25 = vpack.c.bf16 %v5771_v5, %v5767_v24  ;;  %v5781_v39 = vld [vmem:[#allocation14 + $0x80] sm:$0xff]  ;;  %v5783_v24 = vld [vmem:[#allocation14 + $0x90] sm:$0xff] }
 0xc2e   :  { %v5536_v41 = vrot.slane %v5535_v33, 2  ;;  %v5550_v1 = vrot.slane %v5549_v61, 2  ;;  %v5780_v37 = vld [vmem:[#allocation14 + $0x78] sm:$0xff]  ;;  %v23696_v5 = vmov 0.0  }
 0xc2f   :  { %v5543_v13 = vrot.slane %v5542_v48, 2  ;;  %v5557_v21 = vrot.slane %v5556_v18, 2 }
 0xc30   :  { %v5537_v52 = vadd.f32 %v5536_v41, %v5535_v33  ;;  %v5551_v16 = vadd.f32 %v5550_v1, %v5549_v61  ;;  %v5773_v33 = vld [vmem:[#allocation14 + $0x40] sm:$0xff]  ;;  %v17891_v41 = vpack.c.bf16 %v5778_v58, %v5774_v32  ;;  %v17907_v1 = vpack.c.bf16 %v5780_v37, %v5776_v14  ;;  %v5792_v58 = vld [vmem:[#allocation14 + $0xd8] sm:$0xff] }
 0xc31   :  { %v5544_v35 = vadd.f32 %v5543_v13, %v5542_v48  ;;  %v5558_v47 = vadd.f32 %v5557_v21, %v5556_v18  ;;  %v5777_v61 = vld [vmem:[#allocation14 + $0x60] sm:$0xff]  ;;  %v5775_v13 = vld [vmem:[#allocation14 + $0x50] sm:$0xff] }
 0xc32   :  { %v5538_v28 = vrot.slane %v5537_v52, 1  ;;  %v5552_v49 = vrot.slane %v5551_v16, 1  ;;  %v5779_v21 = vld [vmem:[#allocation14 + $0x70] sm:$0xff]  ;;  %v5785_v32 = vld [vmem:[#allocation14 + $0xa0] sm:$0xff] }
 0xc33   :  { %v5545_v0 = vrot.slane %v5544_v35, 1  ;;  %v5559_v4 = vrot.slane %v5558_v47, 1  ;;  %v17909_v30 = vpack.c.bf16 %v5779_v21, %v5775_v13 }
 0xc34   :  { %v5539_v48 = vadd.f32 %v5538_v28, %v5537_v52  ;;  %v5553_v18 = vadd.f32 %v5552_v49, %v5551_v16  ;;  %v17895_v28 = vpack.c.bf16 %v5786_v55, %v5782_v22  ;;  %v17897_v49 = vpack.c.bf16 %v5785_v32, %v5781_v39  ;;  %v5790_v16 = vld [vmem:[#allocation14 + $0xc8] sm:$0xff]  ;;  %v5793_v55 = vld [vmem:[#allocation14 + $0xe0] sm:$0xff] }
 0xc35   :  { %v5546_v45 = vadd.f32 %v5545_v0, %v5544_v35  ;;  %v5560_v36 = vadd.f32 %v5559_v4, %v5558_v47  ;;  %v17893_v35 = vpack.c.bf16 %v5777_v61, %v5773_v33  ;;  %v17911_v47 = vpack.c.bf16 %v5788_v59, %v5784_v10  ;;  %v5787_v0 = vld [vmem:[#allocation14 + $0xb0] sm:$0xff]  ;;  %v5794_v4 = vld [vmem:[#allocation14 + $0xe8] sm:$0xff]  ;;  %v5796_v59 = vld [vmem:[#allocation14 + $0xf8] sm:$0xff] }
 0xc36   :  { %v17913_v52 = vpack.c.bf16 %v5787_v0, %v5783_v24  ;;  %v17899_v22 = vpack.c.bf16 %v5794_v4, %v5790_v16  ;;  %v5789_v10 = vld [vmem:[#allocation14 + $0xc0] sm:$0xff]  ;;  %v17915_v14 = vpack.c.bf16 %v5796_v59, %v5792_v58 }
 0xc37   :  { %5689 = vmatprep.mubr.f32.mxu0 %v5546_v45  ;;  %5759 = vmatprep.mubr.f32.mxu1 %v5560_v36  ;;  %v17901_v37 = vpack.c.bf16 %v5793_v55, %v5789_v10  ;;  %v5791_v45 = vld [vmem:[#allocation14 + $0xd0] sm:$0xff] }
 0xc38   :  { %5690 = vmatmul.mubr.f32.vlgmr.msra.gmra.mrb[22].mxu0 %v5539_v48  ;;  %5760 = vmatmul.mubr.f32.vlgmr.msra.gmra.mrb[22].mxu1 %v5553_v18  ;;  %v5795_v36 = vld [vmem:[#allocation14 + $0xf0] sm:$0xff] }
 0xc39   :  { %17890 = vmatpush1.bf16.msra.mxu0 %v17889_v27  ;;  %17906 = vmatpush1.bf16.msra.mxu1 %v17905_v25  ;;  %v17917_v27 = vpack.c.bf16 %v5795_v36, %v5791_v45 }
 0xc3a   :  { %17892 = vmatprep.subr.bf16.mxu0 %v17891_v41  ;;  %17908 = vmatprep.subr.bf16.mxu1 %v17907_v1 }
 0xc3b   :  { %5864 = vmatprep.mubr.f32.mxu0 %v23696_v5  ;;  %5935 = vmatprep.mubr.f32.mxu1 %v23696_v5 }
 0xc3d   :  { %17894 = vmatpush1.bf16.msra.mxu0 %v17893_v35  ;;  %17910 = vmatpush1.bf16.msra.mxu1 %v17909_v30 }
 0xc3e   :  { %17896 = vmatprep.subr.bf16.mxu0 %v17895_v28  ;;  %17912 = vmatprep.subr.bf16.mxu1 %v17911_v47 }
 0xc41   :  { %17898 = vmatpush1.bf16.msra.mxu0 %v17897_v49  ;;  %17914 = vmatpush1.bf16.msra.mxu1 %v17913_v52 }
 0xc42   :  { %17900 = vmatprep.subr.bf16.mxu0 %v17899_v22  ;;  %17916 = vmatprep.subr.bf16.mxu1 %v17915_v14 }
 0xc45   :  { %17902 = vmatpush1.bf16.msra.mxu0 %v17901_v37  ;;  %17918 = vmatpush1.bf16.msra.mxu1 %v17917_v27 }
 0xc46   :  { %17920 = vmatprep.subr.bf16.mxu0 %v22615_v7  ;;  %17952 = vmatprep.subr.bf16.mxu1 %v22617_v26 }
 0xd0b   :  { %v17379_v25 = vpop.f32.mrb[22].mxu0  ;;  %v17414_v33 = vpop.f32.mrb[22].mxu1 }
 0xd0c   :  { %v17380_v61 = vpop.f32.mrb[23].mxu0  ;;  %v17415_v48 = vpop.f32.mrb[23].mxu1 }
 0xd0d   :  { %v17381_v18 = vadd.f32 %v17380_v61, %v17379_v25  ;;  %v17416_v41 = vadd.f32 %v17415_v48, %v17414_v33 }
 0xd0f   :  { %v5762_v1 = vadd.f32 %v17416_v41, %v17381_v18  ;;  %v6144_v41 = vld [vmem:[#allocation16 + $0x8] sm:$0xff] }
 0xd11   :  { %16263 = vmatmul.mubr.msk.f32.vlgmr.msra.gmra.mrb[40].mxu0 %vm498_vm0, %v5762_v1  ;;  %16264 = vmatmul.mubr.msk.f32.vlgmr.msra.gmra.mrb[40].mxu1 %vm498_vm0, %v5762_v1  ;;  %v6148_v1 = vld [vmem:[#allocation16 + $0x28] sm:$0xff] }
 0xd12   :  { %17922 = vmatpush3.bf16.msra.mxu0 %v22625_v31  ;;  %17954 = vmatpush3.bf16.msra.mxu1 %v22627_v51  ;;  %v23697_v31 = vld [vmem:[#allocation82_spill] sm:$0xff] }
 0xd13   :  { %17924 = vmatprep.subr.bf16.mxu0 %v22633_v43  ;;  %17956 = vmatprep.subr.bf16.mxu1 %v22635_v54 }
 0xd16   :  { %17926 = vmatpush3.bf16.msra.mxu0 %v22647_v17  ;;  %17958 = vmatpush3.bf16.msra.mxu1 %v22649_v29 }
 0xd17   :  { %17928 = vmatprep.subr.bf16.mxu0 %v22655_v20  ;;  %17960 = vmatprep.subr.bf16.mxu1 %v22657_v60  ;;  %v23698_v60 = vld [vmem:[#allocation71_spill] sm:$0xff] }
 0xd1a   :  { %17930 = vmatpush3.bf16.msra.mxu0 %v22667_v23  ;;  %17962 = vmatpush3.bf16.msra.mxu1 %v22669_v34  ;;  %v23699_v34 = vld [vmem:[#allocation72_spill] sm:$0xff] }
 0xd1b   :  { %17932 = vmatprep.subr.bf16.mxu0 %v22673_v3  ;;  %17964 = vmatprep.subr.bf16.mxu1 %v22675_v42  ;;  %v23700_v42 = vld [vmem:[#allocation73_spill] sm:$0xff] }
 0xd1e   :  { %17934 = vmatpush3.bf16.msra.mxu0 %v22684_v11  ;;  %17966 = vmatpush3.bf16.msra.mxu1 %v22687_v53  ;;  %v23701_v53 = vld [vmem:[#allocation75_spill] sm:$0xff] }
 0xd1f   :  { %17936 = vmatprep.subr.bf16.mxu0 %v22694_v62  ;;  %17968 = vmatprep.subr.bf16.mxu1 %v22699_v63  ;;  %v23702_v63 = vld [vmem:[#allocation76_spill] sm:$0xff] }
 0xd22   :  { %17938 = vmatpush3.bf16.msra.mxu0 %v22701_v15  ;;  %17970 = vmatpush3.bf16.msra.mxu1 %v22706_v9  ;;  %v23703_v9 = vld [vmem:[#allocation78_spill] sm:$0xff] }
 0xd23   :  { %17940 = vmatprep.subr.bf16.mxu0 %v22714_v2  ;;  %17972 = vmatprep.subr.bf16.mxu1 %v22719_v19  ;;  %v23704_v19 = vld [vmem:[#allocation79_spill] sm:$0xff] }
 0xd26   :  { %17942 = vmatpush3.bf16.msra.mxu0 %v22721_v44  ;;  %17974 = vmatpush3.bf16.msra.mxu1 %v22726_v6  ;;  %v23705_v6 = vld [vmem:[#allocation81_spill] sm:$0xff] }
 0xd27   :  { %17944 = vmatprep.subr.bf16.mxu0 %v22733_v12  ;;  %17976 = vmatprep.subr.bf16.mxu1 %v22739_v57 }
 0xd2a   :  { %17946 = vmatpush3.bf16.msra.mxu0 %v22741_v38  ;;  %17978 = vmatpush3.bf16.msra.mxu1 %v22747_v40 }
 0xd2b   :  { %17948 = vmatprep.subr.bf16.mxu0 %v22753_v50  ;;  %17980 = vmatprep.subr.bf16.mxu1 %v22755_v46 }
 0xd2e   :  { %17950 = vmatpush3.bf16.msra.mxu0 %v22761_v8  ;;  %17982 = vmatpush3.bf16.msra.mxu1 %v22766_v56 }
 0xde4   :  { %v5866_v7 = vpop.f32.mrb[40].mxu0  ;;  %v5937_v26 = vpop.f32.mrb[40].mxu1 }
 0xde5   :  { %v5945_v51 = vrot.slane %v5866_v7, %v23697_v31  ;;  %v5953_v43 = vrot.slane %v5937_v26, %v23697_v31  ;;  %v5868_v54 = vpop.f32.mrb[41].mxu0  ;;  %v5939_v17 = vpop.f32.mrb[41].mxu1  ;;  %v6146_v7 = vld [vmem:[#allocation16 + $0x18] sm:$0xff]  ;;  %v17983_v26 = vpack.c.bf16 %v6148_v1, %v6144_v41 }
 0xde6   :  { %v5949_v29 = vrot.slane %v5868_v54, %v23697_v31  ;;  %v5957_v20 = vrot.slane %v5939_v17, %v23697_v31  ;;  %v6147_v54 = vld [vmem:[#allocation16 + $0x20] sm:$0xff] }
 0xde7   :  { %v22836_v23 = vsub.f32 %v23698_v60, %v5945_v51  ;;  %v22839_v3 = vsub.f32 %v23699_v34, %v5945_v51  ;;  %v22842_v11 = vsub.f32 %v23700_v42, %v5953_v43  ;;  %v22845_v62 = vsub.f32 %v23701_v53, %v5953_v43  ;;  %v6150_v51 = vld [vmem:[#allocation16 + $0x38] sm:$0xff]  ;;  %v6143_v43 = vld [vmem:[#allocation16] sm:$0xff]  ;;  %v6149_v60 = vld [vmem:[#allocation16 + $0x30] sm:$0xff]  ;;  %17984 = vmatprep.subr.bf16.mxu0 %v17983_v26 }
 0xde8   :  { %v22848_v15 = vsub.f32 %v23702_v63, %v5949_v29  ;;  %v22851_v2 = vsub.f32 %v23703_v9, %v5949_v29  ;;  %v22854_v44 = vsub.f32 %v23704_v19, %v5957_v20  ;;  %v22857_v12 = vsub.f32 %v23705_v6, %v5957_v20  ;;  %v6145_v20 = vld [vmem:[#allocation16 + $0x10] sm:$0xff]  ;;  %v6152_v34 = vld [vmem:[#allocation16 + $0x48] sm:$0xff]  ;;  %v6154_v63 = vld [vmem:[#allocation16 + $0x58] sm:$0xff] }
 0xde9   :  { %v5966_v57 = vmul.f32 %v22836_v23, %v22836_v23  ;;  %v5970_v38 = vmul.f32 %v22839_v3, %v22839_v3  ;;  %v5968_v40 = vmul.f32 %v22842_v11, %v22842_v11  ;;  %v5972_v50 = vmul.f32 %v22845_v62, %v22845_v62  ;;  %v6156_v53 = vld [vmem:[#allocation16 + $0x68] sm:$0xff]  ;;  %v6158_v9 = vld [vmem:[#allocation16 + $0x78] sm:$0xff] }
 0xdea   :  { %v5967_v46 = vmul.f32 %v22848_v15, %v22848_v15  ;;  %v5971_v8 = vmul.f32 %v22851_v2, %v22851_v2  ;;  %v5969_v56 = vmul.f32 %v22854_v44, %v22854_v44  ;;  %v5973_v13 = vmul.f32 %v22857_v12, %v22857_v12 }
 0xdeb   :  { %v5974_v21 = vadd.f32 %v5970_v38, %v5966_v57  ;;  %v5988_v35 = vadd.f32 %v5972_v50, %v5968_v40  ;;  %v17999_v17 = vpack.c.bf16 %v6150_v51, %v6146_v7  ;;  %v17985_v29 = vpack.c.bf16 %v6147_v54, %v6143_v43  ;;  %v6151_v57 = vld [vmem:[#allocation16 + $0x40] sm:$0xff]  ;;  %v6153_v40 = vld [vmem:[#allocation16 + $0x50] sm:$0xff] }
 0xdec   :  { %v5981_v30 = vadd.f32 %v5971_v8, %v5967_v46  ;;  %v5995_v39 = vadd.f32 %v5973_v13, %v5969_v56  ;;  %v18001_v42 = vpack.c.bf16 %v6149_v60, %v6145_v20  ;;  %v17987_v19 = vpack.c.bf16 %v6156_v53, %v6152_v34  ;;  %v6155_v38 = vld [vmem:[#allocation16 + $0x60] sm:$0xff]  ;;  %v6157_v46 = vld [vmem:[#allocation16 + $0x70] sm:$0xff]  ;;  %v6160_v8 = vld [vmem:[#allocation16 + $0x88] sm:$0xff] }
 0xded   :  { %v5975_v28 = vrot.slane %v5974_v21, 4  ;;  %v5989_v47 = vrot.slane %v5988_v35, 4  ;;  %18000 = vmatprep.subr.bf16.mxu1 %v17999_v17  ;;  %v18003_v6 = vpack.c.bf16 %v6158_v9, %v6154_v63  ;;  %v17989_v50 = vpack.c.bf16 %v6155_v38, %v6151_v57  ;;  %v6164_v56 = vld [vmem:[#allocation16 + $0xa8] sm:$0xff]  ;;  %v6344_v51 = vld [vmem:[#allocation17] sm:$0xf]  ;;  %v23708_v9 = vld [vmem:[#allocation77_spill] sm:$0xff] }
 0xdee   :  { %v5982_v32 = vrot.slane %v5981_v30, 4  ;;  %v5996_v24 = vrot.slane %v5995_v39, 4  ;;  %v18005_v13 = vpack.c.bf16 %v6157_v46, %v6153_v40  ;;  %v23706_v26 = vmov 0   ;;  %v23707_v60 = vld [vmem:[#allocation74_spill] sm:$0xff]  ;;  %v23709_v57 = vld [vmem:[#allocation80_spill] sm:$0xff] }
 0xdef   :  { %v5976_v0 = vadd.f32 %v5975_v28, %v5974_v21  ;;  %v5990_v49 = vadd.f32 %v5989_v47, %v5988_v35  ;;  %v17991_v21 = vpack.c.bf16 %v6164_v56, %v6160_v8  ;;  %v6162_v35 = vld [vmem:[#allocation16 + $0x98] sm:$0xff]  ;;  %v6163_v47 = vld [vmem:[#allocation16 + $0xa0] sm:$0xff]  ;;  %v6357_v34 = vrot.slane %v6344_v51, %v23707_v60 }
 0xdf0   :  { %v5983_v52 = vadd.f32 %v5982_v32, %v5981_v30  ;;  %v5997_v16 = vadd.f32 %v5996_v24, %v5995_v39  ;;  %v6166_v30 = vld [vmem:[#allocation16 + $0xb8] sm:$0xff]  ;;  %v6159_v39 = vld [vmem:[#allocation16 + $0x80] sm:$0xff]  ;;  %v6161_v32 = vld [vmem:[#allocation16 + $0x90] sm:$0xff]  ;;  %v6361_v38 = vrot.slane %v6344_v51, %v23709_v57 }
 0xdf1   :  { %v5977_v4 = vrot.slane %v5976_v0, 2  ;;  %v5991_v58 = vrot.slane %v5990_v49, 2  ;;  %v18007_v28 = vpack.c.bf16 %v6166_v30, %v6162_v35  ;;  %v6165_v24 = vld [vmem:[#allocation16 + $0xb0] sm:$0xff] }
 0xdf2   :  { %v5984_v22 = vrot.slane %v5983_v52, 2  ;;  %v5998_v59 = vrot.slane %v5997_v16, 2 }
 0xdf3   :  { %v5978_v10 = vadd.f32 %v5977_v4, %v5976_v0  ;;  %v5992_v55 = vadd.f32 %v5991_v58, %v5990_v49  ;;  %v17993_v0 = vpack.c.bf16 %v6163_v47, %v6159_v39  ;;  %v6168_v49 = vld [vmem:[#allocation16 + $0xc8] sm:$0xff]  ;;  %v18009_v4 = vpack.c.bf16 %v6165_v24, %v6161_v32 }
 0xdf4   :  { %v5985_v14 = vadd.f32 %v5984_v22, %v5983_v52  ;;  %v5999_v37 = vadd.f32 %v5998_v59, %v5997_v16  ;;  %v6172_v52 = vld [vmem:[#allocation16 + $0xe8] sm:$0xff]  ;;  %v6170_v16 = vld [vmem:[#allocation16 + $0xd8] sm:$0xff]  ;;  %v6167_v59 = vld [vmem:[#allocation16 + $0xc0] sm:$0xff] }
 0xdf5   :  { %v5979_v45 = vrot.slane %v5978_v10, 1  ;;  %v5993_v36 = vrot.slane %v5992_v55, 1  ;;  %v17995_v58 = vpack.c.bf16 %v6172_v52, %v6168_v49  ;;  %v6174_v22 = vld [vmem:[#allocation16 + $0xf8] sm:$0xff] }
 0xdf6   :  { %v5986_v27 = vrot.slane %v5985_v14, 1  ;;  %v6000_v25 = vrot.slane %v5999_v37, 1 }
 0xdf7   :  { %v5980_v48 = vadd.f32 %v5979_v45, %v5978_v10  ;;  %v5994_v18 = vadd.f32 %v5993_v36, %v5992_v55  ;;  %v6171_v10 = vld [vmem:[#allocation16 + $0xe0] sm:$0xff]  ;;  %v18011_v55 = vpack.c.bf16 %v6174_v22, %v6170_v16 }
 0xdf8   :  { %v5987_v33 = vadd.f32 %v5986_v27, %v5985_v14  ;;  %v6001_v61 = vadd.f32 %v6000_v25, %v5999_v37  ;;  %v6169_v14 = vld [vmem:[#allocation16 + $0xd0] sm:$0xff]  ;;  %v17997_v45 = vpack.c.bf16 %v6171_v10, %v6167_v59 }
 0xdf9   :  { %v6173_v37 = vld [vmem:[#allocation16 + $0xf0] sm:$0xff] }
 0xdfa   :  { %6066 = vmatprep.mubr.f32.mxu0 %v5987_v33  ;;  %6136 = vmatprep.mubr.f32.mxu1 %v6001_v61  ;;  %v18013_v36 = vpack.c.bf16 %v6173_v37, %v6169_v14 }
 0xdfb   :  { %6067 = vmatmul.mubr.f32.vlgmr.msra.gmra.mrb[42].mxu0 %v5980_v48  ;;  %6137 = vmatmul.mubr.f32.vlgmr.msra.gmra.mrb[42].mxu1 %v5994_v18 }
 0xdfc   :  { %6242 = vmatprep.mubr.f32.mxu0 %v23696_v5  ;;  %6313 = vmatprep.mubr.f32.mxu1 %v23696_v5 }
 0xdfd   :  { %17986 = vmatpush1.bf16.msra.mxu0 %v17985_v29  ;;  %18002 = vmatpush1.bf16.msra.mxu1 %v18001_v42  ;;  %v6349_v29 = vrot.slane %v6344_v51, %v23697_v31 }
 0xdfe   :  { %17988 = vmatprep.subr.bf16.mxu0 %v17987_v19  ;;  %18004 = vmatprep.subr.bf16.mxu1 %v18003_v6  ;;  %v6353_v19 = vrot.slane %v6344_v51, %v23708_v9  ;;  %v19715_v51 = vld [vmem:[#allocation20 + $0x428] ss:$16 sps:$4 sm:$0xff]  }
 0xdff   :  { %v9716_v9 = vld [vmem:[#allocation23 + $0x58] sm:$0xff] }
 0xe01   :  { %17990 = vmatpush1.bf16.msra.mxu0 %v17989_v50  ;;  %18006 = vmatpush1.bf16.msra.mxu1 %v18005_v13 }
 0xe02   :  { %17992 = vmatprep.subr.bf16.mxu0 %v17991_v21  ;;  %18008 = vmatprep.subr.bf16.mxu1 %v18007_v28 }
 0xe05   :  { %17994 = vmatpush1.bf16.msra.mxu0 %v17993_v0  ;;  %18010 = vmatpush1.bf16.msra.mxu1 %v18009_v4 }
 0xe06   :  { %17996 = vmatprep.subr.bf16.mxu0 %v17995_v58  ;;  %18012 = vmatprep.subr.bf16.mxu1 %v18011_v55 }
 0xe09   :  { %17998 = vmatpush1.bf16.msra.mxu0 %v17997_v45  ;;  %18014 = vmatpush1.bf16.msra.mxu1 %v18013_v36 }
 0xece   :  { %v17449_v27 = vpop.f32.mrb[42].mxu0  ;;  %v17484_v25 = vpop.f32.mrb[42].mxu1 }
 0xecf   :  { %v17450_v33 = vpop.f32.mrb[43].mxu0  ;;  %v17485_v61 = vpop.f32.mrb[43].mxu1 }
 0xed0   :  { %v17451_v48 = vadd.f32 %v17450_v33, %v17449_v27  ;;  %v17486_v18 = vadd.f32 %v17485_v61, %v17484_v25  ;;  %v6402_v27 = vld [vmem:[#allocation19] sm:$0xf]  ;;  %v19711_v33 = vld [vmem:[#allocation20 + $0x40c] ss:$16 sps:$4 sm:$0xff]   ;;  %v6622_v61 = vld [vmem:[#allocation19 + $0x4] sm:$0xf] }
 0xed1   :  { %v19708_v25 = vld [vmem:[#allocation20 + $0x404] ss:$16 sps:$4 sm:$0xff]  }
 0xed2   :  { %v6069_v41 = vadd.f32 1e-05, %v17451_v48  ;;  %v19706_v48 = vld [vmem:[#allocation20 + $0x400] ss:$16 sps:$4 sm:$0xff]  }
 0xed4   :  { %v6139_v1 = vadd.f32 %v17486_v18, %v6069_v41  ;;  %v19709_v18 = vld [vmem:[#allocation20 + $0x408] ss:$16 sps:$4 sm:$0xff]   ;;  %v19714_v41 = vld [vmem:[#allocation20 + $0x424] ss:$16 sps:$4 sm:$0xff]  }
 0xed6   :  { %21052 = vrsqrt.f32 %v6139_v1  ;;  %v19717_v1 = vld [vmem:[#allocation20 + $0x42c] ss:$16 sps:$4 sm:$0xff]  }
 0xee0   :  { %v21053_v7 = vpop.eup %21052 }
 0xee1   :  { %16265 = vmatmul.mubr.msk.f32.vlgmr.msra.gmra.mrb[44].mxu0 %vm498_vm0, %v21053_v7  ;;  %16266 = vmatmul.mubr.msk.f32.vlgmr.msra.gmra.mrb[44].mxu1 %vm498_vm0, %v21053_v7  ;;  %v19712_v7 = vld [vmem:[#allocation20 + $0x420] ss:$16 sps:$4 sm:$0xff]  }
 0xee2   :  { %6439 = vmatprep.mubr.bf16.mxu0 %v23706_v26  ;;  %6480 = vmatprep.mubr.bf16.mxu1 %v23706_v26 }
 0xfb4   :  { %v6244_v43 = vpop.f32.mrb[44].mxu0  ;;  %v6315_v54 = vpop.f32.mrb[44].mxu1 }
 0xfb5   :  { %v6323_v17 = vrot.slane %v6244_v43, %v23697_v31  ;;  %v6331_v20 = vrot.slane %v6315_v54, %v23697_v31  ;;  %v6246_v42 = vpop.f32.mrb[45].mxu0  ;;  %v6317_v53 = vpop.f32.mrb[45].mxu1  ;;  %v19720_v43 = vld [vmem:[#allocation20 + $0x444] ss:$16 sps:$4 sm:$0xff]   ;;  %v19723_v54 = vld [vmem:[#allocation20 + $0x44c] ss:$16 sps:$4 sm:$0xff]  }
 0xfb6   :  { %v6327_v63 = vrot.slane %v6246_v42, %v23697_v31  ;;  %v6335_v6 = vrot.slane %v6317_v53, %v23697_v31  ;;  %v19724_v42 = vld [vmem:[#allocation20 + $0x460] ss:$16 sps:$4 sm:$0xff]   ;;  %v19727_v53 = vld [vmem:[#allocation20 + $0x468] ss:$16 sps:$4 sm:$0xff]  }
 0xfb7   :  { %v6336_v40 = vmul.f32 %v6323_v17, %v22836_v23  ;;  %v6340_v50 = vmul.f32 %v6323_v17, %v22839_v3  ;;  %v6338_v46 = vmul.f32 %v6331_v20, %v22842_v11  ;;  %v6342_v8 = vmul.f32 %v6331_v20, %v22845_v62  ;;  %v19718_v17 = vld [vmem:[#allocation20 + $0x440] ss:$16 sps:$4 sm:$0xff]   ;;  %v19726_v20 = vld [vmem:[#allocation20 + $0x464] ss:$16 sps:$4 sm:$0xff]   ;;  %v9724_v31 = vld [vmem:[#allocation23 + $0x98] sm:$0xff] }
 0xfb8   :  { %v6337_v56 = vmul.f32 %v6327_v63, %v22848_v15  ;;  %v6341_v13 = vmul.f32 %v6327_v63, %v22851_v2  ;;  %v6339_v21 = vmul.f32 %v6335_v6, %v22854_v44  ;;  %v6343_v35 = vmul.f32 %v6335_v6, %v22857_v12  ;;  %v19732_v63 = vld [vmem:[#allocation20 + $0x484] ss:$16 sps:$4 sm:$0xff]   ;;  %v19730_v6 = vld [vmem:[#allocation20 + $0x480] ss:$16 sps:$4 sm:$0xff]  }
 0xfb9   :  { %v6366_v30 = vadd.f32 %v6349_v29, %v6336_v40  ;;  %v6370_v39 = vadd.f32 %v6349_v29, %v6340_v50  ;;  %v6368_v28 = vadd.f32 %v6357_v34, %v6338_v46  ;;  %v6372_v47 = vadd.f32 %v6357_v34, %v6342_v8  ;;  %v19721_v29 = vld [vmem:[#allocation20 + $0x448] ss:$16 sps:$4 sm:$0xff]   ;;  %v19729_v34 = vld [vmem:[#allocation20 + $0x46c] ss:$16 sps:$4 sm:$0xff]   ;;  %v19738_v40 = vld [vmem:[#allocation20 + $0x4a4] ss:$16 sps:$4 sm:$0xff]  }
 0xfba   :  { %v6367_v32 = vadd.f32 %v6353_v19, %v6337_v56  ;;  %v6371_v23 = vadd.f32 %v6353_v19, %v6341_v13  ;;  %v6369_v24 = vadd.f32 %v6361_v38, %v6339_v21  ;;  %v6373_v3 = vadd.f32 %v6361_v38, %v6343_v35  ;;  %v19735_v19 = vld [vmem:[#allocation20 + $0x48c] ss:$16 sps:$4 sm:$0xff]   ;;  %v19733_v38 = vld [vmem:[#allocation20 + $0x488] ss:$16 sps:$4 sm:$0xff]   ;;  %v19736_v46 = vld [vmem:[#allocation20 + $0x4a0] ss:$16 sps:$4 sm:$0xff]  }
 0xfbb   :  { %vm6374_vm0 = vcmp.gt.f32.partialorder %v6366_v30, 0.0  ;;  %vm6378_vm2 = vcmp.gt.f32.partialorder %v6370_v39, 0.0  ;;  %v6382_v11 = vmul.f32 0.01, %v6366_v30  ;;  %v6386_v62 = vmul.f32 0.01, %v6370_v39 }
 0xfbc   :  { %vm6376_vm5 = vcmp.gt.f32.partialorder %v6368_v28, 0.0  ;;  %vm6380_vm6 = vcmp.gt.f32.partialorder %v6372_v47, 0.0  ;;  %v6384_v15 = vmul.f32 0.01, %v6368_v28  ;;  %v6388_v2 = vmul.f32 0.01, %v6372_v47 }
 0xfbd   :  { %v6383_v0 = vmul.f32 0.01, %v6367_v32  ;;  %v6387_v44 = vmul.f32 0.01, %v6371_v23  ;;  %v6385_v49 = vmul.f32 0.01, %v6369_v24  ;;  %v6390_v12 = vsel %vm6374_vm0, %v6366_v30, %v6382_v11 }
 0xfbe   :  { %v6389_v52 = vmul.f32 0.01, %v6373_v3  ;;  %vm6375_vm7 = vcmp.gt.f32.partialorder %v6367_v32, 0.0  ;;  %vm6379_vm8 = vcmp.gt.f32.partialorder %v6371_v23, 0.0  ;;  %vm6377_vm9 = vcmp.gt.f32.partialorder %v6369_v24, 0.0 }
 0xfbf   :  { %v6391_v16 = vsel %vm6375_vm7, %v6367_v32, %v6383_v0  ;;  %v6395_v4 = vsel %vm6379_vm8, %v6371_v23, %v6387_v44  ;;  %vm6381_vm10 = vcmp.gt.f32.partialorder %v6373_v3, 0.0  ;;  %v6393_v58 = vsel %vm6377_vm9, %v6369_v24, %v6385_v49  ;;  %v19741_v50 = vld [vmem:[#allocation20 + $0x4ac] ss:$16 sps:$4 sm:$0xff]   ;;  %v19739_v8 = vld [vmem:[#allocation20 + $0x4a8] ss:$16 sps:$4 sm:$0xff]  }
 0xfc0   :  { %v22897_v22 = vpack.c.bf16 %v6395_v4, %v6391_v16  ;;  %v6397_v59 = vsel %vm6381_vm10, %v6373_v3, %v6389_v52  ;;  %v6394_v10 = vsel %vm6378_vm2, %v6370_v39, %v6386_v62  ;;  %v6392_v55 = vsel %vm6376_vm5, %v6368_v28, %v6384_v15  ;;  %v19744_v56 = vld [vmem:[#allocation20 + $0x4c4] ss:$16 sps:$4 sm:$0xff]   ;;  %v19747_v13 = vld [vmem:[#allocation20 + $0x4cc] ss:$16 sps:$4 sm:$0xff]   ;;  %v19742_v21 = vld [vmem:[#allocation20 + $0x4c0] ss:$16 sps:$4 sm:$0xff]  }
 0xfc1   :  { %v22901_v14 = vpack.c.bf16 %v6397_v59, %v6393_v58  ;;  %v22903_v37 = vpack.c.bf16 %v6394_v10, %v6390_v12  ;;  %v6396_v45 = vsel %vm6380_vm6, %v6372_v47, %v6388_v2  ;;  %v19745_v35 = vld [vmem:[#allocation20 + $0x4c8] ss:$16 sps:$4 sm:$0xff]   ;;  %v19750_v30 = vld [vmem:[#allocation20 + $0x4e4] ss:$16 sps:$4 sm:$0xff]   ;;  %v19753_v39 = vld [vmem:[#allocation20 + $0x4ec] ss:$16 sps:$4 sm:$0xff]  }
 0xfc2   :  { %6407 = vmatprep.subr.bf16.mxu0 %v22897_v22  ;;  %v22907_v36 = vpack.c.bf16 %v6396_v45, %v6392_v55  ;;  %v19748_v28 = vld [vmem:[#allocation20 + $0x4e0] ss:$16 sps:$4 sm:$0xff]   ;;  %v19751_v47 = vld [vmem:[#allocation20 + $0x4e8] ss:$16 sps:$4 sm:$0xff]   ;;  %v19756_v32 = vld [vmem:[#allocation20 + $0x504] ss:$16 sps:$4 sm:$0xff]  }
 0xfc3   :  { %6448 = vmatprep.subr.bf16.mxu1 %v22901_v14  ;;  %6408 = vmatpush1.bf16.msra.mxu0 %v22903_v37  ;;  %v19759_v23 = vld [vmem:[#allocation20 + $0x50c] ss:$16 sps:$4 sm:$0xff]   ;;  %v19754_v24 = vld [vmem:[#allocation20 + $0x500] ss:$16 sps:$4 sm:$0xff]   ;;  %v19757_v3 = vld [vmem:[#allocation20 + $0x508] ss:$16 sps:$4 sm:$0xff]  }
 0xfc4   :  { %6449 = vmatpush1.bf16.msra.mxu1 %v22907_v36  ;;  %6626 = vmatprep.subr.bf16.mxu0 %v22897_v22  ;;  %v19762_v11 = vld [vmem:[#allocation20 + $0x524] ss:$16 sps:$4 sm:$0xff]   ;;  %v19765_v62 = vld [vmem:[#allocation20 + $0x52c] ss:$16 sps:$4 sm:$0xff]   ;;  %v19760_v15 = vld [vmem:[#allocation20 + $0x520] ss:$16 sps:$4 sm:$0xff]  }
 0xfc5   :  { %6667 = vmatprep.subr.bf16.mxu1 %v22901_v14  ;;  %v19763_v2 = vld [vmem:[#allocation20 + $0x528] ss:$16 sps:$4 sm:$0xff]   ;;  %v19768_v0 = vld [vmem:[#allocation20 + $0x544] ss:$16 sps:$4 sm:$0xff]   ;;  %v19771_v44 = vld [vmem:[#allocation20 + $0x54c] ss:$16 sps:$4 sm:$0xff]  }
 0xfc6   :  { %16267 = vmatmul.mubr.msk.bf16.vlgmr.msra.gmra.mrb[48].mxu0 %vm6403_vm11, %v6402_v27  ;;  %v19766_v49 = vld [vmem:[#allocation20 + $0x540] ss:$16 sps:$4 sm:$0xff]   ;;  %v19769_v12 = vld [vmem:[#allocation20 + $0x548] ss:$16 sps:$4 sm:$0xff]   ;;  %v19774_v52 = vld [vmem:[#allocation20 + $0x564] ss:$16 sps:$4 sm:$0xff]  }
 0xfc7   :  { %16268 = vmatmul.mubr.msk.bf16.vlgmr.msra.gmra.mrb[48].mxu1 %vm6403_vm11, %v6402_v27  ;;  %6627 = vmatpush1.bf16.msra.mxu0 %v22903_v37  ;;  %v19777_v16 = vld [vmem:[#allocation20 + $0x56c] ss:$16 sps:$4 sm:$0xff]   ;;  %v19772_v4 = vld [vmem:[#allocation20 + $0x560] ss:$16 sps:$4 sm:$0xff]   ;;  %v19775_v58 = vld [vmem:[#allocation20 + $0x568] ss:$16 sps:$4 sm:$0xff]  }
 0xfc8   :  { %6668 = vmatpush1.bf16.msra.mxu1 %v22907_v36  ;;  %6658 = vmatprep.mubr.bf16.mxu0 %v23706_v26  ;;  %v19780_v59 = vld [vmem:[#allocation20 + $0x584] ss:$16 sps:$4 sm:$0xff]   ;;  %v19783_v10 = vld [vmem:[#allocation20 + $0x58c] ss:$16 sps:$4 sm:$0xff]   ;;  %v19778_v55 = vld [vmem:[#allocation20 + $0x580] ss:$16 sps:$4 sm:$0xff]  }
 0xfc9   :  { %6699 = vmatprep.mubr.bf16.mxu1 %v23706_v26  ;;  %7481 = vmatprep.subr.bf16.mxu0 %v19708_v25  ;;  %v19781_v45 = vld [vmem:[#allocation20 + $0x588] ss:$16 sps:$4 sm:$0xff]   ;;  %v19784_v27 = vld [vmem:[#allocation20 + $0x5a0] ss:$16 sps:$4 sm:$0xff]   ;;  %v19786_v25 = vld [vmem:[#allocation20 + $0x5a4] ss:$16 sps:$4 sm:$0xff]  }
 0xfca   :  { %7563 = vmatprep.subr.bf16.mxu1 %v19711_v33  ;;  %v19787_v33 = vld [vmem:[#allocation20 + $0x5a8] ss:$16 sps:$4 sm:$0xff]   ;;  %vm14557_vm2 = vcmask 1041408   ;;  %vm14553_vm5 = vcmask 31744  }
 0xfce   :  { %16269 = vmatmul.mubr.msk.bf16.vlgmr.msra.gmra.mrb[52].mxu0 %vm6403_vm11, %v6622_v61 }
 0xfcf   :  { %16270 = vmatmul.mubr.msk.bf16.vlgmr.msra.gmra.mrb[52].mxu1 %vm6403_vm11, %v6622_v61  ;;  %7482 = vmatpush1.bf16.msra.mxu0 %v19706_v48  ;;  %v19789_v61 = vld [vmem:[#allocation20 + $0x5ac] ss:$16 sps:$4 sm:$0xff]   ;;  %v19792_v48 = vld [vmem:[#allocation20 + $0x5c4] ss:$16 sps:$4 sm:$0xff]  }
 0xfd0   :  { %7564 = vmatpush1.bf16.msra.mxu1 %v19709_v18  ;;  %7483 = vmatprep.subr.bf16.mxu0 %v19714_v41  ;;  %v19790_v18 = vld [vmem:[#allocation20 + $0x5c0] ss:$16 sps:$4 sm:$0xff]   ;;  %v19795_v41 = vld [vmem:[#allocation20 + $0x5cc] ss:$16 sps:$4 sm:$0xff]  }
 0xfd1   :  { %7565 = vmatprep.subr.bf16.mxu1 %v19717_v1  ;;  %v19793_v1 = vld [vmem:[#allocation20 + $0x5c8] ss:$16 sps:$4 sm:$0xff]  }
 0xfd3   :  { %7484 = vmatpush1.bf16.msra.mxu0 %v19712_v7  ;;  %v19796_v7 = vld [vmem:[#allocation20 + $0x5e0] ss:$16 sps:$4 sm:$0xff]  }
 0xfd4   :  { %7566 = vmatpush1.bf16.msra.mxu1 %v19715_v51  ;;  %7485 = vmatprep.subr.bf16.mxu0 %v19720_v43  ;;  %v19798_v51 = vld [vmem:[#allocation20 + $0x5e4] ss:$16 sps:$4 sm:$0xff]   ;;  %v19799_v43 = vld [vmem:[#allocation20 + $0x5e8] ss:$16 sps:$4 sm:$0xff]  }
 0xfd5   :  { %7567 = vmatprep.subr.bf16.mxu1 %v19723_v54  ;;  %v19801_v54 = vld [vmem:[#allocation20 + $0x5ec] ss:$16 sps:$4 sm:$0xff]  }
 0xfd7   :  { %7486 = vmatpush1.bf16.msra.mxu0 %v19718_v17  ;;  %v19804_v17 = vld [vmem:[#allocation20 + $0x604] ss:$16 sps:$4 sm:$0xff]  }
 0xfd8   :  { %7568 = vmatpush1.bf16.msra.mxu1 %v19721_v29  ;;  %7487 = vmatprep.subr.bf16.mxu0 %v19726_v20  ;;  %v19807_v29 = vld [vmem:[#allocation20 + $0x60c] ss:$16 sps:$4 sm:$0xff]  }
 0xfd9   :  { %7569 = vmatprep.subr.bf16.mxu1 %v19729_v34 }
 0xfdb   :  { %7488 = vmatpush1.bf16.msra.mxu0 %v19724_v42 }
 0xfdc   :  { %7570 = vmatpush1.bf16.msra.mxu1 %v19727_v53  ;;  %7489 = vmatprep.subr.bf16.mxu0 %v19732_v63 }
 0xfdd   :  { %7571 = vmatprep.subr.bf16.mxu1 %v19735_v19 }
 0xfdf   :  { %7490 = vmatpush1.bf16.msra.mxu0 %v19730_v6 }
 0xfe0   :  { %7572 = vmatpush1.bf16.msra.mxu1 %v19733_v38  ;;  %7491 = vmatprep.subr.bf16.mxu0 %v19738_v40 }
 0xfe1   :  { %7573 = vmatprep.subr.bf16.mxu1 %v19741_v50 }
 0xfe3   :  { %7492 = vmatpush1.bf16.msra.mxu0 %v19736_v46 }
 0xfe4   :  { %7574 = vmatpush1.bf16.msra.mxu1 %v19739_v8  ;;  %7493 = vmatprep.subr.bf16.mxu0 %v19744_v56 }
 0xfe5   :  { %7575 = vmatprep.subr.bf16.mxu1 %v19747_v13  ;;  %v19802_v13 = vld [vmem:[#allocation20 + $0x600] ss:$16 sps:$4 sm:$0xff]  }
 0xfe7   :  { %7494 = vmatpush1.bf16.msra.mxu0 %v19742_v21  ;;  %v19805_v21 = vld [vmem:[#allocation20 + $0x608] ss:$16 sps:$4 sm:$0xff]  }
 0xfe8   :  { %7576 = vmatpush1.bf16.msra.mxu1 %v19745_v35  ;;  %7495 = vmatprep.subr.bf16.mxu0 %v19750_v30 }
 0xfe9   :  { %7577 = vmatprep.subr.bf16.mxu1 %v19753_v39 }
 0xfeb   :  { %7496 = vmatpush1.bf16.msra.mxu0 %v19748_v28  ;;  %v19810_v28 = vld [vmem:[#allocation20 + $0x624] ss:$16 sps:$4 sm:$0xff]  }
 0xfec   :  { %7578 = vmatpush1.bf16.msra.mxu1 %v19751_v47  ;;  %7497 = vmatprep.subr.bf16.mxu0 %v19756_v32  ;;  %v19813_v47 = vld [vmem:[#allocation20 + $0x62c] ss:$16 sps:$4 sm:$0xff]  }
 0xfed   :  { %7579 = vmatprep.subr.bf16.mxu1 %v19759_v23 }
 0xfef   :  { %7498 = vmatpush1.bf16.msra.mxu0 %v19754_v24 }
 0xff0   :  { %7580 = vmatpush1.bf16.msra.mxu1 %v19757_v3  ;;  %7499 = vmatprep.subr.bf16.mxu0 %v19762_v11  ;;  %v19808_v3 = vld [vmem:[#allocation20 + $0x620] ss:$16 sps:$4 sm:$0xff]   ;;  %v19811_v11 = vld [vmem:[#allocation20 + $0x628] ss:$16 sps:$4 sm:$0xff]  }
 0xff1   :  { %7581 = vmatprep.subr.bf16.mxu1 %v19765_v62  ;;  %v19816_v62 = vld [vmem:[#allocation20 + $0x644] ss:$16 sps:$4 sm:$0xff]  }
 0xff3   :  { %7500 = vmatpush1.bf16.msra.mxu0 %v19760_v15  ;;  %v19819_v15 = vld [vmem:[#allocation20 + $0x64c] ss:$16 sps:$4 sm:$0xff]  }
 0xff4   :  { %7582 = vmatpush1.bf16.msra.mxu1 %v19763_v2  ;;  %7501 = vmatprep.subr.bf16.mxu0 %v19768_v0  ;;  %v19814_v2 = vld [vmem:[#allocation20 + $0x640] ss:$16 sps:$4 sm:$0xff]   ;;  %v19817_v0 = vld [vmem:[#allocation20 + $0x648] ss:$16 sps:$4 sm:$0xff]  }
 0xff5   :  { %7583 = vmatprep.subr.bf16.mxu1 %v19771_v44  ;;  %v19822_v44 = vld [vmem:[#allocation20 + $0x664] ss:$16 sps:$4 sm:$0xff]  }
 0xff7   :  { %7502 = vmatpush1.bf16.msra.mxu0 %v19766_v49  ;;  %v19825_v49 = vld [vmem:[#allocation20 + $0x66c] ss:$16 sps:$4 sm:$0xff]  }
 0xff8   :  { %7584 = vmatpush1.bf16.msra.mxu1 %v19769_v12  ;;  %7503 = vmatprep.subr.bf16.mxu0 %v19774_v52  ;;  %v19820_v12 = vld [vmem:[#allocation20 + $0x660] ss:$16 sps:$4 sm:$0xff]   ;;  %v19823_v52 = vld [vmem:[#allocation20 + $0x668] ss:$16 sps:$4 sm:$0xff]  }
 0xff9   :  { %7585 = vmatprep.subr.bf16.mxu1 %v19777_v16  ;;  %v19828_v16 = vld [vmem:[#allocation20 + $0x684] ss:$16 sps:$4 sm:$0xff]  }
 0xffb   :  { %7504 = vmatpush1.bf16.msra.mxu0 %v19772_v4  ;;  %v19831_v4 = vld [vmem:[#allocation20 + $0x68c] ss:$16 sps:$4 sm:$0xff]  }
 0xffc   :  { %7586 = vmatpush1.bf16.msra.mxu1 %v19775_v58  ;;  %7505 = vmatprep.subr.bf16.mxu0 %v19780_v59  ;;  %v19826_v58 = vld [vmem:[#allocation20 + $0x680] ss:$16 sps:$4 sm:$0xff]   ;;  %v19829_v59 = vld [vmem:[#allocation20 + $0x688] ss:$16 sps:$4 sm:$0xff]  }
 0xffd   :  { %7587 = vmatprep.subr.bf16.mxu1 %v19783_v10  ;;  %v19834_v10 = vld [vmem:[#allocation20 + $0x6a4] ss:$16 sps:$4 sm:$0xff]  }
 0xfff   :  { %7506 = vmatpush1.bf16.msra.mxu0 %v19778_v55  ;;  %v19837_v55 = vld [vmem:[#allocation20 + $0x6ac] ss:$16 sps:$4 sm:$0xff]  }
0x1000   :  { %7588 = vmatpush1.bf16.msra.mxu1 %v19781_v45  ;;  %7507 = vmatprep.subr.bf16.mxu0 %v19786_v25  ;;  %v19832_v45 = vld [vmem:[#allocation20 + $0x6a0] ss:$16 sps:$4 sm:$0xff]   ;;  %v19840_v25 = vld [vmem:[#allocation20 + $0x6c4] ss:$16 sps:$4 sm:$0xff]  }
0x1001   :  { %7589 = vmatprep.subr.bf16.mxu1 %v19789_v61  ;;  %v19838_v61 = vld [vmem:[#allocation20 + $0x6c0] ss:$16 sps:$4 sm:$0xff]  }
0x1003   :  { %7508 = vmatpush1.bf16.msra.mxu0 %v19784_v27  ;;  %v19835_v27 = vld [vmem:[#allocation20 + $0x6a8] ss:$16 sps:$4 sm:$0xff]  }
0x1004   :  { %7590 = vmatpush1.bf16.msra.mxu1 %v19787_v33  ;;  %7509 = vmatprep.subr.bf16.mxu0 %v19792_v48  ;;  %v19843_v33 = vld [vmem:[#allocation20 + $0x6cc] ss:$16 sps:$4 sm:$0xff]   ;;  %v19841_v48 = vld [vmem:[#allocation20 + $0x6c8] ss:$16 sps:$4 sm:$0xff]  }
0x1005   :  { %7591 = vmatprep.subr.bf16.mxu1 %v19795_v41  ;;  %v19849_v41 = vld [vmem:[#allocation20 + $0x6ec] ss:$16 sps:$4 sm:$0xff]  }
0x1007   :  { %7510 = vmatpush1.bf16.msra.mxu0 %v19790_v18  ;;  %v19846_v18 = vld [vmem:[#allocation20 + $0x6e4] ss:$16 sps:$4 sm:$0xff]  }
0x1008   :  { %7592 = vmatpush1.bf16.msra.mxu1 %v19793_v1  ;;  %7511 = vmatprep.subr.bf16.mxu0 %v19798_v51  ;;  %v19844_v1 = vld [vmem:[#allocation20 + $0x6e0] ss:$16 sps:$4 sm:$0xff]   ;;  %v19852_v51 = vld [vmem:[#allocation20 + $0x704] ss:$16 sps:$4 sm:$0xff]  }
0x1009   :  { %7593 = vmatprep.subr.bf16.mxu1 %v19801_v54  ;;  %v19850_v54 = vld [vmem:[#allocation20 + $0x700] ss:$16 sps:$4 sm:$0xff]  }
0x100b   :  { %7512 = vmatpush1.bf16.msra.mxu0 %v19796_v7  ;;  %v19847_v7 = vld [vmem:[#allocation20 + $0x6e8] ss:$16 sps:$4 sm:$0xff]  }
0x100c   :  { %7594 = vmatpush1.bf16.msra.mxu1 %v19799_v43  ;;  %7522 = vmatprep.subr.bf16.mxu0 %v19804_v17  ;;  %v19855_v43 = vld [vmem:[#allocation20 + $0x70c] ss:$16 sps:$4 sm:$0xff]   ;;  %v19853_v17 = vld [vmem:[#allocation20 + $0x708] ss:$16 sps:$4 sm:$0xff]  }
0x100d   :  { %7604 = vmatprep.subr.bf16.mxu1 %v19807_v29  ;;  %v19858_v29 = vld [vmem:[#allocation20 + $0x724] ss:$16 sps:$4 sm:$0xff]  }
0x1099   :  { %v22922_v20 = vpop.f32.mrb[48].mxu0 }
0x109a   :  { %v22924_v34 = vpop.f32.mrb[49].mxu0  ;;  %v22926_v42 = vpop.f32.mrb[48].mxu1 }
0x109b   :  { %v6445_v53 = vpop.f32.mrb[50].mxu0  ;;  %v22928_v63 = vpop.f32.mrb[49].mxu1 }
0x109c   :  { %v6446_v19 = vpop.f32.mrb[51].mxu0  ;;  %v6486_v6 = vpop.f32.mrb[50].mxu1  ;;  %v19861_v53 = vld [vmem:[#allocation20 + $0x72c] ss:$16 sps:$4 sm:$0xff]  }
0x109d   :  { %v6487_v38 = vpop.f32.mrb[51].mxu1  ;;  %v19856_v19 = vld [vmem:[#allocation20 + $0x720] ss:$16 sps:$4 sm:$0xff]   ;;  %v19859_v6 = vld [vmem:[#allocation20 + $0x728] ss:$16 sps:$4 sm:$0xff]  }
0x109e   :  { %v19864_v38 = vld [vmem:[#allocation20 + $0x744] ss:$16 sps:$4 sm:$0xff]  }
0x10a1   :  { %v6660_v40 = vpop.f32.mrb[52].mxu0 }
0x10a2   :  { %v6662_v50 = vpop.f32.mrb[53].mxu0  ;;  %v22930_v46 = vpop.f32.mrb[52].mxu1  ;;  %v6708_v30 = vpack.c.bf16 %v6660_v40, %v6660_v40  ;;  %v19867_v40 = vld [vmem:[#allocation20 + $0x74c] ss:$16 sps:$4 sm:$0xff]  }
0x10a3   :  { %v6709_v8 = vpack.c.bf16 %v6662_v50, %v6662_v50  ;;  %v6664_v56 = vpop.f32.mrb[54].mxu0  ;;  %v6703_v35 = vpop.f32.mrb[53].mxu1  ;;  %v19862_v50 = vld [vmem:[#allocation20 + $0x740] ss:$16 sps:$4 sm:$0xff]  }
0x10a4   :  { %v6665_v39 = vpop.f32.mrb[55].mxu0  ;;  %v6705_v32 = vpop.f32.mrb[54].mxu1  ;;  %v6711_v23 = vpack.c.bf16 %v6703_v35, %v6703_v35  ;;  %v19870_v56 = vld [vmem:[#allocation20 + $0x764] ss:$16 sps:$4 sm:$0xff]   ;;  %v19871_v35 = vld [vmem:[#allocation20 + $0x768] ss:$16 sps:$4 sm:$0xff]  }
0x10a5   :  { %7513 = vmatprep.mubr.bf16.mxu0 %v6709_v8  ;;  %7595 = vmatprep.mubr.bf16.mxu1 %v6709_v8  ;;  %v6706_v24 = vpop.f32.mrb[55].mxu1  ;;  %v19865_v8 = vld [vmem:[#allocation20 + $0x748] ss:$16 sps:$4 sm:$0xff]   ;;  %v19879_v39 = vld [vmem:[#allocation20 + $0x78c] ss:$16 sps:$4 sm:$0xff]  }
0x10a6   :  { %7514 = vmatmul.mubr.bf16.vlgmr.msra.gmra.mrb[56].mxu0 %v6708_v30  ;;  %7596 = vmatmul.mubr.bf16.vlgmr.msra.gmra.mrb[56].mxu1 %v6708_v30  ;;  %v19876_v30 = vld [vmem:[#allocation20 + $0x784] ss:$16 sps:$4 sm:$0xff]   ;;  %v19880_v24 = vld [vmem:[#allocation20 + $0x7a0] ss:$16 sps:$4 sm:$0xff]  }
0x10a7   :  { %7523 = vmatpush1.bf16.msra.mxu0 %v19802_v13  ;;  %7605 = vmatpush1.bf16.msra.mxu1 %v19805_v21  ;;  %v19873_v13 = vld [vmem:[#allocation20 + $0x76c] ss:$16 sps:$4 sm:$0xff]   ;;  %v19868_v21 = vld [vmem:[#allocation20 + $0x760] ss:$16 sps:$4 sm:$0xff]   ;;  %v19882_v32 = vld [vmem:[#allocation20 + $0x7a4] ss:$16 sps:$4 sm:$0xff]  }
0x10a8   :  { %7524 = vmatprep.subr.bf16.mxu0 %v19810_v28  ;;  %7606 = vmatprep.subr.bf16.mxu1 %v19813_v47  ;;  %v19874_v28 = vld [vmem:[#allocation20 + $0x780] ss:$16 sps:$4 sm:$0xff]   ;;  %v19877_v47 = vld [vmem:[#allocation20 + $0x788] ss:$16 sps:$4 sm:$0xff]  }
0x10a9   :  { %7554 = vmatprep.mubr.bf16.mxu0 %v6711_v23  ;;  %7636 = vmatprep.mubr.bf16.mxu1 %v6711_v23  ;;  %v19885_v23 = vld [vmem:[#allocation20 + $0x7ac] ss:$16 sps:$4 sm:$0xff]  }
0x10ab   :  { %7525 = vmatpush1.bf16.msra.mxu0 %v19808_v3  ;;  %7607 = vmatpush1.bf16.msra.mxu1 %v19811_v11  ;;  %v19883_v3 = vld [vmem:[#allocation20 + $0x7a8] ss:$16 sps:$4 sm:$0xff]   ;;  %v19888_v11 = vld [vmem:[#allocation20 + $0x7c4] ss:$16 sps:$4 sm:$0xff]  }
0x10ac   :  { %7526 = vmatprep.subr.bf16.mxu0 %v19816_v62  ;;  %7608 = vmatprep.subr.bf16.mxu1 %v19819_v15  ;;  %v19891_v62 = vld [vmem:[#allocation20 + $0x7cc] ss:$16 sps:$4 sm:$0xff]   ;;  %v19886_v15 = vld [vmem:[#allocation20 + $0x7c0] ss:$16 sps:$4 sm:$0xff]  }
0x10af   :  { %7527 = vmatpush1.bf16.msra.mxu0 %v19814_v2  ;;  %7609 = vmatpush1.bf16.msra.mxu1 %v19817_v0  ;;  %v19889_v2 = vld [vmem:[#allocation20 + $0x7c8] ss:$16 sps:$4 sm:$0xff]   ;;  %v19894_v0 = vld [vmem:[#allocation20 + $0x7e4] ss:$16 sps:$4 sm:$0xff]  }
0x10b0   :  { %7528 = vmatprep.subr.bf16.mxu0 %v19822_v44  ;;  %7610 = vmatprep.subr.bf16.mxu1 %v19825_v49  ;;  %v19897_v44 = vld [vmem:[#allocation20 + $0x7ec] ss:$16 sps:$4 sm:$0xff]   ;;  %v19892_v49 = vld [vmem:[#allocation20 + $0x7e0] ss:$16 sps:$4 sm:$0xff]  }
0x10b3   :  { %7529 = vmatpush1.bf16.msra.mxu0 %v19820_v12  ;;  %7611 = vmatpush1.bf16.msra.mxu1 %v19823_v52  ;;  %v19895_v12 = vld [vmem:[#allocation20 + $0x7e8] ss:$16 sps:$4 sm:$0xff]   ;;  %v19900_v52 = vld [vmem:[#allocation20 + $0x4] ss:$16 sps:$4 sm:$0xff]  }
0x10b4   :  { %7530 = vmatprep.subr.bf16.mxu0 %v19828_v16  ;;  %7612 = vmatprep.subr.bf16.mxu1 %v19831_v4  ;;  %v19903_v16 = vld [vmem:[#allocation20 + $0xc] ss:$16 sps:$4 sm:$0xff]   ;;  %v6710_v4 = vpack.c.bf16 %v22930_v46, %v22930_v46  ;;  %v19912_v46 = vld [vmem:[#allocation20 + $0x44] ss:$16 sps:$4 sm:$0xff]  }
0x10b7   :  { %7531 = vmatpush1.bf16.msra.mxu0 %v19826_v58  ;;  %7613 = vmatpush1.bf16.msra.mxu1 %v19829_v59  ;;  %v19898_v58 = vld [vmem:[#allocation20] ss:$16 sps:$4 sm:$0xff]   ;;  %v19901_v59 = vld [vmem:[#allocation20 + $0x8] ss:$16 sps:$4 sm:$0xff]  }
0x10b8   :  { %7532 = vmatprep.subr.bf16.mxu0 %v19834_v10  ;;  %7614 = vmatprep.subr.bf16.mxu1 %v19837_v55  ;;  %v6490_v10 = vpack.c.bf16 %v22924_v34, %v22924_v34  ;;  %v19906_v55 = vld [vmem:[#allocation20 + $0x24] ss:$16 sps:$4 sm:$0xff]  }
0x10b9   :  { %v19918_v34 = vld [vmem:[#allocation20 + $0x64] ss:$16 sps:$4 sm:$0xff]  }
0x10bb   :  { %7533 = vmatpush1.bf16.msra.mxu0 %v19832_v45  ;;  %7615 = vmatpush1.bf16.msra.mxu1 %v19835_v27  ;;  %v19909_v45 = vld [vmem:[#allocation20 + $0x2c] ss:$16 sps:$4 sm:$0xff]   ;;  %v19904_v27 = vld [vmem:[#allocation20 + $0x20] ss:$16 sps:$4 sm:$0xff]  }
0x10bc   :  { %7534 = vmatprep.subr.bf16.mxu0 %v19840_v25  ;;  %7616 = vmatprep.subr.bf16.mxu1 %v19843_v33  ;;  %v19907_v25 = vld [vmem:[#allocation20 + $0x28] ss:$16 sps:$4 sm:$0xff]   ;;  %v19915_v33 = vld [vmem:[#allocation20 + $0x4c] ss:$16 sps:$4 sm:$0xff]  }
0x10bf   :  { %7535 = vmatpush1.bf16.msra.mxu0 %v19838_v61  ;;  %7617 = vmatpush1.bf16.msra.mxu1 %v19841_v48  ;;  %v19910_v61 = vld [vmem:[#allocation20 + $0x40] ss:$16 sps:$4 sm:$0xff]   ;;  %v19913_v48 = vld [vmem:[#allocation20 + $0x48] ss:$16 sps:$4 sm:$0xff]  }
0x10c0   :  { %7536 = vmatprep.subr.bf16.mxu0 %v19846_v18  ;;  %7618 = vmatprep.subr.bf16.mxu1 %v19849_v41  ;;  %v19921_v18 = vld [vmem:[#allocation20 + $0x6c] ss:$16 sps:$4 sm:$0xff]   ;;  %v19916_v41 = vld [vmem:[#allocation20 + $0x60] ss:$16 sps:$4 sm:$0xff]  }
0x10c3   :  { %7537 = vmatpush1.bf16.msra.mxu0 %v19844_v1  ;;  %7619 = vmatpush1.bf16.msra.mxu1 %v19847_v7  ;;  %v19919_v1 = vld [vmem:[#allocation20 + $0x68] ss:$16 sps:$4 sm:$0xff]   ;;  %v19924_v7 = vld [vmem:[#allocation20 + $0x84] ss:$16 sps:$4 sm:$0xff]  }
0x10c4   :  { %7538 = vmatprep.subr.bf16.mxu0 %v19852_v51  ;;  %7620 = vmatprep.subr.bf16.mxu1 %v19855_v43  ;;  %v19927_v51 = vld [vmem:[#allocation20 + $0x8c] ss:$16 sps:$4 sm:$0xff]   ;;  %v19922_v43 = vld [vmem:[#allocation20 + $0x80] ss:$16 sps:$4 sm:$0xff]  }
0x10c7   :  { %7539 = vmatpush1.bf16.msra.mxu0 %v19850_v54  ;;  %7621 = vmatpush1.bf16.msra.mxu1 %v19853_v17  ;;  %v19925_v54 = vld [vmem:[#allocation20 + $0x88] ss:$16 sps:$4 sm:$0xff]   ;;  %v19930_v17 = vld [vmem:[#allocation20 + $0xa4] ss:$16 sps:$4 sm:$0xff]  }
0x10c8   :  { %7540 = vmatprep.subr.bf16.mxu0 %v19858_v29  ;;  %7622 = vmatprep.subr.bf16.mxu1 %v19861_v53  ;;  %v19933_v29 = vld [vmem:[#allocation20 + $0xac] ss:$16 sps:$4 sm:$0xff]   ;;  %v19928_v53 = vld [vmem:[#allocation20 + $0xa0] ss:$16 sps:$4 sm:$0xff]  }
0x10cb   :  { %7541 = vmatpush1.bf16.msra.mxu0 %v19856_v19  ;;  %7623 = vmatpush1.bf16.msra.mxu1 %v19859_v6  ;;  %v19931_v19 = vld [vmem:[#allocation20 + $0xa8] ss:$16 sps:$4 sm:$0xff]   ;;  %v19936_v6 = vld [vmem:[#allocation20 + $0xc4] ss:$16 sps:$4 sm:$0xff]  }
0x10cc   :  { %7542 = vmatprep.subr.bf16.mxu0 %v19864_v38  ;;  %7624 = vmatprep.subr.bf16.mxu1 %v19867_v40  ;;  %v19939_v38 = vld [vmem:[#allocation20 + $0xcc] ss:$16 sps:$4 sm:$0xff]   ;;  %v19934_v40 = vld [vmem:[#allocation20 + $0xc0] ss:$16 sps:$4 sm:$0xff]  }
0x10cf   :  { %7543 = vmatpush1.bf16.msra.mxu0 %v19862_v50  ;;  %7625 = vmatpush1.bf16.msra.mxu1 %v19865_v8  ;;  %v19937_v50 = vld [vmem:[#allocation20 + $0xc8] ss:$16 sps:$4 sm:$0xff]   ;;  %v19942_v8 = vld [vmem:[#allocation20 + $0xe4] ss:$16 sps:$4 sm:$0xff]  }
0x10d0   :  { %7544 = vmatprep.subr.bf16.mxu0 %v19870_v56  ;;  %7626 = vmatprep.subr.bf16.mxu1 %v19873_v13  ;;  %v19945_v56 = vld [vmem:[#allocation20 + $0xec] ss:$16 sps:$4 sm:$0xff]   ;;  %v19940_v13 = vld [vmem:[#allocation20 + $0xe0] ss:$16 sps:$4 sm:$0xff]  }
0x10d3   :  { %7545 = vmatpush1.bf16.msra.mxu0 %v19868_v21  ;;  %7627 = vmatpush1.bf16.msra.mxu1 %v19871_v35  ;;  %v19943_v21 = vld [vmem:[#allocation20 + $0xe8] ss:$16 sps:$4 sm:$0xff]   ;;  %v19948_v35 = vld [vmem:[#allocation20 + $0x104] ss:$16 sps:$4 sm:$0xff]  }
0x10d4   :  { %7546 = vmatprep.subr.bf16.mxu0 %v19876_v30  ;;  %7628 = vmatprep.subr.bf16.mxu1 %v19879_v39  ;;  %v19951_v30 = vld [vmem:[#allocation20 + $0x10c] ss:$16 sps:$4 sm:$0xff]   ;;  %v19946_v39 = vld [vmem:[#allocation20 + $0x100] ss:$16 sps:$4 sm:$0xff]  }
0x10d7   :  { %7547 = vmatpush1.bf16.msra.mxu0 %v19874_v28  ;;  %7629 = vmatpush1.bf16.msra.mxu1 %v19877_v47  ;;  %v19949_v28 = vld [vmem:[#allocation20 + $0x108] ss:$16 sps:$4 sm:$0xff]   ;;  %v19954_v47 = vld [vmem:[#allocation20 + $0x124] ss:$16 sps:$4 sm:$0xff]  }
0x10d8   :  { %7548 = vmatprep.subr.bf16.mxu0 %v19882_v32  ;;  %7630 = vmatprep.subr.bf16.mxu1 %v19885_v23  ;;  %v19957_v32 = vld [vmem:[#allocation20 + $0x12c] ss:$16 sps:$4 sm:$0xff]   ;;  %v19952_v23 = vld [vmem:[#allocation20 + $0x120] ss:$16 sps:$4 sm:$0xff]  }
0x10db   :  { %7549 = vmatpush1.bf16.msra.mxu0 %v19880_v24  ;;  %7631 = vmatpush1.bf16.msra.mxu1 %v19883_v3  ;;  %v19955_v24 = vld [vmem:[#allocation20 + $0x128] ss:$16 sps:$4 sm:$0xff]   ;;  %v19960_v3 = vld [vmem:[#allocation20 + $0x144] ss:$16 sps:$4 sm:$0xff]  }
0x10dc   :  { %7550 = vmatprep.subr.bf16.mxu0 %v19888_v11  ;;  %7632 = vmatprep.subr.bf16.mxu1 %v19891_v62  ;;  %v19963_v11 = vld [vmem:[#allocation20 + $0x14c] ss:$16 sps:$4 sm:$0xff]   ;;  %v19958_v62 = vld [vmem:[#allocation20 + $0x140] ss:$16 sps:$4 sm:$0xff]  }
0x10df   :  { %7551 = vmatpush1.bf16.msra.mxu0 %v19886_v15  ;;  %7633 = vmatpush1.bf16.msra.mxu1 %v19889_v2  ;;  %v19961_v15 = vld [vmem:[#allocation20 + $0x148] ss:$16 sps:$4 sm:$0xff]   ;;  %v19966_v2 = vld [vmem:[#allocation20 + $0x164] ss:$16 sps:$4 sm:$0xff]  }
0x10e0   :  { %7552 = vmatprep.subr.bf16.mxu0 %v19894_v0  ;;  %7634 = vmatprep.subr.bf16.mxu1 %v19897_v44  ;;  %v19969_v0 = vld [vmem:[#allocation20 + $0x16c] ss:$16 sps:$4 sm:$0xff]   ;;  %v19964_v44 = vld [vmem:[#allocation20 + $0x160] ss:$16 sps:$4 sm:$0xff]  }
0x10e3   :  { %7553 = vmatpush1.bf16.msra.mxu0 %v19892_v49  ;;  %7635 = vmatpush1.bf16.msra.mxu1 %v19895_v12  ;;  %v19967_v49 = vld [vmem:[#allocation20 + $0x168] ss:$16 sps:$4 sm:$0xff]   ;;  %v19972_v12 = vld [vmem:[#allocation20 + $0x184] ss:$16 sps:$4 sm:$0xff]  }
0x10e4   :  { %8285 = vmatprep.subr.bf16.mxu0 %v19900_v52  ;;  %8367 = vmatprep.subr.bf16.mxu1 %v19903_v16  ;;  %v19975_v52 = vld [vmem:[#allocation20 + $0x18c] ss:$16 sps:$4 sm:$0xff]   ;;  %v19970_v16 = vld [vmem:[#allocation20 + $0x180] ss:$16 sps:$4 sm:$0xff]  }
0x10e6   :  { %7555 = vmatmul.mubr.bf16.vlgmr.msra.gmra.mrb[56].mxu0 %v6710_v4  ;;  %7637 = vmatmul.mubr.bf16.vlgmr.msra.gmra.mrb[56].mxu1 %v6710_v4  ;;  %v19973_v4 = vld [vmem:[#allocation20 + $0x188] ss:$16 sps:$4 sm:$0xff]  }
0x10e7   :  { %8286 = vmatpush1.bf16.msra.mxu0 %v19898_v58  ;;  %8317 = vmatprep.mubr.bf16.mxu0 %v6490_v10  ;;  %v19978_v58 = vld [vmem:[#allocation20 + $0x1a4] ss:$16 sps:$4 sm:$0xff]  }
0x10e8   :  { %8368 = vmatpush1.bf16.msra.mxu1 %v19901_v59  ;;  %8399 = vmatprep.mubr.bf16.mxu1 %v6490_v10  ;;  %v19981_v59 = vld [vmem:[#allocation20 + $0x1ac] ss:$16 sps:$4 sm:$0xff]   ;;  %v19976_v10 = vld [vmem:[#allocation20 + $0x1a0] ss:$16 sps:$4 sm:$0xff]  }
0x10e9   :  { %8287 = vmatprep.subr.bf16.mxu0 %v19906_v55  ;;  %8369 = vmatprep.subr.bf16.mxu1 %v19909_v45  ;;  %v19979_v55 = vld [vmem:[#allocation20 + $0x1a8] ss:$16 sps:$4 sm:$0xff]   ;;  %v19984_v45 = vld [vmem:[#allocation20 + $0x1c4] ss:$16 sps:$4 sm:$0xff]  }
0x10eb   :  { %8288 = vmatpush1.bf16.msra.mxu0 %v19904_v27  ;;  %v19987_v27 = vld [vmem:[#allocation20 + $0x1cc] ss:$16 sps:$4 sm:$0xff]  }
0x10ec   :  { %8370 = vmatpush1.bf16.msra.mxu1 %v19907_v25  ;;  %8289 = vmatprep.subr.bf16.mxu0 %v19912_v46  ;;  %v19982_v25 = vld [vmem:[#allocation20 + $0x1c0] ss:$16 sps:$4 sm:$0xff]   ;;  %v19985_v46 = vld [vmem:[#allocation20 + $0x1c8] ss:$16 sps:$4 sm:$0xff]  }
0x10ed   :  { %8371 = vmatprep.subr.bf16.mxu1 %v19915_v33  ;;  %v19990_v33 = vld [vmem:[#allocation20 + $0x1e4] ss:$16 sps:$4 sm:$0xff]  }
0x10ef   :  { %8290 = vmatpush1.bf16.msra.mxu0 %v19910_v61  ;;  %v19993_v61 = vld [vmem:[#allocation20 + $0x1ec] ss:$16 sps:$4 sm:$0xff]  }
0x10f0   :  { %8372 = vmatpush1.bf16.msra.mxu1 %v19913_v48  ;;  %8291 = vmatprep.subr.bf16.mxu0 %v19918_v34  ;;  %v19988_v48 = vld [vmem:[#allocation20 + $0x1e0] ss:$16 sps:$4 sm:$0xff]   ;;  %v19991_v34 = vld [vmem:[#allocation20 + $0x1e8] ss:$16 sps:$4 sm:$0xff]  }
0x10f1   :  { %8373 = vmatprep.subr.bf16.mxu1 %v19921_v18  ;;  %v19996_v18 = vld [vmem:[#allocation20 + $0x204] ss:$16 sps:$4 sm:$0xff]  }
0x10f3   :  { %8292 = vmatpush1.bf16.msra.mxu0 %v19916_v41  ;;  %v19999_v41 = vld [vmem:[#allocation20 + $0x20c] ss:$16 sps:$4 sm:$0xff]  }
0x10f4   :  { %8374 = vmatpush1.bf16.msra.mxu1 %v19919_v1  ;;  %8293 = vmatprep.subr.bf16.mxu0 %v19924_v7  ;;  %v19994_v1 = vld [vmem:[#allocation20 + $0x200] ss:$16 sps:$4 sm:$0xff]   ;;  %v6489_v7 = vpack.c.bf16 %v22922_v20, %v22922_v20  ;;  %v20011_v20 = vld [vmem:[#allocation20 + $0x24c] ss:$16 sps:$4 sm:$0xff]  }
0x10f5   :  { %8375 = vmatprep.subr.bf16.mxu1 %v19927_v51  ;;  %v19997_v51 = vld [vmem:[#allocation20 + $0x208] ss:$16 sps:$4 sm:$0xff]  }
0x10f7   :  { %8294 = vmatpush1.bf16.msra.mxu0 %v19922_v43  ;;  %v20002_v43 = vld [vmem:[#allocation20 + $0x224] ss:$16 sps:$4 sm:$0xff]  }
0x10f8   :  { %8376 = vmatpush1.bf16.msra.mxu1 %v19925_v54  ;;  %8295 = vmatprep.subr.bf16.mxu0 %v19930_v17  ;;  %v6492_v54 = vpack.c.bf16 %v22928_v63, %v22928_v63  ;;  %v20005_v17 = vld [vmem:[#allocation20 + $0x22c] ss:$16 sps:$4 sm:$0xff]  }
0x10f9   :  { %8377 = vmatprep.subr.bf16.mxu1 %v19933_v29  ;;  %v20000_v29 = vld [vmem:[#allocation20 + $0x220] ss:$16 sps:$4 sm:$0xff]   ;;  %v20017_v63 = vld [vmem:[#allocation20 + $0x26c] ss:$16 sps:$4 sm:$0xff]  }
0x10fb   :  { %8296 = vmatpush1.bf16.msra.mxu0 %v19928_v53  ;;  %v20003_v53 = vld [vmem:[#allocation20 + $0x228] ss:$16 sps:$4 sm:$0xff]  }
0x10fc   :  { %8378 = vmatpush1.bf16.msra.mxu1 %v19931_v19  ;;  %8297 = vmatprep.subr.bf16.mxu0 %v19936_v6  ;;  %v20008_v19 = vld [vmem:[#allocation20 + $0x244] ss:$16 sps:$4 sm:$0xff]   ;;  %v20006_v6 = vld [vmem:[#allocation20 + $0x240] ss:$16 sps:$4 sm:$0xff]  }
0x10fd   :  { %8379 = vmatprep.subr.bf16.mxu1 %v19939_v38  ;;  %v20009_v38 = vld [vmem:[#allocation20 + $0x248] ss:$16 sps:$4 sm:$0xff]  }
0x10ff   :  { %8298 = vmatpush1.bf16.msra.mxu0 %v19934_v40  ;;  %v20014_v40 = vld [vmem:[#allocation20 + $0x264] ss:$16 sps:$4 sm:$0xff]  }
0x1100   :  { %8380 = vmatpush1.bf16.msra.mxu1 %v19937_v50  ;;  %8299 = vmatprep.subr.bf16.mxu0 %v19942_v8  ;;  %v20012_v50 = vld [vmem:[#allocation20 + $0x260] ss:$16 sps:$4 sm:$0xff]   ;;  %v20015_v8 = vld [vmem:[#allocation20 + $0x268] ss:$16 sps:$4 sm:$0xff]  }
0x1101   :  { %8381 = vmatprep.subr.bf16.mxu1 %v19945_v56  ;;  %v20020_v56 = vld [vmem:[#allocation20 + $0x284] ss:$16 sps:$4 sm:$0xff]  }
0x1103   :  { %8300 = vmatpush1.bf16.msra.mxu0 %v19940_v13  ;;  %v20023_v13 = vld [vmem:[#allocation20 + $0x28c] ss:$16 sps:$4 sm:$0xff]  }
0x1104   :  { %8382 = vmatpush1.bf16.msra.mxu1 %v19943_v21  ;;  %8301 = vmatprep.subr.bf16.mxu0 %v19948_v35  ;;  %v20018_v21 = vld [vmem:[#allocation20 + $0x280] ss:$16 sps:$4 sm:$0xff]   ;;  %v20021_v35 = vld [vmem:[#allocation20 + $0x288] ss:$16 sps:$4 sm:$0xff]  }
0x1105   :  { %8383 = vmatprep.subr.bf16.mxu1 %v19951_v30  ;;  %v20026_v30 = vld [vmem:[#allocation20 + $0x2a4] ss:$16 sps:$4 sm:$0xff]  }
0x1107   :  { %8302 = vmatpush1.bf16.msra.mxu0 %v19946_v39  ;;  %v20029_v39 = vld [vmem:[#allocation20 + $0x2ac] ss:$16 sps:$4 sm:$0xff]  }
0x1108   :  { %8384 = vmatpush1.bf16.msra.mxu1 %v19949_v28  ;;  %8303 = vmatprep.subr.bf16.mxu0 %v19954_v47  ;;  %v20024_v28 = vld [vmem:[#allocation20 + $0x2a0] ss:$16 sps:$4 sm:$0xff]   ;;  %v20027_v47 = vld [vmem:[#allocation20 + $0x2a8] ss:$16 sps:$4 sm:$0xff]  }
0x1109   :  { %8385 = vmatprep.subr.bf16.mxu1 %v19957_v32  ;;  %v20032_v32 = vld [vmem:[#allocation20 + $0x2c4] ss:$16 sps:$4 sm:$0xff]  }
0x110b   :  { %8304 = vmatpush1.bf16.msra.mxu0 %v19952_v23  ;;  %v20035_v23 = vld [vmem:[#allocation20 + $0x2cc] ss:$16 sps:$4 sm:$0xff]  }
0x110c   :  { %8386 = vmatpush1.bf16.msra.mxu1 %v19955_v24  ;;  %8305 = vmatprep.subr.bf16.mxu0 %v19960_v3  ;;  %v20030_v24 = vld [vmem:[#allocation20 + $0x2c0] ss:$16 sps:$4 sm:$0xff]   ;;  %v20033_v3 = vld [vmem:[#allocation20 + $0x2c8] ss:$16 sps:$4 sm:$0xff]  }
0x110d   :  { %8387 = vmatprep.subr.bf16.mxu1 %v19963_v11  ;;  %v20038_v11 = vld [vmem:[#allocation20 + $0x2e4] ss:$16 sps:$4 sm:$0xff]  }
0x110f   :  { %8306 = vmatpush1.bf16.msra.mxu0 %v19958_v62  ;;  %v20041_v62 = vld [vmem:[#allocation20 + $0x2ec] ss:$16 sps:$4 sm:$0xff]  }
0x1110   :  { %8388 = vmatpush1.bf16.msra.mxu1 %v19961_v15  ;;  %8307 = vmatprep.subr.bf16.mxu0 %v19966_v2  ;;  %v20036_v15 = vld [vmem:[#allocation20 + $0x2e0] ss:$16 sps:$4 sm:$0xff]   ;;  %v20039_v2 = vld [vmem:[#allocation20 + $0x2e8] ss:$16 sps:$4 sm:$0xff]  }
0x1111   :  { %8389 = vmatprep.subr.bf16.mxu1 %v19969_v0  ;;  %v20044_v0 = vld [vmem:[#allocation20 + $0x304] ss:$16 sps:$4 sm:$0xff]  }
0x1113   :  { %8308 = vmatpush1.bf16.msra.mxu0 %v19964_v44  ;;  %v20047_v44 = vld [vmem:[#allocation20 + $0x30c] ss:$16 sps:$4 sm:$0xff]  }
0x1114   :  { %8390 = vmatpush1.bf16.msra.mxu1 %v19967_v49  ;;  %8309 = vmatprep.subr.bf16.mxu0 %v19972_v12  ;;  %v20042_v49 = vld [vmem:[#allocation20 + $0x300] ss:$16 sps:$4 sm:$0xff]   ;;  %v20045_v12 = vld [vmem:[#allocation20 + $0x308] ss:$16 sps:$4 sm:$0xff]  }
0x1115   :  { %8391 = vmatprep.subr.bf16.mxu1 %v19975_v52  ;;  %v20050_v52 = vld [vmem:[#allocation20 + $0x324] ss:$16 sps:$4 sm:$0xff]  }
0x1117   :  { %8310 = vmatpush1.bf16.msra.mxu0 %v19970_v16  ;;  %v20053_v16 = vld [vmem:[#allocation20 + $0x32c] ss:$16 sps:$4 sm:$0xff]  }
0x1118   :  { %8392 = vmatpush1.bf16.msra.mxu1 %v19973_v4  ;;  %8311 = vmatprep.subr.bf16.mxu0 %v19978_v58  ;;  %v20048_v4 = vld [vmem:[#allocation20 + $0x320] ss:$16 sps:$4 sm:$0xff]   ;;  %v20051_v58 = vld [vmem:[#allocation20 + $0x328] ss:$16 sps:$4 sm:$0xff]  }
0x1119   :  { %8393 = vmatprep.subr.bf16.mxu1 %v19981_v59  ;;  %v20056_v59 = vld [vmem:[#allocation20 + $0x344] ss:$16 sps:$4 sm:$0xff]  }
0x111b   :  { %8312 = vmatpush1.bf16.msra.mxu0 %v19976_v10  ;;  %v20059_v10 = vld [vmem:[#allocation20 + $0x34c] ss:$16 sps:$4 sm:$0xff]  }
0x111c   :  { %8394 = vmatpush1.bf16.msra.mxu1 %v19979_v55  ;;  %8313 = vmatprep.subr.bf16.mxu0 %v19984_v45  ;;  %v20054_v55 = vld [vmem:[#allocation20 + $0x340] ss:$16 sps:$4 sm:$0xff]   ;;  %v20057_v45 = vld [vmem:[#allocation20 + $0x348] ss:$16 sps:$4 sm:$0xff]  }
0x111d   :  { %8395 = vmatprep.subr.bf16.mxu1 %v19987_v27  ;;  %v20062_v27 = vld [vmem:[#allocation20 + $0x364] ss:$16 sps:$4 sm:$0xff]  }
0x111f   :  { %8314 = vmatpush1.bf16.msra.mxu0 %v19982_v25  ;;  %v20065_v25 = vld [vmem:[#allocation20 + $0x36c] ss:$16 sps:$4 sm:$0xff]  }
0x1120   :  { %8396 = vmatpush1.bf16.msra.mxu1 %v19985_v46  ;;  %8315 = vmatprep.subr.bf16.mxu0 %v19990_v33  ;;  %v20060_v46 = vld [vmem:[#allocation20 + $0x360] ss:$16 sps:$4 sm:$0xff]   ;;  %v20063_v33 = vld [vmem:[#allocation20 + $0x368] ss:$16 sps:$4 sm:$0xff]  }
0x1121   :  { %8397 = vmatprep.subr.bf16.mxu1 %v19993_v61  ;;  %v20068_v61 = vld [vmem:[#allocation20 + $0x384] ss:$16 sps:$4 sm:$0xff]  }
0x1123   :  { %8316 = vmatpush1.bf16.msra.mxu0 %v19988_v48  ;;  %v20071_v48 = vld [vmem:[#allocation20 + $0x38c] ss:$16 sps:$4 sm:$0xff]  }
0x1124   :  { %8398 = vmatpush1.bf16.msra.mxu1 %v19991_v34  ;;  %8326 = vmatprep.subr.bf16.mxu0 %v19996_v18  ;;  %v20066_v34 = vld [vmem:[#allocation20 + $0x380] ss:$16 sps:$4 sm:$0xff]   ;;  %v20069_v18 = vld [vmem:[#allocation20 + $0x388] ss:$16 sps:$4 sm:$0xff]  }
0x1125   :  { %8408 = vmatprep.subr.bf16.mxu1 %v19999_v41  ;;  %v20074_v41 = vld [vmem:[#allocation20 + $0x3a4] ss:$16 sps:$4 sm:$0xff]  }
0x1126   :  { %8318 = vmatmul.mubr.bf16.vlgmr.msra.gmra.mrb[56].mxu0 %v6489_v7 }
0x1127   :  { %8400 = vmatmul.mubr.bf16.vlgmr.msra.gmra.mrb[56].mxu1 %v6489_v7  ;;  %8327 = vmatpush1.bf16.msra.mxu0 %v19994_v1  ;;  %v20077_v1 = vld [vmem:[#allocation20 + $0x3ac] ss:$16 sps:$4 sm:$0xff]   ;;  %v20072_v7 = vld [vmem:[#allocation20 + $0x3a0] ss:$16 sps:$4 sm:$0xff]  }
0x1128   :  { %8358 = vmatprep.mubr.bf16.mxu0 %v6492_v54  ;;  %8409 = vmatpush1.bf16.msra.mxu1 %v19997_v51  ;;  %v20075_v51 = vld [vmem:[#allocation20 + $0x3a8] ss:$16 sps:$4 sm:$0xff]  }
0x1129   :  { %8440 = vmatprep.mubr.bf16.mxu1 %v6492_v54  ;;  %8328 = vmatprep.subr.bf16.mxu0 %v20002_v43  ;;  %v20080_v43 = vld [vmem:[#allocation20 + $0x3c4] ss:$16 sps:$4 sm:$0xff]   ;;  %v20083_v54 = vld [vmem:[#allocation20 + $0x3cc] ss:$16 sps:$4 sm:$0xff]  }
0x112a   :  { %8410 = vmatprep.subr.bf16.mxu1 %v20005_v17  ;;  %v20078_v17 = vld [vmem:[#allocation20 + $0x3c0] ss:$16 sps:$4 sm:$0xff]  }
0x112b   :  { %8329 = vmatpush1.bf16.msra.mxu0 %v20000_v29  ;;  %v20081_v29 = vld [vmem:[#allocation20 + $0x3c8] ss:$16 sps:$4 sm:$0xff]  }
0x112c   :  { %8411 = vmatpush1.bf16.msra.mxu1 %v20003_v53  ;;  %8330 = vmatprep.subr.bf16.mxu0 %v20008_v19  ;;  %v20086_v53 = vld [vmem:[#allocation20 + $0x3e4] ss:$16 sps:$4 sm:$0xff]   ;;  %v20089_v19 = vld [vmem:[#allocation20 + $0x3ec] ss:$16 sps:$4 sm:$0xff]  }
0x112d   :  { %8412 = vmatprep.subr.bf16.mxu1 %v20011_v20  ;;  %v20084_v20 = vld [vmem:[#allocation20 + $0x3e0] ss:$16 sps:$4 sm:$0xff]  }
0x112f   :  { %8331 = vmatpush1.bf16.msra.mxu0 %v20006_v6  ;;  %v20087_v6 = vld [vmem:[#allocation20 + $0x3e8] ss:$16 sps:$4 sm:$0xff]  }
0x1130   :  { %8413 = vmatpush1.bf16.msra.mxu1 %v20009_v38  ;;  %8332 = vmatprep.subr.bf16.mxu0 %v20014_v40  ;;  %v6491_v38 = vpack.c.bf16 %v22926_v42, %v22926_v42  ;;  %v20092_v40 = vld [vmem:[#allocation20 + $0x804] ss:$16 sps:$4 sm:$0xff]   ;;  %v8450_v42 = vld [vmem:[#allocation19 + $0x8] sm:$0xf] }
0x1131   :  { %8414 = vmatprep.subr.bf16.mxu1 %v20017_v63  ;;  %v20095_v63 = vld [vmem:[#allocation20 + $0x80c] ss:$16 sps:$4 sm:$0xff]  }
0x1133   :  { %8333 = vmatpush1.bf16.msra.mxu0 %v20012_v50  ;;  %v20090_v50 = vld [vmem:[#allocation20 + $0x800] ss:$16 sps:$4 sm:$0xff]  }
0x1134   :  { %8415 = vmatpush1.bf16.msra.mxu1 %v20015_v8  ;;  %8334 = vmatprep.subr.bf16.mxu0 %v20020_v56  ;;  %v20093_v8 = vld [vmem:[#allocation20 + $0x808] ss:$16 sps:$4 sm:$0xff]   ;;  %v20101_v56 = vld [vmem:[#allocation20 + $0x82c] ss:$16 sps:$4 sm:$0xff]  }
0x1135   :  { %8416 = vmatprep.subr.bf16.mxu1 %v20023_v13  ;;  %v20107_v13 = vld [vmem:[#allocation20 + $0x84c] ss:$16 sps:$4 sm:$0xff]  }
0x1137   :  { %8335 = vmatpush1.bf16.msra.mxu0 %v20018_v21  ;;  %v20102_v21 = vld [vmem:[#allocation20 + $0x840] ss:$16 sps:$4 sm:$0xff]  }
0x1138   :  { %8417 = vmatpush1.bf16.msra.mxu1 %v20021_v35  ;;  %8336 = vmatprep.subr.bf16.mxu0 %v20026_v30  ;;  %v20105_v35 = vld [vmem:[#allocation20 + $0x848] ss:$16 sps:$4 sm:$0xff]   ;;  %v20110_v30 = vld [vmem:[#allocation20 + $0x864] ss:$16 sps:$4 sm:$0xff]  }
0x1139   :  { %8418 = vmatprep.subr.bf16.mxu1 %v20029_v39  ;;  %v20113_v39 = vld [vmem:[#allocation20 + $0x86c] ss:$16 sps:$4 sm:$0xff]  }
0x113b   :  { %8337 = vmatpush1.bf16.msra.mxu0 %v20024_v28  ;;  %v20108_v28 = vld [vmem:[#allocation20 + $0x860] ss:$16 sps:$4 sm:$0xff]  }
0x113c   :  { %8419 = vmatpush1.bf16.msra.mxu1 %v20027_v47  ;;  %8338 = vmatprep.subr.bf16.mxu0 %v20032_v32  ;;  %v20111_v47 = vld [vmem:[#allocation20 + $0x868] ss:$16 sps:$4 sm:$0xff]   ;;  %v20116_v32 = vld [vmem:[#allocation20 + $0x884] ss:$16 sps:$4 sm:$0xff]  }
0x113d   :  { %8420 = vmatprep.subr.bf16.mxu1 %v20035_v23  ;;  %v20119_v23 = vld [vmem:[#allocation20 + $0x88c] ss:$16 sps:$4 sm:$0xff]  }
0x113f   :  { %8339 = vmatpush1.bf16.msra.mxu0 %v20030_v24  ;;  %v20114_v24 = vld [vmem:[#allocation20 + $0x880] ss:$16 sps:$4 sm:$0xff]  }
0x1140   :  { %8421 = vmatpush1.bf16.msra.mxu1 %v20033_v3  ;;  %8340 = vmatprep.subr.bf16.mxu0 %v20038_v11  ;;  %v20117_v3 = vld [vmem:[#allocation20 + $0x888] ss:$16 sps:$4 sm:$0xff]   ;;  %v20122_v11 = vld [vmem:[#allocation20 + $0x8a4] ss:$16 sps:$4 sm:$0xff]  }
0x1141   :  { %8422 = vmatprep.subr.bf16.mxu1 %v20041_v62  ;;  %v20125_v62 = vld [vmem:[#allocation20 + $0x8ac] ss:$16 sps:$4 sm:$0xff]  }
0x1143   :  { %8341 = vmatpush1.bf16.msra.mxu0 %v20036_v15  ;;  %v20120_v15 = vld [vmem:[#allocation20 + $0x8a0] ss:$16 sps:$4 sm:$0xff]  }
0x1144   :  { %8423 = vmatpush1.bf16.msra.mxu1 %v20039_v2  ;;  %8342 = vmatprep.subr.bf16.mxu0 %v20044_v0  ;;  %v20123_v2 = vld [vmem:[#allocation20 + $0x8a8] ss:$16 sps:$4 sm:$0xff]   ;;  %v20128_v0 = vld [vmem:[#allocation20 + $0x8c4] ss:$16 sps:$4 sm:$0xff]  }
0x1145   :  { %8424 = vmatprep.subr.bf16.mxu1 %v20047_v44  ;;  %v20131_v44 = vld [vmem:[#allocation20 + $0x8cc] ss:$16 sps:$4 sm:$0xff]  }
0x1147   :  { %8343 = vmatpush1.bf16.msra.mxu0 %v20042_v49  ;;  %v20126_v49 = vld [vmem:[#allocation20 + $0x8c0] ss:$16 sps:$4 sm:$0xff]  }
0x1148   :  { %8425 = vmatpush1.bf16.msra.mxu1 %v20045_v12  ;;  %8344 = vmatprep.subr.bf16.mxu0 %v20050_v52  ;;  %v20129_v12 = vld [vmem:[#allocation20 + $0x8c8] ss:$16 sps:$4 sm:$0xff]   ;;  %v20134_v52 = vld [vmem:[#allocation20 + $0x8e4] ss:$16 sps:$4 sm:$0xff]  }
0x1149   :  { %8426 = vmatprep.subr.bf16.mxu1 %v20053_v16  ;;  %v20137_v16 = vld [vmem:[#allocation20 + $0x8ec] ss:$16 sps:$4 sm:$0xff]  }
0x114b   :  { %8345 = vmatpush1.bf16.msra.mxu0 %v20048_v4  ;;  %v20132_v4 = vld [vmem:[#allocation20 + $0x8e0] ss:$16 sps:$4 sm:$0xff]  }
0x114c   :  { %8427 = vmatpush1.bf16.msra.mxu1 %v20051_v58  ;;  %8346 = vmatprep.subr.bf16.mxu0 %v20056_v59  ;;  %v20135_v58 = vld [vmem:[#allocation20 + $0x8e8] ss:$16 sps:$4 sm:$0xff]   ;;  %v20140_v59 = vld [vmem:[#allocation20 + $0x904] ss:$16 sps:$4 sm:$0xff]  }
0x114d   :  { %8428 = vmatprep.subr.bf16.mxu1 %v20059_v10  ;;  %v20143_v10 = vld [vmem:[#allocation20 + $0x90c] ss:$16 sps:$4 sm:$0xff]  }
0x114f   :  { %8347 = vmatpush1.bf16.msra.mxu0 %v20054_v55  ;;  %v20138_v55 = vld [vmem:[#allocation20 + $0x900] ss:$16 sps:$4 sm:$0xff]  }
0x1150   :  { %8429 = vmatpush1.bf16.msra.mxu1 %v20057_v45  ;;  %8348 = vmatprep.subr.bf16.mxu0 %v20062_v27  ;;  %v20141_v45 = vld [vmem:[#allocation20 + $0x908] ss:$16 sps:$4 sm:$0xff]   ;;  %v20146_v27 = vld [vmem:[#allocation20 + $0x924] ss:$16 sps:$4 sm:$0xff]  }
0x1151   :  { %8430 = vmatprep.subr.bf16.mxu1 %v20065_v25  ;;  %v20149_v25 = vld [vmem:[#allocation20 + $0x92c] ss:$16 sps:$4 sm:$0xff]  }
0x1153   :  { %8349 = vmatpush1.bf16.msra.mxu0 %v20060_v46  ;;  %v20144_v46 = vld [vmem:[#allocation20 + $0x920] ss:$16 sps:$4 sm:$0xff]  }
0x1154   :  { %8431 = vmatpush1.bf16.msra.mxu1 %v20063_v33  ;;  %8350 = vmatprep.subr.bf16.mxu0 %v20068_v61  ;;  %v20147_v33 = vld [vmem:[#allocation20 + $0x928] ss:$16 sps:$4 sm:$0xff]   ;;  %v20152_v61 = vld [vmem:[#allocation20 + $0x944] ss:$16 sps:$4 sm:$0xff]  }
0x1155   :  { %8432 = vmatprep.subr.bf16.mxu1 %v20071_v48  ;;  %v20155_v48 = vld [vmem:[#allocation20 + $0x94c] ss:$16 sps:$4 sm:$0xff]  }
0x1157   :  { %8351 = vmatpush1.bf16.msra.mxu0 %v20066_v34  ;;  %v20150_v34 = vld [vmem:[#allocation20 + $0x940] ss:$16 sps:$4 sm:$0xff]  }
0x1158   :  { %8433 = vmatpush1.bf16.msra.mxu1 %v20069_v18  ;;  %8352 = vmatprep.subr.bf16.mxu0 %v20074_v41  ;;  %v20153_v18 = vld [vmem:[#allocation20 + $0x948] ss:$16 sps:$4 sm:$0xff]   ;;  %v20158_v41 = vld [vmem:[#allocation20 + $0x964] ss:$16 sps:$4 sm:$0xff]  }
0x1159   :  { %8434 = vmatprep.subr.bf16.mxu1 %v20077_v1  ;;  %v20161_v1 = vld [vmem:[#allocation20 + $0x96c] ss:$16 sps:$4 sm:$0xff]  }
0x115b   :  { %8353 = vmatpush1.bf16.msra.mxu0 %v20072_v7  ;;  %v20156_v7 = vld [vmem:[#allocation20 + $0x960] ss:$16 sps:$4 sm:$0xff]  }
0x115c   :  { %8435 = vmatpush1.bf16.msra.mxu1 %v20075_v51  ;;  %8354 = vmatprep.subr.bf16.mxu0 %v20080_v43  ;;  %v20159_v51 = vld [vmem:[#allocation20 + $0x968] ss:$16 sps:$4 sm:$0xff]   ;;  %v20164_v43 = vld [vmem:[#allocation20 + $0x984] ss:$16 sps:$4 sm:$0xff]  }
0x115d   :  { %8436 = vmatprep.subr.bf16.mxu1 %v20083_v54  ;;  %v20167_v54 = vld [vmem:[#allocation20 + $0x98c] ss:$16 sps:$4 sm:$0xff]  }
0x115f   :  { %8355 = vmatpush1.bf16.msra.mxu0 %v20078_v17  ;;  %v20162_v17 = vld [vmem:[#allocation20 + $0x980] ss:$16 sps:$4 sm:$0xff]  }
0x1160   :  { %8437 = vmatpush1.bf16.msra.mxu1 %v20081_v29  ;;  %8356 = vmatprep.subr.bf16.mxu0 %v20086_v53  ;;  %v20165_v29 = vld [vmem:[#allocation20 + $0x988] ss:$16 sps:$4 sm:$0xff]   ;;  %v20170_v53 = vld [vmem:[#allocation20 + $0x9a4] ss:$16 sps:$4 sm:$0xff]  }
0x1161   :  { %8438 = vmatprep.subr.bf16.mxu1 %v20089_v19  ;;  %v20173_v19 = vld [vmem:[#allocation20 + $0x9ac] ss:$16 sps:$4 sm:$0xff]  }
0x1163   :  { %8357 = vmatpush1.bf16.msra.mxu0 %v20084_v20  ;;  %v20168_v20 = vld [vmem:[#allocation20 + $0x9a0] ss:$16 sps:$4 sm:$0xff]  }
0x1164   :  { %8439 = vmatpush1.bf16.msra.mxu1 %v20087_v6  ;;  %8454 = vmatprep.subr.bf16.mxu0 %v22897_v22  ;;  %v20098_v22 = vld [vmem:[#allocation20 + $0x824] ss:$16 sps:$4 sm:$0xff]   ;;  %v20171_v6 = vld [vmem:[#allocation20 + $0x9a8] ss:$16 sps:$4 sm:$0xff]  }
0x1165   :  { %8495 = vmatprep.subr.bf16.mxu1 %v22901_v14  ;;  %v20096_v14 = vld [vmem:[#allocation20 + $0x820] ss:$16 sps:$4 sm:$0xff]  }
0x1166   :  { %8359 = vmatmul.mubr.bf16.vlgmr.msra.gmra.mrb[56].mxu0 %v6491_v38 }
0x1167   :  { %8441 = vmatmul.mubr.bf16.vlgmr.msra.gmra.mrb[56].mxu1 %v6491_v38  ;;  %8455 = vmatpush1.bf16.msra.mxu0 %v22903_v37  ;;  %v20099_v37 = vld [vmem:[#allocation20 + $0x828] ss:$16 sps:$4 sm:$0xff]   ;;  %v20176_v38 = vld [vmem:[#allocation20 + $0x9c4] ss:$16 sps:$4 sm:$0xff]  }
0x1168   :  { %8496 = vmatpush1.bf16.msra.mxu1 %v22907_v36  ;;  %8486 = vmatprep.mubr.bf16.mxu0 %v23706_v26  ;;  %v20104_v36 = vld [vmem:[#allocation20 + $0x844] ss:$16 sps:$4 sm:$0xff]  }
0x1169   :  { %8527 = vmatprep.mubr.bf16.mxu1 %v23706_v26  ;;  %9309 = vmatprep.subr.bf16.mxu0 %v20092_v40  ;;  %v20179_v40 = vld [vmem:[#allocation20 + $0x9cc] ss:$16 sps:$4 sm:$0xff]  }
0x116a   :  { %9391 = vmatprep.subr.bf16.mxu1 %v20095_v63  ;;  %v20174_v63 = vld [vmem:[#allocation20 + $0x9c0] ss:$16 sps:$4 sm:$0xff]  }
0x116e   :  { %16527 = vmatmul.mubr.msk.bf16.vlgmr.msra.gmra.mrb[60].mxu0 %vm6403_vm11, %v8450_v42 }
0x116f   :  { %16528 = vmatmul.mubr.msk.bf16.vlgmr.msra.gmra.mrb[60].mxu1 %vm6403_vm11, %v8450_v42  ;;  %9310 = vmatpush1.bf16.msra.mxu0 %v20090_v50  ;;  %v20177_v42 = vld [vmem:[#allocation20 + $0x9c8] ss:$16 sps:$4 sm:$0xff]   ;;  %v20180_v50 = vld [vmem:[#allocation20 + $0x9e0] ss:$16 sps:$4 sm:$0xff]  }
0x1170   :  { %9392 = vmatpush1.bf16.msra.mxu1 %v20093_v8  ;;  %9311 = vmatprep.subr.bf16.mxu0 %v20098_v22  ;;  %v20182_v8 = vld [vmem:[#allocation20 + $0x9e4] ss:$16 sps:$4 sm:$0xff]   ;;  %v20183_v22 = vld [vmem:[#allocation20 + $0x9e8] ss:$16 sps:$4 sm:$0xff]  }
0x1171   :  { %9393 = vmatprep.subr.bf16.mxu1 %v20101_v56  ;;  %v20185_v56 = vld [vmem:[#allocation20 + $0x9ec] ss:$16 sps:$4 sm:$0xff]  }
0x1173   :  { %9312 = vmatpush1.bf16.msra.mxu0 %v20096_v14  ;;  %v20188_v14 = vld [vmem:[#allocation20 + $0xa04] ss:$16 sps:$4 sm:$0xff]  }
0x1174   :  { %9394 = vmatpush1.bf16.msra.mxu1 %v20099_v37  ;;  %9313 = vmatprep.subr.bf16.mxu0 %v20104_v36  ;;  %v20191_v37 = vld [vmem:[#allocation20 + $0xa0c] ss:$16 sps:$4 sm:$0xff]  }
0x1175   :  { %9395 = vmatprep.subr.bf16.mxu1 %v20107_v13 }
0x1177   :  { %9314 = vmatpush1.bf16.msra.mxu0 %v20102_v21 }
0x1178   :  { %9396 = vmatpush1.bf16.msra.mxu1 %v20105_v35  ;;  %9315 = vmatprep.subr.bf16.mxu0 %v20110_v30 }
0x1179   :  { %9397 = vmatprep.subr.bf16.mxu1 %v20113_v39  ;;  %v20186_v39 = vld [vmem:[#allocation20 + $0xa00] ss:$16 sps:$4 sm:$0xff]  }
0x117b   :  { %9316 = vmatpush1.bf16.msra.mxu0 %v20108_v28  ;;  %v20189_v28 = vld [vmem:[#allocation20 + $0xa08] ss:$16 sps:$4 sm:$0xff]  }
0x117c   :  { %9398 = vmatpush1.bf16.msra.mxu1 %v20111_v47  ;;  %9317 = vmatprep.subr.bf16.mxu0 %v20116_v32 }
0x117d   :  { %9399 = vmatprep.subr.bf16.mxu1 %v20119_v23 }
0x117f   :  { %9318 = vmatpush1.bf16.msra.mxu0 %v20114_v24  ;;  %v20194_v24 = vld [vmem:[#allocation20 + $0xa24] ss:$16 sps:$4 sm:$0xff]  }
0x1180   :  { %9400 = vmatpush1.bf16.msra.mxu1 %v20117_v3  ;;  %9319 = vmatprep.subr.bf16.mxu0 %v20122_v11  ;;  %v20197_v3 = vld [vmem:[#allocation20 + $0xa2c] ss:$16 sps:$4 sm:$0xff]  }
0x1181   :  { %9401 = vmatprep.subr.bf16.mxu1 %v20125_v62 }
0x1183   :  { %9320 = vmatpush1.bf16.msra.mxu0 %v20120_v15 }
0x1184   :  { %9402 = vmatpush1.bf16.msra.mxu1 %v20123_v2  ;;  %9321 = vmatprep.subr.bf16.mxu0 %v20128_v0  ;;  %v20192_v2 = vld [vmem:[#allocation20 + $0xa20] ss:$16 sps:$4 sm:$0xff]   ;;  %v20195_v0 = vld [vmem:[#allocation20 + $0xa28] ss:$16 sps:$4 sm:$0xff]  }
0x1185   :  { %9403 = vmatprep.subr.bf16.mxu1 %v20131_v44  ;;  %v20200_v44 = vld [vmem:[#allocation20 + $0xa44] ss:$16 sps:$4 sm:$0xff]  }
0x1187   :  { %9322 = vmatpush1.bf16.msra.mxu0 %v20126_v49  ;;  %v20203_v49 = vld [vmem:[#allocation20 + $0xa4c] ss:$16 sps:$4 sm:$0xff]  }
0x1188   :  { %9404 = vmatpush1.bf16.msra.mxu1 %v20129_v12  ;;  %9323 = vmatprep.subr.bf16.mxu0 %v20134_v52  ;;  %v20198_v12 = vld [vmem:[#allocation20 + $0xa40] ss:$16 sps:$4 sm:$0xff]   ;;  %v20201_v52 = vld [vmem:[#allocation20 + $0xa48] ss:$16 sps:$4 sm:$0xff]  }
0x1189   :  { %9405 = vmatprep.subr.bf16.mxu1 %v20137_v16  ;;  %v20206_v16 = vld [vmem:[#allocation20 + $0xa64] ss:$16 sps:$4 sm:$0xff]  }
0x118b   :  { %9324 = vmatpush1.bf16.msra.mxu0 %v20132_v4  ;;  %v20209_v4 = vld [vmem:[#allocation20 + $0xa6c] ss:$16 sps:$4 sm:$0xff]  }
0x118c   :  { %9406 = vmatpush1.bf16.msra.mxu1 %v20135_v58  ;;  %9325 = vmatprep.subr.bf16.mxu0 %v20140_v59  ;;  %v20204_v58 = vld [vmem:[#allocation20 + $0xa60] ss:$16 sps:$4 sm:$0xff]   ;;  %v20207_v59 = vld [vmem:[#allocation20 + $0xa68] ss:$16 sps:$4 sm:$0xff]  }
0x118d   :  { %9407 = vmatprep.subr.bf16.mxu1 %v20143_v10  ;;  %v20212_v10 = vld [vmem:[#allocation20 + $0xa84] ss:$16 sps:$4 sm:$0xff]  }
0x118f   :  { %9326 = vmatpush1.bf16.msra.mxu0 %v20138_v55  ;;  %v20215_v55 = vld [vmem:[#allocation20 + $0xa8c] ss:$16 sps:$4 sm:$0xff]  }
0x1190   :  { %9408 = vmatpush1.bf16.msra.mxu1 %v20141_v45  ;;  %9327 = vmatprep.subr.bf16.mxu0 %v20146_v27  ;;  %v20210_v45 = vld [vmem:[#allocation20 + $0xa80] ss:$16 sps:$4 sm:$0xff]   ;;  %v20213_v27 = vld [vmem:[#allocation20 + $0xa88] ss:$16 sps:$4 sm:$0xff]  }
0x1191   :  { %9409 = vmatprep.subr.bf16.mxu1 %v20149_v25  ;;  %v20218_v25 = vld [vmem:[#allocation20 + $0xaa4] ss:$16 sps:$4 sm:$0xff]  }
0x1193   :  { %9328 = vmatpush1.bf16.msra.mxu0 %v20144_v46  ;;  %v20221_v46 = vld [vmem:[#allocation20 + $0xaac] ss:$16 sps:$4 sm:$0xff]  }
0x1194   :  { %9410 = vmatpush1.bf16.msra.mxu1 %v20147_v33  ;;  %9329 = vmatprep.subr.bf16.mxu0 %v20152_v61  ;;  %v20216_v33 = vld [vmem:[#allocation20 + $0xaa0] ss:$16 sps:$4 sm:$0xff]   ;;  %v20219_v61 = vld [vmem:[#allocation20 + $0xaa8] ss:$16 sps:$4 sm:$0xff]  }
0x1195   :  { %9411 = vmatprep.subr.bf16.mxu1 %v20155_v48  ;;  %v20224_v48 = vld [vmem:[#allocation20 + $0xac4] ss:$16 sps:$4 sm:$0xff]  }
0x1197   :  { %9330 = vmatpush1.bf16.msra.mxu0 %v20150_v34  ;;  %v20227_v34 = vld [vmem:[#allocation20 + $0xacc] ss:$16 sps:$4 sm:$0xff]  }
0x1198   :  { %9412 = vmatpush1.bf16.msra.mxu1 %v20153_v18  ;;  %9331 = vmatprep.subr.bf16.mxu0 %v20158_v41  ;;  %v20222_v18 = vld [vmem:[#allocation20 + $0xac0] ss:$16 sps:$4 sm:$0xff]   ;;  %v20225_v41 = vld [vmem:[#allocation20 + $0xac8] ss:$16 sps:$4 sm:$0xff]  }
0x1199   :  { %9413 = vmatprep.subr.bf16.mxu1 %v20161_v1  ;;  %v20230_v1 = vld [vmem:[#allocation20 + $0xae4] ss:$16 sps:$4 sm:$0xff]  }
0x119b   :  { %9332 = vmatpush1.bf16.msra.mxu0 %v20156_v7  ;;  %v20233_v7 = vld [vmem:[#allocation20 + $0xaec] ss:$16 sps:$4 sm:$0xff]  }
0x119c   :  { %9414 = vmatpush1.bf16.msra.mxu1 %v20159_v51  ;;  %9333 = vmatprep.subr.bf16.mxu0 %v20164_v43  ;;  %v20228_v51 = vld [vmem:[#allocation20 + $0xae0] ss:$16 sps:$4 sm:$0xff]   ;;  %v20231_v43 = vld [vmem:[#allocation20 + $0xae8] ss:$16 sps:$4 sm:$0xff]  }
0x119d   :  { %9415 = vmatprep.subr.bf16.mxu1 %v20167_v54  ;;  %v20236_v54 = vld [vmem:[#allocation20 + $0xb04] ss:$16 sps:$4 sm:$0xff]  }
0x119f   :  { %9334 = vmatpush1.bf16.msra.mxu0 %v20162_v17  ;;  %v20239_v17 = vld [vmem:[#allocation20 + $0xb0c] ss:$16 sps:$4 sm:$0xff]  }
0x11a0   :  { %9416 = vmatpush1.bf16.msra.mxu1 %v20165_v29  ;;  %9335 = vmatprep.subr.bf16.mxu0 %v20170_v53  ;;  %v20234_v29 = vld [vmem:[#allocation20 + $0xb00] ss:$16 sps:$4 sm:$0xff]   ;;  %v20237_v53 = vld [vmem:[#allocation20 + $0xb08] ss:$16 sps:$4 sm:$0xff]  }
0x11a1   :  { %9417 = vmatprep.subr.bf16.mxu1 %v20173_v19  ;;  %v20242_v19 = vld [vmem:[#allocation20 + $0xb24] ss:$16 sps:$4 sm:$0xff]  }
0x11a3   :  { %9336 = vmatpush1.bf16.msra.mxu0 %v20168_v20  ;;  %v20245_v20 = vld [vmem:[#allocation20 + $0xb2c] ss:$16 sps:$4 sm:$0xff]  }
0x11a4   :  { %9418 = vmatpush1.bf16.msra.mxu1 %v20171_v6  ;;  %9337 = vmatprep.subr.bf16.mxu0 %v20176_v38  ;;  %v20240_v6 = vld [vmem:[#allocation20 + $0xb20] ss:$16 sps:$4 sm:$0xff]   ;;  %v20243_v38 = vld [vmem:[#allocation20 + $0xb28] ss:$16 sps:$4 sm:$0xff]  }
0x11a5   :  { %9419 = vmatprep.subr.bf16.mxu1 %v20179_v40  ;;  %v20248_v40 = vld [vmem:[#allocation20 + $0xb44] ss:$16 sps:$4 sm:$0xff]  }
0x11a7   :  { %9338 = vmatpush1.bf16.msra.mxu0 %v20174_v63  ;;  %v20251_v63 = vld [vmem:[#allocation20 + $0xb4c] ss:$16 sps:$4 sm:$0xff]  }
0x11a8   :  { %9420 = vmatpush1.bf16.msra.mxu1 %v20177_v42  ;;  %9339 = vmatprep.subr.bf16.mxu0 %v20182_v8  ;;  %v20246_v42 = vld [vmem:[#allocation20 + $0xb40] ss:$16 sps:$4 sm:$0xff]   ;;  %v20254_v8 = vld [vmem:[#allocation20 + $0xb64] ss:$16 sps:$4 sm:$0xff]  }
0x11a9   :  { %9421 = vmatprep.subr.bf16.mxu1 %v20185_v56  ;;  %v20252_v56 = vld [vmem:[#allocation20 + $0xb60] ss:$16 sps:$4 sm:$0xff]  }
0x11ab   :  { %9340 = vmatpush1.bf16.msra.mxu0 %v20180_v50  ;;  %v20249_v50 = vld [vmem:[#allocation20 + $0xb48] ss:$16 sps:$4 sm:$0xff]  }
0x11ac   :  { %9422 = vmatpush1.bf16.msra.mxu1 %v20183_v22  ;;  %9350 = vmatprep.subr.bf16.mxu0 %v20188_v14  ;;  %v20257_v22 = vld [vmem:[#allocation20 + $0xb6c] ss:$16 sps:$4 sm:$0xff]   ;;  %v20255_v14 = vld [vmem:[#allocation20 + $0xb68] ss:$16 sps:$4 sm:$0xff]  }
0x11ad   :  { %9432 = vmatprep.subr.bf16.mxu1 %v20191_v37  ;;  %v20260_v37 = vld [vmem:[#allocation20 + $0xb84] ss:$16 sps:$4 sm:$0xff]  }
0x1241   :  { %v8488_v36 = vpop.f32.mrb[60].mxu0 }
0x1242   :  { %v8490_v13 = vpop.f32.mrb[61].mxu0  ;;  %v22950_v21 = vpop.f32.mrb[60].mxu1  ;;  %v8536_v32 = vpack.c.bf16 %v8488_v36, %v8488_v36  ;;  %v20263_v36 = vld [vmem:[#allocation20 + $0xb8c] ss:$16 sps:$4 sm:$0xff]  }
0x1243   :  { %v8537_v35 = vpack.c.bf16 %v8490_v13, %v8490_v13  ;;  %v8492_v30 = vpop.f32.mrb[62].mxu0  ;;  %v8531_v47 = vpop.f32.mrb[61].mxu1  ;;  %v20258_v13 = vld [vmem:[#allocation20 + $0xb80] ss:$16 sps:$4 sm:$0xff]  }
0x1244   :  { %v8493_v23 = vpop.f32.mrb[63].mxu0  ;;  %v8533_v11 = vpop.f32.mrb[62].mxu1  ;;  %v8539_v62 = vpack.c.bf16 %v8531_v47, %v8531_v47  ;;  %v20266_v30 = vld [vmem:[#allocation20 + $0xba4] ss:$16 sps:$4 sm:$0xff]   ;;  %v20267_v47 = vld [vmem:[#allocation20 + $0xba8] ss:$16 sps:$4 sm:$0xff]  }
0x1245   :  { %9341 = vmatprep.mubr.bf16.mxu0 %v8537_v35  ;;  %9423 = vmatprep.mubr.bf16.mxu1 %v8537_v35  ;;  %v8534_v15 = vpop.f32.mrb[63].mxu1  ;;  %v20261_v35 = vld [vmem:[#allocation20 + $0xb88] ss:$16 sps:$4 sm:$0xff]   ;;  %v20275_v23 = vld [vmem:[#allocation20 + $0xbcc] ss:$16 sps:$4 sm:$0xff]  }
0x1246   :  { %9342 = vmatmul.mubr.bf16.vlgmr.msra.gmra.mrb[56].mxu0 %v8536_v32  ;;  %9424 = vmatmul.mubr.bf16.vlgmr.msra.gmra.mrb[56].mxu1 %v8536_v32  ;;  %v20272_v32 = vld [vmem:[#allocation20 + $0xbc4] ss:$16 sps:$4 sm:$0xff]  }
0x1247   :  { %9351 = vmatpush1.bf16.msra.mxu0 %v20186_v39  ;;  %9433 = vmatpush1.bf16.msra.mxu1 %v20189_v28  ;;  %v20269_v39 = vld [vmem:[#allocation20 + $0xbac] ss:$16 sps:$4 sm:$0xff]   ;;  %v20264_v28 = vld [vmem:[#allocation20 + $0xba0] ss:$16 sps:$4 sm:$0xff]   ;;  %v20278_v11 = vld [vmem:[#allocation20 + $0xbe4] ss:$16 sps:$4 sm:$0xff]  }
0x1248   :  { %9352 = vmatprep.subr.bf16.mxu0 %v20194_v24  ;;  %9434 = vmatprep.subr.bf16.mxu1 %v20197_v3  ;;  %v20270_v24 = vld [vmem:[#allocation20 + $0xbc0] ss:$16 sps:$4 sm:$0xff]   ;;  %v20273_v3 = vld [vmem:[#allocation20 + $0xbc8] ss:$16 sps:$4 sm:$0xff]  }
0x1249   :  { %9382 = vmatprep.mubr.bf16.mxu0 %v8539_v62  ;;  %9464 = vmatprep.mubr.bf16.mxu1 %v8539_v62  ;;  %v20281_v62 = vld [vmem:[#allocation20 + $0xbec] ss:$16 sps:$4 sm:$0xff]   ;;  %v9517_v15 = vld [vmem:[#allocation22 + $0x80] sm:$0xff] }
0x124b   :  { %9353 = vmatpush1.bf16.msra.mxu0 %v20192_v2  ;;  %9435 = vmatpush1.bf16.msra.mxu1 %v20195_v0  ;;  %v9518_v2 = vld [vmem:[#allocation22 + $0x88] sm:$0xff]  ;;  %v9549_v0 = vld [vmem:[#allocation22 + $0x180] sm:$0xff] }
0x124c   :  { %9354 = vmatprep.subr.bf16.mxu0 %v20200_v44  ;;  %9436 = vmatprep.subr.bf16.mxu1 %v20203_v49  ;;  %v9550_v44 = vld [vmem:[#allocation22 + $0x188] sm:$0xff]  ;;  %v20276_v49 = vld [vmem:[#allocation20 + $0xbe0] ss:$16 sps:$4 sm:$0xff]  }
0x124f   :  { %9355 = vmatpush1.bf16.msra.mxu0 %v20198_v12  ;;  %9437 = vmatpush1.bf16.msra.mxu1 %v20201_v52  ;;  %v20279_v12 = vld [vmem:[#allocation20 + $0xbe8] ss:$16 sps:$4 sm:$0xff]   ;;  %v9501_v52 = vld [vmem:[#allocation22] sm:$0xff] }
0x1250   :  { %9356 = vmatprep.subr.bf16.mxu0 %v20206_v16  ;;  %9438 = vmatprep.subr.bf16.mxu1 %v20209_v4  ;;  %v9502_v16 = vld [vmem:[#allocation22 + $0x8] sm:$0xff]  ;;  %v22952_v4 = vpack.c.bf16 %v9518_v2, %v9517_v15  ;;  %v9541_v2 = vld [vmem:[#allocation22 + $0x140] sm:$0xff] }
0x1251   :  { %v9510_v15 = vld [vmem:[#allocation22 + $0x48] sm:$0xff] }
0x1253   :  { %9357 = vmatpush1.bf16.msra.mxu0 %v20204_v58  ;;  %9439 = vmatpush1.bf16.msra.mxu1 %v20207_v59  ;;  %v22954_v58 = vpack.c.bf16 %v9550_v44, %v9549_v0  ;;  %v9533_v59 = vld [vmem:[#allocation22 + $0x100] sm:$0xff]  ;;  %v9542_v44 = vld [vmem:[#allocation22 + $0x148] sm:$0xff] }
0x1254   :  { %9358 = vmatprep.subr.bf16.mxu0 %v20212_v10  ;;  %9440 = vmatprep.subr.bf16.mxu1 %v20215_v55  ;;  %v9534_v10 = vld [vmem:[#allocation22 + $0x108] sm:$0xff]  ;;  %v9519_v55 = vld [vmem:[#allocation22 + $0x90] sm:$0xff] }
0x1257   :  { %9359 = vmatpush1.bf16.msra.mxu0 %v20210_v45  ;;  %9441 = vmatpush1.bf16.msra.mxu1 %v20213_v27  ;;  %v9520_v45 = vld [vmem:[#allocation22 + $0x98] sm:$0xff]  ;;  %v9551_v27 = vld [vmem:[#allocation22 + $0x190] sm:$0xff] }
0x1258   :  { %9360 = vmatprep.subr.bf16.mxu0 %v20218_v25  ;;  %9442 = vmatprep.subr.bf16.mxu1 %v20221_v46  ;;  %v9552_v25 = vld [vmem:[#allocation22 + $0x198] sm:$0xff]  ;;  %v22956_v46 = vpack.c.bf16 %v9502_v16, %v9501_v52  ;;  %v9559_v16 = vld [vmem:[#allocation22 + $0x1d0] sm:$0xff] }
0x1259   :  { %v9528_v52 = vld [vmem:[#allocation22 + $0xd8] sm:$0xff] }
0x125b   :  { %9361 = vmatpush1.bf16.msra.mxu0 %v20216_v33  ;;  %9443 = vmatpush1.bf16.msra.mxu1 %v20219_v61  ;;  %v22958_v33 = vpack.c.bf16 %v9534_v10, %v9533_v59  ;;  %v9503_v61 = vld [vmem:[#allocation22 + $0x10] sm:$0xff]  ;;  %v9560_v10 = vld [vmem:[#allocation22 + $0x1d8] sm:$0xff] }
0x125c   :  { %9362 = vmatprep.subr.bf16.mxu0 %v20224_v48  ;;  %9444 = vmatprep.subr.bf16.mxu1 %v20227_v34  ;;  %v9504_v48 = vld [vmem:[#allocation22 + $0x18] sm:$0xff]  ;;  %v8538_v34 = vpack.c.bf16 %v22950_v21, %v22950_v21 }
0x125d   :  { %v22970_v21 = vpack.c.bf16 %v9504_v48, %v9503_v61  ;;  %v9543_v61 = vld [vmem:[#allocation22 + $0x150] sm:$0xff]  ;;  %v9544_v48 = vld [vmem:[#allocation22 + $0x158] sm:$0xff] }
0x125f   :  { %9363 = vmatpush1.bf16.msra.mxu0 %v20222_v18  ;;  %9445 = vmatpush1.bf16.msra.mxu1 %v20225_v41  ;;  %v22964_v18 = vpack.c.bf16 %v9520_v45, %v9519_v55  ;;  %v22966_v41 = vpack.c.bf16 %v9552_v25, %v9551_v27  ;;  %v9511_v55 = vld [vmem:[#allocation22 + $0x50] sm:$0xff]  ;;  %v9512_v45 = vld [vmem:[#allocation22 + $0x58] sm:$0xff]  ;;  %v23016_v27 = vpack.c.bf16 %v9560_v10, %v9559_v16 }
0x1260   :  { %9364 = vmatprep.subr.bf16.mxu0 %v20230_v1  ;;  %9446 = vmatprep.subr.bf16.mxu1 %v20233_v7  ;;  %v9535_v1 = vld [vmem:[#allocation22 + $0x110] sm:$0xff]  ;;  %v9536_v7 = vld [vmem:[#allocation22 + $0x118] sm:$0xff]  ;;  %v23018_v25 = vpack.c.bf16 %v9512_v45, %v9511_v55 }
0x1261   :  { %v9712_v16 = vld [vmem:[#allocation23 + $0x38] sm:$0xff] }
0x1263   :  { %9365 = vmatpush1.bf16.msra.mxu0 %v20228_v51  ;;  %9447 = vmatpush1.bf16.msra.mxu1 %v20231_v43  ;;  %v9521_v51 = vld [vmem:[#allocation22 + $0xa0] sm:$0xff]  ;;  %v9522_v43 = vld [vmem:[#allocation22 + $0xa8] sm:$0xff] }
0x1264   :  { %9366 = vmatprep.subr.bf16.mxu0 %v20236_v54  ;;  %9448 = vmatprep.subr.bf16.mxu1 %v20239_v17  ;;  %v9553_v54 = vld [vmem:[#allocation22 + $0x1a0] sm:$0xff]  ;;  %v9554_v17 = vld [vmem:[#allocation22 + $0x1a8] sm:$0xff] }
0x1267   :  { %9367 = vmatpush1.bf16.msra.mxu0 %v20234_v29  ;;  %9449 = vmatpush1.bf16.msra.mxu1 %v20237_v53  ;;  %v22972_v29 = vpack.c.bf16 %v9536_v7, %v9535_v1  ;;  %v9505_v53 = vld [vmem:[#allocation22 + $0x20] sm:$0xff]  ;;  %v9530_v7 = vld [vmem:[#allocation22 + $0xe8] sm:$0xff] }
0x1268   :  { %9368 = vmatprep.subr.bf16.mxu0 %v20242_v19  ;;  %9450 = vmatprep.subr.bf16.mxu1 %v20245_v20  ;;  %v9506_v19 = vld [vmem:[#allocation22 + $0x28] sm:$0xff]  ;;  %v22976_v20 = vpack.c.bf16 %v9522_v43, %v9521_v51  ;;  %v9529_v1 = vld [vmem:[#allocation22 + $0xe0] sm:$0xff] }
0x1269   :  { %v9561_v51 = vld [vmem:[#allocation22 + $0x1e0] sm:$0xff]  ;;  %v23026_v43 = vpack.c.bf16 %v9530_v7, %v9529_v1 }
0x126b   :  { %9369 = vmatpush1.bf16.msra.mxu0 %v20240_v6  ;;  %9451 = vmatpush1.bf16.msra.mxu1 %v20243_v38  ;;  %v22978_v6 = vpack.c.bf16 %v9554_v17, %v9553_v54  ;;  %v9537_v38 = vld [vmem:[#allocation22 + $0x120] sm:$0xff]  ;;  %v9562_v54 = vld [vmem:[#allocation22 + $0x1e8] sm:$0xff] }
0x126c   :  { %9370 = vmatprep.subr.bf16.mxu0 %v20248_v40  ;;  %9452 = vmatprep.subr.bf16.mxu1 %v20251_v63  ;;  %v9538_v40 = vld [vmem:[#allocation22 + $0x128] sm:$0xff]  ;;  %v9523_v63 = vld [vmem:[#allocation22 + $0xb0] sm:$0xff]  ;;  %v9513_v17 = vld [vmem:[#allocation22 + $0x60] sm:$0xff] }
0x126f   :  { %9371 = vmatpush1.bf16.msra.mxu0 %v20246_v42  ;;  %9453 = vmatpush1.bf16.msra.mxu1 %v20249_v50  ;;  %v9524_v42 = vld [vmem:[#allocation22 + $0xb8] sm:$0xff]  ;;  %v9555_v50 = vld [vmem:[#allocation22 + $0x1b0] sm:$0xff] }
0x1270   :  { %9372 = vmatprep.subr.bf16.mxu0 %v20254_v8  ;;  %9454 = vmatprep.subr.bf16.mxu1 %v20257_v22  ;;  %v9556_v8 = vld [vmem:[#allocation22 + $0x1b8] sm:$0xff]  ;;  %v22982_v22 = vpack.c.bf16 %v9506_v19, %v9505_v53  ;;  %v9514_v53 = vld [vmem:[#allocation22 + $0x68] sm:$0xff]  ;;  %v23028_v19 = vpack.c.bf16 %v9562_v54, %v9561_v51 }
0x1273   :  { %9373 = vmatpush1.bf16.msra.mxu0 %v20252_v56  ;;  %9455 = vmatpush1.bf16.msra.mxu1 %v20255_v14  ;;  %v22984_v56 = vpack.c.bf16 %v9538_v40, %v9537_v38  ;;  %v9507_v14 = vld [vmem:[#allocation22 + $0x30] sm:$0xff]  ;;  %v23030_v38 = vpack.c.bf16 %v9514_v53, %v9513_v17  ;;  %v9545_v40 = vld [vmem:[#allocation22 + $0x160] sm:$0xff] }
0x1274   :  { %9374 = vmatprep.subr.bf16.mxu0 %v20260_v37  ;;  %9456 = vmatprep.subr.bf16.mxu1 %v20263_v36  ;;  %v9508_v37 = vld [vmem:[#allocation22 + $0x38] sm:$0xff]  ;;  %v22988_v36 = vpack.c.bf16 %v9524_v42, %v9523_v63  ;;  %v9546_v63 = vld [vmem:[#allocation22 + $0x168] sm:$0xff]  ;;  %v9531_v42 = vld [vmem:[#allocation22 + $0xf0] sm:$0xff] }
0x1277   :  { %9375 = vmatpush1.bf16.msra.mxu0 %v20258_v13  ;;  %9457 = vmatpush1.bf16.msra.mxu1 %v20261_v35  ;;  %v22990_v13 = vpack.c.bf16 %v9556_v8, %v9555_v50  ;;  %v9539_v35 = vld [vmem:[#allocation22 + $0x130] sm:$0xff]  ;;  %v23033_v50 = vpack.c.bf16 %v9546_v63, %v9545_v40  ;;  %v9532_v8 = vld [vmem:[#allocation22 + $0xf8] sm:$0xff] }
0x1278   :  { %9376 = vmatprep.subr.bf16.mxu0 %v20266_v30  ;;  %9458 = vmatprep.subr.bf16.mxu1 %v20269_v39  ;;  %v9540_v30 = vld [vmem:[#allocation22 + $0x138] sm:$0xff]  ;;  %v9525_v39 = vld [vmem:[#allocation22 + $0xc0] sm:$0xff] }
0x127b   :  { %9377 = vmatpush1.bf16.msra.mxu0 %v20264_v28  ;;  %9459 = vmatpush1.bf16.msra.mxu1 %v20267_v47  ;;  %v9526_v28 = vld [vmem:[#allocation22 + $0xc8] sm:$0xff]  ;;  %v9557_v47 = vld [vmem:[#allocation22 + $0x1c0] sm:$0xff] }
0x127c   :  { %9378 = vmatprep.subr.bf16.mxu0 %v20272_v32  ;;  %9460 = vmatprep.subr.bf16.mxu1 %v20275_v23  ;;  %v9558_v32 = vld [vmem:[#allocation22 + $0x1c8] sm:$0xff]  ;;  %v22994_v23 = vpack.c.bf16 %v9508_v37, %v9507_v14  ;;  %v9563_v14 = vld [vmem:[#allocation22 + $0x1f0] sm:$0xff]  ;;  %v9564_v37 = vld [vmem:[#allocation22 + $0x1f8] sm:$0xff] }
0x127f   :  { %9379 = vmatpush1.bf16.msra.mxu0 %v20270_v24  ;;  %9461 = vmatpush1.bf16.msra.mxu1 %v20273_v3  ;;  %v22996_v24 = vpack.c.bf16 %v9540_v30, %v9539_v35  ;;  %v23000_v3 = vpack.c.bf16 %v9526_v28, %v9525_v39  ;;  %v23037_v35 = vpack.c.bf16 %v9532_v8, %v9531_v42  ;;  %v9515_v39 = vld [vmem:[#allocation22 + $0x70] sm:$0xff]  ;;  %v9516_v28 = vld [vmem:[#allocation22 + $0x78] sm:$0xff] }
0x1280   :  { %9380 = vmatprep.subr.bf16.mxu0 %v20278_v11  ;;  %9462 = vmatprep.subr.bf16.mxu1 %v20281_v62  ;;  %v23002_v11 = vpack.c.bf16 %v9558_v32, %v9557_v47  ;;  %v9509_v62 = vld [vmem:[#allocation22 + $0x40] sm:$0xff]  ;;  %v23039_v30 = vpack.c.bf16 %v9564_v37, %v9563_v14  ;;  %v9547_v47 = vld [vmem:[#allocation22 + $0x170] sm:$0xff]  ;;  %v23042_v32 = vpack.c.bf16 %v9516_v28, %v9515_v39 }
0x1281   :  { %v23008_v0 = vpack.c.bf16 %v9510_v15, %v9509_v62  ;;  %v9548_v62 = vld [vmem:[#allocation22 + $0x178] sm:$0xff] }
0x1282   :  { %v23046_v15 = vpack.c.bf16 %v9548_v62, %v9547_v47 }
0x1283   :  { %9381 = vmatpush1.bf16.msra.mxu0 %v20276_v49  ;;  %9463 = vmatpush1.bf16.msra.mxu1 %v20279_v12  ;;  %v23010_v49 = vpack.c.bf16 %v9542_v44, %v9541_v2  ;;  %v9527_v12 = vld [vmem:[#allocation22 + $0xd0] sm:$0xff]  ;;  %v9706_v2 = vld [vmem:[#allocation23 + $0x8] sm:$0xff] }
0x1284   :  { %18016 = vmatprep.subr.bf16.mxu0 %v22952_v4  ;;  %18048 = vmatprep.subr.bf16.mxu1 %v22954_v58  ;;  %v23014_v59 = vpack.c.bf16 %v9528_v52, %v9527_v12  ;;  %23710 = vst [vmem:[#allocation71_spill] sm:$0xff] %v23046_v15  ;;  %v9710_v44 = vld [vmem:[#allocation23 + $0x28] sm:$0xff]  ;;  %v9708_v12 = vld [vmem:[#allocation23 + $0x18] sm:$0xff] }
0x1285   :  { %v18079_v52 = vpack.c.bf16 %v9710_v44, %v9706_v2  ;;  %v18111_v10 = vpack.c.bf16 %v9712_v16, %v9708_v12  ;;  %v9705_v16 = vld [vmem:[#allocation23] sm:$0xff] }
0x1286   :  { %9383 = vmatmul.mubr.bf16.vlgmr.msra.gmra.mrb[56].mxu0 %v8538_v34  ;;  %9465 = vmatmul.mubr.bf16.vlgmr.msra.gmra.mrb[56].mxu1 %v8538_v34  ;;  %v23021_v34 = vpack.c.bf16 %v9544_v48, %v9543_v61 }
0x1287   :  { %18018 = vmatpush3.bf16.msra.mxu0 %v22956_v46  ;;  %18050 = vmatpush3.bf16.msra.mxu1 %v22958_v33 }
0x1288   :  { %18020 = vmatprep.subr.bf16.mxu0 %v22964_v18  ;;  %18052 = vmatprep.subr.bf16.mxu1 %v22966_v41 }
0x128b   :  { %18022 = vmatpush3.bf16.msra.mxu0 %v22970_v21  ;;  %18054 = vmatpush3.bf16.msra.mxu1 %v22972_v29 }
0x128c   :  { %18024 = vmatprep.subr.bf16.mxu0 %v22976_v20  ;;  %18056 = vmatprep.subr.bf16.mxu1 %v22978_v6 }
0x128f   :  { %18026 = vmatpush3.bf16.msra.mxu0 %v22982_v22  ;;  %18058 = vmatpush3.bf16.msra.mxu1 %v22984_v56 }
0x1290   :  { %18028 = vmatprep.subr.bf16.mxu0 %v22988_v36  ;;  %18060 = vmatprep.subr.bf16.mxu1 %v22990_v13 }
0x1293   :  { %18030 = vmatpush3.bf16.msra.mxu0 %v22994_v23  ;;  %18062 = vmatpush3.bf16.msra.mxu1 %v22996_v24 }
0x1294   :  { %18032 = vmatprep.subr.bf16.mxu0 %v23000_v3  ;;  %18064 = vmatprep.subr.bf16.mxu1 %v23002_v11 }
0x1297   :  { %18034 = vmatpush3.bf16.msra.mxu0 %v23008_v0  ;;  %18066 = vmatpush3.bf16.msra.mxu1 %v23010_v49 }
0x1298   :  { %18036 = vmatprep.subr.bf16.mxu0 %v23014_v59  ;;  %18068 = vmatprep.subr.bf16.mxu1 %v23016_v27 }
0x129b   :  { %18038 = vmatpush3.bf16.msra.mxu0 %v23018_v25  ;;  %18070 = vmatpush3.bf16.msra.mxu1 %v23021_v34 }
0x129c   :  { %18040 = vmatprep.subr.bf16.mxu0 %v23026_v43  ;;  %18072 = vmatprep.subr.bf16.mxu1 %v23028_v19 }
0x129f   :  { %18042 = vmatpush3.bf16.msra.mxu0 %v23030_v38  ;;  %18074 = vmatpush3.bf16.msra.mxu1 %v23033_v50 }
0x12a0   :  { %18044 = vmatprep.subr.bf16.mxu0 %v23037_v35  ;;  %18076 = vmatprep.subr.bf16.mxu1 %v23039_v30 }
0x12a3   :  { %18046 = vmatpush3.bf16.msra.mxu0 %v23042_v32  ;;  %18078 = vmatpush3.bf16.msra.mxu1 %v23046_v15  ;;  %v9728_v15 = vld [vmem:[#allocation23 + $0xb8] sm:$0xff] }
0x12a4   :  { %18080 = vmatprep.subr.bf16.mxu0 %v18079_v52  ;;  %18112 = vmatprep.subr.bf16.mxu1 %v18111_v10  ;;  %v9709_v10 = vld [vmem:[#allocation23 + $0x20] sm:$0xff] }
0x1359   :  { %v23050_v55 = vpop.f32.mrb[56].mxu0  ;;  %v23052_v45 = vpop.f32.mrb[56].mxu1 }
0x135a   :  { %23711 = vst [vmem:[#allocation72_spill] sm:$0xff] %v23050_v55  ;;  %23712 = vst [vmem:[#allocation73_spill] sm:$0xff] %v23052_v45  ;;  %v9477_v61 = vrot.slane %v23050_v55, 4  ;;  %v9489_v48 = vrot.slane %v23052_v45, 4  ;;  %v23056_v1 = vpop.f32.mrb[57].mxu0  ;;  %v23058_v7 = vpop.f32.mrb[57].mxu1 }
0x135b   :  { %23713 = vst [vmem:[#allocation75_spill] sm:$0xff] %v23056_v1  ;;  %23714 = vst [vmem:[#allocation76_spill] sm:$0xff] %v23058_v7  ;;  %v9483_v51 = vrot.slane %v23056_v1, 4  ;;  %v9495_v54 = vrot.slane %v23058_v7, 4  ;;  %v9388_v17 = vpop.f32.mrb[58].mxu0  ;;  %v9470_v53 = vpop.f32.mrb[58].mxu1 }
0x135c   :  { %v9478_v40 = vadd.f32 %v9477_v61, %v23050_v55  ;;  %v9490_v63 = vadd.f32 %v9489_v48, %v23052_v45  ;;  %v9389_v42 = vpop.f32.mrb[59].mxu0  ;;  %v9471_v8 = vpop.f32.mrb[59].mxu1  ;;  %v9707_v53 = vld [vmem:[#allocation23 + $0x10] sm:$0xff]  ;;  %v9722_v45 = vld [vmem:[#allocation23 + $0x88] sm:$0xff] }
0x135d   :  { %v9484_v14 = vadd.f32 %v9483_v51, %v23056_v1  ;;  %v9496_v37 = vadd.f32 %v9495_v54, %v23058_v7  ;;  %v9711_v48 = vld [vmem:[#allocation23 + $0x30] sm:$0xff]  ;;  %v9714_v42 = vld [vmem:[#allocation23 + $0x48] sm:$0xff]  ;;  %v9720_v54 = vld [vmem:[#allocation23 + $0x78] sm:$0xff]  ;;  %v18081_v7 = vpack.c.bf16 %v9709_v10, %v9705_v16 }
0x135e   :  { %v9479_v39 = vrot.slane %v9478_v40, 2  ;;  %v9491_v28 = vrot.slane %v9490_v63, 2  ;;  %v9718_v51 = vld [vmem:[#allocation23 + $0x68] sm:$0xff]  ;;  %v18113_v1 = vpack.c.bf16 %v9711_v48, %v9707_v53  ;;  %v9725_v16 = vld [vmem:[#allocation23 + $0xa0] sm:$0xff]  ;;  %v9727_v10 = vld [vmem:[#allocation23 + $0xb0] sm:$0xff] }
0x135f   :  { %v9485_v47 = vrot.slane %v9484_v14, 2  ;;  %v9497_v62 = vrot.slane %v9496_v37, 2  ;;  %v9726_v55 = vld [vmem:[#allocation23 + $0xa8] sm:$0xff]  ;;  %v9729_v53 = vld [vmem:[#allocation23 + $0xc0] sm:$0xff] }
0x1360   :  { %v9480_v2 = vadd.f32 %v9479_v39, %v9478_v40  ;;  %v9492_v44 = vadd.f32 %v9491_v28, %v9490_v63  ;;  %v9713_v40 = vld [vmem:[#allocation23 + $0x40] sm:$0xff]  ;;  %v18083_v39 = vpack.c.bf16 %v9718_v51, %v9714_v42  ;;  %v18115_v28 = vpack.c.bf16 %v9720_v54, %v9716_v9  ;;  %v9738_v42 = vld [vmem:[#allocation23 + $0x108] sm:$0xff]  ;;  %v9740_v51 = vld [vmem:[#allocation23 + $0x118] sm:$0xff] }
0x1361   :  { %v9486_v12 = vadd.f32 %v9485_v47, %v9484_v14  ;;  %v9498_v52 = vadd.f32 %v9497_v62, %v9496_v37  ;;  %v9717_v63 = vld [vmem:[#allocation23 + $0x60] sm:$0xff]  ;;  %v9715_v47 = vld [vmem:[#allocation23 + $0x50] sm:$0xff]  ;;  %v18119_v9 = vpack.c.bf16 %v9728_v15, %v9724_v31  ;;  %v9744_v54 = vld [vmem:[#allocation23 + $0x138] sm:$0xff] }
0x1362   :  { %v9481_v17 = vrot.slane %v9480_v2, 1  ;;  %v9493_v61 = vrot.slane %v9492_v44, 1  ;;  %v9719_v62 = vld [vmem:[#allocation23 + $0x70] sm:$0xff]  ;;  %v9733_v48 = vld [vmem:[#allocation23 + $0xe0] sm:$0xff] }
0x1363   :  { %v9487_v8 = vrot.slane %v9486_v12, 1  ;;  %v9499_v57 = vrot.slane %v9498_v52, 1  ;;  %v9731_v15 = vld [vmem:[#allocation23 + $0xd0] sm:$0xff] }
0x1364   :  { %v9482_v14 = vadd.f32 %v9481_v17, %v9480_v2  ;;  %v9494_v37 = vadd.f32 %v9493_v61, %v9492_v44  ;;  %v18087_v2 = vpack.c.bf16 %v9726_v55, %v9722_v45  ;;  %v9723_v44 = vld [vmem:[#allocation23 + $0x90] sm:$0xff]  ;;  %v9730_v17 = vld [vmem:[#allocation23 + $0xc8] sm:$0xff]  ;;  %v9736_v61 = vld [vmem:[#allocation23 + $0xf8] sm:$0xff] }
0x1365   :  { %v9488_v60 = vadd.f32 %v9487_v8, %v9486_v12  ;;  %v9500_v26 = vadd.f32 %v9499_v57, %v9498_v52  ;;  %v18085_v57 = vpack.c.bf16 %v9717_v63, %v9713_v40  ;;  %v18117_v12 = vpack.c.bf16 %v9719_v62, %v9715_v47  ;;  %v9721_v52 = vld [vmem:[#allocation23 + $0x80] sm:$0xff]  ;;  %v9735_v45 = vld [vmem:[#allocation23 + $0xf0] sm:$0xff]  ;;  %v9742_v8 = vld [vmem:[#allocation23 + $0x128] sm:$0xff] }
0x1366   :  { %v18093_v40 = vpack.c.bf16 %v9733_v48, %v9729_v53  ;;  %v18125_v63 = vpack.c.bf16 %v9735_v45, %v9731_v15  ;;  %v9739_v47 = vld [vmem:[#allocation23 + $0x110] sm:$0xff]  ;;  %v9756_v53 = vld [vmem:[#allocation23 + $0x198] sm:$0xff]  ;;  %v9753_v15 = vld [vmem:[#allocation23 + $0x180] sm:$0xff] }
0x1367   :  { %9629 = vmatprep.mubr.f32.mxu0 %v9488_v60  ;;  %9699 = vmatprep.mubr.f32.mxu1 %v9500_v26  ;;  %v9734_v60 = vld [vmem:[#allocation23 + $0xe8] sm:$0xff]  ;;  %v9732_v26 = vld [vmem:[#allocation23 + $0xd8] sm:$0xff]  ;;  %v9743_v62 = vld [vmem:[#allocation23 + $0x130] sm:$0xff] }
0x1368   :  { %9630 = vmatmul.mubr.f32.vlgmr.msra.gmra.mrb[46].mxu0 %v9482_v14  ;;  %9700 = vmatmul.mubr.f32.vlgmr.msra.gmra.mrb[46].mxu1 %v9494_v37  ;;  %v18091_v55 = vpack.c.bf16 %v9734_v60, %v9730_v17  ;;  %v18123_v31 = vpack.c.bf16 %v9736_v61, %v9732_v26  ;;  %v9737_v14 = vld [vmem:[#allocation23 + $0x100] sm:$0xff]  ;;  %v9747_v26 = vld [vmem:[#allocation23 + $0x150] sm:$0xff]  ;;  %v9760_v48 = vld [vmem:[#allocation23 + $0x1b8] sm:$0xff] }
0x1369   :  { %18082 = vmatpush1.bf16.msra.mxu0 %v18081_v7  ;;  %18114 = vmatpush1.bf16.msra.mxu1 %v18113_v1  ;;  %v18089_v1 = vpack.c.bf16 %v9725_v16, %v9721_v52  ;;  %v18121_v7 = vpack.c.bf16 %v9727_v10, %v9723_v44  ;;  %v9741_v37 = vld [vmem:[#allocation23 + $0x120] sm:$0xff]  ;;  %v9748_v52 = vld [vmem:[#allocation23 + $0x158] sm:$0xff]  ;;  %v9751_v61 = vld [vmem:[#allocation23 + $0x170] sm:$0xff] }
0x136a   :  { %18084 = vmatprep.subr.bf16.mxu0 %v18083_v39  ;;  %18116 = vmatprep.subr.bf16.mxu1 %v18115_v28  ;;  %v18095_v39 = vpack.c.bf16 %v9742_v8, %v9738_v42  ;;  %v18127_v28 = vpack.c.bf16 %v9744_v54, %v9740_v51  ;;  %v9752_v16 = vld [vmem:[#allocation23 + $0x178] sm:$0xff]  ;;  %v9745_v44 = vld [vmem:[#allocation23 + $0x140] sm:$0xff]  ;;  %v18135_v42 = vpack.c.bf16 %v9760_v48, %v9756_v53  ;;  %v9755_v51 = vld [vmem:[#allocation23 + $0x190] sm:$0xff] }
0x136b   :  { %9833 = vmatprep.mubr.f32.mxu0 %v23696_v5  ;;  %9904 = vmatprep.mubr.f32.mxu1 %v23696_v5  ;;  %v9749_v10 = vld [vmem:[#allocation23 + $0x160] sm:$0xff]  ;;  %v18131_v60 = vpack.c.bf16 %v9752_v16, %v9748_v52  ;;  %v9759_v54 = vld [vmem:[#allocation23 + $0x1b0] sm:$0xff] }
0x136c   :  { %v9757_v8 = vld [vmem:[#allocation23 + $0x1a0] sm:$0xff]  ;;  %v9763_v16 = vld [vmem:[#allocation23 + $0x1d0] sm:$0xff] }
0x136d   :  { %18086 = vmatpush1.bf16.msra.mxu0 %v18085_v57  ;;  %18118 = vmatpush1.bf16.msra.mxu1 %v18117_v12  ;;  %v9746_v57 = vld [vmem:[#allocation23 + $0x148] sm:$0xff] }
0x136e   :  { %18088 = vmatprep.subr.bf16.mxu0 %v18087_v2  ;;  %18120 = vmatprep.subr.bf16.mxu1 %v18119_v9  ;;  %v9750_v12 = vld [vmem:[#allocation23 + $0x168] sm:$0xff]  ;;  %v18097_v2 = vpack.c.bf16 %v9741_v37, %v9737_v14  ;;  %v18129_v9 = vpack.c.bf16 %v9743_v62, %v9739_v47  ;;  %v9768_v47 = vld [vmem:[#allocation23 + $0x1f8] sm:$0xff]  ;;  %v9761_v62 = vld [vmem:[#allocation23 + $0x1c0] sm:$0xff] }
0x136f   :  { %v18099_v17 = vpack.c.bf16 %v9750_v12, %v9746_v57  ;;  %v9762_v14 = vld [vmem:[#allocation23 + $0x1c8] sm:$0xff]  ;;  %v9765_v57 = vld [vmem:[#allocation23 + $0x1e0] sm:$0xff] }
0x1370   :  { %v9766_v37 = vld [vmem:[#allocation23 + $0x1e8] sm:$0xff]  ;;  %v18109_v52 = vpack.c.bf16 %v9765_v57, %v9761_v62  ;;  %v10106_v62 = vld [vmem:[#allocation25 + $0x30] sm:$0xff] }
0x1371   :  { %18090 = vmatpush1.bf16.msra.mxu0 %v18089_v1  ;;  %18122 = vmatpush1.bf16.msra.mxu1 %v18121_v7  ;;  %v9754_v1 = vld [vmem:[#allocation23 + $0x188] sm:$0xff] }
0x1372   :  { %18092 = vmatprep.subr.bf16.mxu0 %v18091_v55  ;;  %18124 = vmatprep.subr.bf16.mxu1 %v18123_v31  ;;  %v9758_v7 = vld [vmem:[#allocation23 + $0x1a8] sm:$0xff]  ;;  %v18101_v55 = vpack.c.bf16 %v9749_v10, %v9745_v44  ;;  %v18133_v31 = vpack.c.bf16 %v9751_v61, %v9747_v26 }
0x1373   :  { %v18103_v45 = vpack.c.bf16 %v9758_v7, %v9754_v1  ;;  %v10109_v57 = vld [vmem:[#allocation25 + $0x48] sm:$0xff] }
0x1375   :  { %18094 = vmatpush1.bf16.msra.mxu0 %v18093_v40  ;;  %18126 = vmatpush1.bf16.msra.mxu1 %v18125_v63  ;;  %v18105_v40 = vpack.c.bf16 %v9757_v8, %v9753_v15  ;;  %v18137_v63 = vpack.c.bf16 %v9759_v54, %v9755_v51 }
0x1376   :  { %18096 = vmatprep.subr.bf16.mxu0 %v18095_v39  ;;  %18128 = vmatprep.subr.bf16.mxu1 %v18127_v28  ;;  %v9764_v39 = vld [vmem:[#allocation23 + $0x1d8] sm:$0xff]  ;;  %v18107_v28 = vpack.c.bf16 %v9766_v37, %v9762_v14  ;;  %v10100_v14 = vld [vmem:[#allocation25] sm:$0xff] }
0x1377   :  { %v18139_v12 = vpack.c.bf16 %v9768_v47, %v9764_v39  ;;  %v10104_v37 = vld [vmem:[#allocation25 + $0x20] sm:$0xff]  ;;  %v10102_v47 = vld [vmem:[#allocation25 + $0x10] sm:$0xff] }
0x1379   :  { %18098 = vmatpush1.bf16.msra.mxu0 %v18097_v2  ;;  %18130 = vmatpush1.bf16.msra.mxu1 %v18129_v9  ;;  %v9767_v2 = vld [vmem:[#allocation23 + $0x1f0] sm:$0xff] }
0x137a   :  { %18100 = vmatprep.subr.bf16.mxu0 %v18099_v17  ;;  %18132 = vmatprep.subr.bf16.mxu1 %v18131_v60  ;;  %v18141_v9 = vpack.c.bf16 %v9767_v2, %v9763_v16  ;;  %v10113_v16 = vld [vmem:[#allocation25 + $0x68] sm:$0xff]  ;;  %v10111_v2 = vld [vmem:[#allocation25 + $0x58] sm:$0xff] }
0x137d   :  { %18102 = vmatpush1.bf16.msra.mxu0 %v18101_v55  ;;  %18134 = vmatpush1.bf16.msra.mxu1 %v18133_v31 }
0x137e   :  { %18104 = vmatprep.subr.bf16.mxu0 %v18103_v45  ;;  %18136 = vmatprep.subr.bf16.mxu1 %v18135_v42 }
0x1381   :  { %18106 = vmatpush1.bf16.msra.mxu0 %v18105_v40  ;;  %18138 = vmatpush1.bf16.msra.mxu1 %v18137_v63 }
0x1382   :  { %18108 = vmatprep.subr.bf16.mxu0 %v18107_v28  ;;  %18140 = vmatprep.subr.bf16.mxu1 %v18139_v12 }
0x1385   :  { %18110 = vmatpush1.bf16.msra.mxu0 %v18109_v52  ;;  %18142 = vmatpush1.bf16.msra.mxu1 %v18141_v9  ;;  %v10115_v9 = vld [vmem:[#allocation25 + $0x78] sm:$0xff] }
0x1386   :  { %18144 = vmatprep.subr.bf16.mxu0 %v22952_v4  ;;  %18176 = vmatprep.subr.bf16.mxu1 %v22954_v58  ;;  %v23715_v4 = vld [vmem:[#allocation71_spill] sm:$0xff]  ;;  %v10101_v58 = vld [vmem:[#allocation25 + $0x8] sm:$0xff] }
0x143b   :  { %v17519_v44 = vpop.f32.mrb[46].mxu0  ;;  %v17554_v10 = vpop.f32.mrb[46].mxu1 }
0x143c   :  { %v17520_v17 = vpop.f32.mrb[47].mxu0  ;;  %v17555_v60 = vpop.f32.mrb[47].mxu1 }
0x143d   :  { %v17521_v26 = vadd.f32 %v17520_v17, %v17519_v44  ;;  %v17556_v61 = vadd.f32 %v17555_v60, %v17554_v10  ;;  %v18209_v17 = vpack.c.bf16 %v10104_v37, %v10100_v14  ;;  %v18241_v60 = vpack.c.bf16 %v10106_v62, %v10102_v47  ;;  %v10134_v14 = vld [vmem:[#allocation25 + $0x110] sm:$0xff]  ;;  %v10145_v47 = vld [vmem:[#allocation25 + $0x168] sm:$0xff]  ;;  %v10143_v62 = vld [vmem:[#allocation25 + $0x158] sm:$0xff] }
0x143e   :  { %v10138_v37 = vld [vmem:[#allocation25 + $0x130] sm:$0xff] }
0x143f   :  { %v9702_v1 = vadd.f32 %v17556_v61, %v17521_v26  ;;  %v10108_v26 = vld [vmem:[#allocation25 + $0x40] sm:$0xff] }
0x1440   :  { %v10112_v61 = vld [vmem:[#allocation25 + $0x60] sm:$0xff] }
0x1441   :  { %9834 = vmatmul.mubr.f32.vlgmr.msra.gmra.mrb[64].mxu0 %v9702_v1  ;;  %9905 = vmatmul.mubr.f32.vlgmr.msra.gmra.mrb[64].mxu1 %v9702_v1 }
0x1442   :  { %18146 = vmatpush3.bf16.msra.mxu0 %v22956_v46  ;;  %18178 = vmatpush3.bf16.msra.mxu1 %v22958_v33  ;;  %v10105_v46 = vld [vmem:[#allocation25 + $0x28] sm:$0xff]  ;;  %v10103_v33 = vld [vmem:[#allocation25 + $0x18] sm:$0xff] }
0x1443   :  { %18148 = vmatprep.subr.bf16.mxu0 %v22964_v18  ;;  %18180 = vmatprep.subr.bf16.mxu1 %v22966_v41  ;;  %v18207_v18 = vpack.c.bf16 %v10105_v46, %v10101_v58  ;;  %v10107_v41 = vld [vmem:[#allocation25 + $0x38] sm:$0xff]  ;;  %v18211_v58 = vpack.c.bf16 %v10113_v16, %v10109_v57  ;;  %v18243_v46 = vpack.c.bf16 %v10115_v9, %v10111_v2  ;;  %v10144_v16 = vld [vmem:[#allocation25 + $0x160] sm:$0xff] }
0x1446   :  { %18150 = vmatpush3.bf16.msra.mxu0 %v22970_v21  ;;  %18182 = vmatpush3.bf16.msra.mxu1 %v22972_v29  ;;  %v18239_v21 = vpack.c.bf16 %v10107_v41, %v10103_v33  ;;  %v10110_v33 = vld [vmem:[#allocation25 + $0x50] sm:$0xff]  ;;  %v10117_v41 = vld [vmem:[#allocation25 + $0x88] sm:$0xff] }
0x1447   :  { %18152 = vmatprep.subr.bf16.mxu0 %v22976_v20  ;;  %18184 = vmatprep.subr.bf16.mxu1 %v22978_v6  ;;  %v23716_v6 = vld [vmem:[#allocation82_spill] sm:$0xff] }
0x144a   :  { %18154 = vmatpush3.bf16.msra.mxu0 %v22982_v22  ;;  %18186 = vmatpush3.bf16.msra.mxu1 %v22984_v56 }
0x144b   :  { %18156 = vmatprep.subr.bf16.mxu0 %v22988_v36  ;;  %18188 = vmatprep.subr.bf16.mxu1 %v22990_v13 }
0x144e   :  { %18158 = vmatpush3.bf16.msra.mxu0 %v22994_v23  ;;  %18190 = vmatpush3.bf16.msra.mxu1 %v22996_v24 }
0x144f   :  { %18160 = vmatprep.subr.bf16.mxu0 %v23000_v3  ;;  %18192 = vmatprep.subr.bf16.mxu1 %v23002_v11  ;;  %v23717_v3 = vld [vmem:[#allocation72_spill] sm:$0xff] }
0x1452   :  { %18162 = vmatpush3.bf16.msra.mxu0 %v23008_v0  ;;  %18194 = vmatpush3.bf16.msra.mxu1 %v23010_v49  ;;  %v23718_v0 = vld [vmem:[#allocation73_spill] sm:$0xff] }
0x1453   :  { %18164 = vmatprep.subr.bf16.mxu0 %v23014_v59  ;;  %18196 = vmatprep.subr.bf16.mxu1 %v23016_v27  ;;  %v23719_v59 = vld [vmem:[#allocation75_spill] sm:$0xff] }
0x1456   :  { %18166 = vmatpush3.bf16.msra.mxu0 %v23018_v25  ;;  %18198 = vmatpush3.bf16.msra.mxu1 %v23021_v34  ;;  %v23720_v25 = vld [vmem:[#allocation76_spill] sm:$0xff] }
0x1457   :  { %18168 = vmatprep.subr.bf16.mxu0 %v23026_v43  ;;  %18200 = vmatprep.subr.bf16.mxu1 %v23028_v19 }
0x145a   :  { %18170 = vmatpush3.bf16.msra.mxu0 %v23030_v38  ;;  %18202 = vmatpush3.bf16.msra.mxu1 %v23033_v50 }
0x145b   :  { %18172 = vmatprep.subr.bf16.mxu0 %v23037_v35  ;;  %18204 = vmatprep.subr.bf16.mxu1 %v23039_v30 }
0x145e   :  { %18174 = vmatpush3.bf16.msra.mxu0 %v23042_v32  ;;  %18206 = vmatpush3.bf16.msra.mxu1 %v23715_v4 }
0x145f   :  { %18208 = vmatprep.subr.bf16.mxu0 %v18207_v18  ;;  %18240 = vmatprep.subr.bf16.mxu1 %v18239_v21  ;;  %v10114_v18 = vld [vmem:[#allocation25 + $0x70] sm:$0xff]  ;;  %v10121_v21 = vld [vmem:[#allocation25 + $0xa8] sm:$0xff] }
0x1514   :  { %v9835_v29 = vpop.f32.mrb[64].mxu0  ;;  %v9906_v20 = vpop.f32.mrb[64].mxu1 }
0x1515   :  { %v9914_v22 = vrot.slane %v9835_v29, %v23716_v6  ;;  %v9922_v56 = vrot.slane %v9906_v20, %v23716_v6  ;;  %v9837_v36 = vpop.f32.mrb[65].mxu0  ;;  %v9908_v13 = vpop.f32.mrb[65].mxu1  ;;  %v10119_v29 = vld [vmem:[#allocation25 + $0x98] sm:$0xff] }
0x1516   :  { %v9918_v23 = vrot.slane %v9837_v36, %v23716_v6  ;;  %v9926_v24 = vrot.slane %v9908_v13, %v23716_v6  ;;  %v10123_v20 = vld [vmem:[#allocation25 + $0xb8] sm:$0xff]  ;;  %v10116_v36 = vld [vmem:[#allocation25 + $0x80] sm:$0xff] }
0x1517   :  { %v23105_v11 = vsub.f32 %v23717_v3, %v9914_v22  ;;  %v23108_v49 = vsub.f32 %v23718_v0, %v9922_v56  ;;  %v18213_v22 = vpack.c.bf16 %v10112_v61, %v10108_v26  ;;  %v18245_v56 = vpack.c.bf16 %v10114_v18, %v10110_v33  ;;  %v10120_v13 = vld [vmem:[#allocation25 + $0xa0] sm:$0xff]  ;;  %v10118_v3 = vld [vmem:[#allocation25 + $0x90] sm:$0xff]  ;;  %v10153_v26 = vld [vmem:[#allocation25 + $0x1a8] sm:$0xff] }
0x1518   :  { %v23111_v27 = vsub.f32 %v23719_v59, %v9918_v23  ;;  %v23114_v34 = vsub.f32 %v23720_v25, %v9926_v24  ;;  %v18215_v23 = vpack.c.bf16 %v10121_v21, %v10117_v41  ;;  %v18247_v24 = vpack.c.bf16 %v10123_v20, %v10119_v29  ;;  %v10122_v0 = vld [vmem:[#allocation25 + $0xb0] sm:$0xff]  ;;  %v10125_v59 = vld [vmem:[#allocation25 + $0xc8] sm:$0xff]  ;;  %v10151_v61 = vld [vmem:[#allocation25 + $0x198] sm:$0xff] }
0x1519   :  { %v9931_v43 = vmul.f32 %v23105_v11, %v23105_v11  ;;  %v9933_v19 = vmul.f32 %v23108_v49, %v23108_v49  ;;  %v10129_v25 = vld [vmem:[#allocation25 + $0xe8] sm:$0xff]  ;;  %v10152_v33 = vld [vmem:[#allocation25 + $0x1a0] sm:$0xff]  ;;  %v10150_v18 = vld [vmem:[#allocation25 + $0x190] sm:$0xff] }
0x151a   :  { %v9932_v38 = vmul.f32 %v23111_v27, %v23111_v27  ;;  %v9934_v50 = vmul.f32 %v23114_v34, %v23114_v34  ;;  %v10154_v21 = vld [vmem:[#allocation25 + $0x1b0] sm:$0xff]  ;;  %v10157_v29 = vld [vmem:[#allocation25 + $0x1c8] sm:$0xff] }
0x151b   :  { %v9935_v35 = vrot.slane %v9931_v43, 4  ;;  %v9947_v30 = vrot.slane %v9933_v19, 4  ;;  %v10161_v20 = vld [vmem:[#allocation25 + $0x1e8] sm:$0xff] }
0x151c   :  { %v9941_v32 = vrot.slane %v9932_v38, 4  ;;  %v9953_v7 = vrot.slane %v9934_v50, 4 }
0x151d   :  { %v9936_v53 = vadd.f32 %v9935_v35, %v9931_v43  ;;  %v9948_v48 = vadd.f32 %v9947_v30, %v9933_v19  ;;  %v10127_v43 = vld [vmem:[#allocation25 + $0xd8] sm:$0xff]  ;;  %v18219_v35 = vpack.c.bf16 %v10129_v25, %v10125_v59  ;;  %v10162_v59 = vld [vmem:[#allocation25 + $0x1f0] sm:$0xff] }
0x151e   :  { %v9942_v55 = vadd.f32 %v9941_v32, %v9932_v38  ;;  %v9954_v31 = vadd.f32 %v9953_v7, %v9934_v50  ;;  %v10131_v19 = vld [vmem:[#allocation25 + $0xf8] sm:$0xff]  ;;  %v18217_v38 = vpack.c.bf16 %v10120_v13, %v10116_v36  ;;  %v18249_v50 = vpack.c.bf16 %v10122_v0, %v10118_v3  ;;  %v10124_v32 = vld [vmem:[#allocation25 + $0xc0] sm:$0xff]  ;;  %v10158_v0 = vld [vmem:[#allocation25 + $0x1d0] sm:$0xff] }
0x151f   :  { %v9937_v15 = vrot.slane %v9936_v53, 2  ;;  %v9949_v45 = vrot.slane %v9948_v48, 2  ;;  %v18251_v30 = vpack.c.bf16 %v10131_v19, %v10127_v43  ;;  %v10128_v7 = vld [vmem:[#allocation25 + $0xe0] sm:$0xff]  ;;  %v10159_v36 = vld [vmem:[#allocation25 + $0x1d8] sm:$0xff]  ;;  %v18269_v43 = vpack.c.bf16 %v10162_v59, %v10158_v0 }
0x1520   :  { %v9943_v42 = vrot.slane %v9942_v55, 2  ;;  %v9955_v8 = vrot.slane %v9954_v31, 2  ;;  %v10163_v13 = vld [vmem:[#allocation25 + $0x1f8] sm:$0xff]  ;;  %v10160_v3 = vld [vmem:[#allocation25 + $0x1e0] sm:$0xff] }
0x1521   :  { %v9938_v51 = vadd.f32 %v9937_v15, %v9936_v53  ;;  %v9950_v54 = vadd.f32 %v9949_v45, %v9948_v48  ;;  %v10126_v53 = vld [vmem:[#allocation25 + $0xd0] sm:$0xff]  ;;  %v18221_v48 = vpack.c.bf16 %v10128_v7, %v10124_v32  ;;  %v10137_v15 = vld [vmem:[#allocation25 + $0x128] sm:$0xff]  ;;  %v10135_v45 = vld [vmem:[#allocation25 + $0x118] sm:$0xff] }
0x1522   :  { %v9944_v40 = vadd.f32 %v9943_v42, %v9942_v55  ;;  %v9956_v63 = vadd.f32 %v9955_v8, %v9954_v31  ;;  %v10130_v55 = vld [vmem:[#allocation25 + $0xf0] sm:$0xff]  ;;  %v10139_v8 = vld [vmem:[#allocation25 + $0x138] sm:$0xff] }
0x1523   :  { %v9939_v39 = vrot.slane %v9938_v51, 1  ;;  %v9951_v28 = vrot.slane %v9950_v54, 1  ;;  %v18253_v31 = vpack.c.bf16 %v10130_v55, %v10126_v53  ;;  %v23721_v55 = vmov 0   ;;  %v20299_v0 = vld [vmem:[#allocation29 + $0x44c] ss:$16 sps:$4 sm:$0xff]  }
0x1524   :  { %v9945_v12 = vrot.slane %v9944_v40, 1  ;;  %v9957_v52 = vrot.slane %v9956_v63, 1  ;;  %v20294_v59 = vld [vmem:[#allocation29 + $0x440] ss:$16 sps:$4 sm:$0xff]  }
0x1525   :  { %v9940_v1 = vadd.f32 %v9939_v39, %v9938_v51  ;;  %v9952_v4 = vadd.f32 %v9951_v28, %v9950_v54  ;;  %v10132_v51 = vld [vmem:[#allocation25 + $0x100] sm:$0xff]  ;;  %v18257_v39 = vpack.c.bf16 %v10138_v37, %v10134_v14  ;;  %v10141_v28 = vld [vmem:[#allocation25 + $0x148] sm:$0xff] }
0x1526   :  { %v9946_v44 = vadd.f32 %v9945_v12, %v9944_v40  ;;  %v9958_v10 = vadd.f32 %v9957_v52, %v9956_v63  ;;  %v10136_v54 = vld [vmem:[#allocation25 + $0x120] sm:$0xff]  ;;  %v18255_v40 = vpack.c.bf16 %v10139_v8, %v10135_v45  ;;  %v18227_v57 = vpack.c.bf16 %v10145_v47, %v10141_v28  ;;  %v10147_v12 = vld [vmem:[#allocation25 + $0x178] sm:$0xff] }
0x1527   :  { %v18225_v63 = vpack.c.bf16 %v10136_v54, %v10132_v51  ;;  %v10140_v52 = vld [vmem:[#allocation25 + $0x140] sm:$0xff]  ;;  %v18259_v2 = vpack.c.bf16 %v10147_v12, %v10143_v62  ;;  %v23722_v51 = vld [vmem:[#allocation74_spill] sm:$0xff] }
0x1528   :  { %10023 = vmatprep.mubr.f32.mxu0 %v9946_v44  ;;  %10093 = vmatprep.mubr.f32.mxu1 %v9958_v10  ;;  %v18229_v9 = vpack.c.bf16 %v10144_v16, %v10140_v52  ;;  %v10142_v44 = vld [vmem:[#allocation25 + $0x150] sm:$0xff]  ;;  %v23723_v37 = vld [vmem:[#allocation77_spill] sm:$0xff]  ;;  %v23724_v47 = vld [vmem:[#allocation80_spill] sm:$0xff] }
0x1529   :  { %10024 = vmatmul.mubr.f32.vlgmr.msra.gmra.mrb[66].mxu0 %v9940_v1  ;;  %10094 = vmatmul.mubr.f32.vlgmr.msra.gmra.mrb[66].mxu1 %v9952_v4  ;;  %v10146_v10 = vld [vmem:[#allocation25 + $0x170] sm:$0xff]  ;;  %v10155_v1 = vld [vmem:[#allocation25 + $0x1b8] sm:$0xff] }
0x152a   :  { %18210 = vmatpush1.bf16.msra.mxu0 %v18209_v17  ;;  %18242 = vmatpush1.bf16.msra.mxu1 %v18241_v60  ;;  %v10149_v17 = vld [vmem:[#allocation25 + $0x188] sm:$0xff]  ;;  %v18261_v60 = vpack.c.bf16 %v10146_v10, %v10142_v44 }
0x152b   :  { %18212 = vmatprep.subr.bf16.mxu0 %v18211_v58  ;;  %18244 = vmatprep.subr.bf16.mxu1 %v18243_v46  ;;  %v18231_v4 = vpack.c.bf16 %v10153_v26, %v10149_v17  ;;  %v18263_v58 = vpack.c.bf16 %v10155_v1, %v10151_v61  ;;  %v10148_v46 = vld [vmem:[#allocation25 + $0x180] sm:$0xff] }
0x152c   :  { %10228 = vmatprep.mubr.f32.mxu0 %v23696_v5  ;;  %10299 = vmatprep.mubr.f32.mxu1 %v23696_v5  ;;  %v10133_v5 = vld [vmem:[#allocation25 + $0x108] sm:$0xff]  ;;  %v18233_v41 = vpack.c.bf16 %v10152_v33, %v10148_v46 }
0x152d   :  { %v18223_v42 = vpack.c.bf16 %v10137_v15, %v10133_v5 }
0x152e   :  { %18214 = vmatpush1.bf16.msra.mxu0 %v18213_v22  ;;  %18246 = vmatpush1.bf16.msra.mxu1 %v18245_v56  ;;  %v18265_v22 = vpack.c.bf16 %v10154_v21, %v10150_v18  ;;  %v18235_v56 = vpack.c.bf16 %v10161_v20, %v10157_v29  ;;  %v20284_v21 = vld [vmem:[#allocation29 + $0x404] ss:$16 sps:$4 sm:$0xff]   ;;  %v20287_v29 = vld [vmem:[#allocation29 + $0x40c] ss:$16 sps:$4 sm:$0xff]  }
0x152f   :  { %18216 = vmatprep.subr.bf16.mxu0 %v18215_v23  ;;  %18248 = vmatprep.subr.bf16.mxu1 %v18247_v24  ;;  %v10156_v23 = vld [vmem:[#allocation25 + $0x1c0] sm:$0xff]  ;;  %v18267_v24 = vpack.c.bf16 %v10163_v13, %v10159_v36 }
0x1530   :  { %v18237_v25 = vpack.c.bf16 %v10160_v3, %v10156_v23  ;;  %v10601_v20 = vld [vmem:[#allocation28 + $0x2] sm:$0x3]  ;;  %v20290_v36 = vld [vmem:[#allocation29 + $0x424] ss:$16 sps:$4 sm:$0xff]   ;;  %v20288_v23 = vld [vmem:[#allocation29 + $0x420] ss:$16 sps:$4 sm:$0xff]  }
0x1531   :  { %v20293_v13 = vld [vmem:[#allocation29 + $0x42c] ss:$16 sps:$4 sm:$0xff]   ;;  %v20296_v3 = vld [vmem:[#allocation29 + $0x444] ss:$16 sps:$4 sm:$0xff]  }
0x1532   :  { %18218 = vmatpush1.bf16.msra.mxu0 %v18217_v38  ;;  %18250 = vmatpush1.bf16.msra.mxu1 %v18249_v50 }
0x1533   :  { %18220 = vmatprep.subr.bf16.mxu0 %v18219_v35  ;;  %18252 = vmatprep.subr.bf16.mxu1 %v18251_v30 }
0x1536   :  { %18222 = vmatpush1.bf16.msra.mxu0 %v18221_v48  ;;  %18254 = vmatpush1.bf16.msra.mxu1 %v18253_v31  ;;  %v10326_v31 = vld [vmem:[#allocation26] sm:$0xf] }
0x1537   :  { %18224 = vmatprep.subr.bf16.mxu0 %v18223_v42  ;;  %18256 = vmatprep.subr.bf16.mxu1 %v18255_v40  ;;  %v10331_v42 = vrot.slane %v10326_v31, %v23716_v6  ;;  %v10339_v54 = vrot.slane %v10326_v31, %v23722_v51  ;;  %v10343_v62 = vrot.slane %v10326_v31, %v23724_v47  ;;  %v13870_v47 = vld [vmem:[#allocation32 + $0x3a0] sm:$0xff] }
0x153a   :  { %18226 = vmatpush1.bf16.msra.mxu0 %v18225_v63  ;;  %18258 = vmatpush1.bf16.msra.mxu1 %v18257_v39  ;;  %v10335_v39 = vrot.slane %v10326_v31, %v23723_v37  ;;  %v20312_v31 = vld [vmem:[#allocation29 + $0x4a0] ss:$16 sps:$4 sm:$0xff]   ;;  %v13875_v37 = vld [vmem:[#allocation32 + $0x3c8] sm:$0xff] }
0x153b   :  { %18228 = vmatprep.subr.bf16.mxu0 %v18227_v57  ;;  %18260 = vmatprep.subr.bf16.mxu1 %v18259_v2 }
0x153e   :  { %18230 = vmatpush1.bf16.msra.mxu0 %v18229_v9  ;;  %18262 = vmatpush1.bf16.msra.mxu1 %v18261_v60 }
0x153f   :  { %18232 = vmatprep.subr.bf16.mxu0 %v18231_v4  ;;  %18264 = vmatprep.subr.bf16.mxu1 %v18263_v58 }
0x1542   :  { %18234 = vmatpush1.bf16.msra.mxu0 %v18233_v41  ;;  %18266 = vmatpush1.bf16.msra.mxu1 %v18265_v22  ;;  %v10368_v41 = vld [vmem:[#allocation28] sm:$0x3]  ;;  %v20282_v22 = vld [vmem:[#allocation29 + $0x400] ss:$16 sps:$4 sm:$0xff]  }
0x1543   :  { %18236 = vmatprep.subr.bf16.mxu0 %v18235_v56  ;;  %18268 = vmatprep.subr.bf16.mxu1 %v18267_v24  ;;  %v20285_v56 = vld [vmem:[#allocation29 + $0x408] ss:$16 sps:$4 sm:$0xff]  }
0x1544   :  { %v20291_v24 = vld [vmem:[#allocation29 + $0x428] ss:$16 sps:$4 sm:$0xff]  }
0x1546   :  { %18238 = vmatpush1.bf16.msra.mxu0 %v18237_v25  ;;  %18270 = vmatpush1.bf16.msra.mxu1 %v18269_v43  ;;  %v20297_v25 = vld [vmem:[#allocation29 + $0x448] ss:$16 sps:$4 sm:$0xff]   ;;  %v20302_v43 = vld [vmem:[#allocation29 + $0x464] ss:$16 sps:$4 sm:$0xff]  }
0x15fc   :  { %v17589_v19 = vpop.f32.mrb[66].mxu0  ;;  %v17624_v38 = vpop.f32.mrb[66].mxu1 }
0x15fd   :  { %v17590_v50 = vpop.f32.mrb[67].mxu0  ;;  %v17625_v35 = vpop.f32.mrb[67].mxu1 }
0x15fe   :  { %v17591_v30 = vadd.f32 %v17590_v50, %v17589_v19  ;;  %v17626_v32 = vadd.f32 %v17625_v35, %v17624_v38  ;;  %v20305_v19 = vld [vmem:[#allocation29 + $0x46c] ss:$16 sps:$4 sm:$0xff]   ;;  %v20300_v38 = vld [vmem:[#allocation29 + $0x460] ss:$16 sps:$4 sm:$0xff]   ;;  %v20303_v50 = vld [vmem:[#allocation29 + $0x468] ss:$16 sps:$4 sm:$0xff]  }
0x15ff   :  { %v20308_v35 = vld [vmem:[#allocation29 + $0x484] ss:$16 sps:$4 sm:$0xff]  }
0x1600   :  { %v10026_v7 = vadd.f32 1e-05, %v17591_v30  ;;  %v20311_v30 = vld [vmem:[#allocation29 + $0x48c] ss:$16 sps:$4 sm:$0xff]  }
0x1602   :  { %v10096_v53 = vadd.f32 %v17626_v32, %v10026_v7  ;;  %v20306_v32 = vld [vmem:[#allocation29 + $0x480] ss:$16 sps:$4 sm:$0xff]   ;;  %v20309_v7 = vld [vmem:[#allocation29 + $0x488] ss:$16 sps:$4 sm:$0xff]  }
0x1604   :  { %21054 = vrsqrt.f32 %v10096_v53  ;;  %v20314_v53 = vld [vmem:[#allocation29 + $0x4a4] ss:$16 sps:$4 sm:$0xff]  }
0x160e   :  { %v21055_v48 = vpop.eup %21054 }
0x160f   :  { %10229 = vmatmul.mubr.f32.vlgmr.msra.gmra.mrb[68].mxu0 %v21055_v48  ;;  %10300 = vmatmul.mubr.f32.vlgmr.msra.gmra.mrb[68].mxu1 %v21055_v48  ;;  %v20317_v48 = vld [vmem:[#allocation29 + $0x4ac] ss:$16 sps:$4 sm:$0xff]  }
0x1610   :  { %10418 = vmatprep.mubr.bf16.mxu0 %v23721_v55  ;;  %10459 = vmatprep.mubr.bf16.mxu1 %v23721_v55 }
0x16e2   :  { %v10230_v5 = vpop.f32.mrb[68].mxu0  ;;  %v10301_v15 = vpop.f32.mrb[68].mxu1 }
0x16e3   :  { %v10309_v45 = vrot.slane %v10230_v5, %v23716_v6  ;;  %v10317_v8 = vrot.slane %v10301_v15, %v23716_v6  ;;  %v10232_v40 = vpop.f32.mrb[69].mxu0  ;;  %v10303_v63 = vpop.f32.mrb[69].mxu1  ;;  %v20315_v5 = vld [vmem:[#allocation29 + $0x4a8] ss:$16 sps:$4 sm:$0xff]   ;;  %v20320_v15 = vld [vmem:[#allocation29 + $0x4c4] ss:$16 sps:$4 sm:$0xff]  }
0x16e4   :  { %v10313_v14 = vrot.slane %v10232_v40, %v23716_v6  ;;  %v10321_v28 = vrot.slane %v10303_v63, %v23716_v6  ;;  %v20329_v40 = vld [vmem:[#allocation29 + $0x4ec] ss:$16 sps:$4 sm:$0xff]   ;;  %v20324_v63 = vld [vmem:[#allocation29 + $0x4e0] ss:$16 sps:$4 sm:$0xff]  }
0x16e5   :  { %v10322_v57 = vmul.f32 %v10309_v45, %v23105_v11  ;;  %v10324_v12 = vmul.f32 %v10317_v8, %v23108_v49  ;;  %v20323_v45 = vld [vmem:[#allocation29 + $0x4cc] ss:$16 sps:$4 sm:$0xff]   ;;  %v20321_v8 = vld [vmem:[#allocation29 + $0x4c8] ss:$16 sps:$4 sm:$0xff]  }
0x16e6   :  { %v10323_v52 = vmul.f32 %v10313_v14, %v23111_v27  ;;  %v10325_v16 = vmul.f32 %v10321_v28, %v23114_v34  ;;  %v20327_v14 = vld [vmem:[#allocation29 + $0x4e8] ss:$16 sps:$4 sm:$0xff]   ;;  %v20335_v28 = vld [vmem:[#allocation29 + $0x50c] ss:$16 sps:$4 sm:$0xff]  }
0x16e7   :  { %v10348_v2 = vadd.f32 %v10331_v42, %v10322_v57  ;;  %v10350_v9 = vadd.f32 %v10339_v54, %v10324_v12  ;;  %v20318_v42 = vld [vmem:[#allocation29 + $0x4c0] ss:$16 sps:$4 sm:$0xff]   ;;  %v20326_v54 = vld [vmem:[#allocation29 + $0x4e4] ss:$16 sps:$4 sm:$0xff]   ;;  %v20333_v57 = vld [vmem:[#allocation29 + $0x508] ss:$16 sps:$4 sm:$0xff]  }
0x16e8   :  { %v10349_v44 = vadd.f32 %v10335_v39, %v10323_v52  ;;  %v10351_v10 = vadd.f32 %v10343_v62, %v10325_v16  ;;  %v20332_v39 = vld [vmem:[#allocation29 + $0x504] ss:$16 sps:$4 sm:$0xff]   ;;  %v20330_v62 = vld [vmem:[#allocation29 + $0x500] ss:$16 sps:$4 sm:$0xff]   ;;  %v20341_v52 = vld [vmem:[#allocation29 + $0x52c] ss:$16 sps:$4 sm:$0xff]  }
0x16e9   :  { %v10356_v17 = vmul.f32 0.01, %v10348_v2  ;;  %v10358_v60 = vmul.f32 0.01, %v10350_v9  ;;  %vm10352_vm12 = vcmp.gt.f32.partialorder %v10348_v2, 0.0  ;;  %vm10354_vm13 = vcmp.gt.f32.partialorder %v10350_v9, 0.0 }
0x16ea   :  { %vm10353_vm14 = vcmp.gt.f32.partialorder %v10349_v44, 0.0  ;;  %v10357_v26 = vmul.f32 0.01, %v10349_v44  ;;  %vm10355_vm15 = vcmp.gt.f32.partialorder %v10351_v10, 0.0  ;;  %v10359_v61 = vmul.f32 0.01, %v10351_v10 }
0x16eb   :  { %v10360_v11 = vsel %vm10352_vm12, %v10348_v2, %v10356_v17  ;;  %v10362_v1 = vsel %vm10354_vm13, %v10350_v9, %v10358_v60  ;;  %v20338_v12 = vld [vmem:[#allocation29 + $0x524] ss:$16 sps:$4 sm:$0xff]   ;;  %v20336_v16 = vld [vmem:[#allocation29 + $0x520] ss:$16 sps:$4 sm:$0xff]   ;;  %v20339_v2 = vld [vmem:[#allocation29 + $0x528] ss:$16 sps:$4 sm:$0xff]  }
0x16ec   :  { %v10361_v49 = vsel %vm10353_vm14, %v10349_v44, %v10357_v26  ;;  %v10363_v4 = vsel %vm10355_vm15, %v10351_v10, %v10359_v61  ;;  %v10364_v27 = vpack.c.bf16 %v10360_v11, %v10360_v11  ;;  %v10366_v58 = vpack.c.bf16 %v10362_v1, %v10362_v1  ;;  %v20344_v9 = vld [vmem:[#allocation29 + $0x544] ss:$16 sps:$4 sm:$0xff]   ;;  %v20347_v44 = vld [vmem:[#allocation29 + $0x54c] ss:$16 sps:$4 sm:$0xff]   ;;  %v20342_v10 = vld [vmem:[#allocation29 + $0x540] ss:$16 sps:$4 sm:$0xff]  }
0x16ed   :  { %v23140_v34 = vpack.c.bf16 %v10361_v49, %v10361_v49  ;;  %v23142_v46 = vpack.c.bf16 %v10363_v4, %v10363_v4  ;;  %v20345_v17 = vld [vmem:[#allocation29 + $0x548] ss:$16 sps:$4 sm:$0xff]   ;;  %v20350_v60 = vld [vmem:[#allocation29 + $0x564] ss:$16 sps:$4 sm:$0xff]   ;;  %v20353_v26 = vld [vmem:[#allocation29 + $0x56c] ss:$16 sps:$4 sm:$0xff]  }
0x16ee   :  { %v23145_v33 = vsel %vm10373_vm1, %v10364_v27, 0  ;;  %v23148_v18 = vsel %vm10373_vm1, %v10366_v58, 0  ;;  %v20348_v61 = vld [vmem:[#allocation29 + $0x560] ss:$16 sps:$4 sm:$0xff]   ;;  %v20351_v11 = vld [vmem:[#allocation29 + $0x568] ss:$16 sps:$4 sm:$0xff]  }
0x16ef   :  { %16657 = vmatprep.subr.msk.bf16.mxu0 %vm10373_vm1, %v23140_v34  ;;  %16659 = vmatprep.subr.msk.bf16.mxu1 %vm10373_vm1, %v23142_v46  ;;  %v20356_v1 = vld [vmem:[#allocation29 + $0x584] ss:$16 sps:$4 sm:$0xff]   ;;  %v20359_v49 = vld [vmem:[#allocation29 + $0x58c] ss:$16 sps:$4 sm:$0xff]   ;;  %v20354_v4 = vld [vmem:[#allocation29 + $0x580] ss:$16 sps:$4 sm:$0xff]  }
0x16f0   :  { %10387 = vmatpush1.bf16.msra.mxu0 %v23145_v33  ;;  %10428 = vmatpush1.bf16.msra.mxu1 %v23148_v18  ;;  %v20357_v27 = vld [vmem:[#allocation29 + $0x588] ss:$16 sps:$4 sm:$0xff]   ;;  %v20360_v58 = vld [vmem:[#allocation29 + $0x5a0] ss:$16 sps:$4 sm:$0xff]  }
0x16f1   :  { %16661 = vmatprep.subr.msk.bf16.mxu0 %vm10373_vm1, %v23140_v34  ;;  %16663 = vmatprep.subr.msk.bf16.mxu1 %vm10373_vm1, %v23142_v46 }
0x16f3   :  { %16658 = vmatmul.mubr.msk.bf16.vlgmr.msra.gmra.mrb[72].mxu0 %vm10369_vm3, %v10368_v41  ;;  %16660 = vmatmul.mubr.msk.bf16.vlgmr.msra.gmra.mrb[72].mxu1 %vm10369_vm3, %v10368_v41  ;;  %v20362_v41 = vld [vmem:[#allocation29 + $0x5a4] ss:$16 sps:$4 sm:$0xff]  }
0x16f4   :  { %10606 = vmatpush1.bf16.msra.mxu0 %v23145_v33  ;;  %10647 = vmatpush1.bf16.msra.mxu1 %v23148_v18 }
0x16f5   :  { %10637 = vmatprep.mubr.bf16.mxu0 %v23721_v55  ;;  %10678 = vmatprep.mubr.bf16.mxu1 %v23721_v55 }
0x16f6   :  { %11460 = vmatprep.subr.bf16.mxu0 %v20284_v21  ;;  %11542 = vmatprep.subr.bf16.mxu1 %v20287_v29  ;;  %v20363_v21 = vld [vmem:[#allocation29 + $0x5a8] ss:$16 sps:$4 sm:$0xff]   ;;  %v20365_v29 = vld [vmem:[#allocation29 + $0x5ac] ss:$16 sps:$4 sm:$0xff]  }
0x16fb   :  { %16662 = vmatmul.mubr.msk.bf16.vlgmr.msra.gmra.mrb[76].mxu0 %vm10369_vm3, %v10601_v20  ;;  %16664 = vmatmul.mubr.msk.bf16.vlgmr.msra.gmra.mrb[76].mxu1 %vm10369_vm3, %v10601_v20  ;;  %v20368_v20 = vld [vmem:[#allocation29 + $0x5c4] ss:$16 sps:$4 sm:$0xff]  }
0x16fc   :  { %11461 = vmatpush1.bf16.msra.mxu0 %v20282_v22  ;;  %11543 = vmatpush1.bf16.msra.mxu1 %v20285_v56  ;;  %v20366_v22 = vld [vmem:[#allocation29 + $0x5c0] ss:$16 sps:$4 sm:$0xff]   ;;  %v20371_v56 = vld [vmem:[#allocation29 + $0x5cc] ss:$16 sps:$4 sm:$0xff]  }
0x16fd   :  { %11462 = vmatprep.subr.bf16.mxu0 %v20290_v36  ;;  %11544 = vmatprep.subr.bf16.mxu1 %v20293_v13  ;;  %v20369_v36 = vld [vmem:[#allocation29 + $0x5c8] ss:$16 sps:$4 sm:$0xff]   ;;  %v20372_v13 = vld [vmem:[#allocation29 + $0x5e0] ss:$16 sps:$4 sm:$0xff]  }
0x1700   :  { %11463 = vmatpush1.bf16.msra.mxu0 %v20288_v23  ;;  %11545 = vmatpush1.bf16.msra.mxu1 %v20291_v24  ;;  %v20374_v23 = vld [vmem:[#allocation29 + $0x5e4] ss:$16 sps:$4 sm:$0xff]   ;;  %v20375_v24 = vld [vmem:[#allocation29 + $0x5e8] ss:$16 sps:$4 sm:$0xff]  }
0x1701   :  { %11464 = vmatprep.subr.bf16.mxu0 %v20296_v3  ;;  %11546 = vmatprep.subr.bf16.mxu1 %v20299_v0  ;;  %v20377_v3 = vld [vmem:[#allocation29 + $0x5ec] ss:$16 sps:$4 sm:$0xff]   ;;  %v20380_v0 = vld [vmem:[#allocation29 + $0x604] ss:$16 sps:$4 sm:$0xff]  }
0x1704   :  { %11465 = vmatpush1.bf16.msra.mxu0 %v20294_v59  ;;  %11547 = vmatpush1.bf16.msra.mxu1 %v20297_v25  ;;  %v20383_v59 = vld [vmem:[#allocation29 + $0x60c] ss:$16 sps:$4 sm:$0xff]  }
0x1705   :  { %11466 = vmatprep.subr.bf16.mxu0 %v20302_v43  ;;  %11548 = vmatprep.subr.bf16.mxu1 %v20305_v19 }
0x1708   :  { %11467 = vmatpush1.bf16.msra.mxu0 %v20300_v38  ;;  %11549 = vmatpush1.bf16.msra.mxu1 %v20303_v50 }
0x1709   :  { %11468 = vmatprep.subr.bf16.mxu0 %v20308_v35  ;;  %11550 = vmatprep.subr.bf16.mxu1 %v20311_v30 }
0x170c   :  { %11469 = vmatpush1.bf16.msra.mxu0 %v20306_v32  ;;  %11551 = vmatpush1.bf16.msra.mxu1 %v20309_v7 }
0x170d   :  { %11470 = vmatprep.subr.bf16.mxu0 %v20314_v53  ;;  %11552 = vmatprep.subr.bf16.mxu1 %v20317_v48 }
0x1710   :  { %11471 = vmatpush1.bf16.msra.mxu0 %v20312_v31  ;;  %11553 = vmatpush1.bf16.msra.mxu1 %v20315_v5 }
0x1711   :  { %11472 = vmatprep.subr.bf16.mxu0 %v20320_v15  ;;  %11554 = vmatprep.subr.bf16.mxu1 %v20323_v45  ;;  %v20378_v45 = vld [vmem:[#allocation29 + $0x600] ss:$16 sps:$4 sm:$0xff]  }
0x1714   :  { %11473 = vmatpush1.bf16.msra.mxu0 %v20318_v42  ;;  %11555 = vmatpush1.bf16.msra.mxu1 %v20321_v8  ;;  %v20381_v42 = vld [vmem:[#allocation29 + $0x608] ss:$16 sps:$4 sm:$0xff]  }
0x1715   :  { %11474 = vmatprep.subr.bf16.mxu0 %v20326_v54  ;;  %11556 = vmatprep.subr.bf16.mxu1 %v20329_v40 }
0x1718   :  { %11475 = vmatpush1.bf16.msra.mxu0 %v20324_v63  ;;  %11557 = vmatpush1.bf16.msra.mxu1 %v20327_v14  ;;  %v20386_v63 = vld [vmem:[#allocation29 + $0x624] ss:$16 sps:$4 sm:$0xff]   ;;  %v20389_v14 = vld [vmem:[#allocation29 + $0x62c] ss:$16 sps:$4 sm:$0xff]  }
0x1719   :  { %11476 = vmatprep.subr.bf16.mxu0 %v20332_v39  ;;  %11558 = vmatprep.subr.bf16.mxu1 %v20335_v28 }
0x171c   :  { %11477 = vmatpush1.bf16.msra.mxu0 %v20330_v62  ;;  %11559 = vmatpush1.bf16.msra.mxu1 %v20333_v57  ;;  %v20384_v62 = vld [vmem:[#allocation29 + $0x620] ss:$16 sps:$4 sm:$0xff]   ;;  %v20387_v57 = vld [vmem:[#allocation29 + $0x628] ss:$16 sps:$4 sm:$0xff]  }
0x171d   :  { %11478 = vmatprep.subr.bf16.mxu0 %v20338_v12  ;;  %11560 = vmatprep.subr.bf16.mxu1 %v20341_v52  ;;  %v20392_v12 = vld [vmem:[#allocation29 + $0x644] ss:$16 sps:$4 sm:$0xff]   ;;  %v20395_v52 = vld [vmem:[#allocation29 + $0x64c] ss:$16 sps:$4 sm:$0xff]  }
0x1720   :  { %11479 = vmatpush1.bf16.msra.mxu0 %v20336_v16  ;;  %11561 = vmatpush1.bf16.msra.mxu1 %v20339_v2  ;;  %v20390_v16 = vld [vmem:[#allocation29 + $0x640] ss:$16 sps:$4 sm:$0xff]   ;;  %v20393_v2 = vld [vmem:[#allocation29 + $0x648] ss:$16 sps:$4 sm:$0xff]  }
0x1721   :  { %11480 = vmatprep.subr.bf16.mxu0 %v20344_v9  ;;  %11562 = vmatprep.subr.bf16.mxu1 %v20347_v44  ;;  %v20398_v9 = vld [vmem:[#allocation29 + $0x664] ss:$16 sps:$4 sm:$0xff]   ;;  %v20401_v44 = vld [vmem:[#allocation29 + $0x66c] ss:$16 sps:$4 sm:$0xff]  }
0x1724   :  { %11481 = vmatpush1.bf16.msra.mxu0 %v20342_v10  ;;  %11563 = vmatpush1.bf16.msra.mxu1 %v20345_v17  ;;  %v20396_v10 = vld [vmem:[#allocation29 + $0x660] ss:$16 sps:$4 sm:$0xff]   ;;  %v20399_v17 = vld [vmem:[#allocation29 + $0x668] ss:$16 sps:$4 sm:$0xff]  }
0x1725   :  { %11482 = vmatprep.subr.bf16.mxu0 %v20350_v60  ;;  %11564 = vmatprep.subr.bf16.mxu1 %v20353_v26  ;;  %v20404_v60 = vld [vmem:[#allocation29 + $0x684] ss:$16 sps:$4 sm:$0xff]   ;;  %v20407_v26 = vld [vmem:[#allocation29 + $0x68c] ss:$16 sps:$4 sm:$0xff]  }
0x1728   :  { %11483 = vmatpush1.bf16.msra.mxu0 %v20348_v61  ;;  %11565 = vmatpush1.bf16.msra.mxu1 %v20351_v11  ;;  %v20402_v61 = vld [vmem:[#allocation29 + $0x680] ss:$16 sps:$4 sm:$0xff]   ;;  %v20405_v11 = vld [vmem:[#allocation29 + $0x688] ss:$16 sps:$4 sm:$0xff]  }
0x1729   :  { %11484 = vmatprep.subr.bf16.mxu0 %v20356_v1  ;;  %11566 = vmatprep.subr.bf16.mxu1 %v20359_v49  ;;  %v20410_v1 = vld [vmem:[#allocation29 + $0x6a4] ss:$16 sps:$4 sm:$0xff]   ;;  %v20413_v49 = vld [vmem:[#allocation29 + $0x6ac] ss:$16 sps:$4 sm:$0xff]  }
0x172c   :  { %11485 = vmatpush1.bf16.msra.mxu0 %v20354_v4  ;;  %11567 = vmatpush1.bf16.msra.mxu1 %v20357_v27  ;;  %v20408_v4 = vld [vmem:[#allocation29 + $0x6a0] ss:$16 sps:$4 sm:$0xff]   ;;  %v20411_v27 = vld [vmem:[#allocation29 + $0x6a8] ss:$16 sps:$4 sm:$0xff]  }
0x172d   :  { %11486 = vmatprep.subr.bf16.mxu0 %v20362_v41  ;;  %11568 = vmatprep.subr.bf16.mxu1 %v20365_v29  ;;  %v20419_v41 = vld [vmem:[#allocation29 + $0x6cc] ss:$16 sps:$4 sm:$0xff]   ;;  %v20417_v29 = vld [vmem:[#allocation29 + $0x6c8] ss:$16 sps:$4 sm:$0xff]  }
0x1730   :  { %11487 = vmatpush1.bf16.msra.mxu0 %v20360_v58  ;;  %11569 = vmatpush1.bf16.msra.mxu1 %v20363_v21  ;;  %v20416_v58 = vld [vmem:[#allocation29 + $0x6c4] ss:$16 sps:$4 sm:$0xff]   ;;  %v20414_v21 = vld [vmem:[#allocation29 + $0x6c0] ss:$16 sps:$4 sm:$0xff]  }
0x1731   :  { %11488 = vmatprep.subr.bf16.mxu0 %v20368_v20  ;;  %11570 = vmatprep.subr.bf16.mxu1 %v20371_v56  ;;  %v20422_v20 = vld [vmem:[#allocation29 + $0x6e4] ss:$16 sps:$4 sm:$0xff]   ;;  %v20420_v56 = vld [vmem:[#allocation29 + $0x6e0] ss:$16 sps:$4 sm:$0xff]  }
0x1734   :  { %11489 = vmatpush1.bf16.msra.mxu0 %v20366_v22  ;;  %11571 = vmatpush1.bf16.msra.mxu1 %v20369_v36  ;;  %v20425_v22 = vld [vmem:[#allocation29 + $0x6ec] ss:$16 sps:$4 sm:$0xff]   ;;  %v20423_v36 = vld [vmem:[#allocation29 + $0x6e8] ss:$16 sps:$4 sm:$0xff]  }
0x1735   :  { %11490 = vmatprep.subr.bf16.mxu0 %v20374_v23  ;;  %11572 = vmatprep.subr.bf16.mxu1 %v20377_v3  ;;  %v20431_v23 = vld [vmem:[#allocation29 + $0x70c] ss:$16 sps:$4 sm:$0xff]   ;;  %v20429_v3 = vld [vmem:[#allocation29 + $0x708] ss:$16 sps:$4 sm:$0xff]  }
0x1738   :  { %11491 = vmatpush1.bf16.msra.mxu0 %v20372_v13  ;;  %11573 = vmatpush1.bf16.msra.mxu1 %v20375_v24  ;;  %v20428_v13 = vld [vmem:[#allocation29 + $0x704] ss:$16 sps:$4 sm:$0xff]   ;;  %v20426_v24 = vld [vmem:[#allocation29 + $0x700] ss:$16 sps:$4 sm:$0xff]  }
0x1739   :  { %11501 = vmatprep.subr.bf16.mxu0 %v20380_v0  ;;  %11583 = vmatprep.subr.bf16.mxu1 %v20383_v59  ;;  %v20434_v0 = vld [vmem:[#allocation29 + $0x724] ss:$16 sps:$4 sm:$0xff]   ;;  %v20437_v59 = vld [vmem:[#allocation29 + $0x72c] ss:$16 sps:$4 sm:$0xff]  }
0x17c6   :  { %v23168_v25 = vpop.f32.mrb[72].mxu0  ;;  %v23170_v43 = vpop.f32.mrb[72].mxu1 }
0x17c7   :  { %v23172_v19 = vpop.f32.mrb[73].mxu0  ;;  %v23174_v38 = vpop.f32.mrb[73].mxu1 }
0x17c8   :  { %v10424_v50 = vpop.f32.mrb[74].mxu0  ;;  %v10465_v35 = vpop.f32.mrb[74].mxu1 }
0x17c9   :  { %v10425_v30 = vpop.f32.mrb[75].mxu0  ;;  %v10466_v32 = vpop.f32.mrb[75].mxu1  ;;  %v20432_v50 = vld [vmem:[#allocation29 + $0x720] ss:$16 sps:$4 sm:$0xff]   ;;  %v20435_v35 = vld [vmem:[#allocation29 + $0x728] ss:$16 sps:$4 sm:$0xff]  }
0x17ca   :  { %v20440_v30 = vld [vmem:[#allocation29 + $0x744] ss:$16 sps:$4 sm:$0xff]   ;;  %v20443_v32 = vld [vmem:[#allocation29 + $0x74c] ss:$16 sps:$4 sm:$0xff]  }
0x17ce   :  { %v10639_v7 = vpop.f32.mrb[76].mxu0  ;;  %v23176_v53 = vpop.f32.mrb[76].mxu1 }
0x17cf   :  { %v10641_v48 = vpop.f32.mrb[77].mxu0  ;;  %v10682_v31 = vpop.f32.mrb[77].mxu1  ;;  %v10687_v54 = vpack.c.bf16 %v10639_v7, %v10639_v7  ;;  %v20438_v7 = vld [vmem:[#allocation29 + $0x740] ss:$16 sps:$4 sm:$0xff]  }
0x17d0   :  { %v10688_v5 = vpack.c.bf16 %v10641_v48, %v10641_v48  ;;  %v10643_v15 = vpop.f32.mrb[78].mxu0  ;;  %v10684_v8 = vpop.f32.mrb[78].mxu1  ;;  %v10690_v28 = vpack.c.bf16 %v10682_v31, %v10682_v31  ;;  %v20441_v48 = vld [vmem:[#allocation29 + $0x748] ss:$16 sps:$4 sm:$0xff]   ;;  %v20446_v31 = vld [vmem:[#allocation29 + $0x764] ss:$16 sps:$4 sm:$0xff]  }
0x17d1   :  { %v10644_v40 = vpop.f32.mrb[79].mxu0  ;;  %v10685_v39 = vpop.f32.mrb[79].mxu1  ;;  %v20444_v15 = vld [vmem:[#allocation29 + $0x760] ss:$16 sps:$4 sm:$0xff]   ;;  %v20455_v8 = vld [vmem:[#allocation29 + $0x78c] ss:$16 sps:$4 sm:$0xff]  }
0x17d2   :  { %11492 = vmatprep.mubr.bf16.mxu0 %v10688_v5  ;;  %11574 = vmatprep.mubr.bf16.mxu1 %v10688_v5  ;;  %v20449_v5 = vld [vmem:[#allocation29 + $0x76c] ss:$16 sps:$4 sm:$0xff]   ;;  %v20453_v40 = vld [vmem:[#allocation29 + $0x788] ss:$16 sps:$4 sm:$0xff]   ;;  %v20456_v39 = vld [vmem:[#allocation29 + $0x7a0] ss:$16 sps:$4 sm:$0xff]  }
0x17d3   :  { %11493 = vmatmul.mubr.bf16.vlgmr.msra.gmra.mrb[80].mxu0 %v10687_v54  ;;  %11575 = vmatmul.mubr.bf16.vlgmr.msra.gmra.mrb[80].mxu1 %v10687_v54  ;;  %v20450_v54 = vld [vmem:[#allocation29 + $0x780] ss:$16 sps:$4 sm:$0xff]  }
0x17d4   :  { %11502 = vmatpush1.bf16.msra.mxu0 %v20378_v45  ;;  %11584 = vmatpush1.bf16.msra.mxu1 %v20381_v42  ;;  %v20447_v45 = vld [vmem:[#allocation29 + $0x768] ss:$16 sps:$4 sm:$0xff]   ;;  %v20452_v42 = vld [vmem:[#allocation29 + $0x784] ss:$16 sps:$4 sm:$0xff]  }
0x17d5   :  { %11503 = vmatprep.subr.bf16.mxu0 %v20386_v63  ;;  %11585 = vmatprep.subr.bf16.mxu1 %v20389_v14  ;;  %v20458_v63 = vld [vmem:[#allocation29 + $0x7a4] ss:$16 sps:$4 sm:$0xff]   ;;  %v20461_v14 = vld [vmem:[#allocation29 + $0x7ac] ss:$16 sps:$4 sm:$0xff]  }
0x17d6   :  { %11533 = vmatprep.mubr.bf16.mxu0 %v10690_v28  ;;  %11615 = vmatprep.mubr.bf16.mxu1 %v10690_v28  ;;  %v20459_v28 = vld [vmem:[#allocation29 + $0x7a8] ss:$16 sps:$4 sm:$0xff]  }
0x17d8   :  { %11504 = vmatpush1.bf16.msra.mxu0 %v20384_v62  ;;  %11586 = vmatpush1.bf16.msra.mxu1 %v20387_v57  ;;  %v20464_v62 = vld [vmem:[#allocation29 + $0x7c4] ss:$16 sps:$4 sm:$0xff]   ;;  %v20467_v57 = vld [vmem:[#allocation29 + $0x7cc] ss:$16 sps:$4 sm:$0xff]  }
0x17d9   :  { %11505 = vmatprep.subr.bf16.mxu0 %v20392_v12  ;;  %11587 = vmatprep.subr.bf16.mxu1 %v20395_v52  ;;  %v20462_v12 = vld [vmem:[#allocation29 + $0x7c0] ss:$16 sps:$4 sm:$0xff]   ;;  %v20465_v52 = vld [vmem:[#allocation29 + $0x7c8] ss:$16 sps:$4 sm:$0xff]  }
0x17dc   :  { %11506 = vmatpush1.bf16.msra.mxu0 %v20390_v16  ;;  %11588 = vmatpush1.bf16.msra.mxu1 %v20393_v2  ;;  %v20470_v16 = vld [vmem:[#allocation29 + $0x7e4] ss:$16 sps:$4 sm:$0xff]   ;;  %v20473_v2 = vld [vmem:[#allocation29 + $0x7ec] ss:$16 sps:$4 sm:$0xff]  }
0x17dd   :  { %11507 = vmatprep.subr.bf16.mxu0 %v20398_v9  ;;  %11589 = vmatprep.subr.bf16.mxu1 %v20401_v44  ;;  %v20468_v9 = vld [vmem:[#allocation29 + $0x7e0] ss:$16 sps:$4 sm:$0xff]   ;;  %v20471_v44 = vld [vmem:[#allocation29 + $0x7e8] ss:$16 sps:$4 sm:$0xff]  }
0x17e0   :  { %11508 = vmatpush1.bf16.msra.mxu0 %v20396_v10  ;;  %11590 = vmatpush1.bf16.msra.mxu1 %v20399_v17  ;;  %v20476_v10 = vld [vmem:[#allocation29 + $0x4] ss:$16 sps:$4 sm:$0xff]   ;;  %v20479_v17 = vld [vmem:[#allocation29 + $0xc] ss:$16 sps:$4 sm:$0xff]  }
0x17e1   :  { %11509 = vmatprep.subr.bf16.mxu0 %v20404_v60  ;;  %11591 = vmatprep.subr.bf16.mxu1 %v20407_v26  ;;  %v10689_v60 = vpack.c.bf16 %v23176_v53, %v23176_v53  ;;  %v20474_v26 = vld [vmem:[#allocation29] ss:$16 sps:$4 sm:$0xff]   ;;  %v20488_v53 = vld [vmem:[#allocation29 + $0x44] ss:$16 sps:$4 sm:$0xff]  }
0x17e4   :  { %11510 = vmatpush1.bf16.msra.mxu0 %v20402_v61  ;;  %11592 = vmatpush1.bf16.msra.mxu1 %v20405_v11  ;;  %v20477_v61 = vld [vmem:[#allocation29 + $0x8] ss:$16 sps:$4 sm:$0xff]   ;;  %v10469_v11 = vpack.c.bf16 %v23172_v19, %v23172_v19  ;;  %v20494_v19 = vld [vmem:[#allocation29 + $0x64] ss:$16 sps:$4 sm:$0xff]  }
0x17e5   :  { %11511 = vmatprep.subr.bf16.mxu0 %v20410_v1  ;;  %11593 = vmatprep.subr.bf16.mxu1 %v20413_v49  ;;  %v20482_v1 = vld [vmem:[#allocation29 + $0x24] ss:$16 sps:$4 sm:$0xff]   ;;  %v20485_v49 = vld [vmem:[#allocation29 + $0x2c] ss:$16 sps:$4 sm:$0xff]  }
0x17e8   :  { %11512 = vmatpush1.bf16.msra.mxu0 %v20408_v4  ;;  %11594 = vmatpush1.bf16.msra.mxu1 %v20411_v27  ;;  %v20480_v4 = vld [vmem:[#allocation29 + $0x20] ss:$16 sps:$4 sm:$0xff]   ;;  %v20483_v27 = vld [vmem:[#allocation29 + $0x28] ss:$16 sps:$4 sm:$0xff]  }
0x17e9   :  { %11513 = vmatprep.subr.bf16.mxu0 %v20416_v58  ;;  %11595 = vmatprep.subr.bf16.mxu1 %v20419_v41  ;;  %v20491_v58 = vld [vmem:[#allocation29 + $0x4c] ss:$16 sps:$4 sm:$0xff]   ;;  %v20486_v41 = vld [vmem:[#allocation29 + $0x40] ss:$16 sps:$4 sm:$0xff]  }
0x17ec   :  { %11514 = vmatpush1.bf16.msra.mxu0 %v20414_v21  ;;  %11596 = vmatpush1.bf16.msra.mxu1 %v20417_v29  ;;  %v20489_v21 = vld [vmem:[#allocation29 + $0x48] ss:$16 sps:$4 sm:$0xff]   ;;  %v20497_v29 = vld [vmem:[#allocation29 + $0x6c] ss:$16 sps:$4 sm:$0xff]  }
0x17ed   :  { %11515 = vmatprep.subr.bf16.mxu0 %v20422_v20  ;;  %11597 = vmatprep.subr.bf16.mxu1 %v20425_v22  ;;  %v20492_v20 = vld [vmem:[#allocation29 + $0x60] ss:$16 sps:$4 sm:$0xff]   ;;  %v20495_v22 = vld [vmem:[#allocation29 + $0x68] ss:$16 sps:$4 sm:$0xff]  }
0x17f0   :  { %11516 = vmatpush1.bf16.msra.mxu0 %v20420_v56  ;;  %11598 = vmatpush1.bf16.msra.mxu1 %v20423_v36  ;;  %v20500_v56 = vld [vmem:[#allocation29 + $0x84] ss:$16 sps:$4 sm:$0xff]   ;;  %v20503_v36 = vld [vmem:[#allocation29 + $0x8c] ss:$16 sps:$4 sm:$0xff]  }
0x17f1   :  { %11517 = vmatprep.subr.bf16.mxu0 %v20428_v13  ;;  %11599 = vmatprep.subr.bf16.mxu1 %v20431_v23  ;;  %v20498_v13 = vld [vmem:[#allocation29 + $0x80] ss:$16 sps:$4 sm:$0xff]   ;;  %v20501_v23 = vld [vmem:[#allocation29 + $0x88] ss:$16 sps:$4 sm:$0xff]  }
0x17f4   :  { %11518 = vmatpush1.bf16.msra.mxu0 %v20426_v24  ;;  %11600 = vmatpush1.bf16.msra.mxu1 %v20429_v3  ;;  %v20506_v24 = vld [vmem:[#allocation29 + $0xa4] ss:$16 sps:$4 sm:$0xff]   ;;  %v20509_v3 = vld [vmem:[#allocation29 + $0xac] ss:$16 sps:$4 sm:$0xff]  }
0x17f5   :  { %11519 = vmatprep.subr.bf16.mxu0 %v20434_v0  ;;  %11601 = vmatprep.subr.bf16.mxu1 %v20437_v59  ;;  %v20504_v0 = vld [vmem:[#allocation29 + $0xa0] ss:$16 sps:$4 sm:$0xff]   ;;  %v20507_v59 = vld [vmem:[#allocation29 + $0xa8] ss:$16 sps:$4 sm:$0xff]  }
0x17f8   :  { %11520 = vmatpush1.bf16.msra.mxu0 %v20432_v50  ;;  %11602 = vmatpush1.bf16.msra.mxu1 %v20435_v35  ;;  %v20512_v50 = vld [vmem:[#allocation29 + $0xc4] ss:$16 sps:$4 sm:$0xff]   ;;  %v20515_v35 = vld [vmem:[#allocation29 + $0xcc] ss:$16 sps:$4 sm:$0xff]  }
0x17f9   :  { %11521 = vmatprep.subr.bf16.mxu0 %v20440_v30  ;;  %11603 = vmatprep.subr.bf16.mxu1 %v20443_v32  ;;  %v20510_v30 = vld [vmem:[#allocation29 + $0xc0] ss:$16 sps:$4 sm:$0xff]   ;;  %v20513_v32 = vld [vmem:[#allocation29 + $0xc8] ss:$16 sps:$4 sm:$0xff]  }
0x17fc   :  { %11522 = vmatpush1.bf16.msra.mxu0 %v20438_v7  ;;  %11604 = vmatpush1.bf16.msra.mxu1 %v20441_v48  ;;  %v20518_v7 = vld [vmem:[#allocation29 + $0xe4] ss:$16 sps:$4 sm:$0xff]   ;;  %v20521_v48 = vld [vmem:[#allocation29 + $0xec] ss:$16 sps:$4 sm:$0xff]  }
0x17fd   :  { %11523 = vmatprep.subr.bf16.mxu0 %v20446_v31  ;;  %11605 = vmatprep.subr.bf16.mxu1 %v20449_v5  ;;  %v20516_v31 = vld [vmem:[#allocation29 + $0xe0] ss:$16 sps:$4 sm:$0xff]   ;;  %v20519_v5 = vld [vmem:[#allocation29 + $0xe8] ss:$16 sps:$4 sm:$0xff]  }
0x1800   :  { %11524 = vmatpush1.bf16.msra.mxu0 %v20444_v15  ;;  %11606 = vmatpush1.bf16.msra.mxu1 %v20447_v45  ;;  %v20524_v15 = vld [vmem:[#allocation29 + $0x104] ss:$16 sps:$4 sm:$0xff]   ;;  %v20527_v45 = vld [vmem:[#allocation29 + $0x10c] ss:$16 sps:$4 sm:$0xff]  }
0x1801   :  { %11525 = vmatprep.subr.bf16.mxu0 %v20452_v42  ;;  %11607 = vmatprep.subr.bf16.mxu1 %v20455_v8  ;;  %v20522_v42 = vld [vmem:[#allocation29 + $0x100] ss:$16 sps:$4 sm:$0xff]   ;;  %v20525_v8 = vld [vmem:[#allocation29 + $0x108] ss:$16 sps:$4 sm:$0xff]  }
0x1804   :  { %11526 = vmatpush1.bf16.msra.mxu0 %v20450_v54  ;;  %11608 = vmatpush1.bf16.msra.mxu1 %v20453_v40  ;;  %v20530_v54 = vld [vmem:[#allocation29 + $0x124] ss:$16 sps:$4 sm:$0xff]   ;;  %v20533_v40 = vld [vmem:[#allocation29 + $0x12c] ss:$16 sps:$4 sm:$0xff]  }
0x1805   :  { %11527 = vmatprep.subr.bf16.mxu0 %v20458_v63  ;;  %11609 = vmatprep.subr.bf16.mxu1 %v20461_v14  ;;  %v20528_v63 = vld [vmem:[#allocation29 + $0x120] ss:$16 sps:$4 sm:$0xff]   ;;  %v20531_v14 = vld [vmem:[#allocation29 + $0x128] ss:$16 sps:$4 sm:$0xff]  }
0x1808   :  { %11528 = vmatpush1.bf16.msra.mxu0 %v20456_v39  ;;  %11610 = vmatpush1.bf16.msra.mxu1 %v20459_v28  ;;  %v20536_v39 = vld [vmem:[#allocation29 + $0x144] ss:$16 sps:$4 sm:$0xff]   ;;  %v20539_v28 = vld [vmem:[#allocation29 + $0x14c] ss:$16 sps:$4 sm:$0xff]  }
0x1809   :  { %11529 = vmatprep.subr.bf16.mxu0 %v20464_v62  ;;  %11611 = vmatprep.subr.bf16.mxu1 %v20467_v57  ;;  %v20534_v62 = vld [vmem:[#allocation29 + $0x140] ss:$16 sps:$4 sm:$0xff]   ;;  %v20537_v57 = vld [vmem:[#allocation29 + $0x148] ss:$16 sps:$4 sm:$0xff]  }
0x180c   :  { %11530 = vmatpush1.bf16.msra.mxu0 %v20462_v12  ;;  %11612 = vmatpush1.bf16.msra.mxu1 %v20465_v52  ;;  %v20542_v12 = vld [vmem:[#allocation29 + $0x164] ss:$16 sps:$4 sm:$0xff]   ;;  %v20545_v52 = vld [vmem:[#allocation29 + $0x16c] ss:$16 sps:$4 sm:$0xff]  }
0x180d   :  { %11531 = vmatprep.subr.bf16.mxu0 %v20470_v16  ;;  %11613 = vmatprep.subr.bf16.mxu1 %v20473_v2  ;;  %v20540_v16 = vld [vmem:[#allocation29 + $0x160] ss:$16 sps:$4 sm:$0xff]   ;;  %v20543_v2 = vld [vmem:[#allocation29 + $0x168] ss:$16 sps:$4 sm:$0xff]  }
0x1810   :  { %11532 = vmatpush1.bf16.msra.mxu0 %v20468_v9  ;;  %11614 = vmatpush1.bf16.msra.mxu1 %v20471_v44  ;;  %v20548_v9 = vld [vmem:[#allocation29 + $0x184] ss:$16 sps:$4 sm:$0xff]   ;;  %v20551_v44 = vld [vmem:[#allocation29 + $0x18c] ss:$16 sps:$4 sm:$0xff]  }
0x1811   :  { %12264 = vmatprep.subr.bf16.mxu0 %v20476_v10  ;;  %12346 = vmatprep.subr.bf16.mxu1 %v20479_v17  ;;  %v20546_v10 = vld [vmem:[#allocation29 + $0x180] ss:$16 sps:$4 sm:$0xff]   ;;  %v20549_v17 = vld [vmem:[#allocation29 + $0x188] ss:$16 sps:$4 sm:$0xff]  }
0x1813   :  { %11534 = vmatmul.mubr.bf16.vlgmr.msra.gmra.mrb[80].mxu0 %v10689_v60  ;;  %11616 = vmatmul.mubr.bf16.vlgmr.msra.gmra.mrb[80].mxu1 %v10689_v60  ;;  %v20554_v60 = vld [vmem:[#allocation29 + $0x1a4] ss:$16 sps:$4 sm:$0xff]  }
0x1814   :  { %12265 = vmatpush1.bf16.msra.mxu0 %v20474_v26  ;;  %12296 = vmatprep.mubr.bf16.mxu0 %v10469_v11  ;;  %v20557_v26 = vld [vmem:[#allocation29 + $0x1ac] ss:$16 sps:$4 sm:$0xff]  }
0x1815   :  { %12347 = vmatpush1.bf16.msra.mxu1 %v20477_v61  ;;  %12378 = vmatprep.mubr.bf16.mxu1 %v10469_v11  ;;  %v20552_v61 = vld [vmem:[#allocation29 + $0x1a0] ss:$16 sps:$4 sm:$0xff]   ;;  %v20555_v11 = vld [vmem:[#allocation29 + $0x1a8] ss:$16 sps:$4 sm:$0xff]  }
0x1816   :  { %12266 = vmatprep.subr.bf16.mxu0 %v20482_v1  ;;  %12348 = vmatprep.subr.bf16.mxu1 %v20485_v49  ;;  %v20560_v1 = vld [vmem:[#allocation29 + $0x1c4] ss:$16 sps:$4 sm:$0xff]   ;;  %v20563_v49 = vld [vmem:[#allocation29 + $0x1cc] ss:$16 sps:$4 sm:$0xff]  }
0x1818   :  { %12267 = vmatpush1.bf16.msra.mxu0 %v20480_v4  ;;  %v20558_v4 = vld [vmem:[#allocation29 + $0x1c0] ss:$16 sps:$4 sm:$0xff]  }
0x1819   :  { %12349 = vmatpush1.bf16.msra.mxu1 %v20483_v27  ;;  %12268 = vmatprep.subr.bf16.mxu0 %v20488_v53  ;;  %v20561_v27 = vld [vmem:[#allocation29 + $0x1c8] ss:$16 sps:$4 sm:$0xff]   ;;  %v20566_v53 = vld [vmem:[#allocation29 + $0x1e4] ss:$16 sps:$4 sm:$0xff]  }
0x181a   :  { %12350 = vmatprep.subr.bf16.mxu1 %v20491_v58  ;;  %v20569_v58 = vld [vmem:[#allocation29 + $0x1ec] ss:$16 sps:$4 sm:$0xff]  }
0x181c   :  { %12269 = vmatpush1.bf16.msra.mxu0 %v20486_v41  ;;  %v20564_v41 = vld [vmem:[#allocation29 + $0x1e0] ss:$16 sps:$4 sm:$0xff]  }
0x181d   :  { %12351 = vmatpush1.bf16.msra.mxu1 %v20489_v21  ;;  %12270 = vmatprep.subr.bf16.mxu0 %v20494_v19  ;;  %v20567_v21 = vld [vmem:[#allocation29 + $0x1e8] ss:$16 sps:$4 sm:$0xff]   ;;  %v20572_v19 = vld [vmem:[#allocation29 + $0x204] ss:$16 sps:$4 sm:$0xff]  }
0x181e   :  { %12352 = vmatprep.subr.bf16.mxu1 %v20497_v29  ;;  %v20575_v29 = vld [vmem:[#allocation29 + $0x20c] ss:$16 sps:$4 sm:$0xff]  }
0x1820   :  { %12271 = vmatpush1.bf16.msra.mxu0 %v20492_v20  ;;  %v20570_v20 = vld [vmem:[#allocation29 + $0x200] ss:$16 sps:$4 sm:$0xff]  }
0x1821   :  { %12353 = vmatpush1.bf16.msra.mxu1 %v20495_v22  ;;  %12272 = vmatprep.subr.bf16.mxu0 %v20500_v56  ;;  %v10468_v22 = vpack.c.bf16 %v23168_v25, %v23168_v25  ;;  %v20573_v56 = vld [vmem:[#allocation29 + $0x208] ss:$16 sps:$4 sm:$0xff]   ;;  %v20587_v25 = vld [vmem:[#allocation29 + $0x24c] ss:$16 sps:$4 sm:$0xff]  }
0x1822   :  { %12354 = vmatprep.subr.bf16.mxu1 %v20503_v36  ;;  %v20578_v36 = vld [vmem:[#allocation29 + $0x224] ss:$16 sps:$4 sm:$0xff]  }
0x1824   :  { %12273 = vmatpush1.bf16.msra.mxu0 %v20498_v13  ;;  %v10471_v13 = vpack.c.bf16 %v23174_v38, %v23174_v38  ;;  %v20593_v38 = vld [vmem:[#allocation29 + $0x26c] ss:$16 sps:$4 sm:$0xff]  }
0x1825   :  { %12355 = vmatpush1.bf16.msra.mxu1 %v20501_v23  ;;  %12274 = vmatprep.subr.bf16.mxu0 %v20506_v24  ;;  %v20581_v23 = vld [vmem:[#allocation29 + $0x22c] ss:$16 sps:$4 sm:$0xff]   ;;  %v20576_v24 = vld [vmem:[#allocation29 + $0x220] ss:$16 sps:$4 sm:$0xff]  }
0x1826   :  { %12356 = vmatprep.subr.bf16.mxu1 %v20509_v3  ;;  %v20579_v3 = vld [vmem:[#allocation29 + $0x228] ss:$16 sps:$4 sm:$0xff]  }
0x1828   :  { %12275 = vmatpush1.bf16.msra.mxu0 %v20504_v0  ;;  %v20584_v0 = vld [vmem:[#allocation29 + $0x244] ss:$16 sps:$4 sm:$0xff]  }
0x1829   :  { %12357 = vmatpush1.bf16.msra.mxu1 %v20507_v59  ;;  %12276 = vmatprep.subr.bf16.mxu0 %v20512_v50  ;;  %v20582_v59 = vld [vmem:[#allocation29 + $0x240] ss:$16 sps:$4 sm:$0xff]   ;;  %v20585_v50 = vld [vmem:[#allocation29 + $0x248] ss:$16 sps:$4 sm:$0xff]  }
0x182a   :  { %12358 = vmatprep.subr.bf16.mxu1 %v20515_v35  ;;  %v20590_v35 = vld [vmem:[#allocation29 + $0x264] ss:$16 sps:$4 sm:$0xff]  }
0x182c   :  { %12277 = vmatpush1.bf16.msra.mxu0 %v20510_v30  ;;  %v20588_v30 = vld [vmem:[#allocation29 + $0x260] ss:$16 sps:$4 sm:$0xff]  }
0x182d   :  { %12359 = vmatpush1.bf16.msra.mxu1 %v20513_v32  ;;  %12278 = vmatprep.subr.bf16.mxu0 %v20518_v7  ;;  %v20591_v32 = vld [vmem:[#allocation29 + $0x268] ss:$16 sps:$4 sm:$0xff]   ;;  %v20596_v7 = vld [vmem:[#allocation29 + $0x284] ss:$16 sps:$4 sm:$0xff]  }
0x182e   :  { %12360 = vmatprep.subr.bf16.mxu1 %v20521_v48  ;;  %v20599_v48 = vld [vmem:[#allocation29 + $0x28c] ss:$16 sps:$4 sm:$0xff]  }
0x1830   :  { %12279 = vmatpush1.bf16.msra.mxu0 %v20516_v31  ;;  %v20594_v31 = vld [vmem:[#allocation29 + $0x280] ss:$16 sps:$4 sm:$0xff]  }
0x1831   :  { %12361 = vmatpush1.bf16.msra.mxu1 %v20519_v5  ;;  %12280 = vmatprep.subr.bf16.mxu0 %v20524_v15  ;;  %v20597_v5 = vld [vmem:[#allocation29 + $0x288] ss:$16 sps:$4 sm:$0xff]   ;;  %v20602_v15 = vld [vmem:[#allocation29 + $0x2a4] ss:$16 sps:$4 sm:$0xff]  }
0x1832   :  { %12362 = vmatprep.subr.bf16.mxu1 %v20527_v45  ;;  %v20605_v45 = vld [vmem:[#allocation29 + $0x2ac] ss:$16 sps:$4 sm:$0xff]  }
0x1834   :  { %12281 = vmatpush1.bf16.msra.mxu0 %v20522_v42  ;;  %v20600_v42 = vld [vmem:[#allocation29 + $0x2a0] ss:$16 sps:$4 sm:$0xff]  }
0x1835   :  { %12363 = vmatpush1.bf16.msra.mxu1 %v20525_v8  ;;  %12282 = vmatprep.subr.bf16.mxu0 %v20530_v54  ;;  %v20603_v8 = vld [vmem:[#allocation29 + $0x2a8] ss:$16 sps:$4 sm:$0xff]   ;;  %v20608_v54 = vld [vmem:[#allocation29 + $0x2c4] ss:$16 sps:$4 sm:$0xff]  }
0x1836   :  { %12364 = vmatprep.subr.bf16.mxu1 %v20533_v40  ;;  %v20611_v40 = vld [vmem:[#allocation29 + $0x2cc] ss:$16 sps:$4 sm:$0xff]  }
0x1838   :  { %12283 = vmatpush1.bf16.msra.mxu0 %v20528_v63  ;;  %v20606_v63 = vld [vmem:[#allocation29 + $0x2c0] ss:$16 sps:$4 sm:$0xff]  }
0x1839   :  { %12365 = vmatpush1.bf16.msra.mxu1 %v20531_v14  ;;  %12284 = vmatprep.subr.bf16.mxu0 %v20536_v39  ;;  %v20609_v14 = vld [vmem:[#allocation29 + $0x2c8] ss:$16 sps:$4 sm:$0xff]   ;;  %v20614_v39 = vld [vmem:[#allocation29 + $0x2e4] ss:$16 sps:$4 sm:$0xff]  }
0x183a   :  { %12366 = vmatprep.subr.bf16.mxu1 %v20539_v28  ;;  %v20617_v28 = vld [vmem:[#allocation29 + $0x2ec] ss:$16 sps:$4 sm:$0xff]  }
0x183c   :  { %12285 = vmatpush1.bf16.msra.mxu0 %v20534_v62  ;;  %v20612_v62 = vld [vmem:[#allocation29 + $0x2e0] ss:$16 sps:$4 sm:$0xff]  }
0x183d   :  { %12367 = vmatpush1.bf16.msra.mxu1 %v20537_v57  ;;  %12286 = vmatprep.subr.bf16.mxu0 %v20542_v12  ;;  %v20615_v57 = vld [vmem:[#allocation29 + $0x2e8] ss:$16 sps:$4 sm:$0xff]   ;;  %v20620_v12 = vld [vmem:[#allocation29 + $0x304] ss:$16 sps:$4 sm:$0xff]  }
0x183e   :  { %12368 = vmatprep.subr.bf16.mxu1 %v20545_v52  ;;  %v20623_v52 = vld [vmem:[#allocation29 + $0x30c] ss:$16 sps:$4 sm:$0xff]  }
0x1840   :  { %12287 = vmatpush1.bf16.msra.mxu0 %v20540_v16  ;;  %v20618_v16 = vld [vmem:[#allocation29 + $0x300] ss:$16 sps:$4 sm:$0xff]  }
0x1841   :  { %12369 = vmatpush1.bf16.msra.mxu1 %v20543_v2  ;;  %12288 = vmatprep.subr.bf16.mxu0 %v20548_v9  ;;  %v20621_v2 = vld [vmem:[#allocation29 + $0x308] ss:$16 sps:$4 sm:$0xff]   ;;  %v20626_v9 = vld [vmem:[#allocation29 + $0x324] ss:$16 sps:$4 sm:$0xff]  }
0x1842   :  { %12370 = vmatprep.subr.bf16.mxu1 %v20551_v44  ;;  %v20629_v44 = vld [vmem:[#allocation29 + $0x32c] ss:$16 sps:$4 sm:$0xff]  }
0x1844   :  { %12289 = vmatpush1.bf16.msra.mxu0 %v20546_v10  ;;  %v20624_v10 = vld [vmem:[#allocation29 + $0x320] ss:$16 sps:$4 sm:$0xff]  }
0x1845   :  { %12371 = vmatpush1.bf16.msra.mxu1 %v20549_v17  ;;  %12290 = vmatprep.subr.bf16.mxu0 %v20554_v60  ;;  %v20627_v17 = vld [vmem:[#allocation29 + $0x328] ss:$16 sps:$4 sm:$0xff]   ;;  %v20632_v60 = vld [vmem:[#allocation29 + $0x344] ss:$16 sps:$4 sm:$0xff]  }
0x1846   :  { %12372 = vmatprep.subr.bf16.mxu1 %v20557_v26  ;;  %v20635_v26 = vld [vmem:[#allocation29 + $0x34c] ss:$16 sps:$4 sm:$0xff]  }
0x1848   :  { %12291 = vmatpush1.bf16.msra.mxu0 %v20552_v61  ;;  %v20630_v61 = vld [vmem:[#allocation29 + $0x340] ss:$16 sps:$4 sm:$0xff]  }
0x1849   :  { %12373 = vmatpush1.bf16.msra.mxu1 %v20555_v11  ;;  %12292 = vmatprep.subr.bf16.mxu0 %v20560_v1  ;;  %v20633_v11 = vld [vmem:[#allocation29 + $0x348] ss:$16 sps:$4 sm:$0xff]   ;;  %v20638_v1 = vld [vmem:[#allocation29 + $0x364] ss:$16 sps:$4 sm:$0xff]  }
0x184a   :  { %12374 = vmatprep.subr.bf16.mxu1 %v20563_v49  ;;  %v20641_v49 = vld [vmem:[#allocation29 + $0x36c] ss:$16 sps:$4 sm:$0xff]  }
0x184c   :  { %12293 = vmatpush1.bf16.msra.mxu0 %v20558_v4  ;;  %v20636_v4 = vld [vmem:[#allocation29 + $0x360] ss:$16 sps:$4 sm:$0xff]  }
0x184d   :  { %12375 = vmatpush1.bf16.msra.mxu1 %v20561_v27  ;;  %12294 = vmatprep.subr.bf16.mxu0 %v20566_v53  ;;  %v20639_v27 = vld [vmem:[#allocation29 + $0x368] ss:$16 sps:$4 sm:$0xff]   ;;  %v20644_v53 = vld [vmem:[#allocation29 + $0x384] ss:$16 sps:$4 sm:$0xff]  }
0x184e   :  { %12376 = vmatprep.subr.bf16.mxu1 %v20569_v58  ;;  %v20647_v58 = vld [vmem:[#allocation29 + $0x38c] ss:$16 sps:$4 sm:$0xff]  }
0x1850   :  { %12295 = vmatpush1.bf16.msra.mxu0 %v20564_v41  ;;  %v20642_v41 = vld [vmem:[#allocation29 + $0x380] ss:$16 sps:$4 sm:$0xff]  }
0x1851   :  { %12377 = vmatpush1.bf16.msra.mxu1 %v20567_v21  ;;  %12305 = vmatprep.subr.bf16.mxu0 %v20572_v19  ;;  %v20645_v21 = vld [vmem:[#allocation29 + $0x388] ss:$16 sps:$4 sm:$0xff]   ;;  %v20650_v19 = vld [vmem:[#allocation29 + $0x3a4] ss:$16 sps:$4 sm:$0xff]  }
0x1852   :  { %12387 = vmatprep.subr.bf16.mxu1 %v20575_v29  ;;  %v20653_v29 = vld [vmem:[#allocation29 + $0x3ac] ss:$16 sps:$4 sm:$0xff]  }
0x1853   :  { %12297 = vmatmul.mubr.bf16.vlgmr.msra.gmra.mrb[80].mxu0 %v10468_v22 }
0x1854   :  { %12379 = vmatmul.mubr.bf16.vlgmr.msra.gmra.mrb[80].mxu1 %v10468_v22  ;;  %12306 = vmatpush1.bf16.msra.mxu0 %v20570_v20  ;;  %v20648_v20 = vld [vmem:[#allocation29 + $0x3a0] ss:$16 sps:$4 sm:$0xff]   ;;  %v20651_v22 = vld [vmem:[#allocation29 + $0x3a8] ss:$16 sps:$4 sm:$0xff]  }
0x1855   :  { %12337 = vmatprep.mubr.bf16.mxu0 %v10471_v13  ;;  %12388 = vmatpush1.bf16.msra.mxu1 %v20573_v56  ;;  %v20656_v56 = vld [vmem:[#allocation29 + $0x3c4] ss:$16 sps:$4 sm:$0xff]  }
0x1856   :  { %12419 = vmatprep.mubr.bf16.mxu1 %v10471_v13  ;;  %12307 = vmatprep.subr.bf16.mxu0 %v20578_v36  ;;  %v20659_v36 = vld [vmem:[#allocation29 + $0x3cc] ss:$16 sps:$4 sm:$0xff]   ;;  %v20654_v13 = vld [vmem:[#allocation29 + $0x3c0] ss:$16 sps:$4 sm:$0xff]  }
0x1857   :  { %12389 = vmatprep.subr.bf16.mxu1 %v20581_v23  ;;  %v20657_v23 = vld [vmem:[#allocation29 + $0x3c8] ss:$16 sps:$4 sm:$0xff]  }
0x1858   :  { %12308 = vmatpush1.bf16.msra.mxu0 %v20576_v24  ;;  %v20662_v24 = vld [vmem:[#allocation29 + $0x3e4] ss:$16 sps:$4 sm:$0xff]  }
0x1859   :  { %12390 = vmatpush1.bf16.msra.mxu1 %v20579_v3  ;;  %12309 = vmatprep.subr.bf16.mxu0 %v20584_v0  ;;  %v20665_v3 = vld [vmem:[#allocation29 + $0x3ec] ss:$16 sps:$4 sm:$0xff]   ;;  %v20660_v0 = vld [vmem:[#allocation29 + $0x3e0] ss:$16 sps:$4 sm:$0xff]  }
0x185a   :  { %12391 = vmatprep.subr.bf16.mxu1 %v20587_v25  ;;  %v20663_v25 = vld [vmem:[#allocation29 + $0x3e8] ss:$16 sps:$4 sm:$0xff]  }
0x185c   :  { %12310 = vmatpush1.bf16.msra.mxu0 %v20582_v59  ;;  %v10470_v59 = vpack.c.bf16 %v23170_v43, %v23170_v43  ;;  %v12429_v43 = vld [vmem:[#allocation28 + $0x4] sm:$0x3] }
0x185d   :  { %12392 = vmatpush1.bf16.msra.mxu1 %v20585_v50  ;;  %12311 = vmatprep.subr.bf16.mxu0 %v20590_v35  ;;  %v20668_v50 = vld [vmem:[#allocation29 + $0x804] ss:$16 sps:$4 sm:$0xff]   ;;  %v20671_v35 = vld [vmem:[#allocation29 + $0x80c] ss:$16 sps:$4 sm:$0xff]  }
0x185e   :  { %12393 = vmatprep.subr.bf16.mxu1 %v20593_v38  ;;  %v20666_v38 = vld [vmem:[#allocation29 + $0x800] ss:$16 sps:$4 sm:$0xff]  }
0x1860   :  { %12312 = vmatpush1.bf16.msra.mxu0 %v20588_v30  ;;  %v20674_v30 = vld [vmem:[#allocation29 + $0x824] ss:$16 sps:$4 sm:$0xff]  }
0x1861   :  { %12394 = vmatpush1.bf16.msra.mxu1 %v20591_v32  ;;  %12313 = vmatprep.subr.bf16.mxu0 %v20596_v7  ;;  %v20677_v32 = vld [vmem:[#allocation29 + $0x82c] ss:$16 sps:$4 sm:$0xff]  }
0x1862   :  { %12395 = vmatprep.subr.bf16.mxu1 %v20599_v48  ;;  %v20683_v7 = vld [vmem:[#allocation29 + $0x84c] ss:$16 sps:$4 sm:$0xff]   ;;  %v20678_v48 = vld [vmem:[#allocation29 + $0x840] ss:$16 sps:$4 sm:$0xff]  }
0x1864   :  { %12314 = vmatpush1.bf16.msra.mxu0 %v20594_v31  ;;  %v20681_v31 = vld [vmem:[#allocation29 + $0x848] ss:$16 sps:$4 sm:$0xff]  }
0x1865   :  { %12396 = vmatpush1.bf16.msra.mxu1 %v20597_v5  ;;  %12315 = vmatprep.subr.bf16.mxu0 %v20602_v15  ;;  %v20686_v5 = vld [vmem:[#allocation29 + $0x864] ss:$16 sps:$4 sm:$0xff]   ;;  %v20689_v15 = vld [vmem:[#allocation29 + $0x86c] ss:$16 sps:$4 sm:$0xff]  }
0x1866   :  { %12397 = vmatprep.subr.bf16.mxu1 %v20605_v45  ;;  %v20684_v45 = vld [vmem:[#allocation29 + $0x860] ss:$16 sps:$4 sm:$0xff]  }
0x1868   :  { %12316 = vmatpush1.bf16.msra.mxu0 %v20600_v42  ;;  %v20687_v42 = vld [vmem:[#allocation29 + $0x868] ss:$16 sps:$4 sm:$0xff]  }
0x1869   :  { %12398 = vmatpush1.bf16.msra.mxu1 %v20603_v8  ;;  %12317 = vmatprep.subr.bf16.mxu0 %v20608_v54  ;;  %v20692_v8 = vld [vmem:[#allocation29 + $0x884] ss:$16 sps:$4 sm:$0xff]   ;;  %v20695_v54 = vld [vmem:[#allocation29 + $0x88c] ss:$16 sps:$4 sm:$0xff]  }
0x186a   :  { %12399 = vmatprep.subr.bf16.mxu1 %v20611_v40  ;;  %v20690_v40 = vld [vmem:[#allocation29 + $0x880] ss:$16 sps:$4 sm:$0xff]  }
0x186c   :  { %12318 = vmatpush1.bf16.msra.mxu0 %v20606_v63  ;;  %v20693_v63 = vld [vmem:[#allocation29 + $0x888] ss:$16 sps:$4 sm:$0xff]  }
0x186d   :  { %12400 = vmatpush1.bf16.msra.mxu1 %v20609_v14  ;;  %12319 = vmatprep.subr.bf16.mxu0 %v20614_v39  ;;  %v20698_v14 = vld [vmem:[#allocation29 + $0x8a4] ss:$16 sps:$4 sm:$0xff]   ;;  %v20701_v39 = vld [vmem:[#allocation29 + $0x8ac] ss:$16 sps:$4 sm:$0xff]  }
0x186e   :  { %12401 = vmatprep.subr.bf16.mxu1 %v20617_v28  ;;  %v20696_v28 = vld [vmem:[#allocation29 + $0x8a0] ss:$16 sps:$4 sm:$0xff]  }
0x1870   :  { %12320 = vmatpush1.bf16.msra.mxu0 %v20612_v62  ;;  %v20699_v62 = vld [vmem:[#allocation29 + $0x8a8] ss:$16 sps:$4 sm:$0xff]  }
0x1871   :  { %12402 = vmatpush1.bf16.msra.mxu1 %v20615_v57  ;;  %12321 = vmatprep.subr.bf16.mxu0 %v20620_v12  ;;  %v20704_v57 = vld [vmem:[#allocation29 + $0x8c4] ss:$16 sps:$4 sm:$0xff]   ;;  %v20707_v12 = vld [vmem:[#allocation29 + $0x8cc] ss:$16 sps:$4 sm:$0xff]  }
0x1872   :  { %12403 = vmatprep.subr.bf16.mxu1 %v20623_v52  ;;  %v20702_v52 = vld [vmem:[#allocation29 + $0x8c0] ss:$16 sps:$4 sm:$0xff]  }
0x1874   :  { %12322 = vmatpush1.bf16.msra.mxu0 %v20618_v16  ;;  %v20705_v16 = vld [vmem:[#allocation29 + $0x8c8] ss:$16 sps:$4 sm:$0xff]  }
0x1875   :  { %12404 = vmatpush1.bf16.msra.mxu1 %v20621_v2  ;;  %12323 = vmatprep.subr.bf16.mxu0 %v20626_v9  ;;  %v20710_v2 = vld [vmem:[#allocation29 + $0x8e4] ss:$16 sps:$4 sm:$0xff]   ;;  %v20713_v9 = vld [vmem:[#allocation29 + $0x8ec] ss:$16 sps:$4 sm:$0xff]  }
0x1876   :  { %12405 = vmatprep.subr.bf16.mxu1 %v20629_v44  ;;  %v20708_v44 = vld [vmem:[#allocation29 + $0x8e0] ss:$16 sps:$4 sm:$0xff]  }
0x1878   :  { %12324 = vmatpush1.bf16.msra.mxu0 %v20624_v10  ;;  %v20711_v10 = vld [vmem:[#allocation29 + $0x8e8] ss:$16 sps:$4 sm:$0xff]  }
0x1879   :  { %12406 = vmatpush1.bf16.msra.mxu1 %v20627_v17  ;;  %12325 = vmatprep.subr.bf16.mxu0 %v20632_v60  ;;  %v20716_v17 = vld [vmem:[#allocation29 + $0x904] ss:$16 sps:$4 sm:$0xff]   ;;  %v20719_v60 = vld [vmem:[#allocation29 + $0x90c] ss:$16 sps:$4 sm:$0xff]  }
0x187a   :  { %12407 = vmatprep.subr.bf16.mxu1 %v20635_v26  ;;  %v20714_v26 = vld [vmem:[#allocation29 + $0x900] ss:$16 sps:$4 sm:$0xff]  }
0x187c   :  { %12326 = vmatpush1.bf16.msra.mxu0 %v20630_v61  ;;  %v20717_v61 = vld [vmem:[#allocation29 + $0x908] ss:$16 sps:$4 sm:$0xff]  }
0x187d   :  { %12408 = vmatpush1.bf16.msra.mxu1 %v20633_v11  ;;  %12327 = vmatprep.subr.bf16.mxu0 %v20638_v1  ;;  %v20722_v11 = vld [vmem:[#allocation29 + $0x924] ss:$16 sps:$4 sm:$0xff]   ;;  %v20725_v1 = vld [vmem:[#allocation29 + $0x92c] ss:$16 sps:$4 sm:$0xff]  }
0x187e   :  { %12409 = vmatprep.subr.bf16.mxu1 %v20641_v49  ;;  %v20720_v49 = vld [vmem:[#allocation29 + $0x920] ss:$16 sps:$4 sm:$0xff]  }
0x1880   :  { %12328 = vmatpush1.bf16.msra.mxu0 %v20636_v4  ;;  %v20723_v4 = vld [vmem:[#allocation29 + $0x928] ss:$16 sps:$4 sm:$0xff]  }
0x1881   :  { %12410 = vmatpush1.bf16.msra.mxu1 %v20639_v27  ;;  %12329 = vmatprep.subr.bf16.mxu0 %v20644_v53  ;;  %v20728_v27 = vld [vmem:[#allocation29 + $0x944] ss:$16 sps:$4 sm:$0xff]   ;;  %v20731_v53 = vld [vmem:[#allocation29 + $0x94c] ss:$16 sps:$4 sm:$0xff]  }
0x1882   :  { %12411 = vmatprep.subr.bf16.mxu1 %v20647_v58  ;;  %v20726_v58 = vld [vmem:[#allocation29 + $0x940] ss:$16 sps:$4 sm:$0xff]  }
0x1884   :  { %12330 = vmatpush1.bf16.msra.mxu0 %v20642_v41  ;;  %v20729_v41 = vld [vmem:[#allocation29 + $0x948] ss:$16 sps:$4 sm:$0xff]  }
0x1885   :  { %12412 = vmatpush1.bf16.msra.mxu1 %v20645_v21  ;;  %12331 = vmatprep.subr.bf16.mxu0 %v20650_v19  ;;  %v20734_v21 = vld [vmem:[#allocation29 + $0x964] ss:$16 sps:$4 sm:$0xff]   ;;  %v20737_v19 = vld [vmem:[#allocation29 + $0x96c] ss:$16 sps:$4 sm:$0xff]  }
0x1886   :  { %12413 = vmatprep.subr.bf16.mxu1 %v20653_v29  ;;  %v20732_v29 = vld [vmem:[#allocation29 + $0x960] ss:$16 sps:$4 sm:$0xff]  }
0x1888   :  { %12332 = vmatpush1.bf16.msra.mxu0 %v20648_v20  ;;  %v20735_v20 = vld [vmem:[#allocation29 + $0x968] ss:$16 sps:$4 sm:$0xff]  }
0x1889   :  { %12414 = vmatpush1.bf16.msra.mxu1 %v20651_v22  ;;  %12333 = vmatprep.subr.bf16.mxu0 %v20656_v56  ;;  %v20740_v22 = vld [vmem:[#allocation29 + $0x984] ss:$16 sps:$4 sm:$0xff]   ;;  %v20743_v56 = vld [vmem:[#allocation29 + $0x98c] ss:$16 sps:$4 sm:$0xff]  }
0x188a   :  { %12415 = vmatprep.subr.bf16.mxu1 %v20659_v36  ;;  %v20738_v36 = vld [vmem:[#allocation29 + $0x980] ss:$16 sps:$4 sm:$0xff]  }
0x188c   :  { %12334 = vmatpush1.bf16.msra.mxu0 %v20654_v13  ;;  %v20741_v13 = vld [vmem:[#allocation29 + $0x988] ss:$16 sps:$4 sm:$0xff]  }
0x188d   :  { %12416 = vmatpush1.bf16.msra.mxu1 %v20657_v23  ;;  %12335 = vmatprep.subr.bf16.mxu0 %v20662_v24  ;;  %v20746_v23 = vld [vmem:[#allocation29 + $0x9a4] ss:$16 sps:$4 sm:$0xff]   ;;  %v20749_v24 = vld [vmem:[#allocation29 + $0x9ac] ss:$16 sps:$4 sm:$0xff]  }
0x188e   :  { %12417 = vmatprep.subr.bf16.mxu1 %v20665_v3  ;;  %v20744_v3 = vld [vmem:[#allocation29 + $0x9a0] ss:$16 sps:$4 sm:$0xff]  }
0x1890   :  { %12336 = vmatpush1.bf16.msra.mxu0 %v20660_v0  ;;  %v20747_v0 = vld [vmem:[#allocation29 + $0x9a8] ss:$16 sps:$4 sm:$0xff]  }
0x1891   :  { %12418 = vmatpush1.bf16.msra.mxu1 %v20663_v25  ;;  %16921 = vmatprep.subr.msk.bf16.mxu0 %vm10373_vm1, %v23140_v34  ;;  %v20669_v34 = vld [vmem:[#allocation29 + $0x808] ss:$16 sps:$4 sm:$0xff]   ;;  %v20752_v25 = vld [vmem:[#allocation29 + $0x9c4] ss:$16 sps:$4 sm:$0xff]  }
0x1892   :  { %16923 = vmatprep.subr.msk.bf16.mxu1 %vm10373_vm1, %v23142_v46  ;;  %v20672_v46 = vld [vmem:[#allocation29 + $0x820] ss:$16 sps:$4 sm:$0xff]  }
0x1893   :  { %12338 = vmatmul.mubr.bf16.vlgmr.msra.gmra.mrb[80].mxu0 %v10470_v59 }
0x1894   :  { %12420 = vmatmul.mubr.bf16.vlgmr.msra.gmra.mrb[80].mxu1 %v10470_v59  ;;  %12434 = vmatpush1.bf16.msra.mxu0 %v23145_v33  ;;  %v20675_v33 = vld [vmem:[#allocation29 + $0x828] ss:$16 sps:$4 sm:$0xff]   ;;  %v20755_v59 = vld [vmem:[#allocation29 + $0x9cc] ss:$16 sps:$4 sm:$0xff]  }
0x1895   :  { %12475 = vmatpush1.bf16.msra.mxu1 %v23148_v18  ;;  %12465 = vmatprep.mubr.bf16.mxu0 %v23721_v55  ;;  %v20680_v18 = vld [vmem:[#allocation29 + $0x844] ss:$16 sps:$4 sm:$0xff]  }
0x1896   :  { %12506 = vmatprep.mubr.bf16.mxu1 %v23721_v55  ;;  %13288 = vmatprep.subr.bf16.mxu0 %v20668_v50  ;;  %v20750_v50 = vld [vmem:[#allocation29 + $0x9c0] ss:$16 sps:$4 sm:$0xff]   ;;  %v13879_v55 = vld [vmem:[#allocation32 + $0x3e8] sm:$0xff] }
0x1897   :  { %13370 = vmatprep.subr.bf16.mxu1 %v20671_v35  ;;  %v20753_v35 = vld [vmem:[#allocation29 + $0x9c8] ss:$16 sps:$4 sm:$0xff]  }
0x189b   :  { %16922 = vmatmul.mubr.msk.bf16.vlgmr.msra.gmra.mrb[84].mxu0 %vm10369_vm3, %v12429_v43 }
0x189c   :  { %16924 = vmatmul.mubr.msk.bf16.vlgmr.msra.gmra.mrb[84].mxu1 %vm10369_vm3, %v12429_v43  ;;  %13289 = vmatpush1.bf16.msra.mxu0 %v20666_v38  ;;  %v20758_v43 = vld [vmem:[#allocation29 + $0x9e4] ss:$16 sps:$4 sm:$0xff]   ;;  %v20761_v38 = vld [vmem:[#allocation29 + $0x9ec] ss:$16 sps:$4 sm:$0xff]  }
0x189d   :  { %13371 = vmatpush1.bf16.msra.mxu1 %v20669_v34  ;;  %13290 = vmatprep.subr.bf16.mxu0 %v20674_v30  ;;  %v20756_v34 = vld [vmem:[#allocation29 + $0x9e0] ss:$16 sps:$4 sm:$0xff]   ;;  %v20759_v30 = vld [vmem:[#allocation29 + $0x9e8] ss:$16 sps:$4 sm:$0xff]  }
0x189e   :  { %13372 = vmatprep.subr.bf16.mxu1 %v20677_v32  ;;  %v20764_v32 = vld [vmem:[#allocation29 + $0xa04] ss:$16 sps:$4 sm:$0xff]  }
0x18a0   :  { %13291 = vmatpush1.bf16.msra.mxu0 %v20672_v46  ;;  %v20767_v46 = vld [vmem:[#allocation29 + $0xa0c] ss:$16 sps:$4 sm:$0xff]  }
0x18a1   :  { %13373 = vmatpush1.bf16.msra.mxu1 %v20675_v33  ;;  %13292 = vmatprep.subr.bf16.mxu0 %v20680_v18 }
0x18a2   :  { %13374 = vmatprep.subr.bf16.mxu1 %v20683_v7 }
0x18a4   :  { %13293 = vmatpush1.bf16.msra.mxu0 %v20678_v48 }
0x18a5   :  { %13375 = vmatpush1.bf16.msra.mxu1 %v20681_v31  ;;  %13294 = vmatprep.subr.bf16.mxu0 %v20686_v5  ;;  %v20762_v5 = vld [vmem:[#allocation29 + $0xa00] ss:$16 sps:$4 sm:$0xff]  }
0x18a6   :  { %13376 = vmatprep.subr.bf16.mxu1 %v20689_v15  ;;  %v20765_v15 = vld [vmem:[#allocation29 + $0xa08] ss:$16 sps:$4 sm:$0xff]  }
0x18a8   :  { %13295 = vmatpush1.bf16.msra.mxu0 %v20684_v45 }
0x18a9   :  { %13377 = vmatpush1.bf16.msra.mxu1 %v20687_v42  ;;  %13296 = vmatprep.subr.bf16.mxu0 %v20692_v8 }
0x18aa   :  { %13378 = vmatprep.subr.bf16.mxu1 %v20695_v54  ;;  %v20770_v54 = vld [vmem:[#allocation29 + $0xa24] ss:$16 sps:$4 sm:$0xff]  }
0x18ac   :  { %13297 = vmatpush1.bf16.msra.mxu0 %v20690_v40  ;;  %v20773_v40 = vld [vmem:[#allocation29 + $0xa2c] ss:$16 sps:$4 sm:$0xff]  }
0x18ad   :  { %13379 = vmatpush1.bf16.msra.mxu1 %v20693_v63  ;;  %13298 = vmatprep.subr.bf16.mxu0 %v20698_v14 }
0x18ae   :  { %13380 = vmatprep.subr.bf16.mxu1 %v20701_v39 }
0x18b0   :  { %13299 = vmatpush1.bf16.msra.mxu0 %v20696_v28  ;;  %v20768_v28 = vld [vmem:[#allocation29 + $0xa20] ss:$16 sps:$4 sm:$0xff]  }
0x18b1   :  { %13381 = vmatpush1.bf16.msra.mxu1 %v20699_v62  ;;  %13300 = vmatprep.subr.bf16.mxu0 %v20704_v57  ;;  %v20771_v62 = vld [vmem:[#allocation29 + $0xa28] ss:$16 sps:$4 sm:$0xff]   ;;  %v20776_v57 = vld [vmem:[#allocation29 + $0xa44] ss:$16 sps:$4 sm:$0xff]  }
0x18b2   :  { %13382 = vmatprep.subr.bf16.mxu1 %v20707_v12  ;;  %v20779_v12 = vld [vmem:[#allocation29 + $0xa4c] ss:$16 sps:$4 sm:$0xff]  }
0x18b4   :  { %13301 = vmatpush1.bf16.msra.mxu0 %v20702_v52  ;;  %v20774_v52 = vld [vmem:[#allocation29 + $0xa40] ss:$16 sps:$4 sm:$0xff]  }
0x18b5   :  { %13383 = vmatpush1.bf16.msra.mxu1 %v20705_v16  ;;  %13302 = vmatprep.subr.bf16.mxu0 %v20710_v2  ;;  %v20777_v16 = vld [vmem:[#allocation29 + $0xa48] ss:$16 sps:$4 sm:$0xff]   ;;  %v20782_v2 = vld [vmem:[#allocation29 + $0xa64] ss:$16 sps:$4 sm:$0xff]  }
0x18b6   :  { %13384 = vmatprep.subr.bf16.mxu1 %v20713_v9  ;;  %v20785_v9 = vld [vmem:[#allocation29 + $0xa6c] ss:$16 sps:$4 sm:$0xff]  }
0x18b8   :  { %13303 = vmatpush1.bf16.msra.mxu0 %v20708_v44  ;;  %v20780_v44 = vld [vmem:[#allocation29 + $0xa60] ss:$16 sps:$4 sm:$0xff]  }
0x18b9   :  { %13385 = vmatpush1.bf16.msra.mxu1 %v20711_v10  ;;  %13304 = vmatprep.subr.bf16.mxu0 %v20716_v17  ;;  %v20783_v10 = vld [vmem:[#allocation29 + $0xa68] ss:$16 sps:$4 sm:$0xff]   ;;  %v20788_v17 = vld [vmem:[#allocation29 + $0xa84] ss:$16 sps:$4 sm:$0xff]  }
0x18ba   :  { %13386 = vmatprep.subr.bf16.mxu1 %v20719_v60  ;;  %v20791_v60 = vld [vmem:[#allocation29 + $0xa8c] ss:$16 sps:$4 sm:$0xff]  }
0x18bc   :  { %13305 = vmatpush1.bf16.msra.mxu0 %v20714_v26  ;;  %v20786_v26 = vld [vmem:[#allocation29 + $0xa80] ss:$16 sps:$4 sm:$0xff]  }
0x18bd   :  { %13387 = vmatpush1.bf16.msra.mxu1 %v20717_v61  ;;  %13306 = vmatprep.subr.bf16.mxu0 %v20722_v11  ;;  %v20789_v61 = vld [vmem:[#allocation29 + $0xa88] ss:$16 sps:$4 sm:$0xff]   ;;  %v20794_v11 = vld [vmem:[#allocation29 + $0xaa4] ss:$16 sps:$4 sm:$0xff]  }
0x18be   :  { %13388 = vmatprep.subr.bf16.mxu1 %v20725_v1  ;;  %v20797_v1 = vld [vmem:[#allocation29 + $0xaac] ss:$16 sps:$4 sm:$0xff]  }
0x18c0   :  { %13307 = vmatpush1.bf16.msra.mxu0 %v20720_v49  ;;  %v20792_v49 = vld [vmem:[#allocation29 + $0xaa0] ss:$16 sps:$4 sm:$0xff]  }
0x18c1   :  { %13389 = vmatpush1.bf16.msra.mxu1 %v20723_v4  ;;  %13308 = vmatprep.subr.bf16.mxu0 %v20728_v27  ;;  %v20795_v4 = vld [vmem:[#allocation29 + $0xaa8] ss:$16 sps:$4 sm:$0xff]   ;;  %v20800_v27 = vld [vmem:[#allocation29 + $0xac4] ss:$16 sps:$4 sm:$0xff]  }
0x18c2   :  { %13390 = vmatprep.subr.bf16.mxu1 %v20731_v53  ;;  %v20803_v53 = vld [vmem:[#allocation29 + $0xacc] ss:$16 sps:$4 sm:$0xff]  }
0x18c4   :  { %13309 = vmatpush1.bf16.msra.mxu0 %v20726_v58  ;;  %v20798_v58 = vld [vmem:[#allocation29 + $0xac0] ss:$16 sps:$4 sm:$0xff]  }
0x18c5   :  { %13391 = vmatpush1.bf16.msra.mxu1 %v20729_v41  ;;  %13310 = vmatprep.subr.bf16.mxu0 %v20734_v21  ;;  %v20801_v41 = vld [vmem:[#allocation29 + $0xac8] ss:$16 sps:$4 sm:$0xff]   ;;  %v20806_v21 = vld [vmem:[#allocation29 + $0xae4] ss:$16 sps:$4 sm:$0xff]  }
0x18c6   :  { %13392 = vmatprep.subr.bf16.mxu1 %v20737_v19  ;;  %v20809_v19 = vld [vmem:[#allocation29 + $0xaec] ss:$16 sps:$4 sm:$0xff]  }
0x18c8   :  { %13311 = vmatpush1.bf16.msra.mxu0 %v20732_v29  ;;  %v20804_v29 = vld [vmem:[#allocation29 + $0xae0] ss:$16 sps:$4 sm:$0xff]  }
0x18c9   :  { %13393 = vmatpush1.bf16.msra.mxu1 %v20735_v20  ;;  %13312 = vmatprep.subr.bf16.mxu0 %v20740_v22  ;;  %v20807_v20 = vld [vmem:[#allocation29 + $0xae8] ss:$16 sps:$4 sm:$0xff]   ;;  %v20812_v22 = vld [vmem:[#allocation29 + $0xb04] ss:$16 sps:$4 sm:$0xff]  }
0x18ca   :  { %13394 = vmatprep.subr.bf16.mxu1 %v20743_v56  ;;  %v20815_v56 = vld [vmem:[#allocation29 + $0xb0c] ss:$16 sps:$4 sm:$0xff]  }
0x18cc   :  { %13313 = vmatpush1.bf16.msra.mxu0 %v20738_v36  ;;  %v20810_v36 = vld [vmem:[#allocation29 + $0xb00] ss:$16 sps:$4 sm:$0xff]  }
0x18cd   :  { %13395 = vmatpush1.bf16.msra.mxu1 %v20741_v13  ;;  %13314 = vmatprep.subr.bf16.mxu0 %v20746_v23  ;;  %v20813_v13 = vld [vmem:[#allocation29 + $0xb08] ss:$16 sps:$4 sm:$0xff]   ;;  %v20818_v23 = vld [vmem:[#allocation29 + $0xb24] ss:$16 sps:$4 sm:$0xff]  }
0x18ce   :  { %13396 = vmatprep.subr.bf16.mxu1 %v20749_v24  ;;  %v20821_v24 = vld [vmem:[#allocation29 + $0xb2c] ss:$16 sps:$4 sm:$0xff]  }
0x18d0   :  { %13315 = vmatpush1.bf16.msra.mxu0 %v20744_v3  ;;  %v20816_v3 = vld [vmem:[#allocation29 + $0xb20] ss:$16 sps:$4 sm:$0xff]  }
0x18d1   :  { %13397 = vmatpush1.bf16.msra.mxu1 %v20747_v0  ;;  %13316 = vmatprep.subr.bf16.mxu0 %v20752_v25  ;;  %v20819_v0 = vld [vmem:[#allocation29 + $0xb28] ss:$16 sps:$4 sm:$0xff]   ;;  %v20824_v25 = vld [vmem:[#allocation29 + $0xb44] ss:$16 sps:$4 sm:$0xff]  }
0x18d2   :  { %13398 = vmatprep.subr.bf16.mxu1 %v20755_v59  ;;  %v20827_v59 = vld [vmem:[#allocation29 + $0xb4c] ss:$16 sps:$4 sm:$0xff]  }
0x18d4   :  { %13317 = vmatpush1.bf16.msra.mxu0 %v20750_v50  ;;  %v20822_v50 = vld [vmem:[#allocation29 + $0xb40] ss:$16 sps:$4 sm:$0xff]  }
0x18d5   :  { %13399 = vmatpush1.bf16.msra.mxu1 %v20753_v35  ;;  %13318 = vmatprep.subr.bf16.mxu0 %v20758_v43  ;;  %v20825_v35 = vld [vmem:[#allocation29 + $0xb48] ss:$16 sps:$4 sm:$0xff]   ;;  %v20830_v43 = vld [vmem:[#allocation29 + $0xb64] ss:$16 sps:$4 sm:$0xff]  }
0x18d6   :  { %13400 = vmatprep.subr.bf16.mxu1 %v20761_v38  ;;  %v20833_v38 = vld [vmem:[#allocation29 + $0xb6c] ss:$16 sps:$4 sm:$0xff]  }
0x18d8   :  { %13319 = vmatpush1.bf16.msra.mxu0 %v20756_v34  ;;  %v20828_v34 = vld [vmem:[#allocation29 + $0xb60] ss:$16 sps:$4 sm:$0xff]  }
0x18d9   :  { %13401 = vmatpush1.bf16.msra.mxu1 %v20759_v30  ;;  %13329 = vmatprep.subr.bf16.mxu0 %v20764_v32  ;;  %v20831_v30 = vld [vmem:[#allocation29 + $0xb68] ss:$16 sps:$4 sm:$0xff]   ;;  %v20836_v32 = vld [vmem:[#allocation29 + $0xb84] ss:$16 sps:$4 sm:$0xff]  }
0x18da   :  { %13411 = vmatprep.subr.bf16.mxu1 %v20767_v46  ;;  %v20839_v46 = vld [vmem:[#allocation29 + $0xb8c] ss:$16 sps:$4 sm:$0xff]  }
0x196e   :  { %v12467_v33 = vpop.f32.mrb[84].mxu0 }
0x196f   :  { %v12469_v18 = vpop.f32.mrb[85].mxu0  ;;  %v23198_v7 = vpop.f32.mrb[84].mxu1  ;;  %v12515_v42 = vpack.c.bf16 %v12467_v33, %v12467_v33  ;;  %v20834_v33 = vld [vmem:[#allocation29 + $0xb80] ss:$16 sps:$4 sm:$0xff]  }
0x1970   :  { %v12516_v48 = vpack.c.bf16 %v12469_v18, %v12469_v18  ;;  %v12471_v31 = vpop.f32.mrb[86].mxu0  ;;  %v12510_v45 = vpop.f32.mrb[85].mxu1  ;;  %v20837_v18 = vld [vmem:[#allocation29 + $0xb88] ss:$16 sps:$4 sm:$0xff]  }
0x1971   :  { %v12472_v8 = vpop.f32.mrb[87].mxu0  ;;  %v12512_v63 = vpop.f32.mrb[86].mxu1  ;;  %v12518_v14 = vpack.c.bf16 %v12510_v45, %v12510_v45  ;;  %v20845_v31 = vld [vmem:[#allocation29 + $0xbac] ss:$16 sps:$4 sm:$0xff]   ;;  %v20848_v45 = vld [vmem:[#allocation29 + $0xbc4] ss:$16 sps:$4 sm:$0xff]  }
0x1972   :  { %13320 = vmatprep.mubr.bf16.mxu0 %v12516_v48  ;;  %13402 = vmatprep.mubr.bf16.mxu1 %v12516_v48  ;;  %v12513_v39 = vpop.f32.mrb[87].mxu1  ;;  %v20842_v48 = vld [vmem:[#allocation29 + $0xba4] ss:$16 sps:$4 sm:$0xff]   ;;  %v20846_v8 = vld [vmem:[#allocation29 + $0xbc0] ss:$16 sps:$4 sm:$0xff]  }
0x1973   :  { %13321 = vmatmul.mubr.bf16.vlgmr.msra.gmra.mrb[80].mxu0 %v12515_v42  ;;  %13403 = vmatmul.mubr.bf16.vlgmr.msra.gmra.mrb[80].mxu1 %v12515_v42  ;;  %v20851_v42 = vld [vmem:[#allocation29 + $0xbcc] ss:$16 sps:$4 sm:$0xff]  }
0x1974   :  { %13330 = vmatpush1.bf16.msra.mxu0 %v20762_v5  ;;  %13412 = vmatpush1.bf16.msra.mxu1 %v20765_v15  ;;  %v20840_v5 = vld [vmem:[#allocation29 + $0xba0] ss:$16 sps:$4 sm:$0xff]   ;;  %v20843_v15 = vld [vmem:[#allocation29 + $0xba8] ss:$16 sps:$4 sm:$0xff]   ;;  %v20857_v63 = vld [vmem:[#allocation29 + $0xbec] ss:$16 sps:$4 sm:$0xff]  }
0x1975   :  { %13331 = vmatprep.subr.bf16.mxu0 %v20770_v54  ;;  %13413 = vmatprep.subr.bf16.mxu1 %v20773_v40  ;;  %v20849_v54 = vld [vmem:[#allocation29 + $0xbc8] ss:$16 sps:$4 sm:$0xff]   ;;  %v20854_v40 = vld [vmem:[#allocation29 + $0xbe4] ss:$16 sps:$4 sm:$0xff]  }
0x1976   :  { %13361 = vmatprep.mubr.bf16.mxu0 %v12518_v14  ;;  %13443 = vmatprep.mubr.bf16.mxu1 %v12518_v14  ;;  %v13485_v14 = vld [vmem:[#allocation31 + $0x8] sm:$0xff]  ;;  %v13487_v39 = vld [vmem:[#allocation31 + $0x18] sm:$0xff] }
0x1978   :  { %13332 = vmatpush1.bf16.msra.mxu0 %v20768_v28  ;;  %13414 = vmatpush1.bf16.msra.mxu1 %v20771_v62  ;;  %v20852_v28 = vld [vmem:[#allocation29 + $0xbe0] ss:$16 sps:$4 sm:$0xff]   ;;  %v20855_v62 = vld [vmem:[#allocation29 + $0xbe8] ss:$16 sps:$4 sm:$0xff]  }
0x1979   :  { %13333 = vmatprep.subr.bf16.mxu0 %v20776_v57  ;;  %13415 = vmatprep.subr.bf16.mxu1 %v20779_v12  ;;  %v23200_v57 = vpack.c.bf16 %v13487_v39, %v13485_v14  ;;  %v13484_v12 = vld [vmem:[#allocation31] sm:$0xff] }
0x197a   :  { %v13520_v39 = vld [vmem:[#allocation31 + $0x120] sm:$0xff] }
0x197c   :  { %13334 = vmatpush1.bf16.msra.mxu0 %v20774_v52  ;;  %13416 = vmatpush1.bf16.msra.mxu1 %v20777_v16  ;;  %v13486_v52 = vld [vmem:[#allocation31 + $0x10] sm:$0xff]  ;;  %v13489_v16 = vld [vmem:[#allocation31 + $0x28] sm:$0xff] }
0x197d   :  { %13335 = vmatprep.subr.bf16.mxu0 %v20782_v2  ;;  %13417 = vmatprep.subr.bf16.mxu1 %v20785_v9  ;;  %v13491_v2 = vld [vmem:[#allocation31 + $0x38] sm:$0xff]  ;;  %v23202_v9 = vpack.c.bf16 %v13486_v52, %v13484_v12 }
0x197e   :  { %v13527_v12 = vld [vmem:[#allocation31 + $0x158] sm:$0xff] }
0x1980   :  { %13336 = vmatpush1.bf16.msra.mxu0 %v20780_v44  ;;  %13418 = vmatpush1.bf16.msra.mxu1 %v20783_v10  ;;  %v12517_v44 = vpack.c.bf16 %v23198_v7, %v23198_v7  ;;  %v23207_v10 = vpack.c.bf16 %v13491_v2, %v13489_v16  ;;  %v13494_v7 = vld [vmem:[#allocation31 + $0x50] sm:$0xff]  ;;  %v13524_v2 = vld [vmem:[#allocation31 + $0x140] sm:$0xff] }
0x1981   :  { %13337 = vmatprep.subr.bf16.mxu0 %v20788_v17  ;;  %13419 = vmatprep.subr.bf16.mxu1 %v20791_v60  ;;  %v13488_v17 = vld [vmem:[#allocation31 + $0x20] sm:$0xff]  ;;  %v13490_v60 = vld [vmem:[#allocation31 + $0x30] sm:$0xff] }
0x1984   :  { %13338 = vmatpush1.bf16.msra.mxu0 %v20786_v26  ;;  %13420 = vmatpush1.bf16.msra.mxu1 %v20789_v61  ;;  %v13493_v26 = vld [vmem:[#allocation31 + $0x48] sm:$0xff]  ;;  %v13495_v61 = vld [vmem:[#allocation31 + $0x58] sm:$0xff] }
0x1985   :  { %13339 = vmatprep.subr.bf16.mxu0 %v20794_v11  ;;  %13421 = vmatprep.subr.bf16.mxu1 %v20797_v1  ;;  %v23210_v11 = vpack.c.bf16 %v13490_v60, %v13488_v17  ;;  %v23213_v1 = vpack.c.bf16 %v13495_v61, %v13493_v26  ;;  %v13529_v17 = vld [vmem:[#allocation31 + $0x168] sm:$0xff]  ;;  %v13531_v60 = vld [vmem:[#allocation31 + $0x178] sm:$0xff] }
0x1986   :  { %v23267_v61 = vpack.c.bf16 %v13531_v60, %v13529_v17  ;;  %v13758_v17 = vld [vmem:[#allocation32 + $0x20] sm:$0xff]  ;;  %v13763_v60 = vld [vmem:[#allocation32 + $0x48] sm:$0xff] }
0x1988   :  { %13340 = vmatpush1.bf16.msra.mxu0 %v20792_v49  ;;  %13422 = vmatpush1.bf16.msra.mxu1 %v20795_v4  ;;  %v13492_v49 = vld [vmem:[#allocation31 + $0x40] sm:$0xff]  ;;  %v13497_v4 = vld [vmem:[#allocation31 + $0x68] sm:$0xff] }
0x1989   :  { %13341 = vmatprep.subr.bf16.mxu0 %v20800_v27  ;;  %13423 = vmatprep.subr.bf16.mxu1 %v20803_v53  ;;  %v13499_v27 = vld [vmem:[#allocation31 + $0x78] sm:$0xff]  ;;  %v23216_v53 = vpack.c.bf16 %v13494_v7, %v13492_v49  ;;  %v13528_v49 = vld [vmem:[#allocation31 + $0x160] sm:$0xff]  ;;  %v13530_v7 = vld [vmem:[#allocation31 + $0x170] sm:$0xff] }
0x198c   :  { %13342 = vmatpush1.bf16.msra.mxu0 %v20798_v58  ;;  %13424 = vmatpush1.bf16.msra.mxu1 %v20801_v41  ;;  %v23219_v58 = vpack.c.bf16 %v13499_v27, %v13497_v4  ;;  %v13496_v41 = vld [vmem:[#allocation31 + $0x60] sm:$0xff]  ;;  %v13533_v4 = vld [vmem:[#allocation31 + $0x188] sm:$0xff]  ;;  %v13535_v27 = vld [vmem:[#allocation31 + $0x198] sm:$0xff] }
0x198d   :  { %13343 = vmatprep.subr.bf16.mxu0 %v20806_v21  ;;  %13425 = vmatprep.subr.bf16.mxu1 %v20809_v19  ;;  %v13498_v21 = vld [vmem:[#allocation31 + $0x70] sm:$0xff]  ;;  %v13501_v19 = vld [vmem:[#allocation31 + $0x88] sm:$0xff] }
0x1990   :  { %13344 = vmatpush1.bf16.msra.mxu0 %v20804_v29  ;;  %13426 = vmatpush1.bf16.msra.mxu1 %v20807_v20  ;;  %v13503_v29 = vld [vmem:[#allocation31 + $0x98] sm:$0xff]  ;;  %v23222_v20 = vpack.c.bf16 %v13498_v21, %v13496_v41  ;;  %v23270_v41 = vpack.c.bf16 %v13530_v7, %v13528_v49  ;;  %v23273_v21 = vpack.c.bf16 %v13535_v27, %v13533_v4  ;;  %v13767_v49 = vld [vmem:[#allocation32 + $0x68] sm:$0xff]  ;;  %v13762_v27 = vld [vmem:[#allocation32 + $0x40] sm:$0xff] }
0x1991   :  { %13345 = vmatprep.subr.bf16.mxu0 %v20812_v22  ;;  %13427 = vmatprep.subr.bf16.mxu1 %v20815_v56  ;;  %v23225_v22 = vpack.c.bf16 %v13503_v29, %v13501_v19  ;;  %v13500_v56 = vld [vmem:[#allocation31 + $0x80] sm:$0xff]  ;;  %v13534_v29 = vld [vmem:[#allocation31 + $0x190] sm:$0xff]  ;;  %v18403_v4 = vpack.c.bf16 %v13767_v49, %v13763_v60 }
0x1992   :  { %v13532_v19 = vld [vmem:[#allocation31 + $0x180] sm:$0xff] }
0x1994   :  { %13346 = vmatpush1.bf16.msra.mxu0 %v20810_v36  ;;  %13428 = vmatpush1.bf16.msra.mxu1 %v20813_v13  ;;  %v13502_v36 = vld [vmem:[#allocation31 + $0x90] sm:$0xff]  ;;  %v13505_v13 = vld [vmem:[#allocation31 + $0xa8] sm:$0xff] }
0x1995   :  { %13347 = vmatprep.subr.bf16.mxu0 %v20818_v23  ;;  %13429 = vmatprep.subr.bf16.mxu1 %v20821_v24  ;;  %v13507_v23 = vld [vmem:[#allocation31 + $0xb8] sm:$0xff]  ;;  %v23228_v24 = vpack.c.bf16 %v13502_v36, %v13500_v56  ;;  %v23277_v56 = vpack.c.bf16 %v13534_v29, %v13532_v19  ;;  %v13537_v36 = vld [vmem:[#allocation31 + $0x1a8] sm:$0xff]  ;;  %v13766_v19 = vld [vmem:[#allocation32 + $0x60] sm:$0xff] }
0x1996   :  { %v13771_v29 = vld [vmem:[#allocation32 + $0x88] sm:$0xff] }
0x1998   :  { %13348 = vmatpush1.bf16.msra.mxu0 %v20816_v3  ;;  %13430 = vmatpush1.bf16.msra.mxu1 %v20819_v0  ;;  %v23231_v3 = vpack.c.bf16 %v13507_v23, %v13505_v13  ;;  %v13504_v0 = vld [vmem:[#allocation31 + $0xa0] sm:$0xff]  ;;  %v13539_v13 = vld [vmem:[#allocation31 + $0x1b8] sm:$0xff] }
0x1999   :  { %13349 = vmatprep.subr.bf16.mxu0 %v20824_v25  ;;  %13431 = vmatprep.subr.bf16.mxu1 %v20827_v59  ;;  %v13506_v25 = vld [vmem:[#allocation31 + $0xb0] sm:$0xff]  ;;  %v13509_v59 = vld [vmem:[#allocation31 + $0xc8] sm:$0xff]  ;;  %v23280_v23 = vpack.c.bf16 %v13539_v13, %v13537_v36  ;;  %v18405_v13 = vpack.c.bf16 %v13766_v19, %v13762_v27 }
0x199a   :  { %v13775_v36 = vld [vmem:[#allocation32 + $0xa8] sm:$0xff] }
0x199b   :  { %v13803_v27 = vld [vmem:[#allocation32 + $0x188] sm:$0xff] }
0x199c   :  { %13350 = vmatpush1.bf16.msra.mxu0 %v20822_v50  ;;  %13432 = vmatpush1.bf16.msra.mxu1 %v20825_v35  ;;  %v13511_v50 = vld [vmem:[#allocation31 + $0xd8] sm:$0xff]  ;;  %v23234_v35 = vpack.c.bf16 %v13506_v25, %v13504_v0  ;;  %v13536_v0 = vld [vmem:[#allocation31 + $0x1a0] sm:$0xff]  ;;  %v13538_v25 = vld [vmem:[#allocation31 + $0x1b0] sm:$0xff] }
0x199d   :  { %13351 = vmatprep.subr.bf16.mxu0 %v20830_v43  ;;  %13433 = vmatprep.subr.bf16.mxu1 %v20833_v38  ;;  %v23237_v43 = vpack.c.bf16 %v13511_v50, %v13509_v59  ;;  %v13508_v38 = vld [vmem:[#allocation31 + $0xc0] sm:$0xff]  ;;  %v23282_v59 = vpack.c.bf16 %v13538_v25, %v13536_v0  ;;  %v13541_v50 = vld [vmem:[#allocation31 + $0x1c8] sm:$0xff]  ;;  %v18407_v0 = vpack.c.bf16 %v13775_v36, %v13771_v29 }
0x199e   :  { %v13770_v25 = vld [vmem:[#allocation32 + $0x80] sm:$0xff]  ;;  %v13807_v19 = vld [vmem:[#allocation32 + $0x1a8] sm:$0xff] }
0x199f   :  { %v18423_v36 = vpack.c.bf16 %v13807_v19, %v13803_v27 }
0x19a0   :  { %13352 = vmatpush1.bf16.msra.mxu0 %v20828_v34  ;;  %13434 = vmatpush1.bf16.msra.mxu1 %v20831_v30  ;;  %v13510_v34 = vld [vmem:[#allocation31 + $0xd0] sm:$0xff]  ;;  %v13513_v30 = vld [vmem:[#allocation31 + $0xe8] sm:$0xff] }
0x19a1   :  { %13353 = vmatprep.subr.bf16.mxu0 %v20836_v32  ;;  %13435 = vmatprep.subr.bf16.mxu1 %v20839_v46  ;;  %v13515_v32 = vld [vmem:[#allocation31 + $0xf8] sm:$0xff]  ;;  %v23240_v46 = vpack.c.bf16 %v13510_v34, %v13508_v38 }
0x19a2   :  { %v13543_v38 = vld [vmem:[#allocation31 + $0x1d8] sm:$0xff] }
0x19a3   :  { %v23286_v34 = vpack.c.bf16 %v13543_v38, %v13541_v50  ;;  %v13774_v50 = vld [vmem:[#allocation32 + $0xa0] sm:$0xff]  ;;  %v13779_v38 = vld [vmem:[#allocation32 + $0xc8] sm:$0xff] }
0x19a4   :  { %13354 = vmatpush1.bf16.msra.mxu0 %v20834_v33  ;;  %13436 = vmatpush1.bf16.msra.mxu1 %v20837_v18  ;;  %v23243_v33 = vpack.c.bf16 %v13515_v32, %v13513_v30  ;;  %v13512_v18 = vld [vmem:[#allocation31 + $0xe0] sm:$0xff]  ;;  %v13542_v32 = vld [vmem:[#allocation31 + $0x1d0] sm:$0xff] }
0x19a5   :  { %13355 = vmatprep.subr.bf16.mxu0 %v20842_v48  ;;  %13437 = vmatprep.subr.bf16.mxu1 %v20845_v31  ;;  %v13514_v48 = vld [vmem:[#allocation31 + $0xf0] sm:$0xff]  ;;  %v13517_v31 = vld [vmem:[#allocation31 + $0x108] sm:$0xff]  ;;  %v13540_v30 = vld [vmem:[#allocation31 + $0x1c0] sm:$0xff] }
0x19a8   :  { %13356 = vmatpush1.bf16.msra.mxu0 %v20840_v5  ;;  %13438 = vmatpush1.bf16.msra.mxu1 %v20843_v15  ;;  %v13519_v5 = vld [vmem:[#allocation31 + $0x118] sm:$0xff]  ;;  %v23246_v15 = vpack.c.bf16 %v13514_v48, %v13512_v18  ;;  %v23288_v18 = vpack.c.bf16 %v13542_v32, %v13540_v30  ;;  %v13545_v48 = vld [vmem:[#allocation31 + $0x1e8] sm:$0xff]  ;;  %v18409_v32 = vpack.c.bf16 %v13774_v50, %v13770_v25 }
0x19a9   :  { %13357 = vmatprep.subr.bf16.mxu0 %v20848_v45  ;;  %13439 = vmatprep.subr.bf16.mxu1 %v20851_v42  ;;  %v23249_v45 = vpack.c.bf16 %v13519_v5, %v13517_v31  ;;  %v13516_v42 = vld [vmem:[#allocation31 + $0x100] sm:$0xff]  ;;  %v13547_v31 = vld [vmem:[#allocation31 + $0x1f8] sm:$0xff]  ;;  %v13783_v30 = vld [vmem:[#allocation32 + $0xe8] sm:$0xff] }
0x19aa   :  { %v23292_v5 = vpack.c.bf16 %v13547_v31, %v13545_v48  ;;  %v18411_v48 = vpack.c.bf16 %v13783_v30, %v13779_v38  ;;  %v13778_v31 = vld [vmem:[#allocation32 + $0xc0] sm:$0xff]  ;;  %v13811_v25 = vld [vmem:[#allocation32 + $0x1c8] sm:$0xff] }
0x19ab   :  { %v13815_v50 = vld [vmem:[#allocation32 + $0x1e8] sm:$0xff] }
0x19ac   :  { %13358 = vmatpush1.bf16.msra.mxu0 %v20846_v8  ;;  %13440 = vmatpush1.bf16.msra.mxu1 %v20849_v54  ;;  %v13518_v8 = vld [vmem:[#allocation31 + $0x110] sm:$0xff]  ;;  %v13521_v54 = vld [vmem:[#allocation31 + $0x128] sm:$0xff]  ;;  %v18427_v30 = vpack.c.bf16 %v13815_v50, %v13811_v25 }
0x19ad   :  { %13359 = vmatprep.subr.bf16.mxu0 %v20854_v40  ;;  %13441 = vmatprep.subr.bf16.mxu1 %v20857_v63  ;;  %v13523_v40 = vld [vmem:[#allocation31 + $0x138] sm:$0xff]  ;;  %v23252_v63 = vpack.c.bf16 %v13518_v8, %v13516_v42  ;;  %v13544_v42 = vld [vmem:[#allocation31 + $0x1e0] sm:$0xff]  ;;  %v13546_v8 = vld [vmem:[#allocation31 + $0x1f0] sm:$0xff] }
0x19ae   :  { %v23255_v14 = vpack.c.bf16 %v13523_v40, %v13521_v54  ;;  %v23294_v54 = vpack.c.bf16 %v13546_v8, %v13544_v42  ;;  %v13549_v40 = vld [vmem:[#allocation31 + $0x208] sm:$0xff]  ;;  %v13782_v42 = vld [vmem:[#allocation32 + $0xe0] sm:$0xff] }
0x19af   :  { %v13787_v8 = vld [vmem:[#allocation32 + $0x108] sm:$0xff] }
0x19b0   :  { %13360 = vmatpush1.bf16.msra.mxu0 %v20852_v28  ;;  %13442 = vmatpush1.bf16.msra.mxu1 %v20855_v62  ;;  %v13522_v28 = vld [vmem:[#allocation31 + $0x130] sm:$0xff]  ;;  %v13525_v62 = vld [vmem:[#allocation31 + $0x148] sm:$0xff] }
0x19b1   :  { %18272 = vmatprep.subr.bf16.mxu0 %v23200_v57  ;;  %v23258_v52 = vpack.c.bf16 %v13522_v28, %v13520_v39  ;;  %v23261_v16 = vpack.c.bf16 %v13527_v12, %v13525_v62  ;;  %v13551_v39 = vld [vmem:[#allocation31 + $0x218] sm:$0xff]  ;;  %v13755_v62 = vld [vmem:[#allocation32 + $0x8] sm:$0xff] }
0x19b2   :  { %v23298_v28 = vpack.c.bf16 %v13551_v39, %v13549_v40  ;;  %v13759_v12 = vld [vmem:[#allocation32 + $0x28] sm:$0xff]  ;;  %v18413_v39 = vpack.c.bf16 %v13782_v42, %v13778_v31 }
0x19b3   :  { %13362 = vmatmul.mubr.bf16.vlgmr.msra.gmra.mrb[80].mxu0 %v12517_v44  ;;  %13444 = vmatmul.mubr.bf16.vlgmr.msra.gmra.mrb[80].mxu1 %v12517_v44  ;;  %v13526_v44 = vld [vmem:[#allocation31 + $0x150] sm:$0xff]  ;;  %v13791_v40 = vld [vmem:[#allocation32 + $0x128] sm:$0xff] }
0x19b4   :  { %18274 = vmatpush1.bf16.msra.mxu0 %v23202_v9  ;;  %v23264_v26 = vpack.c.bf16 %v13526_v44, %v13524_v2  ;;  %v13754_v2 = vld [vmem:[#allocation32] sm:$0xff]  ;;  %v18399_v44 = vpack.c.bf16 %v13759_v12, %v13755_v62  ;;  %v18415_v62 = vpack.c.bf16 %v13791_v40, %v13787_v8  ;;  %v13819_v31 = vld [vmem:[#allocation32 + $0x208] sm:$0xff] }
0x19b5   :  { %18276 = vmatprep.subr.bf16.mxu0 %v23207_v10  ;;  %v18401_v7 = vpack.c.bf16 %v13758_v17, %v13754_v2  ;;  %v13786_v12 = vld [vmem:[#allocation32 + $0x100] sm:$0xff]  ;;  %v13799_v17 = vld [vmem:[#allocation32 + $0x168] sm:$0xff] }
0x19b6   :  { %18400 = vmatprep.subr.bf16.mxu1 %v18399_v44  ;;  %v13790_v2 = vld [vmem:[#allocation32 + $0x120] sm:$0xff]  ;;  %v13795_v44 = vld [vmem:[#allocation32 + $0x148] sm:$0xff] }
0x19b7   :  { %18402 = vmatpush1.bf16.msra.mxu1 %v18401_v7  ;;  %v18417_v60 = vpack.c.bf16 %v13790_v2, %v13786_v12  ;;  %v18419_v49 = vpack.c.bf16 %v13799_v17, %v13795_v44  ;;  %v13794_v7 = vld [vmem:[#allocation32 + $0x140] sm:$0xff]  ;;  %v13823_v42 = vld [vmem:[#allocation32 + $0x228] sm:$0xff] }
0x19b8   :  { %18278 = vmatpush1.bf16.msra.mxu0 %v23210_v11  ;;  %18404 = vmatprep.subr.bf16.mxu1 %v18403_v4  ;;  %v13798_v4 = vld [vmem:[#allocation32 + $0x160] sm:$0xff]  ;;  %v18431_v40 = vpack.c.bf16 %v13823_v42, %v13819_v31  ;;  %v13827_v12 = vld [vmem:[#allocation32 + $0x248] sm:$0xff] }
0x19b9   :  { %18280 = vmatprep.subr.bf16.mxu0 %v23213_v1  ;;  %v18421_v29 = vpack.c.bf16 %v13798_v4, %v13794_v7  ;;  %v13831_v2 = vld [vmem:[#allocation32 + $0x268] sm:$0xff] }
0x19ba   :  { %v18435_v17 = vpack.c.bf16 %v13831_v2, %v13827_v12  ;;  %v13835_v7 = vld [vmem:[#allocation32 + $0x288] sm:$0xff] }
0x19bb   :  { %18406 = vmatpush1.bf16.msra.mxu1 %v18405_v13  ;;  %v13802_v13 = vld [vmem:[#allocation32 + $0x180] sm:$0xff]  ;;  %v13839_v4 = vld [vmem:[#allocation32 + $0x2a8] sm:$0xff] }
0x19bc   :  { %18282 = vmatpush1.bf16.msra.mxu0 %v23216_v53  ;;  %18408 = vmatprep.subr.bf16.mxu1 %v18407_v0  ;;  %v13806_v0 = vld [vmem:[#allocation32 + $0x1a0] sm:$0xff]  ;;  %v18439_v19 = vpack.c.bf16 %v13839_v4, %v13835_v7 }
0x19bd   :  { %18284 = vmatprep.subr.bf16.mxu0 %v23219_v58  ;;  %v18425_v38 = vpack.c.bf16 %v13806_v0, %v13802_v13  ;;  %v13843_v13 = vld [vmem:[#allocation32 + $0x2c8] sm:$0xff]  ;;  %v13858_v4 = vld [vmem:[#allocation32 + $0x340] sm:$0xff] }
0x19be   :  { %v13847_v0 = vld [vmem:[#allocation32 + $0x2e8] sm:$0xff] }
0x19bf   :  { %18410 = vmatpush1.bf16.msra.mxu1 %v18409_v32  ;;  %v13810_v32 = vld [vmem:[#allocation32 + $0x1c0] sm:$0xff]  ;;  %v18443_v50 = vpack.c.bf16 %v13847_v0, %v13843_v13 }
0x19c0   :  { %18286 = vmatpush1.bf16.msra.mxu0 %v23222_v20  ;;  %18412 = vmatprep.subr.bf16.mxu1 %v18411_v48  ;;  %v13814_v48 = vld [vmem:[#allocation32 + $0x1e0] sm:$0xff] }
0x19c1   :  { %18288 = vmatprep.subr.bf16.mxu0 %v23225_v22  ;;  %v18429_v8 = vpack.c.bf16 %v13814_v48, %v13810_v32  ;;  %v13851_v32 = vld [vmem:[#allocation32 + $0x308] sm:$0xff] }
0x19c2   :  { %v13855_v48 = vld [vmem:[#allocation32 + $0x328] sm:$0xff] }
0x19c3   :  { %18414 = vmatpush1.bf16.msra.mxu1 %v18413_v39  ;;  %v13818_v39 = vld [vmem:[#allocation32 + $0x200] sm:$0xff]  ;;  %v18447_v42 = vpack.c.bf16 %v13855_v48, %v13851_v32 }
0x19c4   :  { %18290 = vmatpush1.bf16.msra.mxu0 %v23228_v24  ;;  %18416 = vmatprep.subr.bf16.mxu1 %v18415_v62  ;;  %v13822_v62 = vld [vmem:[#allocation32 + $0x220] sm:$0xff] }
0x19c5   :  { %18292 = vmatprep.subr.bf16.mxu0 %v23231_v3  ;;  %v18433_v44 = vpack.c.bf16 %v13822_v62, %v13818_v39  ;;  %v13859_v39 = vld [vmem:[#allocation32 + $0x348] sm:$0xff] }
0x19c6   :  { %v13863_v62 = vld [vmem:[#allocation32 + $0x368] sm:$0xff] }
0x19c7   :  { %18418 = vmatpush1.bf16.msra.mxu1 %v18417_v60  ;;  %v13826_v60 = vld [vmem:[#allocation32 + $0x240] sm:$0xff]  ;;  %v18451_v7 = vpack.c.bf16 %v13863_v62, %v13859_v39 }
0x19c8   :  { %18294 = vmatpush1.bf16.msra.mxu0 %v23234_v35  ;;  %18420 = vmatprep.subr.bf16.mxu1 %v18419_v49  ;;  %v13830_v49 = vld [vmem:[#allocation32 + $0x260] sm:$0xff] }
0x19c9   :  { %18296 = vmatprep.subr.bf16.mxu0 %v23237_v43  ;;  %v18437_v27 = vpack.c.bf16 %v13830_v49, %v13826_v60  ;;  %v13866_v62 = vld [vmem:[#allocation32 + $0x380] sm:$0xff] }
0x19cb   :  { %18422 = vmatpush1.bf16.msra.mxu1 %v18421_v29  ;;  %v13834_v29 = vld [vmem:[#allocation32 + $0x280] sm:$0xff] }
0x19cc   :  { %18298 = vmatpush1.bf16.msra.mxu0 %v23240_v46  ;;  %18424 = vmatprep.subr.bf16.mxu1 %v18423_v36  ;;  %v13838_v36 = vld [vmem:[#allocation32 + $0x2a0] sm:$0xff] }
0x19cd   :  { %18300 = vmatprep.subr.bf16.mxu0 %v23243_v33  ;;  %v18441_v25 = vpack.c.bf16 %v13838_v36, %v13834_v29 }
0x19cf   :  { %18426 = vmatpush1.bf16.msra.mxu1 %v18425_v38  ;;  %v13842_v38 = vld [vmem:[#allocation32 + $0x2c0] sm:$0xff] }
0x19d0   :  { %18302 = vmatpush1.bf16.msra.mxu0 %v23246_v15  ;;  %18428 = vmatprep.subr.bf16.mxu1 %v18427_v30  ;;  %v13846_v30 = vld [vmem:[#allocation32 + $0x2e0] sm:$0xff] }
0x19d1   :  { %18304 = vmatprep.subr.bf16.mxu0 %v23249_v45  ;;  %v18445_v31 = vpack.c.bf16 %v13846_v30, %v13842_v38 }
0x19d3   :  { %18430 = vmatpush1.bf16.msra.mxu1 %v18429_v8  ;;  %v13850_v8 = vld [vmem:[#allocation32 + $0x300] sm:$0xff] }
0x19d4   :  { %18306 = vmatpush1.bf16.msra.mxu0 %v23252_v63  ;;  %18432 = vmatprep.subr.bf16.mxu1 %v18431_v40  ;;  %v13854_v40 = vld [vmem:[#allocation32 + $0x320] sm:$0xff] }
0x19d5   :  { %18308 = vmatprep.subr.bf16.mxu0 %v23255_v14 }
0x19d7   :  { %18434 = vmatpush1.bf16.msra.mxu1 %v18433_v44  ;;  %v18449_v44 = vpack.c.bf16 %v13854_v40, %v13850_v8 }
0x19d8   :  { %18310 = vmatpush1.bf16.msra.mxu0 %v23258_v52  ;;  %18436 = vmatprep.subr.bf16.mxu1 %v18435_v17 }
0x19d9   :  { %18312 = vmatprep.subr.bf16.mxu0 %v23261_v16 }
0x19db   :  { %18438 = vmatpush1.bf16.msra.mxu1 %v18437_v27  ;;  %v13862_v27 = vld [vmem:[#allocation32 + $0x360] sm:$0xff] }
0x19dc   :  { %18314 = vmatpush1.bf16.msra.mxu0 %v23264_v26  ;;  %18440 = vmatprep.subr.bf16.mxu1 %v18439_v19  ;;  %v13867_v19 = vld [vmem:[#allocation32 + $0x388] sm:$0xff] }
0x19dd   :  { %18316 = vmatprep.subr.bf16.mxu0 %v23267_v61 }
0x19df   :  { %18442 = vmatpush1.bf16.msra.mxu1 %v18441_v25 }
0x19e0   :  { %18318 = vmatpush1.bf16.msra.mxu0 %v23270_v41  ;;  %18444 = vmatprep.subr.bf16.mxu1 %v18443_v50  ;;  %v13871_v50 = vld [vmem:[#allocation32 + $0x3a8] sm:$0xff] }
0x19e1   :  { %18320 = vmatprep.subr.bf16.mxu0 %v23273_v21  ;;  %v18455_v39 = vpack.c.bf16 %v13871_v50, %v13867_v19  ;;  %v13555_v50 = vld [vmem:[#allocation31 + $0x238] sm:$0xff] }
0x19e3   :  { %18446 = vmatpush1.bf16.msra.mxu1 %v18445_v31 }
0x19e4   :  { %18322 = vmatpush1.bf16.msra.mxu0 %v23277_v56  ;;  %18448 = vmatprep.subr.bf16.mxu1 %v18447_v42  ;;  %v18453_v42 = vpack.c.bf16 %v13862_v27, %v13858_v4  ;;  %v13878_v4 = vld [vmem:[#allocation32 + $0x3e0] sm:$0xff] }
0x19e5   :  { %18324 = vmatprep.subr.bf16.mxu0 %v23280_v23 }
0x19e7   :  { %18450 = vmatpush1.bf16.msra.mxu1 %v18449_v44  ;;  %v13874_v44 = vld [vmem:[#allocation32 + $0x3c0] sm:$0xff] }
0x19e8   :  { %18326 = vmatpush1.bf16.msra.mxu0 %v23282_v59  ;;  %18452 = vmatprep.subr.bf16.mxu1 %v18451_v7  ;;  %v13550_v7 = vld [vmem:[#allocation31 + $0x210] sm:$0xff] }
0x19e9   :  { %18328 = vmatprep.subr.bf16.mxu0 %v23286_v34 }
0x19eb   :  { %18454 = vmatpush1.bf16.msra.mxu1 %v18453_v42  ;;  %v13559_v42 = vld [vmem:[#allocation31 + $0x258] sm:$0xff] }
0x19ec   :  { %18330 = vmatpush1.bf16.msra.mxu0 %v23288_v18  ;;  %18456 = vmatprep.subr.bf16.mxu1 %v18455_v39  ;;  %v13561_v39 = vld [vmem:[#allocation31 + $0x268] sm:$0xff] }
0x19ed   :  { %18332 = vmatprep.subr.bf16.mxu0 %v23292_v5 }
0x19f0   :  { %18334 = vmatpush1.bf16.msra.mxu0 %v23294_v54 }
0x19f1   :  { %18336 = vmatprep.subr.bf16.mxu0 %v23298_v28 }
0x1a86   :  { %v23301_v12 = vpop.f32.mrb[80].mxu0  ;;  %v23303_v2 = vpop.f32.mrb[80].mxu1 }
0x1a87   :  { %23725 = vst [vmem:[#allocation78_spill] sm:$0xff] %v23301_v12  ;;  %23726 = vst [vmem:[#allocation79_spill] sm:$0xff] %v23303_v2  ;;  %v13456_v17 = vsel %vm10373_vm1, %v23301_v12, 0.0  ;;  %v23307_v60 = vpop.f32.mrb[81].mxu0  ;;  %v23309_v49 = vpop.f32.mrb[81].mxu1 }
0x1a88   :  { %23727 = vst [vmem:[#allocation81_spill] sm:$0xff] %v23307_v60  ;;  %23728 = vst [vmem:[#allocation71_spill] sm:$0xff] %v23309_v49  ;;  %v13457_v29 = vrot.slane %v13456_v17, 4  ;;  %v13463_v36 = vsel %vm10373_vm1, %v23307_v60, 0.0  ;;  %v13477_v13 = vsel %vm10373_vm1, %v23309_v49, 0.0  ;;  %v13367_v0 = vpop.f32.mrb[82].mxu0  ;;  %v18457_v60 = vpack.c.bf16 %v13870_v47, %v13866_v62 }
0x1a89   :  { %v13449_v25 = vpop.f32.mrb[82].mxu1  ;;  %v13464_v38 = vrot.slane %v13463_v36, 4  ;;  %v13478_v30 = vrot.slane %v13477_v13, 4  ;;  %v13368_v32 = vpop.f32.mrb[83].mxu0  ;;  %v13563_v62 = vld [vmem:[#allocation31 + $0x278] sm:$0xff] }
0x1a8a   :  { %v13450_v48 = vpop.f32.mrb[83].mxu1  ;;  %v13458_v31 = vadd.f32 %v13457_v29, %v13456_v17  ;;  %v18459_v17 = vpack.c.bf16 %v13879_v55, %v13875_v37  ;;  %v13548_v29 = vld [vmem:[#allocation31 + $0x200] sm:$0xff]  ;;  %18458 = vmatpush1.bf16.msra.mxu1 %v18457_v60  ;;  %v13554_v55 = vld [vmem:[#allocation31 + $0x230] sm:$0xff] }
0x1a8b   :  { %v13465_v8 = vadd.f32 %v13464_v38, %v13463_v36  ;;  %v13479_v40 = vadd.f32 %v13478_v30, %v13477_v13  ;;  %v13553_v13 = vld [vmem:[#allocation31 + $0x228] sm:$0xff]  ;;  %v18461_v38 = vpack.c.bf16 %v13878_v4, %v13874_v44  ;;  %v23315_v48 = vpack.c.bf16 %v13550_v7, %v13548_v29  ;;  %v13567_v4 = vld [vmem:[#allocation31 + $0x298] sm:$0xff]  ;;  %v13564_v7 = vld [vmem:[#allocation31 + $0x280] sm:$0xff] }
0x1a8c   :  { %v13459_v51 = vrot.slane %v13458_v31, 2  ;;  %18460 = vmatprep.subr.bf16.mxu1 %v18459_v17  ;;  %v23317_v47 = vpack.c.bf16 %v13555_v50, %v13553_v13  ;;  %v13562_v17 = vld [vmem:[#allocation31 + $0x270] sm:$0xff]  ;;  %v13565_v44 = vld [vmem:[#allocation31 + $0x288] sm:$0xff]  ;;  %v13571_v13 = vld [vmem:[#allocation31 + $0x2b8] sm:$0xff] }
0x1a8d   :  { %v13466_v49 = vrot.slane %v13465_v8, 2  ;;  %v13480_v0 = vrot.slane %v13479_v40, 2  ;;  %v23335_v29 = vpack.c.bf16 %v13567_v4, %v13565_v44  ;;  %v13578_v44 = vld [vmem:[#allocation31 + $0x2f0] sm:$0xff]  ;;  %v13581_v4 = vld [vmem:[#allocation31 + $0x308] sm:$0xff] }
0x1a8e   :  { %v13460_v25 = vadd.f32 %v13459_v51, %v13458_v31  ;;  %v13557_v31 = vld [vmem:[#allocation31 + $0x248] sm:$0xff]  ;;  %18462 = vmatpush1.bf16.msra.mxu1 %v18461_v38 }
0x1a8f   :  { %v13467_v12 = vadd.f32 %v13466_v49, %v13465_v8  ;;  %v13481_v32 = vadd.f32 %v13480_v0, %v13479_v40  ;;  %v13552_v49 = vld [vmem:[#allocation31 + $0x220] sm:$0xff]  ;;  %v13558_v40 = vld [vmem:[#allocation31 + $0x250] sm:$0xff] }
0x1a90   :  { %v13461_v27 = vrot.slane %v13460_v25, 1  ;;  %v23320_v60 = vpack.c.bf16 %v13554_v55, %v13552_v49  ;;  %v13556_v8 = vld [vmem:[#allocation31 + $0x240] sm:$0xff]  ;;  %v13573_v49 = vld [vmem:[#allocation31 + $0x2c8] sm:$0xff]  ;;  %v13575_v55 = vld [vmem:[#allocation31 + $0x2d8] sm:$0xff] }
0x1a91   :  { %v13468_v19 = vrot.slane %v13467_v12, 1  ;;  %v13482_v36 = vrot.slane %v13481_v32, 1  ;;  %v23326_v0 = vpack.c.bf16 %v13558_v40, %v13556_v8  ;;  %v13574_v8 = vld [vmem:[#allocation31 + $0x2d0] sm:$0xff]  ;;  %v13577_v40 = vld [vmem:[#allocation31 + $0x2e8] sm:$0xff] }
0x1a92   :  { %v13462_v51 = vadd.f32 %v13461_v27, %v13460_v25  ;;  %v23329_v25 = vpack.c.bf16 %v13563_v62, %v13561_v39  ;;  %v13579_v39 = vld [vmem:[#allocation31 + $0x2f8] sm:$0xff] }
0x1a93   :  { %v13469_v30 = vadd.f32 %v13468_v19, %v13467_v12  ;;  %v13483_v37 = vadd.f32 %v13482_v36, %v13481_v32  ;;  %v23323_v12 = vpack.c.bf16 %v13559_v42, %v13557_v31  ;;  %v13560_v32 = vld [vmem:[#allocation31 + $0x260] sm:$0xff]  ;;  %v13566_v19 = vld [vmem:[#allocation31 + $0x290] sm:$0xff]  ;;  %v13569_v36 = vld [vmem:[#allocation31 + $0x2a8] sm:$0xff]  ;;  %v23347_v31 = vpack.c.bf16 %v13575_v55, %v13573_v49 }
0x1a94   :  { %v23332_v27 = vpack.c.bf16 %v13562_v17, %v13560_v32  ;;  %v23338_v50 = vpack.c.bf16 %v13566_v19, %v13564_v7  ;;  %v23341_v38 = vpack.c.bf16 %v13571_v13, %v13569_v36  ;;  %v13572_v42 = vld [vmem:[#allocation31 + $0x2c0] sm:$0xff]  ;;  %v23353_v32 = vpack.c.bf16 %v13579_v39, %v13577_v40  ;;  %v13583_v7 = vld [vmem:[#allocation31 + $0x318] sm:$0xff]  ;;  %v13586_v40 = vld [vmem:[#allocation31 + $0x330] sm:$0xff] }
0x1a95   :  { %13676 = vmatprep.mubr.f32.mxu0 %v13469_v30  ;;  %v13568_v30 = vld [vmem:[#allocation31 + $0x2a0] sm:$0xff]  ;;  %v23350_v62 = vpack.c.bf16 %v13574_v8, %v13572_v42  ;;  %v23359_v36 = vpack.c.bf16 %v13583_v7, %v13581_v4  ;;  %v13587_v49 = vld [vmem:[#allocation31 + $0x338] sm:$0xff]  ;;  %v13589_v39 = vld [vmem:[#allocation31 + $0x348] sm:$0xff] }
0x1a96   :  { %13677 = vmatmul.mubr.f32.vlgmr.msra.gmra.mrb[70].mxu0 %v13462_v51  ;;  %v13570_v51 = vld [vmem:[#allocation31 + $0x2b0] sm:$0xff]  ;;  %23730 = vst [vmem:[#allocation72_spill] sm:$0xff] %v23353_v32  ;;  %v13576_v17 = vld [vmem:[#allocation31 + $0x2e0] sm:$0xff] }
0x1a97   :  { %18338 = vmatpush1.bf16.msra.mxu0 %v23315_v48  ;;  %13747 = vmatprep.mubr.f32.mxu0 %v13483_v37  ;;  %v23344_v37 = vpack.c.bf16 %v13570_v51, %v13568_v30  ;;  %23729 = vst [vmem:[#allocation82_spill] sm:$0xff] %v23350_v62  ;;  %v23356_v19 = vpack.c.bf16 %v13578_v44, %v13576_v17  ;;  %23732 = vst [vmem:[#allocation75_spill] sm:$0xff] %v23359_v36  ;;  %v13580_v13 = vld [vmem:[#allocation31 + $0x300] sm:$0xff]  ;;  %v13582_v30 = vld [vmem:[#allocation31 + $0x310] sm:$0xff] }
0x1a98   :  { %18340 = vmatprep.subr.bf16.mxu0 %v23317_v47  ;;  %v13585_v51 = vld [vmem:[#allocation31 + $0x328] sm:$0xff]  ;;  %v23362_v55 = vpack.c.bf16 %v13582_v30, %v13580_v13  ;;  %v13584_v8 = vld [vmem:[#allocation31 + $0x320] sm:$0xff]  ;;  %v13591_v17 = vld [vmem:[#allocation31 + $0x358] sm:$0xff] }
0x1a99   :  { %23731 = vst [vmem:[#allocation73_spill] sm:$0xff] %v23356_v19  ;;  %v23365_v42 = vpack.c.bf16 %v13587_v49, %v13585_v51  ;;  %v23368_v44 = vpack.c.bf16 %v13586_v40, %v13584_v8  ;;  %v23371_v4 = vpack.c.bf16 %v13591_v17, %v13589_v39  ;;  %v13588_v7 = vld [vmem:[#allocation31 + $0x340] sm:$0xff]  ;;  %v13593_v13 = vld [vmem:[#allocation31 + $0x368] sm:$0xff]  ;;  %v13595_v30 = vld [vmem:[#allocation31 + $0x378] sm:$0xff]  ;;  %v13470_v8 = vsel %vm10373_vm1, %v23303_v2, 0.0 }
0x1a9a   :  { %23733 = vst [vmem:[#allocation76_spill] sm:$0xff] %v23362_v55  ;;  %v23377_v49 = vpack.c.bf16 %v13595_v30, %v13593_v13  ;;  %v13597_v40 = vld [vmem:[#allocation31 + $0x388] sm:$0xff]  ;;  %v13599_v39 = vld [vmem:[#allocation31 + $0x398] sm:$0xff] }
0x1a9b   :  { %18342 = vmatpush1.bf16.msra.mxu0 %v23320_v60  ;;  %23734 = vst [vmem:[#allocation83_spill] sm:$0xff] %v23365_v42  ;;  %23735 = vst [vmem:[#allocation84_spill] sm:$0xff] %v23368_v44  ;;  %v13601_v13 = vld [vmem:[#allocation31 + $0x3a8] sm:$0xff]  ;;  %v13603_v30 = vld [vmem:[#allocation31 + $0x3b8] sm:$0xff] }
0x1a9c   :  { %18344 = vmatprep.subr.bf16.mxu0 %v23323_v12  ;;  %23736 = vst [vmem:[#allocation85_spill] sm:$0xff] %v23371_v4  ;;  %23738 = vst [vmem:[#allocation87_spill] sm:$0xff] %v23377_v49 }
0x1a9f   :  { %18346 = vmatpush1.bf16.msra.mxu0 %v23326_v0 }
0x1aa0   :  { %18348 = vmatprep.subr.bf16.mxu0 %v23329_v25 }
0x1aa3   :  { %18350 = vmatpush1.bf16.msra.mxu0 %v23332_v27 }
0x1aa4   :  { %18352 = vmatprep.subr.bf16.mxu0 %v23335_v29 }
0x1aa7   :  { %18354 = vmatpush1.bf16.msra.mxu0 %v23338_v50 }
0x1aa8   :  { %18356 = vmatprep.subr.bf16.mxu0 %v23341_v38 }
0x1aab   :  { %18358 = vmatpush1.bf16.msra.mxu0 %v23344_v37 }
0x1aac   :  { %18360 = vmatprep.subr.bf16.mxu0 %v23347_v31 }
0x1aaf   :  { %18362 = vmatpush1.bf16.msra.mxu0 %v23350_v62  ;;  %v13607_v62 = vld [vmem:[#allocation31 + $0x3d8] sm:$0xff] }
0x1ab0   :  { %18364 = vmatprep.subr.bf16.mxu0 %v23353_v32  ;;  %v23391_v32 = vpack.c.bf16 %v13603_v30, %v13601_v13 }
0x1ab2   :  { %23740 = vst [vmem:[#allocation89_spill] sm:$0xff] %v23391_v32 }
0x1ab3   :  { %18366 = vmatpush1.bf16.msra.mxu0 %v23356_v19  ;;  %v13590_v19 = vld [vmem:[#allocation31 + $0x350] sm:$0xff] }
0x1ab4   :  { %18368 = vmatprep.subr.bf16.mxu0 %v23359_v36  ;;  %v23374_v51 = vpack.c.bf16 %v13590_v19, %v13588_v7  ;;  %v13592_v36 = vld [vmem:[#allocation31 + $0x360] sm:$0xff]  ;;  %v23385_v19 = vpack.c.bf16 %v13599_v39, %v13597_v40 }
0x1ab5   :  { %v13596_v7 = vld [vmem:[#allocation31 + $0x380] sm:$0xff] }
0x1ab6   :  { %23737 = vst [vmem:[#allocation86_spill] sm:$0xff] %v23374_v51  ;;  %23739 = vst [vmem:[#allocation88_spill] sm:$0xff] %v23385_v19 }
0x1ab7   :  { %18370 = vmatpush1.bf16.msra.mxu0 %v23362_v55  ;;  %v13594_v55 = vld [vmem:[#allocation31 + $0x370] sm:$0xff] }
0x1ab8   :  { %18372 = vmatprep.subr.bf16.mxu0 %v23365_v42  ;;  %v23382_v17 = vpack.c.bf16 %v13594_v55, %v13592_v36  ;;  %v13471_v42 = vrot.slane %v13470_v8, 4  ;;  %v13600_v36 = vld [vmem:[#allocation31 + $0x3a0] sm:$0xff]  ;;  %v13602_v55 = vld [vmem:[#allocation31 + $0x3b0] sm:$0xff] }
0x1ab9   :  { %v23394_v40 = vpack.c.bf16 %v13602_v55, %v13600_v36  ;;  %v13608_v36 = vld [vmem:[#allocation31 + $0x3e0] sm:$0xff]  ;;  %v13610_v55 = vld [vmem:[#allocation31 + $0x3f0] sm:$0xff] }
0x1aba   :  { %v13472_v2 = vadd.f32 %v13471_v42, %v13470_v8  ;;  %v13609_v42 = vld [vmem:[#allocation31 + $0x3e8] sm:$0xff]  ;;  %v13611_v8 = vld [vmem:[#allocation31 + $0x3f8] sm:$0xff] }
0x1abb   :  { %18374 = vmatpush1.bf16.msra.mxu0 %v23368_v44 }
0x1abc   :  { %18376 = vmatprep.subr.bf16.mxu0 %v23371_v4  ;;  %v13598_v4 = vld [vmem:[#allocation31 + $0x390] sm:$0xff]  ;;  %v13473_v39 = vrot.slane %v13472_v2, 2 }
0x1abd   :  { %v23388_v44 = vpack.c.bf16 %v13598_v4, %v13596_v7  ;;  %v13604_v4 = vld [vmem:[#allocation31 + $0x3c0] sm:$0xff]  ;;  %v13606_v7 = vld [vmem:[#allocation31 + $0x3d0] sm:$0xff] }
0x1abe   :  { %v23400_v13 = vpack.c.bf16 %v13606_v7, %v13604_v4  ;;  %v13474_v30 = vadd.f32 %v13473_v39, %v13472_v2  ;;  %v13796_v4 = vld [vmem:[#allocation32 + $0x150] sm:$0xff] }
0x1abf   :  { %18378 = vmatpush1.bf16.msra.mxu0 %v23374_v51  ;;  %v13605_v51 = vld [vmem:[#allocation31 + $0x3c8] sm:$0xff]  ;;  %v13800_v7 = vld [vmem:[#allocation32 + $0x170] sm:$0xff] }
0x1ac0   :  { %18380 = vmatprep.subr.bf16.mxu0 %v23377_v49  ;;  %v23397_v49 = vpack.c.bf16 %v13607_v62, %v13605_v51  ;;  %v13475_v62 = vrot.slane %v13474_v30, 1 }
0x1ac2   :  { %v13476_v51 = vadd.f32 %v13475_v62, %v13474_v30  ;;  %v18485_v30 = vpack.c.bf16 %v13800_v7, %v13796_v4  ;;  %v13808_v62 = vld [vmem:[#allocation32 + $0x1b0] sm:$0xff]  ;;  %v13861_v7 = vld [vmem:[#allocation32 + $0x358] sm:$0xff] }
0x1ac3   :  { %18382 = vmatpush1.bf16.msra.mxu0 %v23382_v17  ;;  %v13856_v4 = vld [vmem:[#allocation32 + $0x330] sm:$0xff] }
0x1ac4   :  { %18384 = vmatprep.subr.bf16.mxu0 %v23385_v19  ;;  %v23403_v19 = vpack.c.bf16 %v13611_v8, %v13609_v42  ;;  %v13805_v42 = vld [vmem:[#allocation32 + $0x198] sm:$0xff] }
0x1ac5   :  { %v13809_v8 = vld [vmem:[#allocation32 + $0x1b8] sm:$0xff] }
0x1ac7   :  { %18386 = vmatpush1.bf16.msra.mxu0 %v23388_v44 }
0x1ac8   :  { %18388 = vmatprep.subr.bf16.mxu0 %v23391_v32  ;;  %v23406_v32 = vpack.c.bf16 %v13610_v55, %v13608_v36  ;;  %v18487_v36 = vpack.c.bf16 %v13809_v8, %v13805_v42  ;;  %v13804_v55 = vld [vmem:[#allocation32 + $0x190] sm:$0xff]  ;;  %v13865_v42 = vld [vmem:[#allocation32 + $0x378] sm:$0xff] }
0x1acb   :  { %18390 = vmatpush1.bf16.msra.mxu0 %v23394_v40 }
0x1acc   :  { %18392 = vmatprep.subr.bf16.mxu0 %v23397_v49 }
0x1acf   :  { %18394 = vmatpush1.bf16.msra.mxu0 %v23400_v13 }
0x1ad0   :  { %18396 = vmatprep.subr.bf16.mxu0 %v23403_v19 }
0x1ad3   :  { %18398 = vmatpush1.bf16.msra.mxu0 %v23406_v32 }
0x1ad4   :  { %18528 = vmatprep.subr.bf16.mxu0 %v23200_v57  ;;  %v13757_v57 = vld [vmem:[#allocation32 + $0x18] sm:$0xff] }
0x1ad6   :  { %13748 = vmatmul.mubr.f32.vlgmr.msra.gmra.mrb[70].mxu0 %v13476_v51  ;;  %v13813_v51 = vld [vmem:[#allocation32 + $0x1d8] sm:$0xff] }
0x1ad7   :  { %18530 = vmatpush1.bf16.msra.mxu0 %v23202_v9  ;;  %v13761_v9 = vld [vmem:[#allocation32 + $0x38] sm:$0xff] }
0x1ad8   :  { %18532 = vmatprep.subr.bf16.mxu0 %v23207_v10  ;;  %v18463_v10 = vpack.c.bf16 %v13761_v9, %v13757_v57  ;;  %v13817_v57 = vld [vmem:[#allocation32 + $0x1f8] sm:$0xff]  ;;  %v18489_v9 = vpack.c.bf16 %v13808_v62, %v13804_v55  ;;  %v13864_v55 = vld [vmem:[#allocation32 + $0x370] sm:$0xff] }
0x1ad9   :  { %v13869_v62 = vld [vmem:[#allocation32 + $0x398] sm:$0xff] }
0x1ada   :  { %18464 = vmatprep.subr.bf16.mxu1 %v18463_v10  ;;  %v18491_v10 = vpack.c.bf16 %v13817_v57, %v13813_v51  ;;  %v13873_v51 = vld [vmem:[#allocation32 + $0x3b8] sm:$0xff] }
0x1adb   :  { %18534 = vmatpush1.bf16.msra.mxu0 %v23210_v11  ;;  %v13756_v11 = vld [vmem:[#allocation32 + $0x10] sm:$0xff] }
0x1adc   :  { %18536 = vmatprep.subr.bf16.mxu0 %v23213_v1  ;;  %v13760_v1 = vld [vmem:[#allocation32 + $0x30] sm:$0xff] }
0x1adf   :  { %18538 = vmatpush1.bf16.msra.mxu0 %v23216_v53  ;;  %v13765_v53 = vld [vmem:[#allocation32 + $0x58] sm:$0xff] }
0x1ae0   :  { %18540 = vmatprep.subr.bf16.mxu0 %v23219_v58  ;;  %v13769_v58 = vld [vmem:[#allocation32 + $0x78] sm:$0xff] }
0x1ae3   :  { %18542 = vmatpush1.bf16.msra.mxu0 %v23222_v20 }
0x1ae4   :  { %18544 = vmatprep.subr.bf16.mxu0 %v23225_v22  ;;  %v18465_v22 = vpack.c.bf16 %v13760_v1, %v13756_v11  ;;  %v13812_v11 = vld [vmem:[#allocation32 + $0x1d0] sm:$0xff] }
0x1ae5   :  { %v13816_v1 = vld [vmem:[#allocation32 + $0x1f0] sm:$0xff] }
0x1ae7   :  { %18546 = vmatpush1.bf16.msra.mxu0 %v23228_v24 }
0x1ae8   :  { %18548 = vmatprep.subr.bf16.mxu0 %v23231_v3  ;;  %v18467_v3 = vpack.c.bf16 %v13769_v58, %v13765_v53  ;;  %v13821_v53 = vld [vmem:[#allocation32 + $0x218] sm:$0xff] }
0x1ae9   :  { %v13825_v58 = vld [vmem:[#allocation32 + $0x238] sm:$0xff] }
0x1aeb   :  { %18550 = vmatpush1.bf16.msra.mxu0 %v23234_v35  ;;  %v13764_v35 = vld [vmem:[#allocation32 + $0x50] sm:$0xff] }
0x1aec   :  { %18552 = vmatprep.subr.bf16.mxu0 %v23237_v43  ;;  %v13768_v43 = vld [vmem:[#allocation32 + $0x70] sm:$0xff] }
0x1aef   :  { %18554 = vmatpush1.bf16.msra.mxu0 %v23240_v46  ;;  %v13773_v46 = vld [vmem:[#allocation32 + $0x98] sm:$0xff] }
0x1af0   :  { %18556 = vmatprep.subr.bf16.mxu0 %v23243_v33  ;;  %v13777_v33 = vld [vmem:[#allocation32 + $0xb8] sm:$0xff] }
0x1af3   :  { %18558 = vmatpush1.bf16.msra.mxu0 %v23246_v15  ;;  %v18469_v15 = vpack.c.bf16 %v13768_v43, %v13764_v35  ;;  %v13824_v35 = vld [vmem:[#allocation32 + $0x230] sm:$0xff]  ;;  %v13829_v43 = vld [vmem:[#allocation32 + $0x258] sm:$0xff] }
0x1af4   :  { %18560 = vmatprep.subr.bf16.mxu0 %v23249_v45  ;;  %v18471_v45 = vpack.c.bf16 %v13777_v33, %v13773_v46  ;;  %v13833_v46 = vld [vmem:[#allocation32 + $0x278] sm:$0xff] }
0x1af7   :  { %18562 = vmatpush1.bf16.msra.mxu0 %v23252_v63  ;;  %v13772_v63 = vld [vmem:[#allocation32 + $0x90] sm:$0xff] }
0x1af8   :  { %18564 = vmatprep.subr.bf16.mxu0 %v23255_v14  ;;  %v13776_v14 = vld [vmem:[#allocation32 + $0xb0] sm:$0xff] }
0x1afb   :  { %18566 = vmatpush1.bf16.msra.mxu0 %v23258_v52  ;;  %v13781_v52 = vld [vmem:[#allocation32 + $0xd8] sm:$0xff] }
0x1afc   :  { %18568 = vmatprep.subr.bf16.mxu0 %v23261_v16  ;;  %v13785_v16 = vld [vmem:[#allocation32 + $0xf8] sm:$0xff] }
0x1aff   :  { %18570 = vmatpush1.bf16.msra.mxu0 %v23264_v26  ;;  %v18473_v26 = vpack.c.bf16 %v13776_v14, %v13772_v63  ;;  %v13832_v63 = vld [vmem:[#allocation32 + $0x270] sm:$0xff]  ;;  %v13837_v14 = vld [vmem:[#allocation32 + $0x298] sm:$0xff] }
0x1b00   :  { %18572 = vmatprep.subr.bf16.mxu0 %v23267_v61  ;;  %v18475_v61 = vpack.c.bf16 %v13785_v16, %v13781_v52  ;;  %v13841_v52 = vld [vmem:[#allocation32 + $0x2b8] sm:$0xff] }
0x1b03   :  { %18574 = vmatpush1.bf16.msra.mxu0 %v23270_v41  ;;  %v13780_v41 = vld [vmem:[#allocation32 + $0xd0] sm:$0xff] }
0x1b04   :  { %18576 = vmatprep.subr.bf16.mxu0 %v23273_v21  ;;  %v13784_v21 = vld [vmem:[#allocation32 + $0xf0] sm:$0xff] }
0x1b07   :  { %18578 = vmatpush1.bf16.msra.mxu0 %v23277_v56  ;;  %v13789_v56 = vld [vmem:[#allocation32 + $0x118] sm:$0xff] }
0x1b08   :  { %18580 = vmatprep.subr.bf16.mxu0 %v23280_v23  ;;  %v13793_v23 = vld [vmem:[#allocation32 + $0x138] sm:$0xff] }
0x1b0b   :  { %18582 = vmatpush1.bf16.msra.mxu0 %v23282_v59  ;;  %v18477_v59 = vpack.c.bf16 %v13784_v21, %v13780_v41  ;;  %v13840_v41 = vld [vmem:[#allocation32 + $0x2b0] sm:$0xff]  ;;  %v13845_v21 = vld [vmem:[#allocation32 + $0x2d8] sm:$0xff] }
0x1b0c   :  { %18584 = vmatprep.subr.bf16.mxu0 %v23286_v34  ;;  %v18479_v34 = vpack.c.bf16 %v13793_v23, %v13789_v56  ;;  %v13849_v56 = vld [vmem:[#allocation32 + $0x2f8] sm:$0xff] }
0x1b0f   :  { %18586 = vmatpush1.bf16.msra.mxu0 %v23288_v18  ;;  %v13788_v18 = vld [vmem:[#allocation32 + $0x110] sm:$0xff] }
0x1b10   :  { %18588 = vmatprep.subr.bf16.mxu0 %v23292_v5  ;;  %v13792_v5 = vld [vmem:[#allocation32 + $0x130] sm:$0xff] }
0x1b11   :  { %v18481_v2 = vpack.c.bf16 %v13792_v5, %v13788_v18  ;;  %v13848_v18 = vld [vmem:[#allocation32 + $0x2f0] sm:$0xff]  ;;  %v13853_v5 = vld [vmem:[#allocation32 + $0x318] sm:$0xff] }
0x1b13   :  { %18590 = vmatpush1.bf16.msra.mxu0 %v23294_v54  ;;  %v13797_v54 = vld [vmem:[#allocation32 + $0x158] sm:$0xff] }
0x1b14   :  { %18592 = vmatprep.subr.bf16.mxu0 %v23298_v28  ;;  %v13801_v28 = vld [vmem:[#allocation32 + $0x178] sm:$0xff] }
0x1b15   :  { %v18483_v39 = vpack.c.bf16 %v13801_v28, %v13797_v54  ;;  %v13857_v54 = vld [vmem:[#allocation32 + $0x338] sm:$0xff] }
0x1ba9   :  { %v23443_v20 = vpop.f32.mrb[70].mxu0 }
0x1baa   :  { %v13751_v24 = vpop.f32.mrb[71].mxu0 }
0x1bab   :  { %13946 = vmatprep.mubr.f32.mxu1 %v13751_v24 }
0x1bac   :  { %13947 = vmatmul.mubr.f32.vlgmr.msra.gmra.mrb[70].mxu1 %v23443_v20 }
0x1bad   :  { %18466 = vmatpush1.bf16.msra.mxu1 %v18465_v22  ;;  %14017 = vmatprep.mubr.f32.mxu1 %v13751_v24  ;;  %v18493_v22 = vpack.c.bf16 %v13816_v1, %v13812_v11  ;;  %v18495_v24 = vpack.c.bf16 %v13825_v58, %v13821_v53  ;;  %v13872_v11 = vld [vmem:[#allocation32 + $0x3b0] sm:$0xff]  ;;  %v13877_v1 = vld [vmem:[#allocation32 + $0x3d8] sm:$0xff] }
0x1bae   :  { %18468 = vmatprep.subr.bf16.mxu1 %v18467_v3  ;;  %v13820_v3 = vld [vmem:[#allocation32 + $0x210] sm:$0xff]  ;;  %v13881_v53 = vld [vmem:[#allocation32 + $0x3f8] sm:$0xff] }
0x1baf   :  { %v18497_v33 = vpack.c.bf16 %v13824_v35, %v13820_v3  ;;  %v13880_v3 = vld [vmem:[#allocation32 + $0x3f0] sm:$0xff] }
0x1bb1   :  { %18470 = vmatpush1.bf16.msra.mxu1 %v18469_v15  ;;  %v18499_v15 = vpack.c.bf16 %v13833_v46, %v13829_v43  ;;  %v14221_v43 = vld [vmem:[#allocation34 + $0x8] sm:$0xff] }
0x1bb2   :  { %18472 = vmatprep.subr.bf16.mxu1 %v18471_v45  ;;  %v13828_v45 = vld [vmem:[#allocation32 + $0x250] sm:$0xff]  ;;  %v14225_v46 = vld [vmem:[#allocation34 + $0x28] sm:$0xff] }
0x1bb3   :  { %v18501_v16 = vpack.c.bf16 %v13832_v63, %v13828_v45  ;;  %v14224_v45 = vld [vmem:[#allocation34 + $0x20] sm:$0xff]  ;;  %v14229_v63 = vld [vmem:[#allocation34 + $0x48] sm:$0xff] }
0x1bb5   :  { %18474 = vmatpush1.bf16.msra.mxu1 %v18473_v26  ;;  %v18503_v26 = vpack.c.bf16 %v13841_v52, %v13837_v14  ;;  %v14233_v14 = vld [vmem:[#allocation34 + $0x68] sm:$0xff] }
0x1bb6   :  { %18476 = vmatprep.subr.bf16.mxu1 %v18475_v61  ;;  %v13836_v61 = vld [vmem:[#allocation32 + $0x290] sm:$0xff] }
0x1bb7   :  { %v18505_v23 = vpack.c.bf16 %v13840_v41, %v13836_v61  ;;  %v14232_v61 = vld [vmem:[#allocation34 + $0x60] sm:$0xff]  ;;  %v14237_v41 = vld [vmem:[#allocation34 + $0x88] sm:$0xff] }
0x1bb9   :  { %18478 = vmatpush1.bf16.msra.mxu1 %v18477_v59  ;;  %v18507_v59 = vpack.c.bf16 %v13849_v56, %v13845_v21  ;;  %v14241_v21 = vld [vmem:[#allocation34 + $0xa8] sm:$0xff] }
0x1bba   :  { %18480 = vmatprep.subr.bf16.mxu1 %v18479_v34  ;;  %v13844_v34 = vld [vmem:[#allocation32 + $0x2d0] sm:$0xff] }
0x1bbb   :  { %v18509_v28 = vpack.c.bf16 %v13848_v18, %v13844_v34  ;;  %v14245_v34 = vld [vmem:[#allocation34 + $0xc8] sm:$0xff] }
0x1bbc   :  { %v14249_v18 = vld [vmem:[#allocation34 + $0xe8] sm:$0xff] }
0x1bbd   :  { %18482 = vmatpush1.bf16.msra.mxu1 %v18481_v2  ;;  %v18511_v2 = vpack.c.bf16 %v13857_v54, %v13853_v5  ;;  %v18667_v54 = vpack.c.bf16 %v14249_v18, %v14245_v34 }
0x1bbe   :  { %18484 = vmatprep.subr.bf16.mxu1 %v18483_v39  ;;  %v13852_v39 = vld [vmem:[#allocation32 + $0x310] sm:$0xff] }
0x1bbf   :  { %v18513_v8 = vpack.c.bf16 %v13856_v4, %v13852_v39  ;;  %v14253_v39 = vld [vmem:[#allocation34 + $0x108] sm:$0xff] }
0x1bc0   :  { %v14257_v4 = vld [vmem:[#allocation34 + $0x128] sm:$0xff] }
0x1bc1   :  { %18486 = vmatpush1.bf16.msra.mxu1 %v18485_v30  ;;  %v18515_v30 = vpack.c.bf16 %v13865_v42, %v13861_v7  ;;  %v18671_v42 = vpack.c.bf16 %v14257_v4, %v14253_v39 }
0x1bc2   :  { %18488 = vmatprep.subr.bf16.mxu1 %v18487_v36  ;;  %v13860_v36 = vld [vmem:[#allocation32 + $0x350] sm:$0xff] }
0x1bc3   :  { %v18517_v57 = vpack.c.bf16 %v13864_v55, %v13860_v36  ;;  %v14261_v36 = vld [vmem:[#allocation34 + $0x148] sm:$0xff] }
0x1bc4   :  { %v14265_v55 = vld [vmem:[#allocation34 + $0x168] sm:$0xff] }
0x1bc5   :  { %18490 = vmatpush1.bf16.msra.mxu1 %v18489_v9  ;;  %v18519_v9 = vpack.c.bf16 %v13873_v51, %v13869_v62  ;;  %v18675_v51 = vpack.c.bf16 %v14265_v55, %v14261_v36  ;;  %v14321_v36 = vld [vmem:[#allocation34 + $0x328] sm:$0xff] }
0x1bc6   :  { %18492 = vmatprep.subr.bf16.mxu1 %v18491_v10  ;;  %v13868_v10 = vld [vmem:[#allocation32 + $0x390] sm:$0xff] }
0x1bc7   :  { %v18521_v58 = vpack.c.bf16 %v13872_v11, %v13868_v10  ;;  %v14269_v10 = vld [vmem:[#allocation34 + $0x188] sm:$0xff] }
0x1bc8   :  { %v14273_v11 = vld [vmem:[#allocation34 + $0x1a8] sm:$0xff] }
0x1bc9   :  { %18494 = vmatpush1.bf16.msra.mxu1 %v18493_v22  ;;  %v18523_v22 = vpack.c.bf16 %v13881_v53, %v13877_v1  ;;  %v18679_v53 = vpack.c.bf16 %v14273_v11, %v14269_v10 }
0x1bca   :  { %18496 = vmatprep.subr.bf16.mxu1 %v18495_v24  ;;  %v13876_v24 = vld [vmem:[#allocation32 + $0x3d0] sm:$0xff] }
0x1bcb   :  { %v18525_v35 = vpack.c.bf16 %v13880_v3, %v13876_v24  ;;  %v14277_v24 = vld [vmem:[#allocation34 + $0x1c8] sm:$0xff] }
0x1bcc   :  { %v14281_v3 = vld [vmem:[#allocation34 + $0x1e8] sm:$0xff] }
0x1bcd   :  { %18498 = vmatpush1.bf16.msra.mxu1 %v18497_v33  ;;  %v14220_v33 = vld [vmem:[#allocation34] sm:$0xff] }
0x1bce   :  { %18500 = vmatprep.subr.bf16.mxu1 %v18499_v15  ;;  %v18655_v15 = vpack.c.bf16 %v14225_v46, %v14221_v43  ;;  %v18657_v52 = vpack.c.bf16 %v14224_v45, %v14220_v33  ;;  %v18683_v43 = vpack.c.bf16 %v14281_v3, %v14277_v24  ;;  %v14276_v46 = vld [vmem:[#allocation34 + $0x1c0] sm:$0xff]  ;;  %v14289_v45 = vld [vmem:[#allocation34 + $0x228] sm:$0xff] }
0x1bcf   :  { %v14280_v33 = vld [vmem:[#allocation34 + $0x1e0] sm:$0xff] }
0x1bd1   :  { %18502 = vmatpush1.bf16.msra.mxu1 %v18501_v16  ;;  %v18659_v16 = vpack.c.bf16 %v14233_v14, %v14229_v63  ;;  %v18685_v63 = vpack.c.bf16 %v14280_v33, %v14276_v46 }
0x1bd2   :  { %18504 = vmatprep.subr.bf16.mxu1 %v18503_v26  ;;  %v14228_v26 = vld [vmem:[#allocation34 + $0x40] sm:$0xff] }
0x1bd3   :  { %v18661_v56 = vpack.c.bf16 %v14232_v61, %v14228_v26  ;;  %v14293_v26 = vld [vmem:[#allocation34 + $0x248] sm:$0xff] }
0x1bd4   :  { %v14297_v61 = vld [vmem:[#allocation34 + $0x268] sm:$0xff] }
0x1bd5   :  { %18506 = vmatpush1.bf16.msra.mxu1 %v18505_v23  ;;  %v18663_v23 = vpack.c.bf16 %v14241_v21, %v14237_v41  ;;  %v18691_v21 = vpack.c.bf16 %v14297_v61, %v14293_v26 }
0x1bd6   :  { %18508 = vmatprep.subr.bf16.mxu1 %v18507_v59  ;;  %v14236_v59 = vld [vmem:[#allocation34 + $0x80] sm:$0xff] }
0x1bd9   :  { %18510 = vmatpush1.bf16.msra.mxu1 %v18509_v28  ;;  %v14244_v28 = vld [vmem:[#allocation34 + $0xc0] sm:$0xff] }
0x1bda   :  { %18512 = vmatprep.subr.bf16.mxu1 %v18511_v2  ;;  %v14248_v2 = vld [vmem:[#allocation34 + $0xe0] sm:$0xff] }
0x1bdb   :  { %v18669_v7 = vpack.c.bf16 %v14248_v2, %v14244_v28  ;;  %v14309_v28 = vld [vmem:[#allocation34 + $0x2c8] sm:$0xff] }
0x1bdc   :  { %v14313_v2 = vld [vmem:[#allocation34 + $0x2e8] sm:$0xff] }
0x1bdd   :  { %18514 = vmatpush1.bf16.msra.mxu1 %v18513_v8  ;;  %v14252_v8 = vld [vmem:[#allocation34 + $0x100] sm:$0xff]  ;;  %v18699_v4 = vpack.c.bf16 %v14313_v2, %v14309_v28 }
0x1bde   :  { %18516 = vmatprep.subr.bf16.mxu1 %v18515_v30  ;;  %v14256_v30 = vld [vmem:[#allocation34 + $0x120] sm:$0xff] }
0x1bdf   :  { %v18673_v62 = vpack.c.bf16 %v14256_v30, %v14252_v8  ;;  %v14317_v30 = vld [vmem:[#allocation34 + $0x308] sm:$0xff] }
0x1be0   :  { %v18703_v11 = vpack.c.bf16 %v14321_v36, %v14317_v30 }
0x1be1   :  { %18518 = vmatpush1.bf16.msra.mxu1 %v18517_v57  ;;  %v14260_v57 = vld [vmem:[#allocation34 + $0x140] sm:$0xff] }
0x1be2   :  { %18520 = vmatprep.subr.bf16.mxu1 %v18519_v9  ;;  %v14264_v9 = vld [vmem:[#allocation34 + $0x160] sm:$0xff] }
0x1be3   :  { %v18677_v1 = vpack.c.bf16 %v14264_v9, %v14260_v57  ;;  %v23741_v9 = vld [vmem:[#allocation78_spill] sm:$0xff] }
0x1be5   :  { %18522 = vmatpush1.bf16.msra.mxu1 %v18521_v58  ;;  %v14268_v58 = vld [vmem:[#allocation34 + $0x180] sm:$0xff] }
0x1be6   :  { %18524 = vmatprep.subr.bf16.mxu1 %v18523_v22  ;;  %v14272_v22 = vld [vmem:[#allocation34 + $0x1a0] sm:$0xff] }
0x1be9   :  { %18526 = vmatpush1.bf16.msra.mxu1 %v18525_v35  ;;  %v18681_v35 = vpack.c.bf16 %v14272_v22, %v14268_v58 }
0x1bea   :  { %18656 = vmatprep.subr.bf16.mxu1 %v18655_v15  ;;  %v14285_v15 = vld [vmem:[#allocation34 + $0x208] sm:$0xff] }
0x1beb   :  { %v18687_v14 = vpack.c.bf16 %v14289_v45, %v14285_v15 }
0x1bec   :  { %14018 = vmatmul.mubr.f32.vlgmr.msra.gmra.mrb[88].mxu1 %v23443_v20  ;;  %v14240_v20 = vld [vmem:[#allocation34 + $0xa0] sm:$0xff] }
0x1bed   :  { %18658 = vmatpush1.bf16.msra.mxu1 %v18657_v52  ;;  %v18665_v5 = vpack.c.bf16 %v14240_v20, %v14236_v59  ;;  %v14284_v52 = vld [vmem:[#allocation34 + $0x200] sm:$0xff]  ;;  %v14301_v59 = vld [vmem:[#allocation34 + $0x288] sm:$0xff] }
0x1bee   :  { %18660 = vmatprep.subr.bf16.mxu1 %v18659_v16  ;;  %v14288_v16 = vld [vmem:[#allocation34 + $0x220] sm:$0xff]  ;;  %v14305_v20 = vld [vmem:[#allocation34 + $0x2a8] sm:$0xff] }
0x1bef   :  { %v18689_v41 = vpack.c.bf16 %v14288_v16, %v14284_v52  ;;  %v18695_v18 = vpack.c.bf16 %v14305_v20, %v14301_v59  ;;  %v23754_v59 = vld [vmem:[#allocation71_spill] sm:$0xff] }
0x1bf1   :  { %18662 = vmatpush1.bf16.msra.mxu1 %v18661_v56  ;;  %v14292_v56 = vld [vmem:[#allocation34 + $0x240] sm:$0xff] }
0x1bf2   :  { %18664 = vmatprep.subr.bf16.mxu1 %v18663_v23  ;;  %v14296_v23 = vld [vmem:[#allocation34 + $0x260] sm:$0xff] }
0x1bf3   :  { %v18693_v34 = vpack.c.bf16 %v14296_v23, %v14292_v56  ;;  %v23753_v56 = vld [vmem:[#allocation79_spill] sm:$0xff] }
0x1bf5   :  { %18666 = vmatpush1.bf16.msra.mxu1 %v18665_v5  ;;  %v14300_v5 = vld [vmem:[#allocation34 + $0x280] sm:$0xff] }
0x1bf6   :  { %18668 = vmatprep.subr.bf16.mxu1 %v18667_v54  ;;  %v14304_v54 = vld [vmem:[#allocation34 + $0x2a0] sm:$0xff] }
0x1bf7   :  { %v18697_v39 = vpack.c.bf16 %v14304_v54, %v14300_v5 }
0x1bf9   :  { %18670 = vmatpush1.bf16.msra.mxu1 %v18669_v7  ;;  %v14308_v7 = vld [vmem:[#allocation34 + $0x2c0] sm:$0xff] }
0x1bfa   :  { %18672 = vmatprep.subr.bf16.mxu1 %v18671_v42  ;;  %v14312_v42 = vld [vmem:[#allocation34 + $0x2e0] sm:$0xff] }
0x1bfb   :  { %v18701_v57 = vpack.c.bf16 %v14312_v42, %v14308_v7 }
0x1bfd   :  { %18674 = vmatpush1.bf16.msra.mxu1 %v18673_v62 }
0x1bfe   :  { %18676 = vmatprep.subr.bf16.mxu1 %v18675_v51 }
0x1c01   :  { %18678 = vmatpush1.bf16.msra.mxu1 %v18677_v1  ;;  %v23742_v1 = vld [vmem:[#allocation81_spill] sm:$0xff] }
0x1c02   :  { %18680 = vmatprep.subr.bf16.mxu1 %v18679_v53 }
0x1c05   :  { %18682 = vmatpush1.bf16.msra.mxu1 %v18681_v35 }
0x1c06   :  { %18684 = vmatprep.subr.bf16.mxu1 %v18683_v43 }
0x1c09   :  { %18686 = vmatpush1.bf16.msra.mxu1 %v18685_v63 }
0x1c0a   :  { %18688 = vmatprep.subr.bf16.mxu1 %v18687_v14 }
0x1c0d   :  { %18690 = vmatpush1.bf16.msra.mxu1 %v18689_v41 }
0x1c0e   :  { %18692 = vmatprep.subr.bf16.mxu1 %v18691_v21 }
0x1c11   :  { %18694 = vmatpush1.bf16.msra.mxu1 %v18693_v34  ;;  %v23755_v34 = vld [vmem:[#allocation88_spill] sm:$0xff] }
0x1c12   :  { %18696 = vmatprep.subr.bf16.mxu1 %v18695_v18 }
0x1c15   :  { %18698 = vmatpush1.bf16.msra.mxu1 %v18697_v39  ;;  %v23756_v39 = vld [vmem:[#allocation89_spill] sm:$0xff] }
0x1c16   :  { %18700 = vmatprep.subr.bf16.mxu1 %v18699_v4 }
0x1c19   :  { %18702 = vmatpush1.bf16.msra.mxu1 %v18701_v57  ;;  %v23757_v57 = vmov 0  }
0x1c1a   :  { %18704 = vmatprep.subr.bf16.mxu1 %v18703_v11  ;;  %v14325_v11 = vld [vmem:[#allocation34 + $0x348] sm:$0xff] }
0x1c7f   :  { %v13948_v8 = vpop.f32.mrb[70].mxu1 }
0x1c80   :  { %v14027_v55 = vrot.slane %v13948_v8, %v23716_v6  ;;  %v13950_v62 = vpop.f32.mrb[71].mxu1 }
0x1c81   :  { %v14031_v51 = vrot.slane %v13950_v62, %v23716_v6 }
0x1c82   :  { %v23450_v10 = vsub.f32 %v23741_v9, %v14027_v55  ;;  %v14320_v9 = vld [vmem:[#allocation34 + $0x320] sm:$0xff] }
0x1c83   :  { %v23453_v53 = vsub.f32 %v23742_v1, %v14031_v51  ;;  %v14329_v1 = vld [vmem:[#allocation34 + $0x368] sm:$0xff] }
0x1c84   :  { %v14044_v58 = vmul.f32 %v23450_v10, %v23450_v10 }
0x1c85   :  { %v14045_v22 = vmul.f32 %v23453_v53, %v23453_v53 }
0x1c86   :  { %v14048_v24 = vsel %vm10373_vm1, %v14044_v58, 0.0  ;;  %v14324_v58 = vld [vmem:[#allocation34 + $0x340] sm:$0xff] }
0x1c87   :  { %v14049_v3 = vrot.slane %v14048_v24, 4  ;;  %v14055_v35 = vsel %vm10373_vm1, %v14045_v22, 0.0  ;;  %v14328_v22 = vld [vmem:[#allocation34 + $0x360] sm:$0xff] }
0x1c88   :  { %v14056_v43 = vrot.slane %v14055_v35, 4 }
0x1c89   :  { %v14050_v46 = vadd.f32 %v14049_v3, %v14048_v24  ;;  %v14333_v24 = vld [vmem:[#allocation34 + $0x388] sm:$0xff]  ;;  %v14332_v3 = vld [vmem:[#allocation34 + $0x380] sm:$0xff] }
0x1c8a   :  { %v14057_v33 = vadd.f32 %v14056_v43, %v14055_v35  ;;  %v14336_v43 = vld [vmem:[#allocation34 + $0x3a0] sm:$0xff] }
0x1c8b   :  { %v14051_v15 = vrot.slane %v14050_v46, 2 }
0x1c8c   :  { %v14058_v45 = vrot.slane %v14057_v33, 2 }
0x1c8d   :  { %v14052_v63 = vadd.f32 %v14051_v15, %v14050_v46  ;;  %v14341_v46 = vld [vmem:[#allocation34 + $0x3c8] sm:$0xff]  ;;  %v18713_v15 = vpack.c.bf16 %v14336_v43, %v14332_v3  ;;  %v14283_v3 = vld [vmem:[#allocation34 + $0x1f8] sm:$0xff] }
0x1c8e   :  { %v14059_v14 = vadd.f32 %v14058_v45, %v14057_v33  ;;  %v14345_v33 = vld [vmem:[#allocation34 + $0x3e8] sm:$0xff] }
0x1c8f   :  { %v14053_v52 = vrot.slane %v14052_v63, 1  ;;  %v18715_v45 = vpack.c.bf16 %v14345_v33, %v14341_v46  ;;  %v14278_v46 = vld [vmem:[#allocation34 + $0x1d0] sm:$0xff] }
0x1c90   :  { %v14060_v16 = vrot.slane %v14059_v14, 1  ;;  %v14282_v33 = vld [vmem:[#allocation34 + $0x1f0] sm:$0xff] }
0x1c91   :  { %v14054_v61 = vadd.f32 %v14053_v52, %v14052_v63  ;;  %v14340_v63 = vld [vmem:[#allocation34 + $0x3c0] sm:$0xff] }
0x1c92   :  { %v14061_v26 = vadd.f32 %v14060_v16, %v14059_v14  ;;  %v14344_v14 = vld [vmem:[#allocation34 + $0x3e0] sm:$0xff]  ;;  %v14223_v16 = vld [vmem:[#allocation34 + $0x18] sm:$0xff] }
0x1c93   :  { %v18717_v52 = vpack.c.bf16 %v14344_v14, %v14340_v63  ;;  %v18749_v63 = vpack.c.bf16 %v14282_v33, %v14278_v46  ;;  %v23758_v46 = vld [vmem:[#allocation77_spill] sm:$0xff] }
0x1c94   :  { %14140 = vmatprep.mubr.f32.mxu0 %v14061_v26  ;;  %v14227_v26 = vld [vmem:[#allocation34 + $0x38] sm:$0xff] }
0x1c95   :  { %14141 = vmatmul.mubr.f32.vlgmr.msra.gmra.mrb[88].mxu0 %v14054_v61  ;;  %v18719_v61 = vpack.c.bf16 %v14227_v26, %v14223_v16  ;;  %v14290_v16 = vld [vmem:[#allocation34 + $0x230] sm:$0xff]  ;;  %v14295_v26 = vld [vmem:[#allocation34 + $0x258] sm:$0xff] }
0x1c96   :  { %18594 = vmatpush1.bf16.msra.mxu0 %v23315_v48  ;;  %v23743_v48 = vld [vmem:[#allocation82_spill] sm:$0xff] }
0x1c97   :  { %18596 = vmatprep.subr.bf16.mxu0 %v23317_v47  ;;  %v23744_v47 = vld [vmem:[#allocation72_spill] sm:$0xff] }
0x1c9a   :  { %18598 = vmatpush1.bf16.msra.mxu0 %v23320_v60  ;;  %v23745_v60 = vld [vmem:[#allocation73_spill] sm:$0xff] }
0x1c9b   :  { %18600 = vmatprep.subr.bf16.mxu0 %v23323_v12  ;;  %v23746_v12 = vld [vmem:[#allocation75_spill] sm:$0xff] }
0x1c9e   :  { %18602 = vmatpush1.bf16.msra.mxu0 %v23326_v0  ;;  %v23747_v0 = vld [vmem:[#allocation76_spill] sm:$0xff] }
0x1c9f   :  { %18604 = vmatprep.subr.bf16.mxu0 %v23329_v25  ;;  %v23748_v25 = vld [vmem:[#allocation83_spill] sm:$0xff] }
0x1ca2   :  { %18606 = vmatpush1.bf16.msra.mxu0 %v23332_v27  ;;  %v23749_v27 = vld [vmem:[#allocation84_spill] sm:$0xff] }
0x1ca3   :  { %18608 = vmatprep.subr.bf16.mxu0 %v23335_v29  ;;  %v23750_v29 = vld [vmem:[#allocation85_spill] sm:$0xff] }
0x1ca6   :  { %18610 = vmatpush1.bf16.msra.mxu0 %v23338_v50  ;;  %v23751_v50 = vld [vmem:[#allocation86_spill] sm:$0xff] }
0x1ca7   :  { %18612 = vmatprep.subr.bf16.mxu0 %v23341_v38 }
0x1caa   :  { %18614 = vmatpush1.bf16.msra.mxu0 %v23344_v37  ;;  %v23752_v37 = vld [vmem:[#allocation87_spill] sm:$0xff] }
0x1cab   :  { %18616 = vmatprep.subr.bf16.mxu0 %v23347_v31 }
0x1cae   :  { %18618 = vmatpush1.bf16.msra.mxu0 %v23743_v48 }
0x1caf   :  { %18620 = vmatprep.subr.bf16.mxu0 %v23744_v47 }
0x1cb2   :  { %18622 = vmatpush1.bf16.msra.mxu0 %v23745_v60 }
0x1cb3   :  { %18624 = vmatprep.subr.bf16.mxu0 %v23746_v12 }
0x1cb6   :  { %18626 = vmatpush1.bf16.msra.mxu0 %v23747_v0  ;;  %v14222_v0 = vld [vmem:[#allocation34 + $0x10] sm:$0xff] }
0x1cb7   :  { %18628 = vmatprep.subr.bf16.mxu0 %v23748_v25  ;;  %v14226_v25 = vld [vmem:[#allocation34 + $0x30] sm:$0xff] }
0x1cba   :  { %18630 = vmatpush1.bf16.msra.mxu0 %v23749_v27  ;;  %v14231_v27 = vld [vmem:[#allocation34 + $0x58] sm:$0xff] }
0x1cbb   :  { %18632 = vmatprep.subr.bf16.mxu0 %v23750_v29  ;;  %v14235_v29 = vld [vmem:[#allocation34 + $0x78] sm:$0xff] }
0x1cbe   :  { %18634 = vmatpush1.bf16.msra.mxu0 %v23751_v50  ;;  %v18721_v50 = vpack.c.bf16 %v14226_v25, %v14222_v0  ;;  %v14303_v0 = vld [vmem:[#allocation34 + $0x298] sm:$0xff] }
0x1cbf   :  { %v14019_v38 = vpop.f32.mrb[88].mxu1  ;;  %18636 = vmatprep.subr.bf16.mxu0 %v23752_v37  ;;  %v18723_v37 = vpack.c.bf16 %v14235_v29, %v14231_v27  ;;  %v14307_v25 = vld [vmem:[#allocation34 + $0x2b8] sm:$0xff] }
0x1cc0   :  { %v14035_v31 = vrot.slane %v14019_v38, %v23716_v6  ;;  %v14021_v41 = vpop.f32.mrb[89].mxu1  ;;  %v18759_v29 = vpack.c.bf16 %v14307_v25, %v14303_v0  ;;  %v20863_v0 = vld [vmem:[#allocation38 + $0x214] ss:$8 sps:$4 sm:$0xff]   ;;  %v20861_v25 = vld [vmem:[#allocation38 + $0x210] ss:$8 sps:$4 sm:$0xff]  }
0x1cc1   :  { %v14039_v21 = vrot.slane %v14021_v41, %v23716_v6  ;;  %v14234_v41 = vld [vmem:[#allocation34 + $0x70] sm:$0xff] }
0x1cc2   :  { %v23486_v23 = vsub.f32 %v23753_v56, %v14035_v31  ;;  %18638 = vmatpush1.bf16.msra.mxu0 %v23382_v17  ;;  %v14230_v31 = vld [vmem:[#allocation34 + $0x50] sm:$0xff]  ;;  %v14239_v56 = vld [vmem:[#allocation34 + $0x98] sm:$0xff] }
0x1cc3   :  { %v23490_v20 = vsub.f32 %v23754_v59, %v14039_v21  ;;  %18640 = vmatprep.subr.bf16.mxu0 %v23755_v34  ;;  %v14243_v59 = vld [vmem:[#allocation34 + $0xb8] sm:$0xff]  ;;  %v18725_v34 = vpack.c.bf16 %v14234_v41, %v14230_v31 }
0x1cc4   :  { %v14046_v18 = vmul.f32 %v23486_v23, %v23486_v23  ;;  %v14315_v31 = vld [vmem:[#allocation34 + $0x2f8] sm:$0xff] }
0x1cc5   :  { %v14047_v5 = vmul.f32 %v23490_v20, %v23490_v20 }
0x1cc6   :  { %v14062_v54 = vsel %vm10373_vm1, %v14046_v18, 0.0  ;;  %18642 = vmatpush1.bf16.msra.mxu0 %v23388_v44  ;;  %v18727_v18 = vpack.c.bf16 %v14243_v59, %v14239_v56  ;;  %v14310_v59 = vld [vmem:[#allocation34 + $0x2d0] sm:$0xff] }
0x1cc7   :  { %v14063_v28 = vrot.slane %v14062_v54, 4  ;;  %v14069_v2 = vsel %vm10373_vm1, %v14047_v5, 0.0  ;;  %18644 = vmatprep.subr.bf16.mxu0 %v23756_v39  ;;  %v14238_v5 = vld [vmem:[#allocation34 + $0x90] sm:$0xff] }
0x1cc8   :  { %v14070_v17 = vrot.slane %v14069_v2, 4 }
0x1cc9   :  { %v14064_v4 = vadd.f32 %v14063_v28, %v14062_v54  ;;  %v14242_v54 = vld [vmem:[#allocation34 + $0xb0] sm:$0xff]  ;;  %v14247_v28 = vld [vmem:[#allocation34 + $0xd8] sm:$0xff] }
0x1cca   :  { %v14071_v7 = vadd.f32 %v14070_v17, %v14069_v2  ;;  %18646 = vmatpush1.bf16.msra.mxu0 %v23394_v40  ;;  %v14316_v40 = vld [vmem:[#allocation34 + $0x300] sm:$0xff]  ;;  %v14251_v2 = vld [vmem:[#allocation34 + $0xf8] sm:$0xff]  ;;  %v18729_v39 = vpack.c.bf16 %v14242_v54, %v14238_v5 }
0x1ccb   :  { %v14065_v42 = vrot.slane %v14064_v4, 2  ;;  %18648 = vmatprep.subr.bf16.mxu0 %v23397_v49  ;;  %v18705_v49 = vpack.c.bf16 %v14320_v9, %v14316_v40  ;;  %v18731_v17 = vpack.c.bf16 %v14251_v2, %v14247_v28  ;;  %v14323_v5 = vld [vmem:[#allocation34 + $0x338] sm:$0xff]  ;;  %v14318_v2 = vld [vmem:[#allocation34 + $0x310] sm:$0xff] }
0x1ccc   :  { %v14072_v8 = vrot.slane %v14071_v7, 2 }
0x1ccd   :  { %v14066_v30 = vadd.f32 %v14065_v42, %v14064_v4  ;;  %18706 = vmatpush1.bf16.msra.mxu1 %v18705_v49  ;;  %v14246_v4 = vld [vmem:[#allocation34 + $0xd0] sm:$0xff]  ;;  %v14255_v42 = vld [vmem:[#allocation34 + $0x118] sm:$0xff] }
0x1cce   :  { %18650 = vmatpush1.bf16.msra.mxu0 %v23400_v13  ;;  %v14073_v36 = vadd.f32 %v14072_v8, %v14071_v7  ;;  %v18707_v13 = vpack.c.bf16 %v14329_v1, %v14325_v11  ;;  %v14250_v7 = vld [vmem:[#allocation34 + $0xf0] sm:$0xff]  ;;  %v14259_v8 = vld [vmem:[#allocation34 + $0x138] sm:$0xff] }
0x1ccf   :  { %18652 = vmatprep.subr.bf16.mxu0 %v23403_v19  ;;  %v14067_v44 = vrot.slane %v14066_v30, 1  ;;  %v18709_v19 = vpack.c.bf16 %v14328_v22, %v14324_v58  ;;  %v14262_v49 = vld [vmem:[#allocation34 + $0x150] sm:$0xff]  ;;  %v14271_v1 = vld [vmem:[#allocation34 + $0x198] sm:$0xff] }
0x1cd0   :  { %v14074_v55 = vrot.slane %v14073_v36, 1  ;;  %18708 = vmatprep.subr.bf16.mxu1 %v18707_v13  ;;  %v14266_v11 = vld [vmem:[#allocation34 + $0x170] sm:$0xff]  ;;  %v14275_v13 = vld [vmem:[#allocation34 + $0x1b8] sm:$0xff] }
0x1cd1   :  { %v14068_v51 = vadd.f32 %v14067_v44, %v14066_v30  ;;  %18710 = vmatpush1.bf16.msra.mxu1 %v18709_v19  ;;  %v18733_v30 = vpack.c.bf16 %v14250_v7, %v14246_v4  ;;  %v14254_v44 = vld [vmem:[#allocation34 + $0x110] sm:$0xff]  ;;  %v18741_v58 = vpack.c.bf16 %v14266_v11, %v14262_v49  ;;  %v18743_v22 = vpack.c.bf16 %v14275_v13, %v14271_v1  ;;  %v14331_v4 = vld [vmem:[#allocation34 + $0x378] sm:$0xff] }
0x1cd2   :  { %18654 = vmatpush1.bf16.msra.mxu0 %v23406_v32  ;;  %v14075_v62 = vadd.f32 %v14074_v55, %v14073_v36  ;;  %v14337_v32 = vld [vmem:[#allocation34 + $0x3a8] sm:$0xff]  ;;  %v18735_v36 = vpack.c.bf16 %v14259_v8, %v14255_v42  ;;  %v14258_v55 = vld [vmem:[#allocation34 + $0x130] sm:$0xff]  ;;  %v14347_v49 = vld [vmem:[#allocation34 + $0x3f8] sm:$0xff] }
0x1cd3   :  { %v18711_v35 = vpack.c.bf16 %v14337_v32, %v14333_v24  ;;  %v18737_v40 = vpack.c.bf16 %v14258_v55, %v14254_v44  ;;  %v14270_v19 = vld [vmem:[#allocation34 + $0x190] sm:$0xff]  ;;  %v14279_v32 = vld [vmem:[#allocation34 + $0x1d8] sm:$0xff] }
0x1cd4   :  { %14211 = vmatprep.mubr.f32.mxu0 %v14075_v62  ;;  %v14263_v62 = vld [vmem:[#allocation34 + $0x158] sm:$0xff]  ;;  %v14274_v24 = vld [vmem:[#allocation34 + $0x1b0] sm:$0xff]  ;;  %v18747_v43 = vpack.c.bf16 %v14283_v3, %v14279_v32 }
0x1cd5   :  { %14212 = vmatmul.mubr.f32.vlgmr.msra.gmra.mrb[88].mxu0 %v14068_v51  ;;  %18712 = vmatprep.subr.bf16.mxu1 %v18711_v35  ;;  %v14267_v51 = vld [vmem:[#allocation34 + $0x178] sm:$0xff]  ;;  %v18745_v35 = vpack.c.bf16 %v14274_v24, %v14270_v19  ;;  %v14326_v8 = vld [vmem:[#allocation34 + $0x350] sm:$0xff]  ;;  %v23512_v19 = vld [vmem:[#allocation35] sm:$0xf] }
0x1cd6   :  { %14602 = vmatprep.mubr.bf16.mxu0 %v23757_v57  ;;  %18714 = vmatpush1.bf16.msra.mxu1 %v18713_v15  ;;  %v18739_v9 = vpack.c.bf16 %v14267_v51, %v14263_v62  ;;  %v14287_v15 = vld [vmem:[#allocation34 + $0x218] sm:$0xff]  ;;  %v14334_v51 = vld [vmem:[#allocation34 + $0x390] sm:$0xff]  ;;  %v14515_v3 = vrot.slane %v23512_v19, %v23716_v6  ;;  %v14519_v33 = vrot.slane %v23512_v19, %v23758_v46 }
0x1cd7   :  { %18716 = vmatprep.subr.bf16.mxu1 %v18715_v45  ;;  %v14291_v45 = vld [vmem:[#allocation34 + $0x238] sm:$0xff]  ;;  %v14342_v13 = vld [vmem:[#allocation34 + $0x3d0] sm:$0xff] }
0x1cd8   :  { %v18751_v14 = vpack.c.bf16 %v14291_v45, %v14287_v15  ;;  %v14339_v44 = vld [vmem:[#allocation34 + $0x3b8] sm:$0xff] }
0x1cda   :  { %18718 = vmatpush1.bf16.msra.mxu1 %v18717_v52  ;;  %v14286_v52 = vld [vmem:[#allocation34 + $0x210] sm:$0xff] }
0x1cdb   :  { %18720 = vmatprep.subr.bf16.mxu1 %v18719_v61  ;;  %v14299_v61 = vld [vmem:[#allocation34 + $0x278] sm:$0xff] }
0x1da8   :  { %v14213_v48 = vpop.f32.mrb[88].mxu0 }
0x1da9   :  { %v18783_v47 = vadd.f32 1e-05, %v14213_v48  ;;  %v14215_v60 = vpop.f32.mrb[89].mxu0  ;;  %v18753_v48 = vpack.c.bf16 %v14290_v16, %v14286_v52 }
0x1daa   :  { %v18784_v12 = vadd.f32 1e-05, %v14215_v60  ;;  %v14294_v60 = vld [vmem:[#allocation34 + $0x250] sm:$0xff] }
0x1dac   :  { %21056 = vrsqrt.f32 %v18784_v12  ;;  %v14298_v12 = vld [vmem:[#allocation34 + $0x270] sm:$0xff] }
0x1dad   :  { %21058 = vrsqrt.f32 %v18783_v47  ;;  %v18755_v47 = vpack.c.bf16 %v14299_v61, %v14295_v26  ;;  %v18757_v27 = vpack.c.bf16 %v14298_v12, %v14294_v60  ;;  %v23524_v60 = vld [vmem:[#allocation37] sm:$0x1]  ;;  %v20858_v12 = vld [vmem:[#allocation38 + $0x200] ss:$8 sps:$4 sm:$0xff]  }
0x1db6   :  { %v21057_v38 = vpop.eup %21056 }
0x1db7   :  { %v23507_v21 = vpop.eup %21058  ;;  %14412 = vmatprep.mubr.f32.mxu1 %v21057_v38 }
0x1db8   :  { %14413 = vmatmul.mubr.f32.vlgmr.msra.gmra.mrb[90].mxu1 %v23507_v21 }
0x1db9   :  { %18722 = vmatpush1.bf16.msra.mxu1 %v18721_v50  ;;  %14483 = vmatprep.mubr.f32.mxu1 %v21057_v38  ;;  %v14302_v50 = vld [vmem:[#allocation34 + $0x290] sm:$0xff] }
0x1dba   :  { %18724 = vmatprep.subr.bf16.mxu1 %v18723_v37  ;;  %v14306_v38 = vld [vmem:[#allocation34 + $0x2b0] sm:$0xff]  ;;  %v14311_v37 = vld [vmem:[#allocation34 + $0x2d8] sm:$0xff] }
0x1dbb   :  { %v18761_v41 = vpack.c.bf16 %v14306_v38, %v14302_v50  ;;  %v18763_v56 = vpack.c.bf16 %v14315_v31, %v14311_v37  ;;  %v20869_v50 = vld [vmem:[#allocation38 + $0x234] ss:$8 sps:$4 sm:$0xff]   ;;  %v20867_v38 = vld [vmem:[#allocation38 + $0x230] ss:$8 sps:$4 sm:$0xff]   ;;  %v20872_v37 = vld [vmem:[#allocation38 + $0x244] ss:$8 sps:$4 sm:$0xff]  }
0x1dbc   :  { %v20870_v31 = vld [vmem:[#allocation38 + $0x240] ss:$8 sps:$4 sm:$0xff]  }
0x1dbd   :  { %18726 = vmatpush1.bf16.msra.mxu1 %v18725_v34  ;;  %v14314_v34 = vld [vmem:[#allocation34 + $0x2f0] sm:$0xff] }
0x1dbe   :  { %18728 = vmatprep.subr.bf16.mxu1 %v18727_v18  ;;  %v14319_v18 = vld [vmem:[#allocation34 + $0x318] sm:$0xff]  ;;  %v18765_v54 = vpack.c.bf16 %v14314_v34, %v14310_v59  ;;  %v20878_v59 = vld [vmem:[#allocation38 + $0x264] ss:$8 sps:$4 sm:$0xff]   ;;  %v20876_v34 = vld [vmem:[#allocation38 + $0x260] ss:$8 sps:$4 sm:$0xff]  }
0x1dbf   :  { %v18767_v28 = vpack.c.bf16 %v14323_v5, %v14319_v18  ;;  %v20881_v18 = vld [vmem:[#allocation38 + $0x274] ss:$8 sps:$4 sm:$0xff]   ;;  %v20879_v5 = vld [vmem:[#allocation38 + $0x270] ss:$8 sps:$4 sm:$0xff]  }
0x1dc1   :  { %18730 = vmatpush1.bf16.msra.mxu1 %v18729_v39  ;;  %v14322_v39 = vld [vmem:[#allocation34 + $0x330] sm:$0xff] }
0x1dc2   :  { %18732 = vmatprep.subr.bf16.mxu1 %v18731_v17  ;;  %v14327_v17 = vld [vmem:[#allocation34 + $0x358] sm:$0xff]  ;;  %v18769_v7 = vpack.c.bf16 %v14322_v39, %v14318_v2 }
0x1dc3   :  { %v18771_v42 = vpack.c.bf16 %v14331_v4, %v14327_v17  ;;  %v20887_v2 = vld [vmem:[#allocation38 + $0x294] ss:$8 sps:$4 sm:$0xff]   ;;  %v20885_v39 = vld [vmem:[#allocation38 + $0x290] ss:$8 sps:$4 sm:$0xff]   ;;  %v20890_v17 = vld [vmem:[#allocation38 + $0x2a4] ss:$8 sps:$4 sm:$0xff]  }
0x1dc4   :  { %v20888_v4 = vld [vmem:[#allocation38 + $0x2a0] ss:$8 sps:$4 sm:$0xff]  }
0x1dc5   :  { %18734 = vmatpush1.bf16.msra.mxu1 %v18733_v30  ;;  %v14330_v30 = vld [vmem:[#allocation34 + $0x370] sm:$0xff] }
0x1dc6   :  { %18736 = vmatprep.subr.bf16.mxu1 %v18735_v36  ;;  %v14335_v36 = vld [vmem:[#allocation34 + $0x398] sm:$0xff]  ;;  %v18773_v55 = vpack.c.bf16 %v14330_v30, %v14326_v8  ;;  %v23759_v30 = vld [vmem:[#allocation74_spill] sm:$0xff] }
0x1dc7   :  { %v18775_v62 = vpack.c.bf16 %v14339_v44, %v14335_v36  ;;  %v14523_v36 = vrot.slane %v23512_v19, %v23759_v30 }
0x1dc9   :  { %18738 = vmatpush1.bf16.msra.mxu1 %v18737_v40  ;;  %v14338_v40 = vld [vmem:[#allocation34 + $0x3b0] sm:$0xff] }
0x1dca   :  { %18740 = vmatprep.subr.bf16.mxu1 %v18739_v9  ;;  %v14343_v9 = vld [vmem:[#allocation34 + $0x3d8] sm:$0xff]  ;;  %v18777_v11 = vpack.c.bf16 %v14338_v40, %v14334_v51 }
0x1dcb   :  { %v18779_v1 = vpack.c.bf16 %v14347_v49, %v14343_v9  ;;  %v20891_v40 = vld [vmem:[#allocation38 + $0x2b0] ss:$8 sps:$4 sm:$0xff]   ;;  %v20896_v49 = vld [vmem:[#allocation38 + $0x2c4] ss:$8 sps:$4 sm:$0xff]  }
0x1dcd   :  { %18742 = vmatpush1.bf16.msra.mxu1 %v18741_v58  ;;  %v14346_v58 = vld [vmem:[#allocation34 + $0x3f0] sm:$0xff] }
0x1dce   :  { %18744 = vmatprep.subr.bf16.mxu1 %v18743_v22  ;;  %v18781_v22 = vpack.c.bf16 %v14346_v58, %v14342_v13  ;;  %v20894_v58 = vld [vmem:[#allocation38 + $0x2c0] ss:$8 sps:$4 sm:$0xff]  }
0x1dd1   :  { %18746 = vmatpush1.bf16.msra.mxu1 %v18745_v35 }
0x1dd2   :  { %18748 = vmatprep.subr.bf16.mxu1 %v18747_v43 }
0x1dd5   :  { %18750 = vmatpush1.bf16.msra.mxu1 %v18749_v63 }
0x1dd6   :  { %18752 = vmatprep.subr.bf16.mxu1 %v18751_v14 }
0x1dd9   :  { %18754 = vmatpush1.bf16.msra.mxu1 %v18753_v48 }
0x1dda   :  { %18756 = vmatprep.subr.bf16.mxu1 %v18755_v47 }
0x1ddd   :  { %18758 = vmatpush1.bf16.msra.mxu1 %v18757_v27  ;;  %v20866_v27 = vld [vmem:[#allocation38 + $0x224] ss:$8 sps:$4 sm:$0xff]  }
0x1dde   :  { %18760 = vmatprep.subr.bf16.mxu1 %v18759_v29  ;;  %v20864_v29 = vld [vmem:[#allocation38 + $0x220] ss:$8 sps:$4 sm:$0xff]  }
0x1de1   :  { %18762 = vmatpush1.bf16.msra.mxu1 %v18761_v41  ;;  %v20875_v41 = vld [vmem:[#allocation38 + $0x254] ss:$8 sps:$4 sm:$0xff]  }
0x1de2   :  { %18764 = vmatprep.subr.bf16.mxu1 %v18763_v56  ;;  %v20873_v56 = vld [vmem:[#allocation38 + $0x250] ss:$8 sps:$4 sm:$0xff]  }
0x1de5   :  { %18766 = vmatpush1.bf16.msra.mxu1 %v18765_v54  ;;  %v20884_v54 = vld [vmem:[#allocation38 + $0x284] ss:$8 sps:$4 sm:$0xff]  }
0x1de6   :  { %18768 = vmatprep.subr.bf16.mxu1 %v18767_v28  ;;  %v20882_v28 = vld [vmem:[#allocation38 + $0x280] ss:$8 sps:$4 sm:$0xff]  }
0x1de9   :  { %18770 = vmatpush1.bf16.msra.mxu1 %v18769_v7  ;;  %v20893_v7 = vld [vmem:[#allocation38 + $0x2b4] ss:$8 sps:$4 sm:$0xff]  }
0x1dea   :  { %18772 = vmatprep.subr.bf16.mxu1 %v18771_v42 }
0x1ded   :  { %18774 = vmatpush1.bf16.msra.mxu1 %v18773_v55 }
0x1dee   :  { %18776 = vmatprep.subr.bf16.mxu1 %v18775_v62  ;;  %v23760_v62 = vld [vmem:[#allocation80_spill] sm:$0xff] }
0x1def   :  { %v14527_v51 = vrot.slane %v23512_v19, %v23760_v62 }
0x1df1   :  { %18778 = vmatpush1.bf16.msra.mxu1 %v18777_v11 }
0x1df2   :  { %18780 = vmatprep.subr.bf16.mxu1 %v18779_v1 }
0x1df5   :  { %18782 = vmatpush1.bf16.msra.mxu1 %v18781_v22 }
0x1df8   :  { %14484 = vmatmul.mubr.f32.vlgmr.msra.gmra.mrb[92].mxu1 %v23507_v21 }
0x1df9   :  { %14643 = vmatprep.mubr.bf16.mxu1 %v23757_v57 }
0x1e8b   :  { %v14414_v24 = vpop.f32.mrb[90].mxu1 }
0x1e8c   :  { %v14493_v32 = vrot.slane %v14414_v24, %v23716_v6  ;;  %v14416_v35 = vpop.f32.mrb[91].mxu1  ;;  %v20899_v24 = vld [vmem:[#allocation38 + $0x2d4] ss:$8 sps:$4 sm:$0xff]  }
0x1e8d   :  { %v14497_v43 = vrot.slane %v14416_v35, %v23716_v6 }
0x1e8e   :  { %v14506_v15 = vmul.f32 %v14493_v32, %v23450_v10  ;;  %v20860_v10 = vld [vmem:[#allocation38 + $0x204] ss:$8 sps:$4 sm:$0xff]  }
0x1e8f   :  { %v14507_v21 = vmul.f32 %v14497_v43, %v23453_v53  ;;  %v23530_v53 = vld [vmem:[#allocation37 + $0x1] sm:$0x1]  ;;  %v20897_v43 = vld [vmem:[#allocation38 + $0x2d0] ss:$8 sps:$4 sm:$0xff]  }
0x1e90   :  { %v14532_v45 = vadd.f32 %v14515_v3, %v14506_v15  ;;  %v20902_v15 = vld [vmem:[#allocation38 + $0x2e4] ss:$8 sps:$4 sm:$0xff]  }
0x1e91   :  { %v14533_v63 = vadd.f32 %v14519_v33, %v14507_v21  ;;  %v20905_v21 = vld [vmem:[#allocation38 + $0x2f4] ss:$8 sps:$4 sm:$0xff]  }
0x1e92   :  { %v14540_v14 = vmul.f32 0.01, %v14532_v45  ;;  %vm14536_vm4 = vcmp.gt.f32.partialorder %v14532_v45, 0.0 }
0x1e93   :  { %vm14537_vm0 = vcmp.gt.f32.partialorder %v14533_v63, 0.0  ;;  %v14541_v52 = vmul.f32 0.01, %v14533_v63 }
0x1e94   :  { %v14544_v16 = vsel %vm14536_vm4, %v14532_v45, %v14540_v14  ;;  %v20903_v45 = vld [vmem:[#allocation38 + $0x2f0] ss:$8 sps:$4 sm:$0xff]   ;;  %v20908_v14 = vld [vmem:[#allocation38 + $0x304] ss:$8 sps:$4 sm:$0xff]  }
0x1e95   :  { %v14545_v26 = vsel %vm14537_vm0, %v14533_v63, %v14541_v52  ;;  %v14548_v61 = vpack.c.bf16 %v14544_v16, %v14544_v16  ;;  %v20906_v63 = vld [vmem:[#allocation38 + $0x300] ss:$8 sps:$4 sm:$0xff]   ;;  %v20911_v52 = vld [vmem:[#allocation38 + $0x4] ss:$8 sps:$4 sm:$0xff]   ;;  %v20912_v16 = vld [vmem:[#allocation38 + $0x310] ss:$8 sps:$4 sm:$0xff]  }
0x1e96   :  { %v14549_v48 = vpack.c.bf16 %v14545_v26, %v14545_v26  ;;  %v20914_v26 = vld [vmem:[#allocation38 + $0x314] ss:$8 sps:$4 sm:$0xff]  }
0x1e97   :  { %v14559_v47 = vsel %vm14557_vm2, %v14548_v61, 0  ;;  %v20920_v61 = vld [vmem:[#allocation38 + $0x324] ss:$8 sps:$4 sm:$0xff]  }
0x1e98   :  { %17053 = vmatprep.subr.msk.bf16.mxu0 %vm14557_vm2, %v14549_v48 }
0x1e99   :  { %14571 = vmatpush1.bf16.msra.mxu0 %v14559_v47 }
0x1e9a   :  { %17057 = vmatprep.subr.msk.bf16.mxu0 %vm14557_vm2, %v14549_v48  ;;  %v20924_v48 = vld [vmem:[#allocation38 + $0x330] ss:$8 sps:$4 sm:$0xff]  }
0x1e9c   :  { %17054 = vmatmul.mubr.msk.bf16.vlgmr.msra.gmra.mrb[92].mxu0 %vm14553_vm5, %v23524_v60 }
0x1e9d   :  { %14726 = vmatpush1.bf16.msra.mxu0 %v14559_v47  ;;  %14757 = vmatprep.mubr.bf16.mxu0 %v23757_v57  ;;  %v20926_v47 = vld [vmem:[#allocation38 + $0x334] ss:$8 sps:$4 sm:$0xff]  }
0x1e9e   :  { %15196 = vmatprep.subr.bf16.mxu0 %v20860_v10  ;;  %v20932_v10 = vld [vmem:[#allocation38 + $0x344] ss:$8 sps:$4 sm:$0xff]  }
0x1ea4   :  { %17058 = vmatmul.mubr.msk.bf16.vlgmr.msra.gmra.mrb[96].mxu0 %vm14553_vm5, %v23530_v53 }
0x1ea5   :  { %15197 = vmatpush1.bf16.msra.mxu0 %v20858_v12  ;;  %v20938_v12 = vld [vmem:[#allocation38 + $0x354] ss:$8 sps:$4 sm:$0xff]  }
0x1ea6   :  { %15198 = vmatprep.subr.bf16.mxu0 %v20863_v0  ;;  %v20942_v0 = vld [vmem:[#allocation38 + $0x360] ss:$8 sps:$4 sm:$0xff]  }
0x1ea9   :  { %15199 = vmatpush1.bf16.msra.mxu0 %v20861_v25  ;;  %v20944_v25 = vld [vmem:[#allocation38 + $0x364] ss:$8 sps:$4 sm:$0xff]  }
0x1eaa   :  { %15200 = vmatprep.subr.bf16.mxu0 %v20866_v27  ;;  %v20948_v27 = vld [vmem:[#allocation38 + $0x370] ss:$8 sps:$4 sm:$0xff]  }
0x1ead   :  { %15201 = vmatpush1.bf16.msra.mxu0 %v20864_v29  ;;  %v20950_v29 = vld [vmem:[#allocation38 + $0x374] ss:$8 sps:$4 sm:$0xff]  }
0x1eae   :  { %15202 = vmatprep.subr.bf16.mxu0 %v20869_v50  ;;  %v20954_v50 = vld [vmem:[#allocation38 + $0x380] ss:$8 sps:$4 sm:$0xff]  }
0x1eb1   :  { %15203 = vmatpush1.bf16.msra.mxu0 %v20867_v38  ;;  %v20956_v38 = vld [vmem:[#allocation38 + $0x384] ss:$8 sps:$4 sm:$0xff]  }
0x1eb2   :  { %15204 = vmatprep.subr.bf16.mxu0 %v20872_v37  ;;  %v20960_v37 = vld [vmem:[#allocation38 + $0x390] ss:$8 sps:$4 sm:$0xff]  }
0x1eb5   :  { %15205 = vmatpush1.bf16.msra.mxu0 %v20870_v31  ;;  %v20962_v31 = vld [vmem:[#allocation38 + $0x394] ss:$8 sps:$4 sm:$0xff]  }
0x1eb6   :  { %15206 = vmatprep.subr.bf16.mxu0 %v20875_v41  ;;  %v20966_v41 = vld [vmem:[#allocation38 + $0x3a0] ss:$8 sps:$4 sm:$0xff]  }
0x1eb9   :  { %15207 = vmatpush1.bf16.msra.mxu0 %v20873_v56  ;;  %v20968_v56 = vld [vmem:[#allocation38 + $0x3a4] ss:$8 sps:$4 sm:$0xff]  }
0x1eba   :  { %15208 = vmatprep.subr.bf16.mxu0 %v20878_v59  ;;  %v20972_v59 = vld [vmem:[#allocation38 + $0x3b0] ss:$8 sps:$4 sm:$0xff]  }
0x1ebd   :  { %15209 = vmatpush1.bf16.msra.mxu0 %v20876_v34  ;;  %v20974_v34 = vld [vmem:[#allocation38 + $0x3b4] ss:$8 sps:$4 sm:$0xff]  }
0x1ebe   :  { %15210 = vmatprep.subr.bf16.mxu0 %v20881_v18  ;;  %v20978_v18 = vld [vmem:[#allocation38 + $0x3c0] ss:$8 sps:$4 sm:$0xff]  }
0x1ec1   :  { %15211 = vmatpush1.bf16.msra.mxu0 %v20879_v5  ;;  %v20980_v5 = vld [vmem:[#allocation38 + $0x3c4] ss:$8 sps:$4 sm:$0xff]  }
0x1ec2   :  { %15212 = vmatprep.subr.bf16.mxu0 %v20884_v54  ;;  %v20986_v54 = vld [vmem:[#allocation38 + $0x3d4] ss:$8 sps:$4 sm:$0xff]  }
0x1ec5   :  { %15213 = vmatpush1.bf16.msra.mxu0 %v20882_v28  ;;  %v20984_v28 = vld [vmem:[#allocation38 + $0x3d0] ss:$8 sps:$4 sm:$0xff]  }
0x1ec6   :  { %15214 = vmatprep.subr.bf16.mxu0 %v20887_v2  ;;  %v20992_v2 = vld [vmem:[#allocation38 + $0x3e4] ss:$8 sps:$4 sm:$0xff]  }
0x1ec9   :  { %15215 = vmatpush1.bf16.msra.mxu0 %v20885_v39  ;;  %v20990_v39 = vld [vmem:[#allocation38 + $0x3e0] ss:$8 sps:$4 sm:$0xff]  }
0x1eca   :  { %15216 = vmatprep.subr.bf16.mxu0 %v20890_v17  ;;  %v20998_v17 = vld [vmem:[#allocation38 + $0x3f4] ss:$8 sps:$4 sm:$0xff]  }
0x1ecb   :  { %v14485_v42 = vpop.f32.mrb[92].mxu1 }
0x1ecc   :  { %v14501_v8 = vrot.slane %v14485_v42, %v23716_v6  ;;  %v14487_v44 = vpop.f32.mrb[93].mxu1 }
0x1ecd   :  { %v14505_v55 = vrot.slane %v14487_v44, %v23716_v6  ;;  %15217 = vmatpush1.bf16.msra.mxu0 %v20888_v4  ;;  %v20996_v4 = vld [vmem:[#allocation38 + $0x3f0] ss:$8 sps:$4 sm:$0xff]  }
0x1ece   :  { %v14508_v9 = vmul.f32 %v14501_v8, %v23486_v23  ;;  %15218 = vmatprep.subr.bf16.mxu0 %v20893_v7  ;;  %v21004_v7 = vld [vmem:[#allocation38 + $0x104] ss:$8 sps:$4 sm:$0xff]  }
0x1ecf   :  { %v14509_v11 = vmul.f32 %v14505_v55, %v23490_v20  ;;  %v20900_v20 = vld [vmem:[#allocation38 + $0x2e0] ss:$8 sps:$4 sm:$0xff]  }
0x1ed0   :  { %v14534_v1 = vadd.f32 %v14523_v36, %v14508_v9  ;;  %v20909_v9 = vld [vmem:[#allocation38] ss:$8 sps:$4 sm:$0xff]  }
0x1ed1   :  { %v14535_v13 = vadd.f32 %v14527_v51, %v14509_v11  ;;  %15219 = vmatpush1.bf16.msra.mxu0 %v20891_v40  ;;  %v20917_v11 = vld [vmem:[#allocation38 + $0x14] ss:$8 sps:$4 sm:$0xff]  }
0x1ed2   :  { %v14542_v22 = vmul.f32 0.01, %v14534_v1  ;;  %vm14538_vm6 = vcmp.gt.f32.partialorder %v14534_v1, 0.0  ;;  %15220 = vmatprep.subr.bf16.mxu0 %v20896_v49 }
0x1ed3   :  { %vm14539_vm7 = vcmp.gt.f32.partialorder %v14535_v13, 0.0  ;;  %v14543_v32 = vmul.f32 0.01, %v14535_v13 }
0x1ed4   :  { %v14546_v3 = vsel %vm14538_vm6, %v14534_v1, %v14542_v22  ;;  %v20921_v22 = vld [vmem:[#allocation38 + $0x20] ss:$8 sps:$4 sm:$0xff]  }
0x1ed5   :  { %v14547_v19 = vsel %vm14539_vm7, %v14535_v13, %v14543_v32  ;;  %v14550_v35 = vpack.c.bf16 %v14546_v3, %v14546_v3  ;;  %15221 = vmatpush1.bf16.msra.mxu0 %v20894_v58  ;;  %v20915_v13 = vld [vmem:[#allocation38 + $0x10] ss:$8 sps:$4 sm:$0xff]   ;;  %v20923_v58 = vld [vmem:[#allocation38 + $0x24] ss:$8 sps:$4 sm:$0xff]  }
0x1ed6   :  { %v14551_v23 = vpack.c.bf16 %v14547_v19, %v14547_v19  ;;  %15222 = vmatprep.subr.bf16.mxu0 %v20899_v24  ;;  %v20929_v24 = vld [vmem:[#allocation38 + $0x34] ss:$8 sps:$4 sm:$0xff]   ;;  %v20927_v32 = vld [vmem:[#allocation38 + $0x30] ss:$8 sps:$4 sm:$0xff]   ;;  %v20935_v3 = vld [vmem:[#allocation38 + $0x44] ss:$8 sps:$4 sm:$0xff]  }
0x1ed7   :  { %v14565_v33 = vsel %vm14557_vm2, %v14550_v35, 0  ;;  %v20933_v19 = vld [vmem:[#allocation38 + $0x40] ss:$8 sps:$4 sm:$0xff]   ;;  %v20941_v35 = vld [vmem:[#allocation38 + $0x54] ss:$8 sps:$4 sm:$0xff]  }
0x1ed8   :  { %17055 = vmatprep.subr.msk.bf16.mxu1 %vm14557_vm2, %v14551_v23 }
0x1ed9   :  { %14612 = vmatpush1.bf16.msra.mxu1 %v14565_v33  ;;  %15223 = vmatpush1.bf16.msra.mxu0 %v20897_v43  ;;  %v20939_v43 = vld [vmem:[#allocation38 + $0x50] ss:$8 sps:$4 sm:$0xff]  }
0x1eda   :  { %17059 = vmatprep.subr.msk.bf16.mxu1 %vm14557_vm2, %v14551_v23  ;;  %15224 = vmatprep.subr.bf16.mxu0 %v20902_v15  ;;  %v20947_v23 = vld [vmem:[#allocation38 + $0x64] ss:$8 sps:$4 sm:$0xff]   ;;  %v20951_v15 = vld [vmem:[#allocation38 + $0x70] ss:$8 sps:$4 sm:$0xff]  }
0x1edc   :  { %17056 = vmatmul.mubr.msk.bf16.vlgmr.msra.gmra.mrb[96].mxu1 %vm14553_vm5, %v23524_v60  ;;  %v20930_v60 = vld [vmem:[#allocation38 + $0x340] ss:$8 sps:$4 sm:$0xff]  }
0x1edd   :  { %14767 = vmatpush1.bf16.msra.mxu1 %v14565_v33  ;;  %14798 = vmatprep.mubr.bf16.mxu1 %v23757_v57  ;;  %v20918_v57 = vld [vmem:[#allocation38 + $0x320] ss:$8 sps:$4 sm:$0xff]  }
0x1ede   :  { %15225 = vmatpush1.bf16.msra.mxu0 %v20900_v20  ;;  %15237 = vmatprep.subr.bf16.mxu1 %v20908_v14  ;;  %v20945_v33 = vld [vmem:[#allocation38 + $0x60] ss:$8 sps:$4 sm:$0xff]   ;;  %v20953_v20 = vld [vmem:[#allocation38 + $0x74] ss:$8 sps:$4 sm:$0xff]   ;;  %v20963_v14 = vld [vmem:[#allocation38 + $0x90] ss:$8 sps:$4 sm:$0xff]  }
0x1edf   :  { %15226 = vmatprep.subr.bf16.mxu0 %v20905_v21  ;;  %v20959_v21 = vld [vmem:[#allocation38 + $0x84] ss:$8 sps:$4 sm:$0xff]  }
0x1ee2   :  { %15227 = vmatpush1.bf16.msra.mxu0 %v20903_v45  ;;  %v20957_v45 = vld [vmem:[#allocation38 + $0x80] ss:$8 sps:$4 sm:$0xff]  }
0x1ee3   :  { %15598 = vmatprep.subr.bf16.mxu0 %v20911_v52  ;;  %v20971_v52 = vld [vmem:[#allocation38 + $0xa4] ss:$8 sps:$4 sm:$0xff]  }
0x1ee4   :  { %17060 = vmatmul.mubr.msk.bf16.vlgmr.msra.gmra.mrb[100].mxu1 %vm14553_vm5, %v23530_v53  ;;  %v20936_v53 = vld [vmem:[#allocation38 + $0x350] ss:$8 sps:$4 sm:$0xff]  }
0x1ee5   :  { %15238 = vmatpush1.bf16.msra.mxu1 %v20906_v63  ;;  %v20965_v63 = vld [vmem:[#allocation38 + $0x94] ss:$8 sps:$4 sm:$0xff]  }
0x1ee6   :  { %15239 = vmatprep.subr.bf16.mxu1 %v20914_v26  ;;  %v20977_v26 = vld [vmem:[#allocation38 + $0xb4] ss:$8 sps:$4 sm:$0xff]  }
0x1ee9   :  { %15240 = vmatpush1.bf16.msra.mxu1 %v20912_v16  ;;  %v20969_v16 = vld [vmem:[#allocation38 + $0xa0] ss:$8 sps:$4 sm:$0xff]  }
0x1eea   :  { %15241 = vmatprep.subr.bf16.mxu1 %v20920_v61  ;;  %v20983_v61 = vld [vmem:[#allocation38 + $0xc4] ss:$8 sps:$4 sm:$0xff]  }
0x1eed   :  { %15242 = vmatpush1.bf16.msra.mxu1 %v20918_v57  ;;  %v20975_v57 = vld [vmem:[#allocation38 + $0xb0] ss:$8 sps:$4 sm:$0xff]  }
0x1eee   :  { %15243 = vmatprep.subr.bf16.mxu1 %v20926_v47  ;;  %v20989_v47 = vld [vmem:[#allocation38 + $0xd4] ss:$8 sps:$4 sm:$0xff]  }
0x1ef1   :  { %15244 = vmatpush1.bf16.msra.mxu1 %v20924_v48  ;;  %v20981_v48 = vld [vmem:[#allocation38 + $0xc0] ss:$8 sps:$4 sm:$0xff]  }
0x1ef2   :  { %15245 = vmatprep.subr.bf16.mxu1 %v20932_v10  ;;  %v20995_v10 = vld [vmem:[#allocation38 + $0xe4] ss:$8 sps:$4 sm:$0xff]  }
0x1ef5   :  { %15246 = vmatpush1.bf16.msra.mxu1 %v20930_v60  ;;  %v20987_v60 = vld [vmem:[#allocation38 + $0xd0] ss:$8 sps:$4 sm:$0xff]  }
0x1ef6   :  { %15247 = vmatprep.subr.bf16.mxu1 %v20938_v12 }
0x1ef9   :  { %15248 = vmatpush1.bf16.msra.mxu1 %v20936_v53 }
0x1efa   :  { %15249 = vmatprep.subr.bf16.mxu1 %v20944_v25  ;;  %v20993_v25 = vld [vmem:[#allocation38 + $0xe0] ss:$8 sps:$4 sm:$0xff]  }
0x1efd   :  { %15250 = vmatpush1.bf16.msra.mxu1 %v20942_v0 }
0x1efe   :  { %15251 = vmatprep.subr.bf16.mxu1 %v20950_v29  ;;  %v21001_v29 = vld [vmem:[#allocation38 + $0xf4] ss:$8 sps:$4 sm:$0xff]  }
0x1f01   :  { %15252 = vmatpush1.bf16.msra.mxu1 %v20948_v27 }
0x1f02   :  { %15253 = vmatprep.subr.bf16.mxu1 %v20956_v38 }
0x1f05   :  { %15254 = vmatpush1.bf16.msra.mxu1 %v20954_v50  ;;  %v20999_v50 = vld [vmem:[#allocation38 + $0xf0] ss:$8 sps:$4 sm:$0xff]  }
0x1f06   :  { %15255 = vmatprep.subr.bf16.mxu1 %v20962_v31 }
0x1f09   :  { %15256 = vmatpush1.bf16.msra.mxu1 %v20960_v37 }
0x1f0a   :  { %15257 = vmatprep.subr.bf16.mxu1 %v20968_v56  ;;  %v21002_v56 = vld [vmem:[#allocation38 + $0x100] ss:$8 sps:$4 sm:$0xff]  }
0x1f0d   :  { %15258 = vmatpush1.bf16.msra.mxu1 %v20966_v41 }
0x1f0e   :  { %15259 = vmatprep.subr.bf16.mxu1 %v20974_v34 }
0x1f11   :  { %15260 = vmatpush1.bf16.msra.mxu1 %v20972_v59 }
0x1f12   :  { %15261 = vmatprep.subr.bf16.mxu1 %v20980_v5  ;;  %v21007_v5 = vld [vmem:[#allocation38 + $0x114] ss:$8 sps:$4 sm:$0xff]  }
0x1f15   :  { %15262 = vmatpush1.bf16.msra.mxu1 %v20978_v18 }
0x1f16   :  { %15263 = vmatprep.subr.bf16.mxu1 %v20986_v54 }
0x1f19   :  { %15264 = vmatpush1.bf16.msra.mxu1 %v20984_v28  ;;  %v21005_v28 = vld [vmem:[#allocation38 + $0x110] ss:$8 sps:$4 sm:$0xff]  }
0x1f1a   :  { %15265 = vmatprep.subr.bf16.mxu1 %v20992_v2  ;;  %v21010_v2 = vld [vmem:[#allocation38 + $0x124] ss:$8 sps:$4 sm:$0xff]  }
0x1f1d   :  { %15266 = vmatpush1.bf16.msra.mxu1 %v20990_v39  ;;  %v21008_v39 = vld [vmem:[#allocation38 + $0x120] ss:$8 sps:$4 sm:$0xff]  }
0x1f1e   :  { %15267 = vmatprep.subr.bf16.mxu1 %v20998_v17  ;;  %v21013_v17 = vld [vmem:[#allocation38 + $0x134] ss:$8 sps:$4 sm:$0xff]  }
0x1f21   :  { %15268 = vmatpush1.bf16.msra.mxu1 %v20996_v4  ;;  %v21011_v4 = vld [vmem:[#allocation38 + $0x130] ss:$8 sps:$4 sm:$0xff]  }
0x1f22   :  { %15639 = vmatprep.subr.bf16.mxu1 %v21004_v7  ;;  %v21016_v7 = vld [vmem:[#allocation38 + $0x144] ss:$8 sps:$4 sm:$0xff]  }
0x1f6f   :  { %v23550_v42 = vpop.f32.mrb[92].mxu0 }
0x1f70   :  { %v14606_v8 = vpop.f32.mrb[93].mxu0  ;;  %v14652_v59 = vpack.c.bf16 %v23550_v42, %v23550_v42  ;;  %v21014_v42 = vld [vmem:[#allocation38 + $0x140] ss:$8 sps:$4 sm:$0xff]  }
0x1f71   :  { %v14608_v30 = vpop.f32.mrb[94].mxu0  ;;  %v14653_v51 = vpack.c.bf16 %v14606_v8, %v14606_v8  ;;  %v21019_v8 = vld [vmem:[#allocation38 + $0x154] ss:$8 sps:$4 sm:$0xff]  }
0x1f72   :  { %v14609_v36 = vpop.f32.mrb[95].mxu0  ;;  %v21017_v30 = vld [vmem:[#allocation38 + $0x150] ss:$8 sps:$4 sm:$0xff]  }
0x1f73   :  { %v21022_v36 = vld [vmem:[#allocation38 + $0x164] ss:$8 sps:$4 sm:$0xff]  }
0x1f77   :  { %v14759_v44 = vpop.f32.mrb[96].mxu0 }
0x1f78   :  { %v14807_v55 = vpack.c.bf16 %v14759_v44, %v14759_v44  ;;  %v14761_v62 = vpop.f32.mrb[97].mxu0  ;;  %v21020_v44 = vld [vmem:[#allocation38 + $0x160] ss:$8 sps:$4 sm:$0xff]  }
0x1f79   :  { %v14808_v40 = vpack.c.bf16 %v14761_v62, %v14761_v62  ;;  %v14763_v49 = vpop.f32.mrb[98].mxu0  ;;  %v21023_v62 = vld [vmem:[#allocation38 + $0x170] ss:$8 sps:$4 sm:$0xff]  }
0x1f7a   :  { %v14764_v1 = vpop.f32.mrb[99].mxu0  ;;  %v21029_v49 = vld [vmem:[#allocation38 + $0x190] ss:$8 sps:$4 sm:$0xff]  }
0x1f7b   :  { %15228 = vmatprep.mubr.bf16.mxu0 %v14808_v40  ;;  %v21026_v40 = vld [vmem:[#allocation38 + $0x180] ss:$8 sps:$4 sm:$0xff]  }
0x1f7c   :  { %15229 = vmatmul.mubr.bf16.vlgmr.msra.gmra.mrb[100].mxu0 %v14807_v55  ;;  %v21025_v55 = vld [vmem:[#allocation38 + $0x174] ss:$8 sps:$4 sm:$0xff]   ;;  %v21032_v1 = vld [vmem:[#allocation38 + $0x1a0] ss:$8 sps:$4 sm:$0xff]  }
0x1f7d   :  { %15599 = vmatpush1.bf16.msra.mxu0 %v20909_v9  ;;  %15630 = vmatprep.mubr.bf16.mxu0 %v14653_v51  ;;  %v21028_v51 = vld [vmem:[#allocation38 + $0x184] ss:$8 sps:$4 sm:$0xff]   ;;  %v21031_v9 = vld [vmem:[#allocation38 + $0x194] ss:$8 sps:$4 sm:$0xff]  }
0x1f7e   :  { %15600 = vmatprep.subr.bf16.mxu0 %v20917_v11  ;;  %v21034_v11 = vld [vmem:[#allocation38 + $0x1a4] ss:$8 sps:$4 sm:$0xff]  }
0x1f81   :  { %15601 = vmatpush1.bf16.msra.mxu0 %v20915_v13  ;;  %v21037_v13 = vld [vmem:[#allocation38 + $0x1b4] ss:$8 sps:$4 sm:$0xff]  }
0x1f82   :  { %15602 = vmatprep.subr.bf16.mxu0 %v20923_v58  ;;  %v21035_v58 = vld [vmem:[#allocation38 + $0x1b0] ss:$8 sps:$4 sm:$0xff]  }
0x1f85   :  { %15603 = vmatpush1.bf16.msra.mxu0 %v20921_v22  ;;  %v21040_v22 = vld [vmem:[#allocation38 + $0x1c4] ss:$8 sps:$4 sm:$0xff]  }
0x1f86   :  { %15604 = vmatprep.subr.bf16.mxu0 %v20929_v24  ;;  %v21038_v24 = vld [vmem:[#allocation38 + $0x1c0] ss:$8 sps:$4 sm:$0xff]  }
0x1f89   :  { %15605 = vmatpush1.bf16.msra.mxu0 %v20927_v32  ;;  %v21043_v32 = vld [vmem:[#allocation38 + $0x1d4] ss:$8 sps:$4 sm:$0xff]  }
0x1f8a   :  { %15606 = vmatprep.subr.bf16.mxu0 %v20935_v3  ;;  %v21041_v3 = vld [vmem:[#allocation38 + $0x1d0] ss:$8 sps:$4 sm:$0xff]  }
0x1f8d   :  { %15607 = vmatpush1.bf16.msra.mxu0 %v20933_v19  ;;  %v21046_v19 = vld [vmem:[#allocation38 + $0x1e4] ss:$8 sps:$4 sm:$0xff]  }
0x1f8e   :  { %15608 = vmatprep.subr.bf16.mxu0 %v20941_v35  ;;  %v21044_v35 = vld [vmem:[#allocation38 + $0x1e0] ss:$8 sps:$4 sm:$0xff]  }
0x1f91   :  { %15609 = vmatpush1.bf16.msra.mxu0 %v20939_v43  ;;  %v21049_v43 = vld [vmem:[#allocation38 + $0x1f4] ss:$8 sps:$4 sm:$0xff]  }
0x1f92   :  { %15610 = vmatprep.subr.bf16.mxu0 %v20947_v23  ;;  %v21047_v23 = vld [vmem:[#allocation38 + $0x1f0] ss:$8 sps:$4 sm:$0xff]  }
0x1f95   :  { %15611 = vmatpush1.bf16.msra.mxu0 %v20945_v33 }
0x1f96   :  { %15612 = vmatprep.subr.bf16.mxu0 %v20953_v20 }
0x1f99   :  { %15613 = vmatpush1.bf16.msra.mxu0 %v20951_v15 }
0x1f9a   :  { %15614 = vmatprep.subr.bf16.mxu0 %v20959_v21 }
0x1f9d   :  { %15615 = vmatpush1.bf16.msra.mxu0 %v20957_v45 }
0x1f9e   :  { %15616 = vmatprep.subr.bf16.mxu0 %v20965_v63 }
0x1fa1   :  { %15617 = vmatpush1.bf16.msra.mxu0 %v20963_v14 }
0x1fa2   :  { %15618 = vmatprep.subr.bf16.mxu0 %v20971_v52 }
0x1fa5   :  { %15619 = vmatpush1.bf16.msra.mxu0 %v20969_v16 }
0x1fa6   :  { %15620 = vmatprep.subr.bf16.mxu0 %v20977_v26 }
0x1fa9   :  { %15621 = vmatpush1.bf16.msra.mxu0 %v20975_v57 }
0x1faa   :  { %15622 = vmatprep.subr.bf16.mxu0 %v20983_v61 }
0x1fad   :  { %15623 = vmatpush1.bf16.msra.mxu0 %v20981_v48 }
0x1fae   :  { %15624 = vmatprep.subr.bf16.mxu0 %v20989_v47 }
0x1faf   :  { %v23552_v53 = vpop.f32.mrb[96].mxu1 }
0x1fb0   :  { %v14647_v12 = vpop.f32.mrb[97].mxu1  ;;  %v14654_v33 = vpack.c.bf16 %v23552_v53, %v23552_v53 }
0x1fb1   :  { %v14649_v0 = vpop.f32.mrb[98].mxu1  ;;  %15625 = vmatpush1.bf16.msra.mxu0 %v20987_v60  ;;  %v14655_v54 = vpack.c.bf16 %v14647_v12, %v14647_v12 }
0x1fb2   :  { %v14650_v27 = vpop.f32.mrb[99].mxu1  ;;  %15626 = vmatprep.subr.bf16.mxu0 %v20995_v10  ;;  %v15680_v0 = vld [vmem:[#allocation40] sm:$0x3] }
0x1fb3   :  { %v15685_v53 = vrot.slane %v15680_v0, %v23716_v6  ;;  %v15689_v27 = vrot.slane %v15680_v0, %v23758_v46 }
0x1fb5   :  { %15627 = vmatpush1.bf16.msra.mxu0 %v20993_v25 }
0x1fb6   :  { %15628 = vmatprep.subr.bf16.mxu0 %v21001_v29 }
0x1fb7   :  { %v14800_v38 = vpop.f32.mrb[100].mxu1 }
0x1fb8   :  { %v14802_v37 = vpop.f32.mrb[101].mxu1  ;;  %v14809_v34 = vpack.c.bf16 %v14800_v38, %v14800_v38 }
0x1fb9   :  { %v14810_v31 = vpack.c.bf16 %v14802_v37, %v14802_v37  ;;  %v14804_v41 = vpop.f32.mrb[102].mxu1  ;;  %15629 = vmatpush1.bf16.msra.mxu0 %v20999_v50 }
0x1fba   :  { %v14805_v18 = vpop.f32.mrb[103].mxu1 }
0x1fbb   :  { %15269 = vmatprep.mubr.bf16.mxu1 %v14810_v31 }
0x1fbc   :  { %15270 = vmatmul.mubr.bf16.vlgmr.msra.gmra.mrb[104].mxu1 %v14809_v34  ;;  %15631 = vmatmul.mubr.bf16.vlgmr.msra.gmra.mrb[104].mxu0 %v14652_v59 }
0x1fbd   :  { %15640 = vmatpush1.bf16.msra.mxu1 %v21002_v56  ;;  %15671 = vmatprep.mubr.bf16.mxu1 %v14655_v54 }
0x1fbe   :  { %15641 = vmatprep.subr.bf16.mxu1 %v21007_v5 }
0x1fc1   :  { %15642 = vmatpush1.bf16.msra.mxu1 %v21005_v28 }
0x1fc2   :  { %15643 = vmatprep.subr.bf16.mxu1 %v21010_v2 }
0x1fc5   :  { %15644 = vmatpush1.bf16.msra.mxu1 %v21008_v39 }
0x1fc6   :  { %15645 = vmatprep.subr.bf16.mxu1 %v21013_v17 }
0x1fc9   :  { %15646 = vmatpush1.bf16.msra.mxu1 %v21011_v4 }
0x1fca   :  { %15647 = vmatprep.subr.bf16.mxu1 %v21016_v7 }
0x1fcd   :  { %15648 = vmatpush1.bf16.msra.mxu1 %v21014_v42 }
0x1fce   :  { %15649 = vmatprep.subr.bf16.mxu1 %v21019_v8 }
0x1fd1   :  { %15650 = vmatpush1.bf16.msra.mxu1 %v21017_v30 }
0x1fd2   :  { %15651 = vmatprep.subr.bf16.mxu1 %v21022_v36 }
0x1fd5   :  { %15652 = vmatpush1.bf16.msra.mxu1 %v21020_v44 }
0x1fd6   :  { %15653 = vmatprep.subr.bf16.mxu1 %v21025_v55 }
0x1fd9   :  { %15654 = vmatpush1.bf16.msra.mxu1 %v21023_v62 }
0x1fda   :  { %15655 = vmatprep.subr.bf16.mxu1 %v21028_v51 }
0x1fdd   :  { %15656 = vmatpush1.bf16.msra.mxu1 %v21026_v40 }
0x1fde   :  { %15657 = vmatprep.subr.bf16.mxu1 %v21031_v9 }
0x1fe1   :  { %15658 = vmatpush1.bf16.msra.mxu1 %v21029_v49 }
0x1fe2   :  { %15659 = vmatprep.subr.bf16.mxu1 %v21034_v11 }
0x1fe5   :  { %15660 = vmatpush1.bf16.msra.mxu1 %v21032_v1 }
0x1fe6   :  { %15661 = vmatprep.subr.bf16.mxu1 %v21037_v13 }
0x1fe9   :  { %15662 = vmatpush1.bf16.msra.mxu1 %v21035_v58 }
0x1fea   :  { %15663 = vmatprep.subr.bf16.mxu1 %v21040_v22 }
0x1fed   :  { %15664 = vmatpush1.bf16.msra.mxu1 %v21038_v24 }
0x1fee   :  { %15665 = vmatprep.subr.bf16.mxu1 %v21043_v32 }
0x1ff1   :  { %15666 = vmatpush1.bf16.msra.mxu1 %v21041_v3 }
0x1ff2   :  { %15667 = vmatprep.subr.bf16.mxu1 %v21046_v19 }
0x1ff5   :  { %15668 = vmatpush1.bf16.msra.mxu1 %v21044_v35 }
0x1ff6   :  { %15669 = vmatprep.subr.bf16.mxu1 %v21049_v43 }
0x1ff9   :  { %15670 = vmatpush1.bf16.msra.mxu1 %v21047_v23 }
0x1ffc   :  { %15672 = vmatmul.mubr.bf16.vlgmr.msra.gmra.mrb[108].mxu1 %v14654_v33 }
0x204f   :  { %v15230_v20 = vpop.f32.mrb[100].mxu0 }
0x2050   :  { %v15232_v15 = vpop.f32.mrb[101].mxu0 }
0x2051   :  { %v15234_v21 = vpop.f32.mrb[102].mxu0 }
0x2052   :  { %v15235_v45 = vpop.f32.mrb[103].mxu0 }
0x208f   :  { %v15271_v63 = vpop.f32.mrb[104].mxu1  ;;  %v15632_v14 = vpop.f32.mrb[104].mxu0 }
0x2090   :  { %v15272_v52 = vadd.f32 %v15271_v63, %v15230_v20  ;;  %v15273_v16 = vpop.f32.mrb[105].mxu1  ;;  %v15634_v26 = vpop.f32.mrb[105].mxu0 }
0x2091   :  { %v15274_v57 = vadd.f32 %v15273_v16, %v15232_v15  ;;  %v15275_v61 = vpop.f32.mrb[106].mxu1  ;;  %v15636_v48 = vpop.f32.mrb[106].mxu0 }
0x2092   :  { %v15633_v47 = vadd.f32 %v15632_v14, %v15272_v52  ;;  %v15276_v60 = vpop.f32.mrb[107].mxu1  ;;  %v15637_v10 = vpop.f32.mrb[107].mxu0 }
0x2093   :  { %v15635_v12 = vadd.f32 %v15634_v26, %v15274_v57 }
0x20cf   :  { %v15673_v25 = vpop.f32.mrb[108].mxu1 }
0x20d0   :  { %v15674_v29 = vadd.f32 %v15673_v25, %v15633_v47  ;;  %v15675_v50 = vpop.f32.mrb[109].mxu1 }
0x20d1   :  { %v15676_v38 = vadd.f32 %v15675_v50, %v15635_v12  ;;  %v15677_v37 = vpop.f32.mrb[110].mxu1 }
0x20d2   :  { %v15692_v31 = vadd.f32 %v15685_v53, %v15674_v29  ;;  %v15678_v41 = vpop.f32.mrb[111].mxu1 }
0x20d3   :  { %v15693_v56 = vadd.f32 %v15689_v27, %v15676_v38 }
0x20d4   :  { %15694 = vst [vmem:[#allocation41] sm:$0x3] %v15692_v31 }
0x20d5   :  { %15695 = vst [vmem:[#allocation42] sm:$0x3] %v15693_v56 }
0x20d6   :  { %21625 = shalt.err (!%p21622_p8)
}
0x20d7   :  { %s21626_s12 = scalar_lea.hbm %s21904_s8, 32 }
0x20d8   :  { %p21627_p9 = scmp.ne.s32.totalorder %s21904_s8, %s21626_s12  ;;  %p21630_p10 = scmp.lt.u32.totalorder %s21626_s12, %s21904_s8 }
0x20da   :  { %p21632_p11 = pnand %p21630_p10, %p21627_p9 }
0x20dc   :  { %21635 = shalt.err (!%p21632_p11)
}
0x20dd   :  { %15705 = dma.vmem_to_hbm [thread:$0]  %s15703_s3, 32, %s21904_s8, [#allocation4]  }
0x20de   :  { %s21636_s29 = scalar_lea.vmem %s15713_s6, 32  ;;  %p21641_p13 = scmp.lt.s32.totalorder %s15713_s6, %s15713_s6 }
0x20df   :  { %p21637_p12 = scmp.ne.s32.totalorder %s15713_s6, %s21636_s29  ;;  %p21642_p0 = scmp.lt.s32.totalorder %s21636_s29, %s21636_s29 }
0x20e1   :  { %p21643_p1 = por %p21642_p0, %p21641_p13 }
0x20e3   :  { %p21644_p2 = pnand %p21643_p1, %p21637_p12 }
0x20e5   :  { %21647 = shalt.err (!%p21644_p2)
}
0x20e6   :  { %s21648_s1 = scalar_lea.hbm %s21909_s4, 32 }
0x20e7   :  { %p21649_p3 = scmp.ne.s32.totalorder %s21909_s4, %s21648_s1  ;;  %p21652_p4 = scmp.lt.u32.totalorder %s21648_s1, %s21909_s4 }
0x20e9   :  { %p21654_p5 = pnand %p21652_p4, %p21649_p3 }
0x20eb   :  { %21657 = shalt.err (!%p21654_p5)
}
0x20ec   :  { %15715 = dma.vmem_to_hbm [thread:$0]  %s15713_s6, 32, %s21909_s4, [#allocation43]  }
0x20ed   :  { %21684 = dma.done.wait [#allocation4], 32  }
0x20ee   :  { %21685 = vsyncadd [#allocation4], 4294967264 }
0x20ef   :  { %21686 = dma.done.wait [#allocation43], 32  }
0x20f0   :  { %21687 = vsyncadd [#allocation43], 4294967264 }
0x20f1   :  { %15722 = vsyncpa [#allocation3], 1 }
0x20f2   :  { %15723 = vsyncpa [#allocation6], 1 }
0x20f3   :  { %15724 = vsyncpa [#allocation9], 1 }
0x20f4   :  { %15725 = vsyncpa [#allocation12], 1 }
0x20f5   :  { %15726 = vsyncpa [#allocation15], 1 }
0x20f6   :  { %15727 = vsyncpa [#allocation18], 1 }
0x20f7   :  { %15728 = vsyncpa [#allocation21], 1 }
0x20f8   :  { %15729 = vsyncpa [#allocation24], 1 }
0x20f9   :  { %15730 = vsyncpa [#allocation27], 1 }
0x20fa   :  { %15731 = vsyncpa [#allocation30], 1 }
0x20fb   :  { %15732 = vsyncpa [#allocation33], 1 }
0x20fc   :  { %15733 = vsyncpa [#allocation36], 1 }
0x20fd   :  { %15734 = vsyncpa [#allocation39], 1 }
0x20fe   :  { %15735 = vsyncpa [#allocation4], 1 }
0x20ff   :  { %15736 = vsyncpa [#allocation43], 1 }

</bundles_post_ra>
